<compile_context>
chip_gen: v7x
topology: tpu7x:2x2x1
jax: 0.10.0
libtpu: 0.0.40
codegen_flags: <defaults>
</compile_context>

<pallas_src>
import numpy as np
import jax
import jax.numpy as jnp
from jax.experimental import pallas as pl
from jax.experimental.pallas import tpu as pltpu

F32 = jnp.float32
LANE = 128


def _log2(v):
    lg = int(v).bit_length() - 1
    assert (1 << lg) == v, "time lengths must be powers of two in this config"
    return lg


def _pad8(n):
    return ((int(n) + 7) // 8) * 8


# --------------------------------------------------------------------------
# Host-side parameter init + slab packing (kernel-ready layout).
#   conv weight (K, Cin, Cout) -> packed (K*Cin, Cout) rows in one big slab;
#   biases + per-level codebook norms -> rows of a second slab;
#   codebooks -> one (levels*l_bins, emb) slab.
# --------------------------------------------------------------------------

def _rand_conv(kit, K, cin, cout):
    wk, bk = jax.random.split(next(kit))
    bound = 1.0 / np.sqrt(K * cin)
    w = np.asarray(jax.random.uniform(wk, (K, cin, cout), F32, -bound, bound))
    b = np.asarray(jax.random.uniform(bk, (cout,), F32, -bound, bound))
    return w, b


def _block_diag(wr, wo):
    """Block-diagonal fuse of two (K, Cin, Cout) conv weights along Cin/Cout."""
    K, cir, cor = wr.shape
    _, cio, coo = wo.shape
    w = np.zeros((K, cir + cio, cor + coo), np.float32)
    w[:, :cir, :cor] = wr
    w[:, cir:, cor:] = wo
    return w


class _Packer:
    def __init__(self):
        self.w_rows = 0
        self.w_entries = []
        self.b_rows = 0
        self.b_entries = []

    def add_conv(self, w, b, stride, pad):
        K, cin, cout = w.shape
        off = self.w_rows
        self.w_rows += _pad8(K * cin)          # keep every block sublane-aligned
        self.w_entries.append((off, w.reshape(K * cin, cout)))
        brow = self.b_rows
        self.b_rows += 8                       # 8-row stride: aligned bias loads
        self.b_entries.append((brow, np.asarray(b, np.float32)))
        return dict(K=K, cin=cin, cout=cout, stride=stride, pad=pad,
                    off=off, brow=brow)

    def add_row(self, vec):
        brow = self.b_rows
        self.b_rows += 8
        self.b_entries.append((brow, np.asarray(vec, np.float32)))
        return brow

    def finalize(self):
        w = np.zeros((max(_pad8(self.w_rows), 8), LANE), np.float32)
        for off, mat in self.w_entries:
            w[off:off + mat.shape[0], :mat.shape[1]] = mat
        b = np.zeros((max(_pad8(self.b_rows), 8), LANE), np.float32)
        for row, vec in self.b_entries:
            b[row, :vec.shape[0]] = vec
        return jnp.asarray(w), jnp.asarray(b)


def init_packed_params(key, hps, input_dim, output_dim):
    levels, emb, width = hps["levels"], hps["emb_width"], hps["width"]
    strides_t, jc, Kc = hps["strides_t"], hps["joint_channel"], hps["l_bins"]
    kit = iter(jax.random.split(key, 4096))
    packer = _Packer()
    plan, codebooks = [], []

    for L in range(levels):
        # ----- encoder: (L+1) EncoderConvBlocks -----
        enc = []
        for i in range(L + 1):
            cin = input_dim if i == 0 else emb
            s = strides_t[i]
            enc.append(dict(
                down=packer.add_conv(*_rand_conv(kit, 2 * s, cin, width), s, s // 2),
                res1=packer.add_conv(*_rand_conv(kit, 3, width, width), 1, 1),
                res2=packer.add_conv(*_rand_conv(kit, 1, width, width), 1, 0),
                proj=packer.add_conv(*_rand_conv(kit, 3, width, emb), 1, 1)))

        # ----- fused rot+root decoder (block-diagonal / concatenated weights) -----
        dec = [None] * (L + 1)
        first = True                              # first block in processing order
        for i in reversed(range(L + 1)):
            s = strides_t[i]
            wr, br = _rand_conv(kit, 3, emb, width)
            wo, bo = _rand_conv(kit, 3, emb, width)
            if first:                             # shared latent input (emb lanes)
                w_in, b_in = np.concatenate([wr, wo], 2), np.concatenate([br, bo])
            else:                                 # fused emb input (2*emb lanes)
                w_in, b_in = _block_diag(wr, wo), np.concatenate([br, bo])
            wr1, br1 = _rand_conv(kit, 3, width, width)
            wo1, bo1 = _rand_conv(kit, 3, width, width)
            wr2, br2 = _rand_conv(kit, 1, width, width)
            wo2, bo2 = _rand_conv(kit, 1, width, width)
            wru, bru = _rand_conv(kit, 2 * s, width, emb)
            wou, bou = _rand_conv(kit, 2 * s, width, emb)
            dec[i] = {
                "in": packer.add_conv(w_in, b_in, 1, 1),
                "res1": packer.add_conv(_block_diag(wr1, wo1),
                                        np.concatenate([br1, bo1]), 1, 1),
                "res2": packer.add_conv(_block_diag(wr2, wo2),
                                        np.concatenate([br2, bo2]), 1, 0),
                "up": packer.add_conv(_block_diag(wru, wou),
                                      np.concatenate([bru, bou]), s, s // 2),
            }
            first = False
        wr, br = _rand_conv(kit, 3, emb, output_dim)
        wo, bo = _rand_conv(kit, 3, emb, jc)
        out_conv = packer.add_conv(_block_diag(wr, wo),
                                   np.concatenate([br, bo]), 1, 1)

        cb = np.asarray(0.02 * jax.random.normal(next(kit), (Kc, emb), F32))
        codebooks.append(cb)
        c2_row = packer.add_row((cb * cb).sum(axis=1))   # ||e_k||^2 row (1, Kc)

        plan.append(dict(enc=enc, dec=dec, out=out_conv, c2_row=c2_row))

    wslab, bslab = packer.finalize()
    cbslab = jnp.asarray(np.concatenate(codebooks, axis=0))
    return wslab, bslab, cbslab, plan


# --------------------------------------------------------------------------
# The fused kernel: for each level, encoder -> VQ -> fused rot+root decoder ->
# motion losses, entirely in VMEM/vregs.
# --------------------------------------------------------------------------

def make_kernel(plan, *, N, T, output_dim, Kc, levels):
    def kernel(x_ref, xt_ref, w_ref, b_ref, cb_ref, out_ref, m_ref):
        sel = {}                                  # memoised re-sampling matrices

        def shift_rows(x, s, Tl):
            """shifted[b*Tl + t] = x[b*Tl + t + s] if 0 <= t+s < Tl else 0."""
            if s == 0:
                return x
            Ml = x.shape[0]
            r = pltpu.roll(x, shift=(-s) % Ml, axis=0)
            tpos = jax.lax.broadcasted_iota(jnp.int32, x.shape, 0) & (Tl - 1)
            ok = (tpos + s >= 0) & (tpos + s < Tl)
            return jnp.where(ok, r, jnp.zeros_like(r))

        def resample_sel(kind, t_out, t_in, stride):
            key = (kind, t_out, t_in, stride)
            if key not in sel:
                lo, li = _log2(t_out), _log2(t_in)
                shape = (N * t_out, N * t_in)
                r = jax.lax.broadcasted_iota(jnp.int32, shape, 0)
                c = jax.lax.broadcasted_iota(jnp.int32, shape, 1)
                same_b = (r >> lo) == (c >> li)
                if kind == "down":      # out[to] = in[to*stride]
                    hit = same_b & ((c & (t_in - 1)) == (r & (t_out - 1)) * stride)
                else:                   # "up": out[ti*stride] = in[ti]
                    hit = same_b & ((r & (t_out - 1)) == (c & (t_in - 1)) * stride)
                sel[key] = hit.astype(F32)
            return sel[key]

        def load_w(d):
            w = w_ref[d["off"]:d["off"] + d["K"] * d["cin"], 0:d["cout"]]
            b = b_ref[d["brow"]:d["brow"] + 1, 0:d["cout"]]
            return w, b

        def conv(x, Tl, d, relu_in=False):
            """Conv1d (torch semantics): one lane-packed MXU matmul."""
            K, pad, stride = d["K"], d["pad"], d["stride"]
            h = jnp.maximum(x, 0.0) if relu_in else x
            parts = [shift_rows(h, k - pad, Tl) for k in range(K)]
            packed = parts[0] if K == 1 else jnp.concatenate(parts, axis=1)
            t_out = (Tl + 2 * pad - K) // stride + 1
            if stride != 1:
                packed = jnp.dot(resample_sel("down", t_out, Tl, stride), packed,
                                 preferred_element_type=F32)
            w, b = load_w(d)
            return jnp.dot(packed, w, preferred_element_type=F32) + b, t_out

        def convT(x, Tl, d):
            """ConvTranspose1d: zero-upsample (one sel matmul) + lane-packed matmul."""
            K, pad, stride = d["K"], d["pad"], d["stride"]
            t_out = (Tl - 1) * stride - 2 * pad + K
            u = jnp.dot(resample_sel("up", t_out, Tl, stride), x,
                        preferred_element_type=F32)
            parts = [shift_rows(u, pad - k, t_out) for k in range(K)]
            packed = jnp.concatenate(parts, axis=1)
            w, b = load_w(d)
            return jnp.dot(packed, w, preferred_element_type=F32) + b, t_out

        def res_block(h, Tl, d1, d2):
            # ResConv1DBlock: x + Conv1x1(ReLU(Conv3(ReLU(x)))), res_scale = 1
            r, _ = conv(h, Tl, d1, relu_in=True)
            r, _ = conv(r, Tl, d2, relu_in=True)
            return h + r

        x = x_ref[...]                              # (N*T, input_dim)
        xt = xt_ref[...]                            # (N*T, output_dim)

        for level in range(levels):
            lv = plan[level]

            # ---------------- encoder ----------------
            h, t = x, T
            for blk in lv["enc"]:
                h, t = conv(h, t, blk["down"])
                h = res_block(h, t, blk["res1"], blk["res2"])
                h, t = conv(h, t, blk["proj"])
            tz = t                                   # latent length

            # ------------- bottleneck: nearest-code VQ (eval path) -------------
            # TODO(synk): codebook EMA update / restart (training-mode bottleneck)
            #             not implemented; torch forward runs bottleneck.eval().
            cb = cb_ref[level * Kc:(level + 1) * Kc, :]          # (Kc, emb)
            xe = jax.lax.dot_general(h, cb, (((1,), (1,)), ((), ())),
                                     preferred_element_type=F32)  # (M, Kc)
            c2 = b_ref[lv["c2_row"]:lv["c2_row"] + 1, 0:Kc]       # precomputed ||e||^2
            dist = c2 - 2.0 * xe        # ||x||^2 dropped (constant per row for argmin)
            idx = jax.lax.broadcasted_iota(jnp.int32, dist.shape, 1)
            dmin = jnp.min(dist, axis=-1, keepdims=True)
            codes = jnp.min(jnp.where(dist <= dmin, idx, Kc), axis=-1, keepdims=True)
            onehot = (idx == codes).astype(F32)
            xq = jnp.dot(onehot, cb, preferred_element_type=F32)  # (M, emb)
            fit = jnp.sum((xq - h) ** 2) / (N * tz)               # mean min distance

            # ------------- fused rot + root decoder -------------
            g, tg = xq, tz
            for i in reversed(range(len(lv["dec"]))):
                bd = lv["dec"][i]
                g, tg = conv(g, tg, bd["in"])
                g = res_block(g, tg, bd["res1"], bd["res2"])
                g, tg = convT(g, tg, bd["up"])
            g, _ = conv(g, tg, lv["out"])            # (N*T, output_dim + jc)

            # ------------- motion losses (non-weighted _loss_fn path) -------------
            # TODO(synk): weighted loss branch (down_weighted per-joint scaling) not
            #             implemented.
            rot = g[:, 0:output_dim]
            diff = rot - xt
            recons = jnp.mean(jnp.abs(diff))
            tpos = jax.lax.broadcasted_iota(jnp.int32, diff.shape, 0) & (T - 1)
            d1 = shift_rows(diff, 1, T)
            d2 = shift_rows(diff, 2, T)
            vdiff = jnp.where(tpos < T - 1, d1 - diff, 0.0)
            vel = jnp.sum(jnp.abs(vdiff)) / (N * (T - 1) * output_dim)
            amask = tpos < T - 2
            adiff = jnp.where(amask, d2 + diff - 2.0 * d1, 0.0)
            accel = jnp.sum(jnp.abs(adiff)) / (N * (T - 2) * output_dim)
            apred = jnp.where(
                amask, shift_rows(rot, 2, T) + rot - 2.0 * shift_rows(rot, 1, T), 0.0)
            reg = jnp.sum(apred * apred) / (N * (T - 2) * output_dim)

            base = 8 * level
            m_ref[base + 0] = recons
            m_ref[base + 1] = reg
            m_ref[base + 2] = vel
            m_ref[base + 3] = accel
            m_ref[base + 4] = fit
            m_ref[base + 5] = jnp.zeros((), F32)
            m_ref[base + 6] = jnp.zeros((), F32)
            m_ref[base + 7] = jnp.zeros((), F32)

            if level == 0:                           # only level-0 outputs are returned
                out_ref[...] = g

    return kernel


# --------------------------------------------------------------------------
# VQVAERmix forward (one fused pallas_call; scalar bookkeeping stays in XLA).
# --------------------------------------------------------------------------

def make_forward(plan, hps, N, T, input_dim, output_dim):
    levels, jc, Kc = hps["levels"], hps["joint_channel"], hps["l_bins"]
    M = N * T
    kernel = make_kernel(plan, N=N, T=T, output_dim=output_dim, Kc=Kc, levels=levels)
    vmem = pl.BlockSpec(memory_space=pltpu.MemorySpace.VMEM)
    smem = pl.BlockSpec(memory_space=pltpu.MemorySpace.SMEM)
    # TODO(synk): on v7x a ("parallel",) grid axis over levels (or batch) would light
    #             up the second TensorCore; kept grid-less here for robustness.
    call = pl.pallas_call(
        kernel,
        out_shape=(jax.ShapeDtypeStruct((M, output_dim + jc), F32),
                   jax.ShapeDtypeStruct((8 * levels,), F32)),
        in_specs=[vmem] * 5,
        out_specs=(vmem, smem),
    )

    def forward(wslab, bslab, cbslab, x, x_rot, x_shift):
        del x_shift                                   # unused, as in the torch forward
        x2d = x.reshape(M, input_dim).astype(F32)     # preprocess (layout already NTC)
        xt2d = x_rot.reshape(M, output_dim).astype(F32)
        fused, m = call(x2d, xt2d, wslab, bslab, cbslab)
        x_out = fused[:, :output_dim].reshape(N, T, output_dim)   # postprocess = id
        x_out_vel = fused[:, output_dim:].reshape(N, T, jc)

        metrics = {}
        recons_loss = jnp.zeros((), F32)
        regularization = jnp.zeros((), F32)
        velocity_loss = jnp.zeros((), F32)
        acceleration_loss = jnp.zeros((), F32)
        fit = jnp.zeros((), F32)
        for level in reversed(range(levels)):
            base = 8 * level
            metrics[f"recons_loss_l{level + 1}"] = m[base + 0]
            recons_loss = recons_loss + m[base + 0]
            regularization = regularization + m[base + 1]
            velocity_loss = velocity_loss + m[base + 2]
            acceleration_loss = acceleration_loss + m[base + 3]
            fit = fit + m[base + 4]

        loss = recons_loss + hps["vel"] * velocity_loss + hps["acc"] * acceleration_loss
        l1_loss = metrics["recons_loss_l1"]   # equals torch's no-grad recompute
        metrics.update(dict(
            recons_loss=recons_loss,
            l1_loss=l1_loss,
            commit_loss=l1_loss * 0.0,        # torch forward hard-codes this to zero
            regularization=regularization,
            velocity_loss=velocity_loss,
            acceleration_loss=acceleration_loss,
            fit=fit / levels,                 # averaged quantiser metric across levels
        ))
        # TODO(synk): quantiser 'pn' (prenorm) metric is not computed.
        return x_out, x_out_vel, loss, metrics

    return forward


# --------------------------------------------------------------------------

HPS = dict(
    sample_length=16, levels=2, downs_t=(1, 1), strides_t=(2, 2),
    emb_width=32, l_bins=64, l_mu=0.99, commit=0.02, width=32, depth=1,
    m_conv=1.0, dilation_growth_rate=1, dilation_cycle=None,
    hvqvae_multipliers=None, use_bottleneck=True,
    vqvae_reverse_decoder_dilation=True,
    joint_channel=3, vel=1.0, acc=1.0,
)

if __name__ == "__main__":
    N, T = 2, HPS["sample_length"]
    input_dim = output_dim = 36

    key = jax.random.PRNGKey(0)
    kx, kr, ks, kp = jax.random.split(key, 4)
    x = jax.random.normal(kx, (N, T, input_dim), F32)
    x_rot = jax.random.normal(kr, (N, T, output_dim), F32)
    x_shift = jax.random.normal(ks, (N, T, HPS["joint_channel"]), F32)

    wslab, bslab, cbslab, plan = init_packed_params(kp, HPS, input_dim, output_dim)

    fwd = jax.jit(make_forward(plan, HPS, N, T, input_dim, output_dim))
    x_out, x_out_vel, loss, metrics = fwd(wslab, bslab, cbslab, x, x_rot, x_shift)
    jax.block_until_ready((x_out, x_out_vel, loss, metrics))

    assert x_out.shape == (N, T, output_dim)
    assert x_out_vel.shape == (N, T, HPS["joint_channel"])
    assert np.isfinite(float(loss))
    print("KERNEL_OK")
</pallas_src>

<mosaic_0001>
module attributes {stable_mosaic.version = 11 : i64} {
  func.func @kernel(%arg0: memref<32x36xf32, #tpu.memory_space<vmem>>, %arg1: memref<32x36xf32, #tpu.memory_space<vmem>>, %arg2: memref<3392x128xf32, #tpu.memory_space<vmem>>, %arg3: memref<224x128xf32, #tpu.memory_space<vmem>>, %arg4: memref<128x32xf32, #tpu.memory_space<vmem>>, %arg5: memref<32x39xf32, #tpu.memory_space<vmem>>, %arg6: memref<16xf32, #tpu.memory_space<smem>>) attributes {dimension_semantics = [], scalar_prefetch = 0 : i64, scratch_operands = 0 : i64, tpu.core_type = #tpu.core_type<tc>} {
    %c0 = arith.constant 0 : index
    %c0_0 = arith.constant 0 : index
    %0 = vector.load %arg0[%c0, %c0_0] : memref<32x36xf32, #tpu.memory_space<vmem>>, vector<32x36xf32>
    %c0_1 = arith.constant 0 : index
    %c0_2 = arith.constant 0 : index
    %1 = vector.load %arg1[%c0_1, %c0_2] : memref<32x36xf32, #tpu.memory_space<vmem>>, vector<32x36xf32>
    %c1_i32 = arith.constant 1 : i32
    %2 = tpu.dynamic_rotate %0 by %c1_i32 dim 0 : vector<32x36xf32>, i32 -> vector<32x36xf32>
    %3 = tpu.iota {dimensions = array<i32: 0>} : vector<32x36xi32>
    %c15_i32 = arith.constant 15 : i32
    %4 = vector.broadcast %c15_i32 : i32 to vector<32x36xi32>
    %5 = arith.andi %3, %4 : vector<32x36xi32>
    %c-1_i32 = arith.constant -1 : i32
    %6 = vector.broadcast %c-1_i32 : i32 to vector<32x36xi32>
    %7 = arith.addi %5, %6 : vector<32x36xi32>
    %c0_i32 = arith.constant 0 : i32
    %8 = vector.broadcast %c0_i32 : i32 to vector<32x36xi32>
    %9 = arith.cmpi sge, %7, %8 : vector<32x36xi32>
    %c-1_i32_3 = arith.constant -1 : i32
    %10 = vector.broadcast %c-1_i32_3 : i32 to vector<32x36xi32>
    %11 = arith.addi %5, %10 : vector<32x36xi32>
    %c16_i32 = arith.constant 16 : i32
    %12 = vector.broadcast %c16_i32 : i32 to vector<32x36xi32>
    %13 = arith.cmpi slt, %11, %12 : vector<32x36xi32>
    %14 = arith.andi %9, %13 : vector<32x36xi1>
    %cst = arith.constant 0.000000e+00 : f32
    %15 = vector.broadcast %cst : f32 to vector<32x36xf32>
    %16 = arith.select %14, %2, %15 : vector<32x36xi1>, vector<32x36xf32>
    %c31_i32 = arith.constant 31 : i32
    %17 = tpu.dynamic_rotate %0 by %c31_i32 dim 0 : vector<32x36xf32>, i32 -> vector<32x36xf32>
    %18 = tpu.iota {dimensions = array<i32: 0>} : vector<32x36xi32>
    %c15_i32_4 = arith.constant 15 : i32
    %19 = vector.broadcast %c15_i32_4 : i32 to vector<32x36xi32>
    %20 = arith.andi %18, %19 : vector<32x36xi32>
    %c1_i32_5 = arith.constant 1 : i32
    %21 = vector.broadcast %c1_i32_5 : i32 to vector<32x36xi32>
    %22 = arith.addi %20, %21 : vector<32x36xi32>
    %c0_i32_6 = arith.constant 0 : i32
    %23 = vector.broadcast %c0_i32_6 : i32 to vector<32x36xi32>
    %24 = arith.cmpi sge, %22, %23 : vector<32x36xi32>
    %c1_i32_7 = arith.constant 1 : i32
    %25 = vector.broadcast %c1_i32_7 : i32 to vector<32x36xi32>
    %26 = arith.addi %20, %25 : vector<32x36xi32>
    %c16_i32_8 = arith.constant 16 : i32
    %27 = vector.broadcast %c16_i32_8 : i32 to vector<32x36xi32>
    %28 = arith.cmpi slt, %26, %27 : vector<32x36xi32>
    %29 = arith.andi %24, %28 : vector<32x36xi1>
    %cst_9 = arith.constant 0.000000e+00 : f32
    %30 = vector.broadcast %cst_9 : f32 to vector<32x36xf32>
    %31 = arith.select %29, %17, %30 : vector<32x36xi1>, vector<32x36xf32>
    %c30_i32 = arith.constant 30 : i32
    %32 = tpu.dynamic_rotate %0 by %c30_i32 dim 0 : vector<32x36xf32>, i32 -> vector<32x36xf32>
    %33 = tpu.iota {dimensions = array<i32: 0>} : vector<32x36xi32>
    %c15_i32_10 = arith.constant 15 : i32
    %34 = vector.broadcast %c15_i32_10 : i32 to vector<32x36xi32>
    %35 = arith.andi %33, %34 : vector<32x36xi32>
    %c2_i32 = arith.constant 2 : i32
    %36 = vector.broadcast %c2_i32 : i32 to vector<32x36xi32>
    %37 = arith.addi %35, %36 : vector<32x36xi32>
    %c0_i32_11 = arith.constant 0 : i32
    %38 = vector.broadcast %c0_i32_11 : i32 to vector<32x36xi32>
    %39 = arith.cmpi sge, %37, %38 : vector<32x36xi32>
    %c2_i32_12 = arith.constant 2 : i32
    %40 = vector.broadcast %c2_i32_12 : i32 to vector<32x36xi32>
    %41 = arith.addi %35, %40 : vector<32x36xi32>
    %c16_i32_13 = arith.constant 16 : i32
    %42 = vector.broadcast %c16_i32_13 : i32 to vector<32x36xi32>
    %43 = arith.cmpi slt, %41, %42 : vector<32x36xi32>
    %44 = arith.andi %39, %43 : vector<32x36xi1>
    %cst_14 = arith.constant 0.000000e+00 : f32
    %45 = vector.broadcast %cst_14 : f32 to vector<32x36xf32>
    %46 = arith.select %44, %32, %45 : vector<32x36xi1>, vector<32x36xf32>
    %47 = tpu.concatenate %16, %0, %31, %46 in 1 : vector<32x36xf32>, vector<32x36xf32>, vector<32x36xf32>, vector<32x36xf32> -> vector<32x144xf32>
    %48 = tpu.iota {dimensions = array<i32: 0>} : vector<16x32xi32>
    %49 = tpu.iota {dimensions = array<i32: 1>} : vector<16x32xi32>
    %c3_i32 = arith.constant 3 : i32
    %50 = vector.broadcast %c3_i32 : i32 to vector<16x32xi32>
    %51 = arith.shrsi %48, %50 : vector<16x32xi32>
    %c4_i32 = arith.constant 4 : i32
    %52 = vector.broadcast %c4_i32 : i32 to vector<16x32xi32>
    %53 = arith.shrsi %49, %52 : vector<16x32xi32>
    %54 = arith.cmpi eq, %51, %53 : vector<16x32xi32>
    %c15_i32_15 = arith.constant 15 : i32
    %55 = vector.broadcast %c15_i32_15 : i32 to vector<16x32xi32>
    %56 = arith.andi %49, %55 : vector<16x32xi32>
    %c7_i32 = arith.constant 7 : i32
    %57 = vector.broadcast %c7_i32 : i32 to vector<16x32xi32>
    %58 = arith.andi %48, %57 : vector<16x32xi32>
    %c2_i32_16 = arith.constant 2 : i32
    %59 = vector.broadcast %c2_i32_16 : i32 to vector<16x32xi32>
    %60 = arith.muli %58, %59 : vector<16x32xi32>
    %61 = arith.cmpi eq, %56, %60 : vector<16x32xi32>
    %62 = arith.andi %54, %61 : vector<16x32xi1>
    %63 = arith.extui %62 : vector<16x32xi1> to vector<16x32xi32>
    %64 = arith.sitofp %63 : vector<16x32xi32> to vector<16x32xf32>
    %cst_17 = arith.constant dense<0.000000e+00> : vector<16x144xf32>
    %65 = tpu.matmul %64, %47, %cst_17 {dimension_numbers = #tpu.dot_dimension_numbers<[1], [0], [0], [1], [0, 0, 1, 1], [], []>} : vector<16x32xf32>, vector<32x144xf32>, vector<16x144xf32> -> vector<16x144xf32>
    %c0_18 = arith.constant 0 : index
    %c0_19 = arith.constant 0 : index
    %66 = vector.load %arg2[%c0_18, %c0_19] : memref<3392x128xf32, #tpu.memory_space<vmem>>, vector<144x32xf32>
    %c0_20 = arith.constant 0 : index
    %c0_21 = arith.constant 0 : index
    %67 = vector.load %arg3[%c0_20, %c0_21] : memref<224x128xf32, #tpu.memory_space<vmem>>, vector<1x32xf32>
    %cst_22 = arith.constant dense<0.000000e+00> : vector<16x32xf32>
    %68 = tpu.matmul %65, %66, %cst_22 {dimension_numbers = #tpu.dot_dimension_numbers<[1], [0], [0], [1], [0, 0, 1, 1], [], []>} : vector<16x144xf32>, vector<144x32xf32>, vector<16x32xf32> -> vector<16x32xf32>
    %69 = vector.broadcast %67 : vector<1x32xf32> to vector<16x32xf32>
    %70 = arith.addf %68, %69 : vector<16x32xf32>
    %cst_23 = arith.constant 0.000000e+00 : f32
    %71 = vector.broadcast %cst_23 : f32 to vector<16x32xf32>
    %72 = arith.maximumf %70, %71 : vector<16x32xf32>
    %c1_i32_24 = arith.constant 1 : i32
    %73 = tpu.dynamic_rotate %72 by %c1_i32_24 dim 0 : vector<16x32xf32>, i32 -> vector<16x32xf32>
    %74 = tpu.iota {dimensions = array<i32: 0>} : vector<16x32xi32>
    %c7_i32_25 = arith.constant 7 : i32
    %75 = vector.broadcast %c7_i32_25 : i32 to vector<16x32xi32>
    %76 = arith.andi %74, %75 : vector<16x32xi32>
    %c-1_i32_26 = arith.constant -1 : i32
    %77 = vector.broadcast %c-1_i32_26 : i32 to vector<16x32xi32>
    %78 = arith.addi %76, %77 : vector<16x32xi32>
    %c0_i32_27 = arith.constant 0 : i32
    %79 = vector.broadcast %c0_i32_27 : i32 to vector<16x32xi32>
    %80 = arith.cmpi sge, %78, %79 : vector<16x32xi32>
    %c-1_i32_28 = arith.constant -1 : i32
    %81 = vector.broadcast %c-1_i32_28 : i32 to vector<16x32xi32>
    %82 = arith.addi %76, %81 : vector<16x32xi32>
    %c8_i32 = arith.constant 8 : i32
    %83 = vector.broadcast %c8_i32 : i32 to vector<16x32xi32>
    %84 = arith.cmpi slt, %82, %83 : vector<16x32xi32>
    %85 = arith.andi %80, %84 : vector<16x32xi1>
    %cst_29 = arith.constant 0.000000e+00 : f32
    %86 = vector.broadcast %cst_29 : f32 to vector<16x32xf32>
    %87 = arith.select %85, %73, %86 : vector<16x32xi1>, vector<16x32xf32>
    %c15_i32_30 = arith.constant 15 : i32
    %88 = tpu.dynamic_rotate %72 by %c15_i32_30 dim 0 : vector<16x32xf32>, i32 -> vector<16x32xf32>
    %89 = tpu.iota {dimensions = array<i32: 0>} : vector<16x32xi32>
    %c7_i32_31 = arith.constant 7 : i32
    %90 = vector.broadcast %c7_i32_31 : i32 to vector<16x32xi32>
    %91 = arith.andi %89, %90 : vector<16x32xi32>
    %c1_i32_32 = arith.constant 1 : i32
    %92 = vector.broadcast %c1_i32_32 : i32 to vector<16x32xi32>
    %93 = arith.addi %91, %92 : vector<16x32xi32>
    %c0_i32_33 = arith.constant 0 : i32
    %94 = vector.broadcast %c0_i32_33 : i32 to vector<16x32xi32>
    %95 = arith.cmpi sge, %93, %94 : vector<16x32xi32>
    %c1_i32_34 = arith.constant 1 : i32
    %96 = vector.broadcast %c1_i32_34 : i32 to vector<16x32xi32>
    %97 = arith.addi %91, %96 : vector<16x32xi32>
    %c8_i32_35 = arith.constant 8 : i32
    %98 = vector.broadcast %c8_i32_35 : i32 to vector<16x32xi32>
    %99 = arith.cmpi slt, %97, %98 : vector<16x32xi32>
    %100 = arith.andi %95, %99 : vector<16x32xi1>
    %cst_36 = arith.constant 0.000000e+00 : f32
    %101 = vector.broadcast %cst_36 : f32 to vector<16x32xf32>
    %102 = arith.select %100, %88, %101 : vector<16x32xi1>, vector<16x32xf32>
    %103 = tpu.concatenate %87, %72, %102 in 1 : vector<16x32xf32>, vector<16x32xf32>, vector<16x32xf32> -> vector<16x96xf32>
    %c144 = arith.constant 144 : index
    %c0_37 = arith.constant 0 : index
    %104 = vector.load %arg2[%c144, %c0_37] : memref<3392x128xf32, #tpu.memory_space<vmem>>, vector<96x32xf32>
    %c8 = arith.constant 8 : index
    %c0_38 = arith.constant 0 : index
    %105 = vector.load %arg3[%c8, %c0_38] : memref<224x128xf32, #tpu.memory_space<vmem>>, vector<1x32xf32>
    %cst_39 = arith.constant dense<0.000000e+00> : vector<16x32xf32>
    %106 = tpu.matmul %103, %104, %cst_39 {dimension_numbers = #tpu.dot_dimension_numbers<[1], [0], [0], [1], [0, 0, 1, 1], [], []>} : vector<16x96xf32>, vector<96x32xf32>, vector<16x32xf32> -> vector<16x32xf32>
    %107 = vector.broadcast %105 : vector<1x32xf32> to vector<16x32xf32>
    %108 = arith.addf %106, %107 : vector<16x32xf32>
    %cst_40 = arith.constant 0.000000e+00 : f32
    %109 = vector.broadcast %cst_40 : f32 to vector<16x32xf32>
    %110 = arith.maximumf %108, %109 : vector<16x32xf32>
    %c240 = arith.constant 240 : index
    %c0_41 = arith.constant 0 : index
    %111 = vector.load %arg2[%c240, %c0_41] : memref<3392x128xf32, #tpu.memory_space<vmem>>, vector<32x32xf32>
    %c16 = arith.constant 16 : index
    %c0_42 = arith.constant 0 : index
    %112 = vector.load %arg3[%c16, %c0_42] : memref<224x128xf32, #tpu.memory_space<vmem>>, vector<1x32xf32>
    %cst_43 = arith.constant dense<0.000000e+00> : vector<16x32xf32>
    %113 = tpu.matmul %110, %111, %cst_43 {dimension_numbers = #tpu.dot_dimension_numbers<[1], [0], [0], [1], [0, 0, 1, 1], [], []>} : vector<16x32xf32>, vector<32x32xf32>, vector<16x32xf32> -> vector<16x32xf32>
    %114 = vector.broadcast %112 : vector<1x32xf32> to vector<16x32xf32>
    %115 = arith.addf %113, %114 : vector<16x32xf32>
    %116 = arith.addf %70, %115 : vector<16x32xf32>
    %c1_i32_44 = arith.constant 1 : i32
    %117 = tpu.dynamic_rotate %116 by %c1_i32_44 dim 0 : vector<16x32xf32>, i32 -> vector<16x32xf32>
    %118 = tpu.iota {dimensions = array<i32: 0>} : vector<16x32xi32>
    %c7_i32_45 = arith.constant 7 : i32
    %119 = vector.broadcast %c7_i32_45 : i32 to vector<16x32xi32>
    %120 = arith.andi %118, %119 : vector<16x32xi32>
    %c-1_i32_46 = arith.constant -1 : i32
    %121 = vector.broadcast %c-1_i32_46 : i32 to vector<16x32xi32>
    %122 = arith.addi %120, %121 : vector<16x32xi32>
    %c0_i32_47 = arith.constant 0 : i32
    %123 = vector.broadcast %c0_i32_47 : i32 to vector<16x32xi32>
    %124 = arith.cmpi sge, %122, %123 : vector<16x32xi32>
    %c-1_i32_48 = arith.constant -1 : i32
    %125 = vector.broadcast %c-1_i32_48 : i32 to vector<16x32xi32>
    %126 = arith.addi %120, %125 : vector<16x32xi32>
    %c8_i32_49 = arith.constant 8 : i32
    %127 = vector.broadcast %c8_i32_49 : i32 to vector<16x32xi32>
    %128 = arith.cmpi slt, %126, %127 : vector<16x32xi32>
    %129 = arith.andi %124, %128 : vector<16x32xi1>
    %cst_50 = arith.constant 0.000000e+00 : f32
    %130 = vector.broadcast %cst_50 : f32 to vector<16x32xf32>
    %131 = arith.select %129, %117, %130 : vector<16x32xi1>, vector<16x32xf32>
    %c15_i32_51 = arith.constant 15 : i32
    %132 = tpu.dynamic_rotate %116 by %c15_i32_51 dim 0 : vector<16x32xf32>, i32 -> vector<16x32xf32>
    %133 = tpu.iota {dimensions = array<i32: 0>} : vector<16x32xi32>
    %c7_i32_52 = arith.constant 7 : i32
    %134 = vector.broadcast %c7_i32_52 : i32 to vector<16x32xi32>
    %135 = arith.andi %133, %134 : vector<16x32xi32>
    %c1_i32_53 = arith.constant 1 : i32
    %136 = vector.broadcast %c1_i32_53 : i32 to vector<16x32xi32>
    %137 = arith.addi %135, %136 : vector<16x32xi32>
    %c0_i32_54 = arith.constant 0 : i32
    %138 = vector.broadcast %c0_i32_54 : i32 to vector<16x32xi32>
    %139 = arith.cmpi sge, %137, %138 : vector<16x32xi32>
    %c1_i32_55 = arith.constant 1 : i32
    %140 = vector.broadcast %c1_i32_55 : i32 to vector<16x32xi32>
    %141 = arith.addi %135, %140 : vector<16x32xi32>
    %c8_i32_56 = arith.constant 8 : i32
    %142 = vector.broadcast %c8_i32_56 : i32 to vector<16x32xi32>
    %143 = arith.cmpi slt, %141, %142 : vector<16x32xi32>
    %144 = arith.andi %139, %143 : vector<16x32xi1>
    %cst_57 = arith.constant 0.000000e+00 : f32
    %145 = vector.broadcast %cst_57 : f32 to vector<16x32xf32>
    %146 = arith.select %144, %132, %145 : vector<16x32xi1>, vector<16x32xf32>
    %147 = tpu.concatenate %131, %116, %146 in 1 : vector<16x32xf32>, vector<16x32xf32>, vector<16x32xf32> -> vector<16x96xf32>
    %c272 = arith.constant 272 : index
    %c0_58 = arith.constant 0 : index
    %148 = vector.load %arg2[%c272, %c0_58] : memref<3392x128xf32, #tpu.memory_space<vmem>>, vector<96x32xf32>
    %c24 = arith.constant 24 : index
    %c0_59 = arith.constant 0 : index
    %149 = vector.load %arg3[%c24, %c0_59] : memref<224x128xf32, #tpu.memory_space<vmem>>, vector<1x32xf32>
    %cst_60 = arith.constant dense<0.000000e+00> : vector<16x32xf32>
    %150 = tpu.matmul %147, %148, %cst_60 {dimension_numbers = #tpu.dot_dimension_numbers<[1], [0], [0], [1], [0, 0, 1, 1], [], []>} : vector<16x96xf32>, vector<96x32xf32>, vector<16x32xf32> -> vector<16x32xf32>
    %151 = vector.broadcast %149 : vector<1x32xf32> to vector<16x32xf32>
    %152 = arith.addf %150, %151 : vector<16x32xf32>
    %c0_61 = arith.constant 0 : index
    %c0_62 = arith.constant 0 : index
    %153 = vector.load %arg4[%c0_61, %c0_62] : memref<128x32xf32, #tpu.memory_space<vmem>>, vector<64x32xf32>
    %cst_63 = arith.constant dense<0.000000e+00> : vector<16x64xf32>
    %154 = tpu.matmul %152, %153, %cst_63 {dimension_numbers = #tpu.dot_dimension_numbers<[1], [1], [0], [0], [0, 0, 1, 0], [], []>} : vector<16x32xf32>, vector<64x32xf32>, vector<16x64xf32> -> vector<16x64xf32>
    %c72 = arith.constant 72 : index
    %c0_64 = arith.constant 0 : index
    %155 = vector.load %arg3[%c72, %c0_64] : memref<224x128xf32, #tpu.memory_space<vmem>>, vector<1x64xf32>
    %cst_65 = arith.constant 2.000000e+00 : f32
    %156 = vector.broadcast %cst_65 : f32 to vector<16x64xf32>
    %157 = arith.mulf %156, %154 : vector<16x64xf32>
    %158 = vector.broadcast %155 : vector<1x64xf32> to vector<16x64xf32>
    %159 = arith.subf %158, %157 : vector<16x64xf32>
    %160 = tpu.iota {dimensions = array<i32: 1>} : vector<16x64xi32>
    %cst_66 = arith.constant dense<0x7F800000> : vector<16xf32>
    %161 = vector.multi_reduction <minimumf>, %159, %cst_66 [1] : vector<16x64xf32> to vector<16xf32>
    %162 = vector.shape_cast %161 : vector<16xf32> to vector<16x1xf32>
    %163 = vector.broadcast %162 : vector<16x1xf32> to vector<16x64xf32>
    %164 = arith.cmpf ole, %159, %163 : vector<16x64xf32>
    %c64_i32 = arith.constant 64 : i32
    %165 = vector.broadcast %c64_i32 : i32 to vector<16x64xi32>
    %166 = arith.select %164, %160, %165 : vector<16x64xi1>, vector<16x64xi32>
    %cst_67 = arith.constant dense<2147483647> : vector<16xi32>
    %167 = vector.multi_reduction <minsi>, %166, %cst_67 [1] : vector<16x64xi32> to vector<16xi32>
    %168 = vector.shape_cast %167 : vector<16xi32> to vector<16x1xi32>
    %169 = vector.broadcast %168 : vector<16x1xi32> to vector<16x64xi32>
    %170 = arith.cmpi eq, %160, %169 : vector<16x64xi32>
    %171 = arith.extui %170 : vector<16x64xi1> to vector<16x64xi32>
    %172 = arith.sitofp %171 : vector<16x64xi32> to vector<16x64xf32>
    %cst_68 = arith.constant dense<0.000000e+00> : vector<16x32xf32>
    %173 = tpu.matmul %172, %153, %cst_68 {dimension_numbers = #tpu.dot_dimension_numbers<[1], [0], [0], [1], [0, 0, 1, 1], [], []>} : vector<16x64xf32>, vector<64x32xf32>, vector<16x32xf32> -> vector<16x32xf32>
    %174 = arith.subf %173, %152 : vector<16x32xf32>
    %175 = arith.mulf %174, %174 : vector<16x32xf32>
    %176 = vector.shape_cast %175 : vector<16x32xf32> to vector<1x16x32xf32>
    %cst_69 = arith.constant dense<0.000000e+00> : vector<1xf32>
    %177 = vector.multi_reduction <add>, %176, %cst_69 [1, 2] : vector<1x16x32xf32> to vector<1xf32>
    %178 = vector.shape_cast %177 : vector<1xf32> to vector<1x1x1xf32>
    %179 = vector.extract %178[0, 0, 0] : f32 from vector<1x1x1xf32>
    %cst_70 = arith.constant 1.600000e+01 : f32
    %180 = arith.divf %179, %cst_70 : f32
    %c1_i32_71 = arith.constant 1 : i32
    %181 = tpu.dynamic_rotate %173 by %c1_i32_71 dim 0 : vector<16x32xf32>, i32 -> vector<16x32xf32>
    %182 = tpu.iota {dimensions = array<i32: 0>} : vector<16x32xi32>
    %c7_i32_72 = arith.constant 7 : i32
    %183 = vector.broadcast %c7_i32_72 : i32 to vector<16x32xi32>
    %184 = arith.andi %182, %183 : vector<16x32xi32>
    %c-1_i32_73 = arith.constant -1 : i32
    %185 = vector.broadcast %c-1_i32_73 : i32 to vector<16x32xi32>
    %186 = arith.addi %184, %185 : vector<16x32xi32>
    %c0_i32_74 = arith.constant 0 : i32
    %187 = vector.broadcast %c0_i32_74 : i32 to vector<16x32xi32>
    %188 = arith.cmpi sge, %186, %187 : vector<16x32xi32>
    %c-1_i32_75 = arith.constant -1 : i32
    %189 = vector.broadcast %c-1_i32_75 : i32 to vector<16x32xi32>
    %190 = arith.addi %184, %189 : vector<16x32xi32>
    %c8_i32_76 = arith.constant 8 : i32
    %191 = vector.broadcast %c8_i32_76 : i32 to vector<16x32xi32>
    %192 = arith.cmpi slt, %190, %191 : vector<16x32xi32>
    %193 = arith.andi %188, %192 : vector<16x32xi1>
    %cst_77 = arith.constant 0.000000e+00 : f32
    %194 = vector.broadcast %cst_77 : f32 to vector<16x32xf32>
    %195 = arith.select %193, %181, %194 : vector<16x32xi1>, vector<16x32xf32>
    %c15_i32_78 = arith.constant 15 : i32
    %196 = tpu.dynamic_rotate %173 by %c15_i32_78 dim 0 : vector<16x32xf32>, i32 -> vector<16x32xf32>
    %197 = tpu.iota {dimensions = array<i32: 0>} : vector<16x32xi32>
    %c7_i32_79 = arith.constant 7 : i32
    %198 = vector.broadcast %c7_i32_79 : i32 to vector<16x32xi32>
    %199 = arith.andi %197, %198 : vector<16x32xi32>
    %c1_i32_80 = arith.constant 1 : i32
    %200 = vector.broadcast %c1_i32_80 : i32 to vector<16x32xi32>
    %201 = arith.addi %199, %200 : vector<16x32xi32>
    %c0_i32_81 = arith.constant 0 : i32
    %202 = vector.broadcast %c0_i32_81 : i32 to vector<16x32xi32>
    %203 = arith.cmpi sge, %201, %202 : vector<16x32xi32>
    %c1_i32_82 = arith.constant 1 : i32
    %204 = vector.broadcast %c1_i32_82 : i32 to vector<16x32xi32>
    %205 = arith.addi %199, %204 : vector<16x32xi32>
    %c8_i32_83 = arith.constant 8 : i32
    %206 = vector.broadcast %c8_i32_83 : i32 to vector<16x32xi32>
    %207 = arith.cmpi slt, %205, %206 : vector<16x32xi32>
    %208 = arith.andi %203, %207 : vector<16x32xi1>
    %cst_84 = arith.constant 0.000000e+00 : f32
    %209 = vector.broadcast %cst_84 : f32 to vector<16x32xf32>
    %210 = arith.select %208, %196, %209 : vector<16x32xi1>, vector<16x32xf32>
    %211 = tpu.concatenate %195, %173, %210 in 1 : vector<16x32xf32>, vector<16x32xf32>, vector<16x32xf32> -> vector<16x96xf32>
    %c368 = arith.constant 368 : index
    %c0_85 = arith.constant 0 : index
    %212 = vector.load %arg2[%c368, %c0_85] : memref<3392x128xf32, #tpu.memory_space<vmem>>, vector<96x64xf32>
    %c32 = arith.constant 32 : index
    %c0_86 = arith.constant 0 : index
    %213 = vector.load %arg3[%c32, %c0_86] : memref<224x128xf32, #tpu.memory_space<vmem>>, vector<1x64xf32>
    %cst_87 = arith.constant dense<0.000000e+00> : vector<16x64xf32>
    %214 = tpu.matmul %211, %212, %cst_87 {dimension_numbers = #tpu.dot_dimension_numbers<[1], [0], [0], [1], [0, 0, 1, 1], [], []>} : vector<16x96xf32>, vector<96x64xf32>, vector<16x64xf32> -> vector<16x64xf32>
    %215 = vector.broadcast %213 : vector<1x64xf32> to vector<16x64xf32>
    %216 = arith.addf %214, %215 : vector<16x64xf32>
    %cst_88 = arith.constant 0.000000e+00 : f32
    %217 = vector.broadcast %cst_88 : f32 to vector<16x64xf32>
    %218 = arith.maximumf %216, %217 : vector<16x64xf32>
    %c1_i32_89 = arith.constant 1 : i32
    %219 = tpu.dynamic_rotate %218 by %c1_i32_89 dim 0 : vector<16x64xf32>, i32 -> vector<16x64xf32>
    %220 = tpu.iota {dimensions = array<i32: 0>} : vector<16x64xi32>
    %c7_i32_90 = arith.constant 7 : i32
    %221 = vector.broadcast %c7_i32_90 : i32 to vector<16x64xi32>
    %222 = arith.andi %220, %221 : vector<16x64xi32>
    %c-1_i32_91 = arith.constant -1 : i32
    %223 = vector.broadcast %c-1_i32_91 : i32 to vector<16x64xi32>
    %224 = arith.addi %222, %223 : vector<16x64xi32>
    %c0_i32_92 = arith.constant 0 : i32
    %225 = vector.broadcast %c0_i32_92 : i32 to vector<16x64xi32>
    %226 = arith.cmpi sge, %224, %225 : vector<16x64xi32>
    %c-1_i32_93 = arith.constant -1 : i32
    %227 = vector.broadcast %c-1_i32_93 : i32 to vector<16x64xi32>
    %228 = arith.addi %222, %227 : vector<16x64xi32>
    %c8_i32_94 = arith.constant 8 : i32
    %229 = vector.broadcast %c8_i32_94 : i32 to vector<16x64xi32>
    %230 = arith.cmpi slt, %228, %229 : vector<16x64xi32>
    %231 = arith.andi %226, %230 : vector<16x64xi1>
    %cst_95 = arith.constant 0.000000e+00 : f32
    %232 = vector.broadcast %cst_95 : f32 to vector<16x64xf32>
    %233 = arith.select %231, %219, %232 : vector<16x64xi1>, vector<16x64xf32>
    %c15_i32_96 = arith.constant 15 : i32
    %234 = tpu.dynamic_rotate %218 by %c15_i32_96 dim 0 : vector<16x64xf32>, i32 -> vector<16x64xf32>
    %235 = tpu.iota {dimensions = array<i32: 0>} : vector<16x64xi32>
    %c7_i32_97 = arith.constant 7 : i32
    %236 = vector.broadcast %c7_i32_97 : i32 to vector<16x64xi32>
    %237 = arith.andi %235, %236 : vector<16x64xi32>
    %c1_i32_98 = arith.constant 1 : i32
    %238 = vector.broadcast %c1_i32_98 : i32 to vector<16x64xi32>
    %239 = arith.addi %237, %238 : vector<16x64xi32>
    %c0_i32_99 = arith.constant 0 : i32
    %240 = vector.broadcast %c0_i32_99 : i32 to vector<16x64xi32>
    %241 = arith.cmpi sge, %239, %240 : vector<16x64xi32>
    %c1_i32_100 = arith.constant 1 : i32
    %242 = vector.broadcast %c1_i32_100 : i32 to vector<16x64xi32>
    %243 = arith.addi %237, %242 : vector<16x64xi32>
    %c8_i32_101 = arith.constant 8 : i32
    %244 = vector.broadcast %c8_i32_101 : i32 to vector<16x64xi32>
    %245 = arith.cmpi slt, %243, %244 : vector<16x64xi32>
    %246 = arith.andi %241, %245 : vector<16x64xi1>
    %cst_102 = arith.constant 0.000000e+00 : f32
    %247 = vector.broadcast %cst_102 : f32 to vector<16x64xf32>
    %248 = arith.select %246, %234, %247 : vector<16x64xi1>, vector<16x64xf32>
    %249 = tpu.concatenate %233, %218, %248 in 1 : vector<16x64xf32>, vector<16x64xf32>, vector<16x64xf32> -> vector<16x192xf32>
    %c464 = arith.constant 464 : index
    %c0_103 = arith.constant 0 : index
    %250 = vector.load %arg2[%c464, %c0_103] : memref<3392x128xf32, #tpu.memory_space<vmem>>, vector<192x64xf32>
    %c40 = arith.constant 40 : index
    %c0_104 = arith.constant 0 : index
    %251 = vector.load %arg3[%c40, %c0_104] : memref<224x128xf32, #tpu.memory_space<vmem>>, vector<1x64xf32>
    %cst_105 = arith.constant dense<0.000000e+00> : vector<16x64xf32>
    %252 = tpu.matmul %249, %250, %cst_105 {dimension_numbers = #tpu.dot_dimension_numbers<[1], [0], [0], [1], [0, 0, 1, 1], [], []>} : vector<16x192xf32>, vector<192x64xf32>, vector<16x64xf32> -> vector<16x64xf32>
    %253 = vector.broadcast %251 : vector<1x64xf32> to vector<16x64xf32>
    %254 = arith.addf %252, %253 : vector<16x64xf32>
    %cst_106 = arith.constant 0.000000e+00 : f32
    %255 = vector.broadcast %cst_106 : f32 to vector<16x64xf32>
    %256 = arith.maximumf %254, %255 : vector<16x64xf32>
    %c656 = arith.constant 656 : index
    %c0_107 = arith.constant 0 : index
    %257 = vector.load %arg2[%c656, %c0_107] : memref<3392x128xf32, #tpu.memory_space<vmem>>, vector<64x64xf32>
    %c48 = arith.constant 48 : index
    %c0_108 = arith.constant 0 : index
    %258 = vector.load %arg3[%c48, %c0_108] : memref<224x128xf32, #tpu.memory_space<vmem>>, vector<1x64xf32>
    %cst_109 = arith.constant dense<0.000000e+00> : vector<16x64xf32>
    %259 = tpu.matmul %256, %257, %cst_109 {dimension_numbers = #tpu.dot_dimension_numbers<[1], [0], [0], [1], [0, 0, 1, 1], [], []>} : vector<16x64xf32>, vector<64x64xf32>, vector<16x64xf32> -> vector<16x64xf32>
    %260 = vector.broadcast %258 : vector<1x64xf32> to vector<16x64xf32>
    %261 = arith.addf %259, %260 : vector<16x64xf32>
    %262 = arith.addf %216, %261 : vector<16x64xf32>
    %263 = tpu.iota {dimensions = array<i32: 0>} : vector<32x16xi32>
    %264 = tpu.iota {dimensions = array<i32: 1>} : vector<32x16xi32>
    %c4_i32_110 = arith.constant 4 : i32
    %265 = vector.broadcast %c4_i32_110 : i32 to vector<32x16xi32>
    %266 = arith.shrsi %263, %265 : vector<32x16xi32>
    %c3_i32_111 = arith.constant 3 : i32
    %267 = vector.broadcast %c3_i32_111 : i32 to vector<32x16xi32>
    %268 = arith.shrsi %264, %267 : vector<32x16xi32>
    %269 = arith.cmpi eq, %266, %268 : vector<32x16xi32>
    %c15_i32_112 = arith.constant 15 : i32
    %270 = vector.broadcast %c15_i32_112 : i32 to vector<32x16xi32>
    %271 = arith.andi %263, %270 : vector<32x16xi32>
    %c7_i32_113 = arith.constant 7 : i32
    %272 = vector.broadcast %c7_i32_113 : i32 to vector<32x16xi32>
    %273 = arith.andi %264, %272 : vector<32x16xi32>
    %c2_i32_114 = arith.constant 2 : i32
    %274 = vector.broadcast %c2_i32_114 : i32 to vector<32x16xi32>
    %275 = arith.muli %273, %274 : vector<32x16xi32>
    %276 = arith.cmpi eq, %271, %275 : vector<32x16xi32>
    %277 = arith.andi %269, %276 : vector<32x16xi1>
    %278 = arith.extui %277 : vector<32x16xi1> to vector<32x16xi32>
    %279 = arith.sitofp %278 : vector<32x16xi32> to vector<32x16xf32>
    %cst_115 = arith.constant dense<0.000000e+00> : vector<32x64xf32>
    %280 = tpu.matmul %279, %262, %cst_115 {dimension_numbers = #tpu.dot_dimension_numbers<[1], [0], [0], [1], [0, 0, 1, 1], [], []>} : vector<32x16xf32>, vector<16x64xf32>, vector<32x64xf32> -> vector<32x64xf32>
    %c31_i32_116 = arith.constant 31 : i32
    %281 = tpu.dynamic_rotate %280 by %c31_i32_116 dim 0 : vector<32x64xf32>, i32 -> vector<32x64xf32>
    %282 = tpu.iota {dimensions = array<i32: 0>} : vector<32x64xi32>
    %c15_i32_117 = arith.constant 15 : i32
    %283 = vector.broadcast %c15_i32_117 : i32 to vector<32x64xi32>
    %284 = arith.andi %282, %283 : vector<32x64xi32>
    %c1_i32_118 = arith.constant 1 : i32
    %285 = vector.broadcast %c1_i32_118 : i32 to vector<32x64xi32>
    %286 = arith.addi %284, %285 : vector<32x64xi32>
    %c0_i32_119 = arith.constant 0 : i32
    %287 = vector.broadcast %c0_i32_119 : i32 to vector<32x64xi32>
    %288 = arith.cmpi sge, %286, %287 : vector<32x64xi32>
    %c1_i32_120 = arith.constant 1 : i32
    %289 = vector.broadcast %c1_i32_120 : i32 to vector<32x64xi32>
    %290 = arith.addi %284, %289 : vector<32x64xi32>
    %c16_i32_121 = arith.constant 16 : i32
    %291 = vector.broadcast %c16_i32_121 : i32 to vector<32x64xi32>
    %292 = arith.cmpi slt, %290, %291 : vector<32x64xi32>
    %293 = arith.andi %288, %292 : vector<32x64xi1>
    %cst_122 = arith.constant 0.000000e+00 : f32
    %294 = vector.broadcast %cst_122 : f32 to vector<32x64xf32>
    %295 = arith.select %293, %281, %294 : vector<32x64xi1>, vector<32x64xf32>
    %c1_i32_123 = arith.constant 1 : i32
    %296 = tpu.dynamic_rotate %280 by %c1_i32_123 dim 0 : vector<32x64xf32>, i32 -> vector<32x64xf32>
    %297 = tpu.iota {dimensions = array<i32: 0>} : vector<32x64xi32>
    %c15_i32_124 = arith.constant 15 : i32
    %298 = vector.broadcast %c15_i32_124 : i32 to vector<32x64xi32>
    %299 = arith.andi %297, %298 : vector<32x64xi32>
    %c-1_i32_125 = arith.constant -1 : i32
    %300 = vector.broadcast %c-1_i32_125 : i32 to vector<32x64xi32>
    %301 = arith.addi %299, %300 : vector<32x64xi32>
    %c0_i32_126 = arith.constant 0 : i32
    %302 = vector.broadcast %c0_i32_126 : i32 to vector<32x64xi32>
    %303 = arith.cmpi sge, %301, %302 : vector<32x64xi32>
    %c-1_i32_127 = arith.constant -1 : i32
    %304 = vector.broadcast %c-1_i32_127 : i32 to vector<32x64xi32>
    %305 = arith.addi %299, %304 : vector<32x64xi32>
    %c16_i32_128 = arith.constant 16 : i32
    %306 = vector.broadcast %c16_i32_128 : i32 to vector<32x64xi32>
    %307 = arith.cmpi slt, %305, %306 : vector<32x64xi32>
    %308 = arith.andi %303, %307 : vector<32x64xi1>
    %cst_129 = arith.constant 0.000000e+00 : f32
    %309 = vector.broadcast %cst_129 : f32 to vector<32x64xf32>
    %310 = arith.select %308, %296, %309 : vector<32x64xi1>, vector<32x64xf32>
    %c2_i32_130 = arith.constant 2 : i32
    %311 = tpu.dynamic_rotate %280 by %c2_i32_130 dim 0 : vector<32x64xf32>, i32 -> vector<32x64xf32>
    %312 = tpu.iota {dimensions = array<i32: 0>} : vector<32x64xi32>
    %c15_i32_131 = arith.constant 15 : i32
    %313 = vector.broadcast %c15_i32_131 : i32 to vector<32x64xi32>
    %314 = arith.andi %312, %313 : vector<32x64xi32>
    %c-2_i32 = arith.constant -2 : i32
    %315 = vector.broadcast %c-2_i32 : i32 to vector<32x64xi32>
    %316 = arith.addi %314, %315 : vector<32x64xi32>
    %c0_i32_132 = arith.constant 0 : i32
    %317 = vector.broadcast %c0_i32_132 : i32 to vector<32x64xi32>
    %318 = arith.cmpi sge, %316, %317 : vector<32x64xi32>
    %c-2_i32_133 = arith.constant -2 : i32
    %319 = vector.broadcast %c-2_i32_133 : i32 to vector<32x64xi32>
    %320 = arith.addi %314, %319 : vector<32x64xi32>
    %c16_i32_134 = arith.constant 16 : i32
    %321 = vector.broadcast %c16_i32_134 : i32 to vector<32x64xi32>
    %322 = arith.cmpi slt, %320, %321 : vector<32x64xi32>
    %323 = arith.andi %318, %322 : vector<32x64xi1>
    %cst_135 = arith.constant 0.000000e+00 : f32
    %324 = vector.broadcast %cst_135 : f32 to vector<32x64xf32>
    %325 = arith.select %323, %311, %324 : vector<32x64xi1>, vector<32x64xf32>
    %326 = tpu.concatenate %295, %280, %310, %325 in 1 : vector<32x64xf32>, vector<32x64xf32>, vector<32x64xf32>, vector<32x64xf32> -> vector<32x256xf32>
    %c720 = arith.constant 720 : index
    %c0_136 = arith.constant 0 : index
    %327 = vector.load %arg2[%c720, %c0_136] : memref<3392x128xf32, #tpu.memory_space<vmem>>, vector<256x64xf32>
    %c56 = arith.constant 56 : index
    %c0_137 = arith.constant 0 : index
    %328 = vector.load %arg3[%c56, %c0_137] : memref<224x128xf32, #tpu.memory_space<vmem>>, vector<1x64xf32>
    %cst_138 = arith.constant dense<0.000000e+00> : vector<32x64xf32>
    %329 = tpu.matmul %326, %327, %cst_138 {dimension_numbers = #tpu.dot_dimension_numbers<[1], [0], [0], [1], [0, 0, 1, 1], [], []>} : vector<32x256xf32>, vector<256x64xf32>, vector<32x64xf32> -> vector<32x64xf32>
    %330 = vector.broadcast %328 : vector<1x64xf32> to vector<32x64xf32>
    %331 = arith.addf %329, %330 : vector<32x64xf32>
    %c1_i32_139 = arith.constant 1 : i32
    %332 = tpu.dynamic_rotate %331 by %c1_i32_139 dim 0 : vector<32x64xf32>, i32 -> vector<32x64xf32>
    %333 = tpu.iota {dimensions = array<i32: 0>} : vector<32x64xi32>
    %c15_i32_140 = arith.constant 15 : i32
    %334 = vector.broadcast %c15_i32_140 : i32 to vector<32x64xi32>
    %335 = arith.andi %333, %334 : vector<32x64xi32>
    %c-1_i32_141 = arith.constant -1 : i32
    %336 = vector.broadcast %c-1_i32_141 : i32 to vector<32x64xi32>
    %337 = arith.addi %335, %336 : vector<32x64xi32>
    %c0_i32_142 = arith.constant 0 : i32
    %338 = vector.broadcast %c0_i32_142 : i32 to vector<32x64xi32>
    %339 = arith.cmpi sge, %337, %338 : vector<32x64xi32>
    %c-1_i32_143 = arith.constant -1 : i32
    %340 = vector.broadcast %c-1_i32_143 : i32 to vector<32x64xi32>
    %341 = arith.addi %335, %340 : vector<32x64xi32>
    %c16_i32_144 = arith.constant 16 : i32
    %342 = vector.broadcast %c16_i32_144 : i32 to vector<32x64xi32>
    %343 = arith.cmpi slt, %341, %342 : vector<32x64xi32>
    %344 = arith.andi %339, %343 : vector<32x64xi1>
    %cst_145 = arith.constant 0.000000e+00 : f32
    %345 = vector.broadcast %cst_145 : f32 to vector<32x64xf32>
    %346 = arith.select %344, %332, %345 : vector<32x64xi1>, vector<32x64xf32>
    %c31_i32_146 = arith.constant 31 : i32
    %347 = tpu.dynamic_rotate %331 by %c31_i32_146 dim 0 : vector<32x64xf32>, i32 -> vector<32x64xf32>
    %348 = tpu.iota {dimensions = array<i32: 0>} : vector<32x64xi32>
    %c15_i32_147 = arith.constant 15 : i32
    %349 = vector.broadcast %c15_i32_147 : i32 to vector<32x64xi32>
    %350 = arith.andi %348, %349 : vector<32x64xi32>
    %c1_i32_148 = arith.constant 1 : i32
    %351 = vector.broadcast %c1_i32_148 : i32 to vector<32x64xi32>
    %352 = arith.addi %350, %351 : vector<32x64xi32>
    %c0_i32_149 = arith.constant 0 : i32
    %353 = vector.broadcast %c0_i32_149 : i32 to vector<32x64xi32>
    %354 = arith.cmpi sge, %352, %353 : vector<32x64xi32>
    %c1_i32_150 = arith.constant 1 : i32
    %355 = vector.broadcast %c1_i32_150 : i32 to vector<32x64xi32>
    %356 = arith.addi %350, %355 : vector<32x64xi32>
    %c16_i32_151 = arith.constant 16 : i32
    %357 = vector.broadcast %c16_i32_151 : i32 to vector<32x64xi32>
    %358 = arith.cmpi slt, %356, %357 : vector<32x64xi32>
    %359 = arith.andi %354, %358 : vector<32x64xi1>
    %cst_152 = arith.constant 0.000000e+00 : f32
    %360 = vector.broadcast %cst_152 : f32 to vector<32x64xf32>
    %361 = arith.select %359, %347, %360 : vector<32x64xi1>, vector<32x64xf32>
    %362 = tpu.concatenate %346, %331, %361 in 1 : vector<32x64xf32>, vector<32x64xf32>, vector<32x64xf32> -> vector<32x192xf32>
    %c976 = arith.constant 976 : index
    %c0_153 = arith.constant 0 : index
    %363 = vector.load %arg2[%c976, %c0_153] : memref<3392x128xf32, #tpu.memory_space<vmem>>, vector<192x39xf32>
    %c64 = arith.constant 64 : index
    %c0_154 = arith.constant 0 : index
    %364 = vector.load %arg3[%c64, %c0_154] : memref<224x128xf32, #tpu.memory_space<vmem>>, vector<1x39xf32>
    %cst_155 = arith.constant dense<0.000000e+00> : vector<32x39xf32>
    %365 = tpu.matmul %362, %363, %cst_155 {dimension_numbers = #tpu.dot_dimension_numbers<[1], [0], [0], [1], [0, 0, 1, 1], [], []>} : vector<32x192xf32>, vector<192x39xf32>, vector<32x39xf32> -> vector<32x39xf32>
    %366 = vector.broadcast %364 : vector<1x39xf32> to vector<32x39xf32>
    %367 = arith.addf %365, %366 : vector<32x39xf32>
    %368 = vector.extract_strided_slice %367 {offsets = [0, 0], sizes = [32, 36], strides = [1, 1]} : vector<32x39xf32> to vector<32x36xf32>
    %369 = arith.subf %368, %1 : vector<32x36xf32>
    %370 = math.absf %369 : vector<32x36xf32>
    %371 = vector.shape_cast %370 : vector<32x36xf32> to vector<1x32x36xf32>
    %cst_156 = arith.constant dense<0.000000e+00> : vector<1xf32>
    %372 = vector.multi_reduction <add>, %371, %cst_156 [1, 2] : vector<1x32x36xf32> to vector<1xf32>
    %373 = vector.shape_cast %372 : vector<1xf32> to vector<1x1x1xf32>
    %374 = vector.extract %373[0, 0, 0] : f32 from vector<1x1x1xf32>
    %cst_157 = arith.constant 1.152000e+03 : f32
    %375 = arith.divf %374, %cst_157 : f32
    %376 = tpu.iota {dimensions = array<i32: 0>} : vector<32x36xi32>
    %c15_i32_158 = arith.constant 15 : i32
    %377 = vector.broadcast %c15_i32_158 : i32 to vector<32x36xi32>
    %378 = arith.andi %376, %377 : vector<32x36xi32>
    %c31_i32_159 = arith.constant 31 : i32
    %379 = tpu.dynamic_rotate %369 by %c31_i32_159 dim 0 : vector<32x36xf32>, i32 -> vector<32x36xf32>
    %380 = tpu.iota {dimensions = array<i32: 0>} : vector<32x36xi32>
    %c15_i32_160 = arith.constant 15 : i32
    %381 = vector.broadcast %c15_i32_160 : i32 to vector<32x36xi32>
    %382 = arith.andi %380, %381 : vector<32x36xi32>
    %c1_i32_161 = arith.constant 1 : i32
    %383 = vector.broadcast %c1_i32_161 : i32 to vector<32x36xi32>
    %384 = arith.addi %382, %383 : vector<32x36xi32>
    %c0_i32_162 = arith.constant 0 : i32
    %385 = vector.broadcast %c0_i32_162 : i32 to vector<32x36xi32>
    %386 = arith.cmpi sge, %384, %385 : vector<32x36xi32>
    %c1_i32_163 = arith.constant 1 : i32
    %387 = vector.broadcast %c1_i32_163 : i32 to vector<32x36xi32>
    %388 = arith.addi %382, %387 : vector<32x36xi32>
    %c16_i32_164 = arith.constant 16 : i32
    %389 = vector.broadcast %c16_i32_164 : i32 to vector<32x36xi32>
    %390 = arith.cmpi slt, %388, %389 : vector<32x36xi32>
    %391 = arith.andi %386, %390 : vector<32x36xi1>
    %cst_165 = arith.constant 0.000000e+00 : f32
    %392 = vector.broadcast %cst_165 : f32 to vector<32x36xf32>
    %393 = arith.select %391, %379, %392 : vector<32x36xi1>, vector<32x36xf32>
    %c30_i32_166 = arith.constant 30 : i32
    %394 = tpu.dynamic_rotate %369 by %c30_i32_166 dim 0 : vector<32x36xf32>, i32 -> vector<32x36xf32>
    %395 = tpu.iota {dimensions = array<i32: 0>} : vector<32x36xi32>
    %c15_i32_167 = arith.constant 15 : i32
    %396 = vector.broadcast %c15_i32_167 : i32 to vector<32x36xi32>
    %397 = arith.andi %395, %396 : vector<32x36xi32>
    %c2_i32_168 = arith.constant 2 : i32
    %398 = vector.broadcast %c2_i32_168 : i32 to vector<32x36xi32>
    %399 = arith.addi %397, %398 : vector<32x36xi32>
    %c0_i32_169 = arith.constant 0 : i32
    %400 = vector.broadcast %c0_i32_169 : i32 to vector<32x36xi32>
    %401 = arith.cmpi sge, %399, %400 : vector<32x36xi32>
    %c2_i32_170 = arith.constant 2 : i32
    %402 = vector.broadcast %c2_i32_170 : i32 to vector<32x36xi32>
    %403 = arith.addi %397, %402 : vector<32x36xi32>
    %c16_i32_171 = arith.constant 16 : i32
    %404 = vector.broadcast %c16_i32_171 : i32 to vector<32x36xi32>
    %405 = arith.cmpi slt, %403, %404 : vector<32x36xi32>
    %406 = arith.andi %401, %405 : vector<32x36xi1>
    %cst_172 = arith.constant 0.000000e+00 : f32
    %407 = vector.broadcast %cst_172 : f32 to vector<32x36xf32>
    %408 = arith.select %406, %394, %407 : vector<32x36xi1>, vector<32x36xf32>
    %c15_i32_173 = arith.constant 15 : i32
    %409 = vector.broadcast %c15_i32_173 : i32 to vector<32x36xi32>
    %410 = arith.cmpi slt, %378, %409 : vector<32x36xi32>
    %411 = arith.subf %393, %369 : vector<32x36xf32>
    %cst_174 = arith.constant 0.000000e+00 : f32
    %412 = vector.broadcast %cst_174 : f32 to vector<32x36xf32>
    %413 = arith.select %410, %411, %412 : vector<32x36xi1>, vector<32x36xf32>
    %414 = math.absf %413 : vector<32x36xf32>
    %415 = vector.shape_cast %414 : vector<32x36xf32> to vector<1x32x36xf32>
    %cst_175 = arith.constant dense<0.000000e+00> : vector<1xf32>
    %416 = vector.multi_reduction <add>, %415, %cst_175 [1, 2] : vector<1x32x36xf32> to vector<1xf32>
    %417 = vector.shape_cast %416 : vector<1xf32> to vector<1x1x1xf32>
    %418 = vector.extract %417[0, 0, 0] : f32 from vector<1x1x1xf32>
    %cst_176 = arith.constant 1.080000e+03 : f32
    %419 = arith.divf %418, %cst_176 : f32
    %c14_i32 = arith.constant 14 : i32
    %420 = vector.broadcast %c14_i32 : i32 to vector<32x36xi32>
    %421 = arith.cmpi slt, %378, %420 : vector<32x36xi32>
    %422 = arith.addf %408, %369 : vector<32x36xf32>
    %cst_177 = arith.constant 2.000000e+00 : f32
    %423 = vector.broadcast %cst_177 : f32 to vector<32x36xf32>
    %424 = arith.mulf %423, %393 : vector<32x36xf32>
    %425 = arith.subf %422, %424 : vector<32x36xf32>
    %cst_178 = arith.constant 0.000000e+00 : f32
    %426 = vector.broadcast %cst_178 : f32 to vector<32x36xf32>
    %427 = arith.select %421, %425, %426 : vector<32x36xi1>, vector<32x36xf32>
    %428 = math.absf %427 : vector<32x36xf32>
    %429 = vector.shape_cast %428 : vector<32x36xf32> to vector<1x32x36xf32>
    %cst_179 = arith.constant dense<0.000000e+00> : vector<1xf32>
    %430 = vector.multi_reduction <add>, %429, %cst_179 [1, 2] : vector<1x32x36xf32> to vector<1xf32>
    %431 = vector.shape_cast %430 : vector<1xf32> to vector<1x1x1xf32>
    %432 = vector.extract %431[0, 0, 0] : f32 from vector<1x1x1xf32>
    %cst_180 = arith.constant 1.008000e+03 : f32
    %433 = arith.divf %432, %cst_180 : f32
    %c30_i32_181 = arith.constant 30 : i32
    %434 = tpu.dynamic_rotate %368 by %c30_i32_181 dim 0 : vector<32x36xf32>, i32 -> vector<32x36xf32>
    %435 = tpu.iota {dimensions = array<i32: 0>} : vector<32x36xi32>
    %c15_i32_182 = arith.constant 15 : i32
    %436 = vector.broadcast %c15_i32_182 : i32 to vector<32x36xi32>
    %437 = arith.andi %435, %436 : vector<32x36xi32>
    %c2_i32_183 = arith.constant 2 : i32
    %438 = vector.broadcast %c2_i32_183 : i32 to vector<32x36xi32>
    %439 = arith.addi %437, %438 : vector<32x36xi32>
    %c0_i32_184 = arith.constant 0 : i32
    %440 = vector.broadcast %c0_i32_184 : i32 to vector<32x36xi32>
    %441 = arith.cmpi sge, %439, %440 : vector<32x36xi32>
    %c2_i32_185 = arith.constant 2 : i32
    %442 = vector.broadcast %c2_i32_185 : i32 to vector<32x36xi32>
    %443 = arith.addi %437, %442 : vector<32x36xi32>
    %c16_i32_186 = arith.constant 16 : i32
    %444 = vector.broadcast %c16_i32_186 : i32 to vector<32x36xi32>
    %445 = arith.cmpi slt, %443, %444 : vector<32x36xi32>
    %446 = arith.andi %441, %445 : vector<32x36xi1>
    %cst_187 = arith.constant 0.000000e+00 : f32
    %447 = vector.broadcast %cst_187 : f32 to vector<32x36xf32>
    %448 = arith.select %446, %434, %447 : vector<32x36xi1>, vector<32x36xf32>
    %449 = arith.addf %448, %368 : vector<32x36xf32>
    %c31_i32_188 = arith.constant 31 : i32
    %450 = tpu.dynamic_rotate %368 by %c31_i32_188 dim 0 : vector<32x36xf32>, i32 -> vector<32x36xf32>
    %451 = tpu.iota {dimensions = array<i32: 0>} : vector<32x36xi32>
    %c15_i32_189 = arith.constant 15 : i32
    %452 = vector.broadcast %c15_i32_189 : i32 to vector<32x36xi32>
    %453 = arith.andi %451, %452 : vector<32x36xi32>
    %c1_i32_190 = arith.constant 1 : i32
    %454 = vector.broadcast %c1_i32_190 : i32 to vector<32x36xi32>
    %455 = arith.addi %453, %454 : vector<32x36xi32>
    %c0_i32_191 = arith.constant 0 : i32
    %456 = vector.broadcast %c0_i32_191 : i32 to vector<32x36xi32>
    %457 = arith.cmpi sge, %455, %456 : vector<32x36xi32>
    %c1_i32_192 = arith.constant 1 : i32
    %458 = vector.broadcast %c1_i32_192 : i32 to vector<32x36xi32>
    %459 = arith.addi %453, %458 : vector<32x36xi32>
    %c16_i32_193 = arith.constant 16 : i32
    %460 = vector.broadcast %c16_i32_193 : i32 to vector<32x36xi32>
    %461 = arith.cmpi slt, %459, %460 : vector<32x36xi32>
    %462 = arith.andi %457, %461 : vector<32x36xi1>
    %cst_194 = arith.constant 0.000000e+00 : f32
    %463 = vector.broadcast %cst_194 : f32 to vector<32x36xf32>
    %464 = arith.select %462, %450, %463 : vector<32x36xi1>, vector<32x36xf32>
    %cst_195 = arith.constant 2.000000e+00 : f32
    %465 = vector.broadcast %cst_195 : f32 to vector<32x36xf32>
    %466 = arith.mulf %465, %464 : vector<32x36xf32>
    %467 = arith.subf %449, %466 : vector<32x36xf32>
    %cst_196 = arith.constant 0.000000e+00 : f32
    %468 = vector.broadcast %cst_196 : f32 to vector<32x36xf32>
    %469 = arith.select %421, %467, %468 : vector<32x36xi1>, vector<32x36xf32>
    %470 = arith.mulf %469, %469 : vector<32x36xf32>
    %471 = vector.shape_cast %470 : vector<32x36xf32> to vector<1x32x36xf32>
    %cst_197 = arith.constant dense<0.000000e+00> : vector<1xf32>
    %472 = vector.multi_reduction <add>, %471, %cst_197 [1, 2] : vector<1x32x36xf32> to vector<1xf32>
    %473 = vector.shape_cast %472 : vector<1xf32> to vector<1x1x1xf32>
    %474 = vector.extract %473[0, 0, 0] : f32 from vector<1x1x1xf32>
    %cst_198 = arith.constant 1.008000e+03 : f32
    %475 = arith.divf %474, %cst_198 : f32
    %c0_199 = arith.constant 0 : index
    %476 = memref.load %arg6[%c0_199] : memref<16xf32, #tpu.memory_space<smem>>
    memref.store %375, %arg6[%c0_199] : memref<16xf32, #tpu.memory_space<smem>>
    %c1 = arith.constant 1 : index
    %477 = memref.load %arg6[%c1] : memref<16xf32, #tpu.memory_space<smem>>
    memref.store %475, %arg6[%c1] : memref<16xf32, #tpu.memory_space<smem>>
    %c2 = arith.constant 2 : index
    %478 = memref.load %arg6[%c2] : memref<16xf32, #tpu.memory_space<smem>>
    memref.store %419, %arg6[%c2] : memref<16xf32, #tpu.memory_space<smem>>
    %c3 = arith.constant 3 : index
    %479 = memref.load %arg6[%c3] : memref<16xf32, #tpu.memory_space<smem>>
    memref.store %433, %arg6[%c3] : memref<16xf32, #tpu.memory_space<smem>>
    %c4 = arith.constant 4 : index
    %480 = memref.load %arg6[%c4] : memref<16xf32, #tpu.memory_space<smem>>
    memref.store %180, %arg6[%c4] : memref<16xf32, #tpu.memory_space<smem>>
    %cst_200 = arith.constant 0.000000e+00 : f32
    %c5 = arith.constant 5 : index
    %481 = memref.load %arg6[%c5] : memref<16xf32, #tpu.memory_space<smem>>
    memref.store %cst_200, %arg6[%c5] : memref<16xf32, #tpu.memory_space<smem>>
    %cst_201 = arith.constant 0.000000e+00 : f32
    %c6 = arith.constant 6 : index
    %482 = memref.load %arg6[%c6] : memref<16xf32, #tpu.memory_space<smem>>
    memref.store %cst_201, %arg6[%c6] : memref<16xf32, #tpu.memory_space<smem>>
    %cst_202 = arith.constant 0.000000e+00 : f32
    %c7 = arith.constant 7 : index
    %483 = memref.load %arg6[%c7] : memref<16xf32, #tpu.memory_space<smem>>
    memref.store %cst_202, %arg6[%c7] : memref<16xf32, #tpu.memory_space<smem>>
    %c0_203 = arith.constant 0 : index
    %c0_204 = arith.constant 0 : index
    %484 = vector.load %arg5[%c0_203, %c0_204] : memref<32x39xf32, #tpu.memory_space<vmem>>, vector<32x39xf32>
    tpu.vector_store %arg5[%c0_203, %c0_204], %367 {strides = array<i32>} : memref<32x39xf32, #tpu.memory_space<vmem>>, vector<32x39xf32>,
    %c1_i32_205 = arith.constant 1 : i32
    %485 = tpu.dynamic_rotate %0 by %c1_i32_205 dim 0 : vector<32x36xf32>, i32 -> vector<32x36xf32>
    %486 = tpu.iota {dimensions = array<i32: 0>} : vector<32x36xi32>
    %c15_i32_206 = arith.constant 15 : i32
    %487 = vector.broadcast %c15_i32_206 : i32 to vector<32x36xi32>
    %488 = arith.andi %486, %487 : vector<32x36xi32>
    %c-1_i32_207 = arith.constant -1 : i32
    %489 = vector.broadcast %c-1_i32_207 : i32 to vector<32x36xi32>
    %490 = arith.addi %488, %489 : vector<32x36xi32>
    %c0_i32_208 = arith.constant 0 : i32
    %491 = vector.broadcast %c0_i32_208 : i32 to vector<32x36xi32>
    %492 = arith.cmpi sge, %490, %491 : vector<32x36xi32>
    %c-1_i32_209 = arith.constant -1 : i32
    %493 = vector.broadcast %c-1_i32_209 : i32 to vector<32x36xi32>
    %494 = arith.addi %488, %493 : vector<32x36xi32>
    %c16_i32_210 = arith.constant 16 : i32
    %495 = vector.broadcast %c16_i32_210 : i32 to vector<32x36xi32>
    %496 = arith.cmpi slt, %494, %495 : vector<32x36xi32>
    %497 = arith.andi %492, %496 : vector<32x36xi1>
    %cst_211 = arith.constant 0.000000e+00 : f32
    %498 = vector.broadcast %cst_211 : f32 to vector<32x36xf32>
    %499 = arith.select %497, %485, %498 : vector<32x36xi1>, vector<32x36xf32>
    %c31_i32_212 = arith.constant 31 : i32
    %500 = tpu.dynamic_rotate %0 by %c31_i32_212 dim 0 : vector<32x36xf32>, i32 -> vector<32x36xf32>
    %501 = tpu.iota {dimensions = array<i32: 0>} : vector<32x36xi32>
    %c15_i32_213 = arith.constant 15 : i32
    %502 = vector.broadcast %c15_i32_213 : i32 to vector<32x36xi32>
    %503 = arith.andi %501, %502 : vector<32x36xi32>
    %c1_i32_214 = arith.constant 1 : i32
    %504 = vector.broadcast %c1_i32_214 : i32 to vector<32x36xi32>
    %505 = arith.addi %503, %504 : vector<32x36xi32>
    %c0_i32_215 = arith.constant 0 : i32
    %506 = vector.broadcast %c0_i32_215 : i32 to vector<32x36xi32>
    %507 = arith.cmpi sge, %505, %506 : vector<32x36xi32>
    %c1_i32_216 = arith.constant 1 : i32
    %508 = vector.broadcast %c1_i32_216 : i32 to vector<32x36xi32>
    %509 = arith.addi %503, %508 : vector<32x36xi32>
    %c16_i32_217 = arith.constant 16 : i32
    %510 = vector.broadcast %c16_i32_217 : i32 to vector<32x36xi32>
    %511 = arith.cmpi slt, %509, %510 : vector<32x36xi32>
    %512 = arith.andi %507, %511 : vector<32x36xi1>
    %cst_218 = arith.constant 0.000000e+00 : f32
    %513 = vector.broadcast %cst_218 : f32 to vector<32x36xf32>
    %514 = arith.select %512, %500, %513 : vector<32x36xi1>, vector<32x36xf32>
    %c30_i32_219 = arith.constant 30 : i32
    %515 = tpu.dynamic_rotate %0 by %c30_i32_219 dim 0 : vector<32x36xf32>, i32 -> vector<32x36xf32>
    %516 = tpu.iota {dimensions = array<i32: 0>} : vector<32x36xi32>
    %c15_i32_220 = arith.constant 15 : i32
    %517 = vector.broadcast %c15_i32_220 : i32 to vector<32x36xi32>
    %518 = arith.andi %516, %517 : vector<32x36xi32>
    %c2_i32_221 = arith.constant 2 : i32
    %519 = vector.broadcast %c2_i32_221 : i32 to vector<32x36xi32>
    %520 = arith.addi %518, %519 : vector<32x36xi32>
    %c0_i32_222 = arith.constant 0 : i32
    %521 = vector.broadcast %c0_i32_222 : i32 to vector<32x36xi32>
    %522 = arith.cmpi sge, %520, %521 : vector<32x36xi32>
    %c2_i32_223 = arith.constant 2 : i32
    %523 = vector.broadcast %c2_i32_223 : i32 to vector<32x36xi32>
    %524 = arith.addi %518, %523 : vector<32x36xi32>
    %c16_i32_224 = arith.constant 16 : i32
    %525 = vector.broadcast %c16_i32_224 : i32 to vector<32x36xi32>
    %526 = arith.cmpi slt, %524, %525 : vector<32x36xi32>
    %527 = arith.andi %522, %526 : vector<32x36xi1>
    %cst_225 = arith.constant 0.000000e+00 : f32
    %528 = vector.broadcast %cst_225 : f32 to vector<32x36xf32>
    %529 = arith.select %527, %515, %528 : vector<32x36xi1>, vector<32x36xf32>
    %530 = tpu.concatenate %499, %0, %514, %529 in 1 : vector<32x36xf32>, vector<32x36xf32>, vector<32x36xf32>, vector<32x36xf32> -> vector<32x144xf32>
    %cst_226 = arith.constant dense<0.000000e+00> : vector<16x144xf32>
    %531 = tpu.matmul %64, %530, %cst_226 {dimension_numbers = #tpu.dot_dimension_numbers<[1], [0], [0], [1], [0, 0, 1, 1], [], []>} : vector<16x32xf32>, vector<32x144xf32>, vector<16x144xf32> -> vector<16x144xf32>
    %c1168 = arith.constant 1168 : index
    %c0_227 = arith.constant 0 : index
    %532 = vector.load %arg2[%c1168, %c0_227] : memref<3392x128xf32, #tpu.memory_space<vmem>>, vector<144x32xf32>
    %c80 = arith.constant 80 : index
    %c0_228 = arith.constant 0 : index
    %533 = vector.load %arg3[%c80, %c0_228] : memref<224x128xf32, #tpu.memory_space<vmem>>, vector<1x32xf32>
    %cst_229 = arith.constant dense<0.000000e+00> : vector<16x32xf32>
    %534 = tpu.matmul %531, %532, %cst_229 {dimension_numbers = #tpu.dot_dimension_numbers<[1], [0], [0], [1], [0, 0, 1, 1], [], []>} : vector<16x144xf32>, vector<144x32xf32>, vector<16x32xf32> -> vector<16x32xf32>
    %535 = vector.broadcast %533 : vector<1x32xf32> to vector<16x32xf32>
    %536 = arith.addf %534, %535 : vector<16x32xf32>
    %cst_230 = arith.constant 0.000000e+00 : f32
    %537 = vector.broadcast %cst_230 : f32 to vector<16x32xf32>
    %538 = arith.maximumf %536, %537 : vector<16x32xf32>
    %c1_i32_231 = arith.constant 1 : i32
    %539 = tpu.dynamic_rotate %538 by %c1_i32_231 dim 0 : vector<16x32xf32>, i32 -> vector<16x32xf32>
    %540 = tpu.iota {dimensions = array<i32: 0>} : vector<16x32xi32>
    %c7_i32_232 = arith.constant 7 : i32
    %541 = vector.broadcast %c7_i32_232 : i32 to vector<16x32xi32>
    %542 = arith.andi %540, %541 : vector<16x32xi32>
    %c-1_i32_233 = arith.constant -1 : i32
    %543 = vector.broadcast %c-1_i32_233 : i32 to vector<16x32xi32>
    %544 = arith.addi %542, %543 : vector<16x32xi32>
    %c0_i32_234 = arith.constant 0 : i32
    %545 = vector.broadcast %c0_i32_234 : i32 to vector<16x32xi32>
    %546 = arith.cmpi sge, %544, %545 : vector<16x32xi32>
    %c-1_i32_235 = arith.constant -1 : i32
    %547 = vector.broadcast %c-1_i32_235 : i32 to vector<16x32xi32>
    %548 = arith.addi %542, %547 : vector<16x32xi32>
    %c8_i32_236 = arith.constant 8 : i32
    %549 = vector.broadcast %c8_i32_236 : i32 to vector<16x32xi32>
    %550 = arith.cmpi slt, %548, %549 : vector<16x32xi32>
    %551 = arith.andi %546, %550 : vector<16x32xi1>
    %cst_237 = arith.constant 0.000000e+00 : f32
    %552 = vector.broadcast %cst_237 : f32 to vector<16x32xf32>
    %553 = arith.select %551, %539, %552 : vector<16x32xi1>, vector<16x32xf32>
    %c15_i32_238 = arith.constant 15 : i32
    %554 = tpu.dynamic_rotate %538 by %c15_i32_238 dim 0 : vector<16x32xf32>, i32 -> vector<16x32xf32>
    %555 = tpu.iota {dimensions = array<i32: 0>} : vector<16x32xi32>
    %c7_i32_239 = arith.constant 7 : i32
    %556 = vector.broadcast %c7_i32_239 : i32 to vector<16x32xi32>
    %557 = arith.andi %555, %556 : vector<16x32xi32>
    %c1_i32_240 = arith.constant 1 : i32
    %558 = vector.broadcast %c1_i32_240 : i32 to vector<16x32xi32>
    %559 = arith.addi %557, %558 : vector<16x32xi32>
    %c0_i32_241 = arith.constant 0 : i32
    %560 = vector.broadcast %c0_i32_241 : i32 to vector<16x32xi32>
    %561 = arith.cmpi sge, %559, %560 : vector<16x32xi32>
    %c1_i32_242 = arith.constant 1 : i32
    %562 = vector.broadcast %c1_i32_242 : i32 to vector<16x32xi32>
    %563 = arith.addi %557, %562 : vector<16x32xi32>
    %c8_i32_243 = arith.constant 8 : i32
    %564 = vector.broadcast %c8_i32_243 : i32 to vector<16x32xi32>
    %565 = arith.cmpi slt, %563, %564 : vector<16x32xi32>
    %566 = arith.andi %561, %565 : vector<16x32xi1>
    %cst_244 = arith.constant 0.000000e+00 : f32
    %567 = vector.broadcast %cst_244 : f32 to vector<16x32xf32>
    %568 = arith.select %566, %554, %567 : vector<16x32xi1>, vector<16x32xf32>
    %569 = tpu.concatenate %553, %538, %568 in 1 : vector<16x32xf32>, vector<16x32xf32>, vector<16x32xf32> -> vector<16x96xf32>
    %c1312 = arith.constant 1312 : index
    %c0_245 = arith.constant 0 : index
    %570 = vector.load %arg2[%c1312, %c0_245] : memref<3392x128xf32, #tpu.memory_space<vmem>>, vector<96x32xf32>
    %c88 = arith.constant 88 : index
    %c0_246 = arith.constant 0 : index
    %571 = vector.load %arg3[%c88, %c0_246] : memref<224x128xf32, #tpu.memory_space<vmem>>, vector<1x32xf32>
    %cst_247 = arith.constant dense<0.000000e+00> : vector<16x32xf32>
    %572 = tpu.matmul %569, %570, %cst_247 {dimension_numbers = #tpu.dot_dimension_numbers<[1], [0], [0], [1], [0, 0, 1, 1], [], []>} : vector<16x96xf32>, vector<96x32xf32>, vector<16x32xf32> -> vector<16x32xf32>
    %573 = vector.broadcast %571 : vector<1x32xf32> to vector<16x32xf32>
    %574 = arith.addf %572, %573 : vector<16x32xf32>
    %cst_248 = arith.constant 0.000000e+00 : f32
    %575 = vector.broadcast %cst_248 : f32 to vector<16x32xf32>
    %576 = arith.maximumf %574, %575 : vector<16x32xf32>
    %c1408 = arith.constant 1408 : index
    %c0_249 = arith.constant 0 : index
    %577 = vector.load %arg2[%c1408, %c0_249] : memref<3392x128xf32, #tpu.memory_space<vmem>>, vector<32x32xf32>
    %c96 = arith.constant 96 : index
    %c0_250 = arith.constant 0 : index
    %578 = vector.load %arg3[%c96, %c0_250] : memref<224x128xf32, #tpu.memory_space<vmem>>, vector<1x32xf32>
    %cst_251 = arith.constant dense<0.000000e+00> : vector<16x32xf32>
    %579 = tpu.matmul %576, %577, %cst_251 {dimension_numbers = #tpu.dot_dimension_numbers<[1], [0], [0], [1], [0, 0, 1, 1], [], []>} : vector<16x32xf32>, vector<32x32xf32>, vector<16x32xf32> -> vector<16x32xf32>
    %580 = vector.broadcast %578 : vector<1x32xf32> to vector<16x32xf32>
    %581 = arith.addf %579, %580 : vector<16x32xf32>
    %582 = arith.addf %536, %581 : vector<16x32xf32>
    %c1_i32_252 = arith.constant 1 : i32
    %583 = tpu.dynamic_rotate %582 by %c1_i32_252 dim 0 : vector<16x32xf32>, i32 -> vector<16x32xf32>
    %584 = tpu.iota {dimensions = array<i32: 0>} : vector<16x32xi32>
    %c7_i32_253 = arith.constant 7 : i32
    %585 = vector.broadcast %c7_i32_253 : i32 to vector<16x32xi32>
    %586 = arith.andi %584, %585 : vector<16x32xi32>
    %c-1_i32_254 = arith.constant -1 : i32
    %587 = vector.broadcast %c-1_i32_254 : i32 to vector<16x32xi32>
    %588 = arith.addi %586, %587 : vector<16x32xi32>
    %c0_i32_255 = arith.constant 0 : i32
    %589 = vector.broadcast %c0_i32_255 : i32 to vector<16x32xi32>
    %590 = arith.cmpi sge, %588, %589 : vector<16x32xi32>
    %c-1_i32_256 = arith.constant -1 : i32
    %591 = vector.broadcast %c-1_i32_256 : i32 to vector<16x32xi32>
    %592 = arith.addi %586, %591 : vector<16x32xi32>
    %c8_i32_257 = arith.constant 8 : i32
    %593 = vector.broadcast %c8_i32_257 : i32 to vector<16x32xi32>
    %594 = arith.cmpi slt, %592, %593 : vector<16x32xi32>
    %595 = arith.andi %590, %594 : vector<16x32xi1>
    %cst_258 = arith.constant 0.000000e+00 : f32
    %596 = vector.broadcast %cst_258 : f32 to vector<16x32xf32>
    %597 = arith.select %595, %583, %596 : vector<16x32xi1>, vector<16x32xf32>
    %c15_i32_259 = arith.constant 15 : i32
    %598 = tpu.dynamic_rotate %582 by %c15_i32_259 dim 0 : vector<16x32xf32>, i32 -> vector<16x32xf32>
    %599 = tpu.iota {dimensions = array<i32: 0>} : vector<16x32xi32>
    %c7_i32_260 = arith.constant 7 : i32
    %600 = vector.broadcast %c7_i32_260 : i32 to vector<16x32xi32>
    %601 = arith.andi %599, %600 : vector<16x32xi32>
    %c1_i32_261 = arith.constant 1 : i32
    %602 = vector.broadcast %c1_i32_261 : i32 to vector<16x32xi32>
    %603 = arith.addi %601, %602 : vector<16x32xi32>
    %c0_i32_262 = arith.constant 0 : i32
    %604 = vector.broadcast %c0_i32_262 : i32 to vector<16x32xi32>
    %605 = arith.cmpi sge, %603, %604 : vector<16x32xi32>
    %c1_i32_263 = arith.constant 1 : i32
    %606 = vector.broadcast %c1_i32_263 : i32 to vector<16x32xi32>
    %607 = arith.addi %601, %606 : vector<16x32xi32>
    %c8_i32_264 = arith.constant 8 : i32
    %608 = vector.broadcast %c8_i32_264 : i32 to vector<16x32xi32>
    %609 = arith.cmpi slt, %607, %608 : vector<16x32xi32>
    %610 = arith.andi %605, %609 : vector<16x32xi1>
    %cst_265 = arith.constant 0.000000e+00 : f32
    %611 = vector.broadcast %cst_265 : f32 to vector<16x32xf32>
    %612 = arith.select %610, %598, %611 : vector<16x32xi1>, vector<16x32xf32>
    %613 = tpu.concatenate %597, %582, %612 in 1 : vector<16x32xf32>, vector<16x32xf32>, vector<16x32xf32> -> vector<16x96xf32>
    %c1440 = arith.constant 1440 : index
    %c0_266 = arith.constant 0 : index
    %614 = vector.load %arg2[%c1440, %c0_266] : memref<3392x128xf32, #tpu.memory_space<vmem>>, vector<96x32xf32>
    %c104 = arith.constant 104 : index
    %c0_267 = arith.constant 0 : index
    %615 = vector.load %arg3[%c104, %c0_267] : memref<224x128xf32, #tpu.memory_space<vmem>>, vector<1x32xf32>
    %cst_268 = arith.constant dense<0.000000e+00> : vector<16x32xf32>
    %616 = tpu.matmul %613, %614, %cst_268 {dimension_numbers = #tpu.dot_dimension_numbers<[1], [0], [0], [1], [0, 0, 1, 1], [], []>} : vector<16x96xf32>, vector<96x32xf32>, vector<16x32xf32> -> vector<16x32xf32>
    %617 = vector.broadcast %615 : vector<1x32xf32> to vector<16x32xf32>
    %618 = arith.addf %616, %617 : vector<16x32xf32>
    %c1_i32_269 = arith.constant 1 : i32
    %619 = tpu.dynamic_rotate %618 by %c1_i32_269 dim 0 : vector<16x32xf32>, i32 -> vector<16x32xf32>
    %620 = tpu.iota {dimensions = array<i32: 0>} : vector<16x32xi32>
    %c7_i32_270 = arith.constant 7 : i32
    %621 = vector.broadcast %c7_i32_270 : i32 to vector<16x32xi32>
    %622 = arith.andi %620, %621 : vector<16x32xi32>
    %c-1_i32_271 = arith.constant -1 : i32
    %623 = vector.broadcast %c-1_i32_271 : i32 to vector<16x32xi32>
    %624 = arith.addi %622, %623 : vector<16x32xi32>
    %c0_i32_272 = arith.constant 0 : i32
    %625 = vector.broadcast %c0_i32_272 : i32 to vector<16x32xi32>
    %626 = arith.cmpi sge, %624, %625 : vector<16x32xi32>
    %c-1_i32_273 = arith.constant -1 : i32
    %627 = vector.broadcast %c-1_i32_273 : i32 to vector<16x32xi32>
    %628 = arith.addi %622, %627 : vector<16x32xi32>
    %c8_i32_274 = arith.constant 8 : i32
    %629 = vector.broadcast %c8_i32_274 : i32 to vector<16x32xi32>
    %630 = arith.cmpi slt, %628, %629 : vector<16x32xi32>
    %631 = arith.andi %626, %630 : vector<16x32xi1>
    %cst_275 = arith.constant 0.000000e+00 : f32
    %632 = vector.broadcast %cst_275 : f32 to vector<16x32xf32>
    %633 = arith.select %631, %619, %632 : vector<16x32xi1>, vector<16x32xf32>
    %c15_i32_276 = arith.constant 15 : i32
    %634 = tpu.dynamic_rotate %618 by %c15_i32_276 dim 0 : vector<16x32xf32>, i32 -> vector<16x32xf32>
    %635 = tpu.iota {dimensions = array<i32: 0>} : vector<16x32xi32>
    %c7_i32_277 = arith.constant 7 : i32
    %636 = vector.broadcast %c7_i32_277 : i32 to vector<16x32xi32>
    %637 = arith.andi %635, %636 : vector<16x32xi32>
    %c1_i32_278 = arith.constant 1 : i32
    %638 = vector.broadcast %c1_i32_278 : i32 to vector<16x32xi32>
    %639 = arith.addi %637, %638 : vector<16x32xi32>
    %c0_i32_279 = arith.constant 0 : i32
    %640 = vector.broadcast %c0_i32_279 : i32 to vector<16x32xi32>
    %641 = arith.cmpi sge, %639, %640 : vector<16x32xi32>
    %c1_i32_280 = arith.constant 1 : i32
    %642 = vector.broadcast %c1_i32_280 : i32 to vector<16x32xi32>
    %643 = arith.addi %637, %642 : vector<16x32xi32>
    %c8_i32_281 = arith.constant 8 : i32
    %644 = vector.broadcast %c8_i32_281 : i32 to vector<16x32xi32>
    %645 = arith.cmpi slt, %643, %644 : vector<16x32xi32>
    %646 = arith.andi %641, %645 : vector<16x32xi1>
    %cst_282 = arith.constant 0.000000e+00 : f32
    %647 = vector.broadcast %cst_282 : f32 to vector<16x32xf32>
    %648 = arith.select %646, %634, %647 : vector<16x32xi1>, vector<16x32xf32>
    %c14_i32_283 = arith.constant 14 : i32
    %649 = tpu.dynamic_rotate %618 by %c14_i32_283 dim 0 : vector<16x32xf32>, i32 -> vector<16x32xf32>
    %650 = tpu.iota {dimensions = array<i32: 0>} : vector<16x32xi32>
    %c7_i32_284 = arith.constant 7 : i32
    %651 = vector.broadcast %c7_i32_284 : i32 to vector<16x32xi32>
    %652 = arith.andi %650, %651 : vector<16x32xi32>
    %c2_i32_285 = arith.constant 2 : i32
    %653 = vector.broadcast %c2_i32_285 : i32 to vector<16x32xi32>
    %654 = arith.addi %652, %653 : vector<16x32xi32>
    %c0_i32_286 = arith.constant 0 : i32
    %655 = vector.broadcast %c0_i32_286 : i32 to vector<16x32xi32>
    %656 = arith.cmpi sge, %654, %655 : vector<16x32xi32>
    %c2_i32_287 = arith.constant 2 : i32
    %657 = vector.broadcast %c2_i32_287 : i32 to vector<16x32xi32>
    %658 = arith.addi %652, %657 : vector<16x32xi32>
    %c8_i32_288 = arith.constant 8 : i32
    %659 = vector.broadcast %c8_i32_288 : i32 to vector<16x32xi32>
    %660 = arith.cmpi slt, %658, %659 : vector<16x32xi32>
    %661 = arith.andi %656, %660 : vector<16x32xi1>
    %cst_289 = arith.constant 0.000000e+00 : f32
    %662 = vector.broadcast %cst_289 : f32 to vector<16x32xf32>
    %663 = arith.select %661, %649, %662 : vector<16x32xi1>, vector<16x32xf32>
    %664 = tpu.concatenate %633, %618, %648, %663 in 1 : vector<16x32xf32>, vector<16x32xf32>, vector<16x32xf32>, vector<16x32xf32> -> vector<16x128xf32>
    %665 = tpu.iota {dimensions = array<i32: 0>} : vector<8x16xi32>
    %666 = tpu.iota {dimensions = array<i32: 1>} : vector<8x16xi32>
    %c2_i32_290 = arith.constant 2 : i32
    %667 = vector.broadcast %c2_i32_290 : i32 to vector<8x16xi32>
    %668 = arith.shrsi %665, %667 : vector<8x16xi32>
    %c3_i32_291 = arith.constant 3 : i32
    %669 = vector.broadcast %c3_i32_291 : i32 to vector<8x16xi32>
    %670 = arith.shrsi %666, %669 : vector<8x16xi32>
    %671 = arith.cmpi eq, %668, %670 : vector<8x16xi32>
    %c7_i32_292 = arith.constant 7 : i32
    %672 = vector.broadcast %c7_i32_292 : i32 to vector<8x16xi32>
    %673 = arith.andi %666, %672 : vector<8x16xi32>
    %c3_i32_293 = arith.constant 3 : i32
    %674 = vector.broadcast %c3_i32_293 : i32 to vector<8x16xi32>
    %675 = arith.andi %665, %674 : vector<8x16xi32>
    %c2_i32_294 = arith.constant 2 : i32
    %676 = vector.broadcast %c2_i32_294 : i32 to vector<8x16xi32>
    %677 = arith.muli %675, %676 : vector<8x16xi32>
    %678 = arith.cmpi eq, %673, %677 : vector<8x16xi32>
    %679 = arith.andi %671, %678 : vector<8x16xi1>
    %680 = arith.extui %679 : vector<8x16xi1> to vector<8x16xi32>
    %681 = arith.sitofp %680 : vector<8x16xi32> to vector<8x16xf32>
    %cst_295 = arith.constant dense<0.000000e+00> : vector<8x128xf32>
    %682 = tpu.matmul %681, %664, %cst_295 {dimension_numbers = #tpu.dot_dimension_numbers<[1], [0], [0], [1], [0, 0, 1, 1], [], []>} : vector<8x16xf32>, vector<16x128xf32>, vector<8x128xf32> -> vector<8x128xf32>
    %c1536 = arith.constant 1536 : index
    %c0_296 = arith.constant 0 : index
    %683 = vector.load %arg2[%c1536, %c0_296] : memref<3392x128xf32, #tpu.memory_space<vmem>>, vector<128x32xf32>
    %c112 = arith.constant 112 : index
    %c0_297 = arith.constant 0 : index
    %684 = vector.load %arg3[%c112, %c0_297] : memref<224x128xf32, #tpu.memory_space<vmem>>, vector<1x32xf32>
    %cst_298 = arith.constant dense<0.000000e+00> : vector<8x32xf32>
    %685 = tpu.matmul %682, %683, %cst_298 {dimension_numbers = #tpu.dot_dimension_numbers<[1], [0], [0], [1], [0, 0, 1, 1], [], []>} : vector<8x128xf32>, vector<128x32xf32>, vector<8x32xf32> -> vector<8x32xf32>
    %686 = vector.broadcast %684 : vector<1x32xf32> to vector<8x32xf32>
    %687 = arith.addf %685, %686 : vector<8x32xf32>
    %cst_299 = arith.constant 0.000000e+00 : f32
    %688 = vector.broadcast %cst_299 : f32 to vector<8x32xf32>
    %689 = arith.maximumf %687, %688 : vector<8x32xf32>
    %c1_i32_300 = arith.constant 1 : i32
    %690 = tpu.dynamic_rotate %689 by %c1_i32_300 dim 0 : vector<8x32xf32>, i32 -> vector<8x32xf32>
    %691 = tpu.iota {dimensions = array<i32: 0>} : vector<8x32xi32>
    %c3_i32_301 = arith.constant 3 : i32
    %692 = vector.broadcast %c3_i32_301 : i32 to vector<8x32xi32>
    %693 = arith.andi %691, %692 : vector<8x32xi32>
    %c-1_i32_302 = arith.constant -1 : i32
    %694 = vector.broadcast %c-1_i32_302 : i32 to vector<8x32xi32>
    %695 = arith.addi %693, %694 : vector<8x32xi32>
    %c0_i32_303 = arith.constant 0 : i32
    %696 = vector.broadcast %c0_i32_303 : i32 to vector<8x32xi32>
    %697 = arith.cmpi sge, %695, %696 : vector<8x32xi32>
    %c-1_i32_304 = arith.constant -1 : i32
    %698 = vector.broadcast %c-1_i32_304 : i32 to vector<8x32xi32>
    %699 = arith.addi %693, %698 : vector<8x32xi32>
    %c4_i32_305 = arith.constant 4 : i32
    %700 = vector.broadcast %c4_i32_305 : i32 to vector<8x32xi32>
    %701 = arith.cmpi slt, %699, %700 : vector<8x32xi32>
    %702 = arith.andi %697, %701 : vector<8x32xi1>
    %cst_306 = arith.constant 0.000000e+00 : f32
    %703 = vector.broadcast %cst_306 : f32 to vector<8x32xf32>
    %704 = arith.select %702, %690, %703 : vector<8x32xi1>, vector<8x32xf32>
    %c7_i32_307 = arith.constant 7 : i32
    %705 = tpu.dynamic_rotate %689 by %c7_i32_307 dim 0 : vector<8x32xf32>, i32 -> vector<8x32xf32>
    %706 = tpu.iota {dimensions = array<i32: 0>} : vector<8x32xi32>
    %c3_i32_308 = arith.constant 3 : i32
    %707 = vector.broadcast %c3_i32_308 : i32 to vector<8x32xi32>
    %708 = arith.andi %706, %707 : vector<8x32xi32>
    %c1_i32_309 = arith.constant 1 : i32
    %709 = vector.broadcast %c1_i32_309 : i32 to vector<8x32xi32>
    %710 = arith.addi %708, %709 : vector<8x32xi32>
    %c0_i32_310 = arith.constant 0 : i32
    %711 = vector.broadcast %c0_i32_310 : i32 to vector<8x32xi32>
    %712 = arith.cmpi sge, %710, %711 : vector<8x32xi32>
    %c1_i32_311 = arith.constant 1 : i32
    %713 = vector.broadcast %c1_i32_311 : i32 to vector<8x32xi32>
    %714 = arith.addi %708, %713 : vector<8x32xi32>
    %c4_i32_312 = arith.constant 4 : i32
    %715 = vector.broadcast %c4_i32_312 : i32 to vector<8x32xi32>
    %716 = arith.cmpi slt, %714, %715 : vector<8x32xi32>
    %717 = arith.andi %712, %716 : vector<8x32xi1>
    %cst_313 = arith.constant 0.000000e+00 : f32
    %718 = vector.broadcast %cst_313 : f32 to vector<8x32xf32>
    %719 = arith.select %717, %705, %718 : vector<8x32xi1>, vector<8x32xf32>
    %720 = tpu.concatenate %704, %689, %719 in 1 : vector<8x32xf32>, vector<8x32xf32>, vector<8x32xf32> -> vector<8x96xf32>
    %c1664 = arith.constant 1664 : index
    %c0_314 = arith.constant 0 : index
    %721 = vector.load %arg2[%c1664, %c0_314] : memref<3392x128xf32, #tpu.memory_space<vmem>>, vector<96x32xf32>
    %c120 = arith.constant 120 : index
    %c0_315 = arith.constant 0 : index
    %722 = vector.load %arg3[%c120, %c0_315] : memref<224x128xf32, #tpu.memory_space<vmem>>, vector<1x32xf32>
    %cst_316 = arith.constant dense<0.000000e+00> : vector<8x32xf32>
    %723 = tpu.matmul %720, %721, %cst_316 {dimension_numbers = #tpu.dot_dimension_numbers<[1], [0], [0], [1], [0, 0, 1, 1], [], []>} : vector<8x96xf32>, vector<96x32xf32>, vector<8x32xf32> -> vector<8x32xf32>
    %724 = vector.broadcast %722 : vector<1x32xf32> to vector<8x32xf32>
    %725 = arith.addf %723, %724 : vector<8x32xf32>
    %cst_317 = arith.constant 0.000000e+00 : f32
    %726 = vector.broadcast %cst_317 : f32 to vector<8x32xf32>
    %727 = arith.maximumf %725, %726 : vector<8x32xf32>
    %c1760 = arith.constant 1760 : index
    %c0_318 = arith.constant 0 : index
    %728 = vector.load %arg2[%c1760, %c0_318] : memref<3392x128xf32, #tpu.memory_space<vmem>>, vector<32x32xf32>
    %c128 = arith.constant 128 : index
    %c0_319 = arith.constant 0 : index
    %729 = vector.load %arg3[%c128, %c0_319] : memref<224x128xf32, #tpu.memory_space<vmem>>, vector<1x32xf32>
    %cst_320 = arith.constant dense<0.000000e+00> : vector<8x32xf32>
    %730 = tpu.matmul %727, %728, %cst_320 {dimension_numbers = #tpu.dot_dimension_numbers<[1], [0], [0], [1], [0, 0, 1, 1], [], []>} : vector<8x32xf32>, vector<32x32xf32>, vector<8x32xf32> -> vector<8x32xf32>
    %731 = vector.broadcast %729 : vector<1x32xf32> to vector<8x32xf32>
    %732 = arith.addf %730, %731 : vector<8x32xf32>
    %733 = arith.addf %687, %732 : vector<8x32xf32>
    %c1_i32_321 = arith.constant 1 : i32
    %734 = tpu.dynamic_rotate %733 by %c1_i32_321 dim 0 : vector<8x32xf32>, i32 -> vector<8x32xf32>
    %735 = tpu.iota {dimensions = array<i32: 0>} : vector<8x32xi32>
    %c3_i32_322 = arith.constant 3 : i32
    %736 = vector.broadcast %c3_i32_322 : i32 to vector<8x32xi32>
    %737 = arith.andi %735, %736 : vector<8x32xi32>
    %c-1_i32_323 = arith.constant -1 : i32
    %738 = vector.broadcast %c-1_i32_323 : i32 to vector<8x32xi32>
    %739 = arith.addi %737, %738 : vector<8x32xi32>
    %c0_i32_324 = arith.constant 0 : i32
    %740 = vector.broadcast %c0_i32_324 : i32 to vector<8x32xi32>
    %741 = arith.cmpi sge, %739, %740 : vector<8x32xi32>
    %c-1_i32_325 = arith.constant -1 : i32
    %742 = vector.broadcast %c-1_i32_325 : i32 to vector<8x32xi32>
    %743 = arith.addi %737, %742 : vector<8x32xi32>
    %c4_i32_326 = arith.constant 4 : i32
    %744 = vector.broadcast %c4_i32_326 : i32 to vector<8x32xi32>
    %745 = arith.cmpi slt, %743, %744 : vector<8x32xi32>
    %746 = arith.andi %741, %745 : vector<8x32xi1>
    %cst_327 = arith.constant 0.000000e+00 : f32
    %747 = vector.broadcast %cst_327 : f32 to vector<8x32xf32>
    %748 = arith.select %746, %734, %747 : vector<8x32xi1>, vector<8x32xf32>
    %c7_i32_328 = arith.constant 7 : i32
    %749 = tpu.dynamic_rotate %733 by %c7_i32_328 dim 0 : vector<8x32xf32>, i32 -> vector<8x32xf32>
    %750 = tpu.iota {dimensions = array<i32: 0>} : vector<8x32xi32>
    %c3_i32_329 = arith.constant 3 : i32
    %751 = vector.broadcast %c3_i32_329 : i32 to vector<8x32xi32>
    %752 = arith.andi %750, %751 : vector<8x32xi32>
    %c1_i32_330 = arith.constant 1 : i32
    %753 = vector.broadcast %c1_i32_330 : i32 to vector<8x32xi32>
    %754 = arith.addi %752, %753 : vector<8x32xi32>
    %c0_i32_331 = arith.constant 0 : i32
    %755 = vector.broadcast %c0_i32_331 : i32 to vector<8x32xi32>
    %756 = arith.cmpi sge, %754, %755 : vector<8x32xi32>
    %c1_i32_332 = arith.constant 1 : i32
    %757 = vector.broadcast %c1_i32_332 : i32 to vector<8x32xi32>
    %758 = arith.addi %752, %757 : vector<8x32xi32>
    %c4_i32_333 = arith.constant 4 : i32
    %759 = vector.broadcast %c4_i32_333 : i32 to vector<8x32xi32>
    %760 = arith.cmpi slt, %758, %759 : vector<8x32xi32>
    %761 = arith.andi %756, %760 : vector<8x32xi1>
    %cst_334 = arith.constant 0.000000e+00 : f32
    %762 = vector.broadcast %cst_334 : f32 to vector<8x32xf32>
    %763 = arith.select %761, %749, %762 : vector<8x32xi1>, vector<8x32xf32>
    %764 = tpu.concatenate %748, %733, %763 in 1 : vector<8x32xf32>, vector<8x32xf32>, vector<8x32xf32> -> vector<8x96xf32>
    %c1792 = arith.constant 1792 : index
    %c0_335 = arith.constant 0 : index
    %765 = vector.load %arg2[%c1792, %c0_335] : memref<3392x128xf32, #tpu.memory_space<vmem>>, vector<96x32xf32>
    %c136 = arith.constant 136 : index
    %c0_336 = arith.constant 0 : index
    %766 = vector.load %arg3[%c136, %c0_336] : memref<224x128xf32, #tpu.memory_space<vmem>>, vector<1x32xf32>
    %cst_337 = arith.constant dense<0.000000e+00> : vector<8x32xf32>
    %767 = tpu.matmul %764, %765, %cst_337 {dimension_numbers = #tpu.dot_dimension_numbers<[1], [0], [0], [1], [0, 0, 1, 1], [], []>} : vector<8x96xf32>, vector<96x32xf32>, vector<8x32xf32> -> vector<8x32xf32>
    %768 = vector.broadcast %766 : vector<1x32xf32> to vector<8x32xf32>
    %769 = arith.addf %767, %768 : vector<8x32xf32>
    %c64_338 = arith.constant 64 : index
    %c0_339 = arith.constant 0 : index
    %770 = vector.load %arg4[%c64_338, %c0_339] : memref<128x32xf32, #tpu.memory_space<vmem>>, vector<64x32xf32>
    %cst_340 = arith.constant dense<0.000000e+00> : vector<8x64xf32>
    %771 = tpu.matmul %769, %770, %cst_340 {dimension_numbers = #tpu.dot_dimension_numbers<[1], [1], [0], [0], [0, 0, 1, 0], [], []>} : vector<8x32xf32>, vector<64x32xf32>, vector<8x64xf32> -> vector<8x64xf32>
    %c216 = arith.constant 216 : index
    %c0_341 = arith.constant 0 : index
    %772 = vector.load %arg3[%c216, %c0_341] : memref<224x128xf32, #tpu.memory_space<vmem>>, vector<1x64xf32>
    %cst_342 = arith.constant 2.000000e+00 : f32
    %773 = vector.broadcast %cst_342 : f32 to vector<8x64xf32>
    %774 = arith.mulf %773, %771 : vector<8x64xf32>
    %775 = vector.broadcast %772 : vector<1x64xf32> to vector<8x64xf32>
    %776 = arith.subf %775, %774 : vector<8x64xf32>
    %777 = tpu.iota {dimensions = array<i32: 1>} : vector<8x64xi32>
    %cst_343 = arith.constant dense<0x7F800000> : vector<8xf32>
    %778 = vector.multi_reduction <minimumf>, %776, %cst_343 [1] : vector<8x64xf32> to vector<8xf32>
    %779 = vector.shape_cast %778 : vector<8xf32> to vector<8x1xf32>
    %780 = vector.broadcast %779 : vector<8x1xf32> to vector<8x64xf32>
    %781 = arith.cmpf ole, %776, %780 : vector<8x64xf32>
    %c64_i32_344 = arith.constant 64 : i32
    %782 = vector.broadcast %c64_i32_344 : i32 to vector<8x64xi32>
    %783 = arith.select %781, %777, %782 : vector<8x64xi1>, vector<8x64xi32>
    %cst_345 = arith.constant dense<2147483647> : vector<8xi32>
    %784 = vector.multi_reduction <minsi>, %783, %cst_345 [1] : vector<8x64xi32> to vector<8xi32>
    %785 = vector.shape_cast %784 : vector<8xi32> to vector<8x1xi32>
    %786 = vector.broadcast %785 : vector<8x1xi32> to vector<8x64xi32>
    %787 = arith.cmpi eq, %777, %786 : vector<8x64xi32>
    %788 = arith.extui %787 : vector<8x64xi1> to vector<8x64xi32>
    %789 = arith.sitofp %788 : vector<8x64xi32> to vector<8x64xf32>
    %cst_346 = arith.constant dense<0.000000e+00> : vector<8x32xf32>
    %790 = tpu.matmul %789, %770, %cst_346 {dimension_numbers = #tpu.dot_dimension_numbers<[1], [0], [0], [1], [0, 0, 1, 1], [], []>} : vector<8x64xf32>, vector<64x32xf32>, vector<8x32xf32> -> vector<8x32xf32>
    %791 = arith.subf %790, %769 : vector<8x32xf32>
    %792 = arith.mulf %791, %791 : vector<8x32xf32>
    %793 = vector.shape_cast %792 : vector<8x32xf32> to vector<1x8x32xf32>
    %cst_347 = arith.constant dense<0.000000e+00> : vector<1xf32>
    %794 = vector.multi_reduction <add>, %793, %cst_347 [1, 2] : vector<1x8x32xf32> to vector<1xf32>
    %795 = vector.shape_cast %794 : vector<1xf32> to vector<1x1x1xf32>
    %796 = vector.extract %795[0, 0, 0] : f32 from vector<1x1x1xf32>
    %cst_348 = arith.constant 8.000000e+00 : f32
    %797 = arith.divf %796, %cst_348 : f32
    %c1_i32_349 = arith.constant 1 : i32
    %798 = tpu.dynamic_rotate %790 by %c1_i32_349 dim 0 : vector<8x32xf32>, i32 -> vector<8x32xf32>
    %799 = tpu.iota {dimensions = array<i32: 0>} : vector<8x32xi32>
    %c3_i32_350 = arith.constant 3 : i32
    %800 = vector.broadcast %c3_i32_350 : i32 to vector<8x32xi32>
    %801 = arith.andi %799, %800 : vector<8x32xi32>
    %c-1_i32_351 = arith.constant -1 : i32
    %802 = vector.broadcast %c-1_i32_351 : i32 to vector<8x32xi32>
    %803 = arith.addi %801, %802 : vector<8x32xi32>
    %c0_i32_352 = arith.constant 0 : i32
    %804 = vector.broadcast %c0_i32_352 : i32 to vector<8x32xi32>
    %805 = arith.cmpi sge, %803, %804 : vector<8x32xi32>
    %c-1_i32_353 = arith.constant -1 : i32
    %806 = vector.broadcast %c-1_i32_353 : i32 to vector<8x32xi32>
    %807 = arith.addi %801, %806 : vector<8x32xi32>
    %c4_i32_354 = arith.constant 4 : i32
    %808 = vector.broadcast %c4_i32_354 : i32 to vector<8x32xi32>
    %809 = arith.cmpi slt, %807, %808 : vector<8x32xi32>
    %810 = arith.andi %805, %809 : vector<8x32xi1>
    %cst_355 = arith.constant 0.000000e+00 : f32
    %811 = vector.broadcast %cst_355 : f32 to vector<8x32xf32>
    %812 = arith.select %810, %798, %811 : vector<8x32xi1>, vector<8x32xf32>
    %c7_i32_356 = arith.constant 7 : i32
    %813 = tpu.dynamic_rotate %790 by %c7_i32_356 dim 0 : vector<8x32xf32>, i32 -> vector<8x32xf32>
    %814 = tpu.iota {dimensions = array<i32: 0>} : vector<8x32xi32>
    %c3_i32_357 = arith.constant 3 : i32
    %815 = vector.broadcast %c3_i32_357 : i32 to vector<8x32xi32>
    %816 = arith.andi %814, %815 : vector<8x32xi32>
    %c1_i32_358 = arith.constant 1 : i32
    %817 = vector.broadcast %c1_i32_358 : i32 to vector<8x32xi32>
    %818 = arith.addi %816, %817 : vector<8x32xi32>
    %c0_i32_359 = arith.constant 0 : i32
    %819 = vector.broadcast %c0_i32_359 : i32 to vector<8x32xi32>
    %820 = arith.cmpi sge, %818, %819 : vector<8x32xi32>
    %c1_i32_360 = arith.constant 1 : i32
    %821 = vector.broadcast %c1_i32_360 : i32 to vector<8x32xi32>
    %822 = arith.addi %816, %821 : vector<8x32xi32>
    %c4_i32_361 = arith.constant 4 : i32
    %823 = vector.broadcast %c4_i32_361 : i32 to vector<8x32xi32>
    %824 = arith.cmpi slt, %822, %823 : vector<8x32xi32>
    %825 = arith.andi %820, %824 : vector<8x32xi1>
    %cst_362 = arith.constant 0.000000e+00 : f32
    %826 = vector.broadcast %cst_362 : f32 to vector<8x32xf32>
    %827 = arith.select %825, %813, %826 : vector<8x32xi1>, vector<8x32xf32>
    %828 = tpu.concatenate %812, %790, %827 in 1 : vector<8x32xf32>, vector<8x32xf32>, vector<8x32xf32> -> vector<8x96xf32>
    %c1888 = arith.constant 1888 : index
    %c0_363 = arith.constant 0 : index
    %829 = vector.load %arg2[%c1888, %c0_363] : memref<3392x128xf32, #tpu.memory_space<vmem>>, vector<96x64xf32>
    %c144_364 = arith.constant 144 : index
    %c0_365 = arith.constant 0 : index
    %830 = vector.load %arg3[%c144_364, %c0_365] : memref<224x128xf32, #tpu.memory_space<vmem>>, vector<1x64xf32>
    %cst_366 = arith.constant dense<0.000000e+00> : vector<8x64xf32>
    %831 = tpu.matmul %828, %829, %cst_366 {dimension_numbers = #tpu.dot_dimension_numbers<[1], [0], [0], [1], [0, 0, 1, 1], [], []>} : vector<8x96xf32>, vector<96x64xf32>, vector<8x64xf32> -> vector<8x64xf32>
    %832 = vector.broadcast %830 : vector<1x64xf32> to vector<8x64xf32>
    %833 = arith.addf %831, %832 : vector<8x64xf32>
    %cst_367 = arith.constant 0.000000e+00 : f32
    %834 = vector.broadcast %cst_367 : f32 to vector<8x64xf32>
    %835 = arith.maximumf %833, %834 : vector<8x64xf32>
    %c1_i32_368 = arith.constant 1 : i32
    %836 = tpu.dynamic_rotate %835 by %c1_i32_368 dim 0 : vector<8x64xf32>, i32 -> vector<8x64xf32>
    %837 = tpu.iota {dimensions = array<i32: 0>} : vector<8x64xi32>
    %c3_i32_369 = arith.constant 3 : i32
    %838 = vector.broadcast %c3_i32_369 : i32 to vector<8x64xi32>
    %839 = arith.andi %837, %838 : vector<8x64xi32>
    %c-1_i32_370 = arith.constant -1 : i32
    %840 = vector.broadcast %c-1_i32_370 : i32 to vector<8x64xi32>
    %841 = arith.addi %839, %840 : vector<8x64xi32>
    %c0_i32_371 = arith.constant 0 : i32
    %842 = vector.broadcast %c0_i32_371 : i32 to vector<8x64xi32>
    %843 = arith.cmpi sge, %841, %842 : vector<8x64xi32>
    %c-1_i32_372 = arith.constant -1 : i32
    %844 = vector.broadcast %c-1_i32_372 : i32 to vector<8x64xi32>
    %845 = arith.addi %839, %844 : vector<8x64xi32>
    %c4_i32_373 = arith.constant 4 : i32
    %846 = vector.broadcast %c4_i32_373 : i32 to vector<8x64xi32>
    %847 = arith.cmpi slt, %845, %846 : vector<8x64xi32>
    %848 = arith.andi %843, %847 : vector<8x64xi1>
    %cst_374 = arith.constant 0.000000e+00 : f32
    %849 = vector.broadcast %cst_374 : f32 to vector<8x64xf32>
    %850 = arith.select %848, %836, %849 : vector<8x64xi1>, vector<8x64xf32>
    %c7_i32_375 = arith.constant 7 : i32
    %851 = tpu.dynamic_rotate %835 by %c7_i32_375 dim 0 : vector<8x64xf32>, i32 -> vector<8x64xf32>
    %852 = tpu.iota {dimensions = array<i32: 0>} : vector<8x64xi32>
    %c3_i32_376 = arith.constant 3 : i32
    %853 = vector.broadcast %c3_i32_376 : i32 to vector<8x64xi32>
    %854 = arith.andi %852, %853 : vector<8x64xi32>
    %c1_i32_377 = arith.constant 1 : i32
    %855 = vector.broadcast %c1_i32_377 : i32 to vector<8x64xi32>
    %856 = arith.addi %854, %855 : vector<8x64xi32>
    %c0_i32_378 = arith.constant 0 : i32
    %857 = vector.broadcast %c0_i32_378 : i32 to vector<8x64xi32>
    %858 = arith.cmpi sge, %856, %857 : vector<8x64xi32>
    %c1_i32_379 = arith.constant 1 : i32
    %859 = vector.broadcast %c1_i32_379 : i32 to vector<8x64xi32>
    %860 = arith.addi %854, %859 : vector<8x64xi32>
    %c4_i32_380 = arith.constant 4 : i32
    %861 = vector.broadcast %c4_i32_380 : i32 to vector<8x64xi32>
    %862 = arith.cmpi slt, %860, %861 : vector<8x64xi32>
    %863 = arith.andi %858, %862 : vector<8x64xi1>
    %cst_381 = arith.constant 0.000000e+00 : f32
    %864 = vector.broadcast %cst_381 : f32 to vector<8x64xf32>
    %865 = arith.select %863, %851, %864 : vector<8x64xi1>, vector<8x64xf32>
    %866 = tpu.concatenate %850, %835, %865 in 1 : vector<8x64xf32>, vector<8x64xf32>, vector<8x64xf32> -> vector<8x192xf32>
    %c1984 = arith.constant 1984 : index
    %c0_382 = arith.constant 0 : index
    %867 = vector.load %arg2[%c1984, %c0_382] : memref<3392x128xf32, #tpu.memory_space<vmem>>, vector<192x64xf32>
    %c152 = arith.constant 152 : index
    %c0_383 = arith.constant 0 : index
    %868 = vector.load %arg3[%c152, %c0_383] : memref<224x128xf32, #tpu.memory_space<vmem>>, vector<1x64xf32>
    %cst_384 = arith.constant dense<0.000000e+00> : vector<8x64xf32>
    %869 = tpu.matmul %866, %867, %cst_384 {dimension_numbers = #tpu.dot_dimension_numbers<[1], [0], [0], [1], [0, 0, 1, 1], [], []>} : vector<8x192xf32>, vector<192x64xf32>, vector<8x64xf32> -> vector<8x64xf32>
    %870 = vector.broadcast %868 : vector<1x64xf32> to vector<8x64xf32>
    %871 = arith.addf %869, %870 : vector<8x64xf32>
    %cst_385 = arith.constant 0.000000e+00 : f32
    %872 = vector.broadcast %cst_385 : f32 to vector<8x64xf32>
    %873 = arith.maximumf %871, %872 : vector<8x64xf32>
    %c2176 = arith.constant 2176 : index
    %c0_386 = arith.constant 0 : index
    %874 = vector.load %arg2[%c2176, %c0_386] : memref<3392x128xf32, #tpu.memory_space<vmem>>, vector<64x64xf32>
    %c160 = arith.constant 160 : index
    %c0_387 = arith.constant 0 : index
    %875 = vector.load %arg3[%c160, %c0_387] : memref<224x128xf32, #tpu.memory_space<vmem>>, vector<1x64xf32>
    %cst_388 = arith.constant dense<0.000000e+00> : vector<8x64xf32>
    %876 = tpu.matmul %873, %874, %cst_388 {dimension_numbers = #tpu.dot_dimension_numbers<[1], [0], [0], [1], [0, 0, 1, 1], [], []>} : vector<8x64xf32>, vector<64x64xf32>, vector<8x64xf32> -> vector<8x64xf32>
    %877 = vector.broadcast %875 : vector<1x64xf32> to vector<8x64xf32>
    %878 = arith.addf %876, %877 : vector<8x64xf32>
    %879 = arith.addf %833, %878 : vector<8x64xf32>
    %880 = tpu.iota {dimensions = array<i32: 0>} : vector<16x8xi32>
    %881 = tpu.iota {dimensions = array<i32: 1>} : vector<16x8xi32>
    %c3_i32_389 = arith.constant 3 : i32
    %882 = vector.broadcast %c3_i32_389 : i32 to vector<16x8xi32>
    %883 = arith.shrsi %880, %882 : vector<16x8xi32>
    %c2_i32_390 = arith.constant 2 : i32
    %884 = vector.broadcast %c2_i32_390 : i32 to vector<16x8xi32>
    %885 = arith.shrsi %881, %884 : vector<16x8xi32>
    %886 = arith.cmpi eq, %883, %885 : vector<16x8xi32>
    %c7_i32_391 = arith.constant 7 : i32
    %887 = vector.broadcast %c7_i32_391 : i32 to vector<16x8xi32>
    %888 = arith.andi %880, %887 : vector<16x8xi32>
    %c3_i32_392 = arith.constant 3 : i32
    %889 = vector.broadcast %c3_i32_392 : i32 to vector<16x8xi32>
    %890 = arith.andi %881, %889 : vector<16x8xi32>
    %c2_i32_393 = arith.constant 2 : i32
    %891 = vector.broadcast %c2_i32_393 : i32 to vector<16x8xi32>
    %892 = arith.muli %890, %891 : vector<16x8xi32>
    %893 = arith.cmpi eq, %888, %892 : vector<16x8xi32>
    %894 = arith.andi %886, %893 : vector<16x8xi1>
    %895 = arith.extui %894 : vector<16x8xi1> to vector<16x8xi32>
    %896 = arith.sitofp %895 : vector<16x8xi32> to vector<16x8xf32>
    %cst_394 = arith.constant dense<0.000000e+00> : vector<16x64xf32>
    %897 = tpu.matmul %896, %879, %cst_394 {dimension_numbers = #tpu.dot_dimension_numbers<[1], [0], [0], [1], [0, 0, 1, 1], [], []>} : vector<16x8xf32>, vector<8x64xf32>, vector<16x64xf32> -> vector<16x64xf32>
    %c15_i32_395 = arith.constant 15 : i32
    %898 = tpu.dynamic_rotate %897 by %c15_i32_395 dim 0 : vector<16x64xf32>, i32 -> vector<16x64xf32>
    %899 = tpu.iota {dimensions = array<i32: 0>} : vector<16x64xi32>
    %c7_i32_396 = arith.constant 7 : i32
    %900 = vector.broadcast %c7_i32_396 : i32 to vector<16x64xi32>
    %901 = arith.andi %899, %900 : vector<16x64xi32>
    %c1_i32_397 = arith.constant 1 : i32
    %902 = vector.broadcast %c1_i32_397 : i32 to vector<16x64xi32>
    %903 = arith.addi %901, %902 : vector<16x64xi32>
    %c0_i32_398 = arith.constant 0 : i32
    %904 = vector.broadcast %c0_i32_398 : i32 to vector<16x64xi32>
    %905 = arith.cmpi sge, %903, %904 : vector<16x64xi32>
    %c1_i32_399 = arith.constant 1 : i32
    %906 = vector.broadcast %c1_i32_399 : i32 to vector<16x64xi32>
    %907 = arith.addi %901, %906 : vector<16x64xi32>
    %c8_i32_400 = arith.constant 8 : i32
    %908 = vector.broadcast %c8_i32_400 : i32 to vector<16x64xi32>
    %909 = arith.cmpi slt, %907, %908 : vector<16x64xi32>
    %910 = arith.andi %905, %909 : vector<16x64xi1>
    %cst_401 = arith.constant 0.000000e+00 : f32
    %911 = vector.broadcast %cst_401 : f32 to vector<16x64xf32>
    %912 = arith.select %910, %898, %911 : vector<16x64xi1>, vector<16x64xf32>
    %c1_i32_402 = arith.constant 1 : i32
    %913 = tpu.dynamic_rotate %897 by %c1_i32_402 dim 0 : vector<16x64xf32>, i32 -> vector<16x64xf32>
    %914 = tpu.iota {dimensions = array<i32: 0>} : vector<16x64xi32>
    %c7_i32_403 = arith.constant 7 : i32
    %915 = vector.broadcast %c7_i32_403 : i32 to vector<16x64xi32>
    %916 = arith.andi %914, %915 : vector<16x64xi32>
    %c-1_i32_404 = arith.constant -1 : i32
    %917 = vector.broadcast %c-1_i32_404 : i32 to vector<16x64xi32>
    %918 = arith.addi %916, %917 : vector<16x64xi32>
    %c0_i32_405 = arith.constant 0 : i32
    %919 = vector.broadcast %c0_i32_405 : i32 to vector<16x64xi32>
    %920 = arith.cmpi sge, %918, %919 : vector<16x64xi32>
    %c-1_i32_406 = arith.constant -1 : i32
    %921 = vector.broadcast %c-1_i32_406 : i32 to vector<16x64xi32>
    %922 = arith.addi %916, %921 : vector<16x64xi32>
    %c8_i32_407 = arith.constant 8 : i32
    %923 = vector.broadcast %c8_i32_407 : i32 to vector<16x64xi32>
    %924 = arith.cmpi slt, %922, %923 : vector<16x64xi32>
    %925 = arith.andi %920, %924 : vector<16x64xi1>
    %cst_408 = arith.constant 0.000000e+00 : f32
    %926 = vector.broadcast %cst_408 : f32 to vector<16x64xf32>
    %927 = arith.select %925, %913, %926 : vector<16x64xi1>, vector<16x64xf32>
    %c2_i32_409 = arith.constant 2 : i32
    %928 = tpu.dynamic_rotate %897 by %c2_i32_409 dim 0 : vector<16x64xf32>, i32 -> vector<16x64xf32>
    %929 = tpu.iota {dimensions = array<i32: 0>} : vector<16x64xi32>
    %c7_i32_410 = arith.constant 7 : i32
    %930 = vector.broadcast %c7_i32_410 : i32 to vector<16x64xi32>
    %931 = arith.andi %929, %930 : vector<16x64xi32>
    %c-2_i32_411 = arith.constant -2 : i32
    %932 = vector.broadcast %c-2_i32_411 : i32 to vector<16x64xi32>
    %933 = arith.addi %931, %932 : vector<16x64xi32>
    %c0_i32_412 = arith.constant 0 : i32
    %934 = vector.broadcast %c0_i32_412 : i32 to vector<16x64xi32>
    %935 = arith.cmpi sge, %933, %934 : vector<16x64xi32>
    %c-2_i32_413 = arith.constant -2 : i32
    %936 = vector.broadcast %c-2_i32_413 : i32 to vector<16x64xi32>
    %937 = arith.addi %931, %936 : vector<16x64xi32>
    %c8_i32_414 = arith.constant 8 : i32
    %938 = vector.broadcast %c8_i32_414 : i32 to vector<16x64xi32>
    %939 = arith.cmpi slt, %937, %938 : vector<16x64xi32>
    %940 = arith.andi %935, %939 : vector<16x64xi1>
    %cst_415 = arith.constant 0.000000e+00 : f32
    %941 = vector.broadcast %cst_415 : f32 to vector<16x64xf32>
    %942 = arith.select %940, %928, %941 : vector<16x64xi1>, vector<16x64xf32>
    %943 = tpu.concatenate %912, %897, %927, %942 in 1 : vector<16x64xf32>, vector<16x64xf32>, vector<16x64xf32>, vector<16x64xf32> -> vector<16x256xf32>
    %c2240 = arith.constant 2240 : index
    %c0_416 = arith.constant 0 : index
    %944 = vector.load %arg2[%c2240, %c0_416] : memref<3392x128xf32, #tpu.memory_space<vmem>>, vector<256x64xf32>
    %c168 = arith.constant 168 : index
    %c0_417 = arith.constant 0 : index
    %945 = vector.load %arg3[%c168, %c0_417] : memref<224x128xf32, #tpu.memory_space<vmem>>, vector<1x64xf32>
    %cst_418 = arith.constant dense<0.000000e+00> : vector<16x64xf32>
    %946 = tpu.matmul %943, %944, %cst_418 {dimension_numbers = #tpu.dot_dimension_numbers<[1], [0], [0], [1], [0, 0, 1, 1], [], []>} : vector<16x256xf32>, vector<256x64xf32>, vector<16x64xf32> -> vector<16x64xf32>
    %947 = vector.broadcast %945 : vector<1x64xf32> to vector<16x64xf32>
    %948 = arith.addf %946, %947 : vector<16x64xf32>
    %c1_i32_419 = arith.constant 1 : i32
    %949 = tpu.dynamic_rotate %948 by %c1_i32_419 dim 0 : vector<16x64xf32>, i32 -> vector<16x64xf32>
    %950 = tpu.iota {dimensions = array<i32: 0>} : vector<16x64xi32>
    %c7_i32_420 = arith.constant 7 : i32
    %951 = vector.broadcast %c7_i32_420 : i32 to vector<16x64xi32>
    %952 = arith.andi %950, %951 : vector<16x64xi32>
    %c-1_i32_421 = arith.constant -1 : i32
    %953 = vector.broadcast %c-1_i32_421 : i32 to vector<16x64xi32>
    %954 = arith.addi %952, %953 : vector<16x64xi32>
    %c0_i32_422 = arith.constant 0 : i32
    %955 = vector.broadcast %c0_i32_422 : i32 to vector<16x64xi32>
    %956 = arith.cmpi sge, %954, %955 : vector<16x64xi32>
    %c-1_i32_423 = arith.constant -1 : i32
    %957 = vector.broadcast %c-1_i32_423 : i32 to vector<16x64xi32>
    %958 = arith.addi %952, %957 : vector<16x64xi32>
    %c8_i32_424 = arith.constant 8 : i32
    %959 = vector.broadcast %c8_i32_424 : i32 to vector<16x64xi32>
    %960 = arith.cmpi slt, %958, %959 : vector<16x64xi32>
    %961 = arith.andi %956, %960 : vector<16x64xi1>
    %cst_425 = arith.constant 0.000000e+00 : f32
    %962 = vector.broadcast %cst_425 : f32 to vector<16x64xf32>
    %963 = arith.select %961, %949, %962 : vector<16x64xi1>, vector<16x64xf32>
    %c15_i32_426 = arith.constant 15 : i32
    %964 = tpu.dynamic_rotate %948 by %c15_i32_426 dim 0 : vector<16x64xf32>, i32 -> vector<16x64xf32>
    %965 = tpu.iota {dimensions = array<i32: 0>} : vector<16x64xi32>
    %c7_i32_427 = arith.constant 7 : i32
    %966 = vector.broadcast %c7_i32_427 : i32 to vector<16x64xi32>
    %967 = arith.andi %965, %966 : vector<16x64xi32>
    %c1_i32_428 = arith.constant 1 : i32
    %968 = vector.broadcast %c1_i32_428 : i32 to vector<16x64xi32>
    %969 = arith.addi %967, %968 : vector<16x64xi32>
    %c0_i32_429 = arith.constant 0 : i32
    %970 = vector.broadcast %c0_i32_429 : i32 to vector<16x64xi32>
    %971 = arith.cmpi sge, %969, %970 : vector<16x64xi32>
    %c1_i32_430 = arith.constant 1 : i32
    %972 = vector.broadcast %c1_i32_430 : i32 to vector<16x64xi32>
    %973 = arith.addi %967, %972 : vector<16x64xi32>
    %c8_i32_431 = arith.constant 8 : i32
    %974 = vector.broadcast %c8_i32_431 : i32 to vector<16x64xi32>
    %975 = arith.cmpi slt, %973, %974 : vector<16x64xi32>
    %976 = arith.andi %971, %975 : vector<16x64xi1>
    %cst_432 = arith.constant 0.000000e+00 : f32
    %977 = vector.broadcast %cst_432 : f32 to vector<16x64xf32>
    %978 = arith.select %976, %964, %977 : vector<16x64xi1>, vector<16x64xf32>
    %979 = tpu.concatenate %963, %948, %978 in 1 : vector<16x64xf32>, vector<16x64xf32>, vector<16x64xf32> -> vector<16x192xf32>
    %c2496 = arith.constant 2496 : index
    %c0_433 = arith.constant 0 : index
    %980 = vector.load %arg2[%c2496, %c0_433] : memref<3392x128xf32, #tpu.memory_space<vmem>>, vector<192x64xf32>
    %c176 = arith.constant 176 : index
    %c0_434 = arith.constant 0 : index
    %981 = vector.load %arg3[%c176, %c0_434] : memref<224x128xf32, #tpu.memory_space<vmem>>, vector<1x64xf32>
    %cst_435 = arith.constant dense<0.000000e+00> : vector<16x64xf32>
    %982 = tpu.matmul %979, %980, %cst_435 {dimension_numbers = #tpu.dot_dimension_numbers<[1], [0], [0], [1], [0, 0, 1, 1], [], []>} : vector<16x192xf32>, vector<192x64xf32>, vector<16x64xf32> -> vector<16x64xf32>
    %983 = vector.broadcast %981 : vector<1x64xf32> to vector<16x64xf32>
    %984 = arith.addf %982, %983 : vector<16x64xf32>
    %cst_436 = arith.constant 0.000000e+00 : f32
    %985 = vector.broadcast %cst_436 : f32 to vector<16x64xf32>
    %986 = arith.maximumf %984, %985 : vector<16x64xf32>
    %c1_i32_437 = arith.constant 1 : i32
    %987 = tpu.dynamic_rotate %986 by %c1_i32_437 dim 0 : vector<16x64xf32>, i32 -> vector<16x64xf32>
    %988 = tpu.iota {dimensions = array<i32: 0>} : vector<16x64xi32>
    %c7_i32_438 = arith.constant 7 : i32
    %989 = vector.broadcast %c7_i32_438 : i32 to vector<16x64xi32>
    %990 = arith.andi %988, %989 : vector<16x64xi32>
    %c-1_i32_439 = arith.constant -1 : i32
    %991 = vector.broadcast %c-1_i32_439 : i32 to vector<16x64xi32>
    %992 = arith.addi %990, %991 : vector<16x64xi32>
    %c0_i32_440 = arith.constant 0 : i32
    %993 = vector.broadcast %c0_i32_440 : i32 to vector<16x64xi32>
    %994 = arith.cmpi sge, %992, %993 : vector<16x64xi32>
    %c-1_i32_441 = arith.constant -1 : i32
    %995 = vector.broadcast %c-1_i32_441 : i32 to vector<16x64xi32>
    %996 = arith.addi %990, %995 : vector<16x64xi32>
    %c8_i32_442 = arith.constant 8 : i32
    %997 = vector.broadcast %c8_i32_442 : i32 to vector<16x64xi32>
    %998 = arith.cmpi slt, %996, %997 : vector<16x64xi32>
    %999 = arith.andi %994, %998 : vector<16x64xi1>
    %cst_443 = arith.constant 0.000000e+00 : f32
    %1000 = vector.broadcast %cst_443 : f32 to vector<16x64xf32>
    %1001 = arith.select %999, %987, %1000 : vector<16x64xi1>, vector<16x64xf32>
    %c15_i32_444 = arith.constant 15 : i32
    %1002 = tpu.dynamic_rotate %986 by %c15_i32_444 dim 0 : vector<16x64xf32>, i32 -> vector<16x64xf32>
    %1003 = tpu.iota {dimensions = array<i32: 0>} : vector<16x64xi32>
    %c7_i32_445 = arith.constant 7 : i32
    %1004 = vector.broadcast %c7_i32_445 : i32 to vector<16x64xi32>
    %1005 = arith.andi %1003, %1004 : vector<16x64xi32>
    %c1_i32_446 = arith.constant 1 : i32
    %1006 = vector.broadcast %c1_i32_446 : i32 to vector<16x64xi32>
    %1007 = arith.addi %1005, %1006 : vector<16x64xi32>
    %c0_i32_447 = arith.constant 0 : i32
    %1008 = vector.broadcast %c0_i32_447 : i32 to vector<16x64xi32>
    %1009 = arith.cmpi sge, %1007, %1008 : vector<16x64xi32>
    %c1_i32_448 = arith.constant 1 : i32
    %1010 = vector.broadcast %c1_i32_448 : i32 to vector<16x64xi32>
    %1011 = arith.addi %1005, %1010 : vector<16x64xi32>
    %c8_i32_449 = arith.constant 8 : i32
    %1012 = vector.broadcast %c8_i32_449 : i32 to vector<16x64xi32>
    %1013 = arith.cmpi slt, %1011, %1012 : vector<16x64xi32>
    %1014 = arith.andi %1009, %1013 : vector<16x64xi1>
    %cst_450 = arith.constant 0.000000e+00 : f32
    %1015 = vector.broadcast %cst_450 : f32 to vector<16x64xf32>
    %1016 = arith.select %1014, %1002, %1015 : vector<16x64xi1>, vector<16x64xf32>
    %1017 = tpu.concatenate %1001, %986, %1016 in 1 : vector<16x64xf32>, vector<16x64xf32>, vector<16x64xf32> -> vector<16x192xf32>
    %c2688 = arith.constant 2688 : index
    %c0_451 = arith.constant 0 : index
    %1018 = vector.load %arg2[%c2688, %c0_451] : memref<3392x128xf32, #tpu.memory_space<vmem>>, vector<192x64xf32>
    %c184 = arith.constant 184 : index
    %c0_452 = arith.constant 0 : index
    %1019 = vector.load %arg3[%c184, %c0_452] : memref<224x128xf32, #tpu.memory_space<vmem>>, vector<1x64xf32>
    %cst_453 = arith.constant dense<0.000000e+00> : vector<16x64xf32>
    %1020 = tpu.matmul %1017, %1018, %cst_453 {dimension_numbers = #tpu.dot_dimension_numbers<[1], [0], [0], [1], [0, 0, 1, 1], [], []>} : vector<16x192xf32>, vector<192x64xf32>, vector<16x64xf32> -> vector<16x64xf32>
    %1021 = vector.broadcast %1019 : vector<1x64xf32> to vector<16x64xf32>
    %1022 = arith.addf %1020, %1021 : vector<16x64xf32>
    %cst_454 = arith.constant 0.000000e+00 : f32
    %1023 = vector.broadcast %cst_454 : f32 to vector<16x64xf32>
    %1024 = arith.maximumf %1022, %1023 : vector<16x64xf32>
    %c2880 = arith.constant 2880 : index
    %c0_455 = arith.constant 0 : index
    %1025 = vector.load %arg2[%c2880, %c0_455] : memref<3392x128xf32, #tpu.memory_space<vmem>>, vector<64x64xf32>
    %c192 = arith.constant 192 : index
    %c0_456 = arith.constant 0 : index
    %1026 = vector.load %arg3[%c192, %c0_456] : memref<224x128xf32, #tpu.memory_space<vmem>>, vector<1x64xf32>
    %cst_457 = arith.constant dense<0.000000e+00> : vector<16x64xf32>
    %1027 = tpu.matmul %1024, %1025, %cst_457 {dimension_numbers = #tpu.dot_dimension_numbers<[1], [0], [0], [1], [0, 0, 1, 1], [], []>} : vector<16x64xf32>, vector<64x64xf32>, vector<16x64xf32> -> vector<16x64xf32>
    %1028 = vector.broadcast %1026 : vector<1x64xf32> to vector<16x64xf32>
    %1029 = arith.addf %1027, %1028 : vector<16x64xf32>
    %1030 = arith.addf %984, %1029 : vector<16x64xf32>
    %cst_458 = arith.constant dense<0.000000e+00> : vector<32x64xf32>
    %1031 = tpu.matmul %279, %1030, %cst_458 {dimension_numbers = #tpu.dot_dimension_numbers<[1], [0], [0], [1], [0, 0, 1, 1], [], []>} : vector<32x16xf32>, vector<16x64xf32>, vector<32x64xf32> -> vector<32x64xf32>
    %c31_i32_459 = arith.constant 31 : i32
    %1032 = tpu.dynamic_rotate %1031 by %c31_i32_459 dim 0 : vector<32x64xf32>, i32 -> vector<32x64xf32>
    %1033 = tpu.iota {dimensions = array<i32: 0>} : vector<32x64xi32>
    %c15_i32_460 = arith.constant 15 : i32
    %1034 = vector.broadcast %c15_i32_460 : i32 to vector<32x64xi32>
    %1035 = arith.andi %1033, %1034 : vector<32x64xi32>
    %c1_i32_461 = arith.constant 1 : i32
    %1036 = vector.broadcast %c1_i32_461 : i32 to vector<32x64xi32>
    %1037 = arith.addi %1035, %1036 : vector<32x64xi32>
    %c0_i32_462 = arith.constant 0 : i32
    %1038 = vector.broadcast %c0_i32_462 : i32 to vector<32x64xi32>
    %1039 = arith.cmpi sge, %1037, %1038 : vector<32x64xi32>
    %c1_i32_463 = arith.constant 1 : i32
    %1040 = vector.broadcast %c1_i32_463 : i32 to vector<32x64xi32>
    %1041 = arith.addi %1035, %1040 : vector<32x64xi32>
    %c16_i32_464 = arith.constant 16 : i32
    %1042 = vector.broadcast %c16_i32_464 : i32 to vector<32x64xi32>
    %1043 = arith.cmpi slt, %1041, %1042 : vector<32x64xi32>
    %1044 = arith.andi %1039, %1043 : vector<32x64xi1>
    %cst_465 = arith.constant 0.000000e+00 : f32
    %1045 = vector.broadcast %cst_465 : f32 to vector<32x64xf32>
    %1046 = arith.select %1044, %1032, %1045 : vector<32x64xi1>, vector<32x64xf32>
    %c1_i32_466 = arith.constant 1 : i32
    %1047 = tpu.dynamic_rotate %1031 by %c1_i32_466 dim 0 : vector<32x64xf32>, i32 -> vector<32x64xf32>
    %1048 = tpu.iota {dimensions = array<i32: 0>} : vector<32x64xi32>
    %c15_i32_467 = arith.constant 15 : i32
    %1049 = vector.broadcast %c15_i32_467 : i32 to vector<32x64xi32>
    %1050 = arith.andi %1048, %1049 : vector<32x64xi32>
    %c-1_i32_468 = arith.constant -1 : i32
    %1051 = vector.broadcast %c-1_i32_468 : i32 to vector<32x64xi32>
    %1052 = arith.addi %1050, %1051 : vector<32x64xi32>
    %c0_i32_469 = arith.constant 0 : i32
    %1053 = vector.broadcast %c0_i32_469 : i32 to vector<32x64xi32>
    %1054 = arith.cmpi sge, %1052, %1053 : vector<32x64xi32>
    %c-1_i32_470 = arith.constant -1 : i32
    %1055 = vector.broadcast %c-1_i32_470 : i32 to vector<32x64xi32>
    %1056 = arith.addi %1050, %1055 : vector<32x64xi32>
    %c16_i32_471 = arith.constant 16 : i32
    %1057 = vector.broadcast %c16_i32_471 : i32 to vector<32x64xi32>
    %1058 = arith.cmpi slt, %1056, %1057 : vector<32x64xi32>
    %1059 = arith.andi %1054, %1058 : vector<32x64xi1>
    %cst_472 = arith.constant 0.000000e+00 : f32
    %1060 = vector.broadcast %cst_472 : f32 to vector<32x64xf32>
    %1061 = arith.select %1059, %1047, %1060 : vector<32x64xi1>, vector<32x64xf32>
    %c2_i32_473 = arith.constant 2 : i32
    %1062 = tpu.dynamic_rotate %1031 by %c2_i32_473 dim 0 : vector<32x64xf32>, i32 -> vector<32x64xf32>
    %1063 = tpu.iota {dimensions = array<i32: 0>} : vector<32x64xi32>
    %c15_i32_474 = arith.constant 15 : i32
    %1064 = vector.broadcast %c15_i32_474 : i32 to vector<32x64xi32>
    %1065 = arith.andi %1063, %1064 : vector<32x64xi32>
    %c-2_i32_475 = arith.constant -2 : i32
    %1066 = vector.broadcast %c-2_i32_475 : i32 to vector<32x64xi32>
    %1067 = arith.addi %1065, %1066 : vector<32x64xi32>
    %c0_i32_476 = arith.constant 0 : i32
    %1068 = vector.broadcast %c0_i32_476 : i32 to vector<32x64xi32>
    %1069 = arith.cmpi sge, %1067, %1068 : vector<32x64xi32>
    %c-2_i32_477 = arith.constant -2 : i32
    %1070 = vector.broadcast %c-2_i32_477 : i32 to vector<32x64xi32>
    %1071 = arith.addi %1065, %1070 : vector<32x64xi32>
    %c16_i32_478 = arith.constant 16 : i32
    %1072 = vector.broadcast %c16_i32_478 : i32 to vector<32x64xi32>
    %1073 = arith.cmpi slt, %1071, %1072 : vector<32x64xi32>
    %1074 = arith.andi %1069, %1073 : vector<32x64xi1>
    %cst_479 = arith.constant 0.000000e+00 : f32
    %1075 = vector.broadcast %cst_479 : f32 to vector<32x64xf32>
    %1076 = arith.select %1074, %1062, %1075 : vector<32x64xi1>, vector<32x64xf32>
    %1077 = tpu.concatenate %1046, %1031, %1061, %1076 in 1 : vector<32x64xf32>, vector<32x64xf32>, vector<32x64xf32>, vector<32x64xf32> -> vector<32x256xf32>
    %c2944 = arith.constant 2944 : index
    %c0_480 = arith.constant 0 : index
    %1078 = vector.load %arg2[%c2944, %c0_480] : memref<3392x128xf32, #tpu.memory_space<vmem>>, vector<256x64xf32>
    %c200 = arith.constant 200 : index
    %c0_481 = arith.constant 0 : index
    %1079 = vector.load %arg3[%c200, %c0_481] : memref<224x128xf32, #tpu.memory_space<vmem>>, vector<1x64xf32>
    %cst_482 = arith.constant dense<0.000000e+00> : vector<32x64xf32>
    %1080 = tpu.matmul %1077, %1078, %cst_482 {dimension_numbers = #tpu.dot_dimension_numbers<[1], [0], [0], [1], [0, 0, 1, 1], [], []>} : vector<32x256xf32>, vector<256x64xf32>, vector<32x64xf32> -> vector<32x64xf32>
    %1081 = vector.broadcast %1079 : vector<1x64xf32> to vector<32x64xf32>
    %1082 = arith.addf %1080, %1081 : vector<32x64xf32>
    %c1_i32_483 = arith.constant 1 : i32
    %1083 = tpu.dynamic_rotate %1082 by %c1_i32_483 dim 0 : vector<32x64xf32>, i32 -> vector<32x64xf32>
    %1084 = tpu.iota {dimensions = array<i32: 0>} : vector<32x64xi32>
    %c15_i32_484 = arith.constant 15 : i32
    %1085 = vector.broadcast %c15_i32_484 : i32 to vector<32x64xi32>
    %1086 = arith.andi %1084, %1085 : vector<32x64xi32>
    %c-1_i32_485 = arith.constant -1 : i32
    %1087 = vector.broadcast %c-1_i32_485 : i32 to vector<32x64xi32>
    %1088 = arith.addi %1086, %1087 : vector<32x64xi32>
    %c0_i32_486 = arith.constant 0 : i32
    %1089 = vector.broadcast %c0_i32_486 : i32 to vector<32x64xi32>
    %1090 = arith.cmpi sge, %1088, %1089 : vector<32x64xi32>
    %c-1_i32_487 = arith.constant -1 : i32
    %1091 = vector.broadcast %c-1_i32_487 : i32 to vector<32x64xi32>
    %1092 = arith.addi %1086, %1091 : vector<32x64xi32>
    %c16_i32_488 = arith.constant 16 : i32
    %1093 = vector.broadcast %c16_i32_488 : i32 to vector<32x64xi32>
    %1094 = arith.cmpi slt, %1092, %1093 : vector<32x64xi32>
    %1095 = arith.andi %1090, %1094 : vector<32x64xi1>
    %cst_489 = arith.constant 0.000000e+00 : f32
    %1096 = vector.broadcast %cst_489 : f32 to vector<32x64xf32>
    %1097 = arith.select %1095, %1083, %1096 : vector<32x64xi1>, vector<32x64xf32>
    %c31_i32_490 = arith.constant 31 : i32
    %1098 = tpu.dynamic_rotate %1082 by %c31_i32_490 dim 0 : vector<32x64xf32>, i32 -> vector<32x64xf32>
    %1099 = tpu.iota {dimensions = array<i32: 0>} : vector<32x64xi32>
    %c15_i32_491 = arith.constant 15 : i32
    %1100 = vector.broadcast %c15_i32_491 : i32 to vector<32x64xi32>
    %1101 = arith.andi %1099, %1100 : vector<32x64xi32>
    %c1_i32_492 = arith.constant 1 : i32
    %1102 = vector.broadcast %c1_i32_492 : i32 to vector<32x64xi32>
    %1103 = arith.addi %1101, %1102 : vector<32x64xi32>
    %c0_i32_493 = arith.constant 0 : i32
    %1104 = vector.broadcast %c0_i32_493 : i32 to vector<32x64xi32>
    %1105 = arith.cmpi sge, %1103, %1104 : vector<32x64xi32>
    %c1_i32_494 = arith.constant 1 : i32
    %1106 = vector.broadcast %c1_i32_494 : i32 to vector<32x64xi32>
    %1107 = arith.addi %1101, %1106 : vector<32x64xi32>
    %c16_i32_495 = arith.constant 16 : i32
    %1108 = vector.broadcast %c16_i32_495 : i32 to vector<32x64xi32>
    %1109 = arith.cmpi slt, %1107, %1108 : vector<32x64xi32>
    %1110 = arith.andi %1105, %1109 : vector<32x64xi1>
    %cst_496 = arith.constant 0.000000e+00 : f32
    %1111 = vector.broadcast %cst_496 : f32 to vector<32x64xf32>
    %1112 = arith.select %1110, %1098, %1111 : vector<32x64xi1>, vector<32x64xf32>
    %1113 = tpu.concatenate %1097, %1082, %1112 in 1 : vector<32x64xf32>, vector<32x64xf32>, vector<32x64xf32> -> vector<32x192xf32>
    %c3200 = arith.constant 3200 : index
    %c0_497 = arith.constant 0 : index
    %1114 = vector.load %arg2[%c3200, %c0_497] : memref<3392x128xf32, #tpu.memory_space<vmem>>, vector<192x39xf32>
    %c208 = arith.constant 208 : index
    %c0_498 = arith.constant 0 : index
    %1115 = vector.load %arg3[%c208, %c0_498] : memref<224x128xf32, #tpu.memory_space<vmem>>, vector<1x39xf32>
    %cst_499 = arith.constant dense<0.000000e+00> : vector<32x39xf32>
    %1116 = tpu.matmul %1113, %1114, %cst_499 {dimension_numbers = #tpu.dot_dimension_numbers<[1], [0], [0], [1], [0, 0, 1, 1], [], []>} : vector<32x192xf32>, vector<192x39xf32>, vector<32x39xf32> -> vector<32x39xf32>
    %1117 = vector.broadcast %1115 : vector<1x39xf32> to vector<32x39xf32>
    %1118 = arith.addf %1116, %1117 : vector<32x39xf32>
    %1119 = vector.extract_strided_slice %1118 {offsets = [0, 0], sizes = [32, 36], strides = [1, 1]} : vector<32x39xf32> to vector<32x36xf32>
    %1120 = arith.subf %1119, %1 : vector<32x36xf32>
    %1121 = math.absf %1120 : vector<32x36xf32>
    %1122 = vector.shape_cast %1121 : vector<32x36xf32> to vector<1x32x36xf32>
    %cst_500 = arith.constant dense<0.000000e+00> : vector<1xf32>
    %1123 = vector.multi_reduction <add>, %1122, %cst_500 [1, 2] : vector<1x32x36xf32> to vector<1xf32>
    %1124 = vector.shape_cast %1123 : vector<1xf32> to vector<1x1x1xf32>
    %1125 = vector.extract %1124[0, 0, 0] : f32 from vector<1x1x1xf32>
    %cst_501 = arith.constant 1.152000e+03 : f32
    %1126 = arith.divf %1125, %cst_501 : f32
    %1127 = tpu.iota {dimensions = array<i32: 0>} : vector<32x36xi32>
    %c15_i32_502 = arith.constant 15 : i32
    %1128 = vector.broadcast %c15_i32_502 : i32 to vector<32x36xi32>
    %1129 = arith.andi %1127, %1128 : vector<32x36xi32>
    %c31_i32_503 = arith.constant 31 : i32
    %1130 = tpu.dynamic_rotate %1120 by %c31_i32_503 dim 0 : vector<32x36xf32>, i32 -> vector<32x36xf32>
    %1131 = tpu.iota {dimensions = array<i32: 0>} : vector<32x36xi32>
    %c15_i32_504 = arith.constant 15 : i32
    %1132 = vector.broadcast %c15_i32_504 : i32 to vector<32x36xi32>
    %1133 = arith.andi %1131, %1132 : vector<32x36xi32>
    %c1_i32_505 = arith.constant 1 : i32
    %1134 = vector.broadcast %c1_i32_505 : i32 to vector<32x36xi32>
    %1135 = arith.addi %1133, %1134 : vector<32x36xi32>
    %c0_i32_506 = arith.constant 0 : i32
    %1136 = vector.broadcast %c0_i32_506 : i32 to vector<32x36xi32>
    %1137 = arith.cmpi sge, %1135, %1136 : vector<32x36xi32>
    %c1_i32_507 = arith.constant 1 : i32
    %1138 = vector.broadcast %c1_i32_507 : i32 to vector<32x36xi32>
    %1139 = arith.addi %1133, %1138 : vector<32x36xi32>
    %c16_i32_508 = arith.constant 16 : i32
    %1140 = vector.broadcast %c16_i32_508 : i32 to vector<32x36xi32>
    %1141 = arith.cmpi slt, %1139, %1140 : vector<32x36xi32>
    %1142 = arith.andi %1137, %1141 : vector<32x36xi1>
    %cst_509 = arith.constant 0.000000e+00 : f32
    %1143 = vector.broadcast %cst_509 : f32 to vector<32x36xf32>
    %1144 = arith.select %1142, %1130, %1143 : vector<32x36xi1>, vector<32x36xf32>
    %c30_i32_510 = arith.constant 30 : i32
    %1145 = tpu.dynamic_rotate %1120 by %c30_i32_510 dim 0 : vector<32x36xf32>, i32 -> vector<32x36xf32>
    %1146 = tpu.iota {dimensions = array<i32: 0>} : vector<32x36xi32>
    %c15_i32_511 = arith.constant 15 : i32
    %1147 = vector.broadcast %c15_i32_511 : i32 to vector<32x36xi32>
    %1148 = arith.andi %1146, %1147 : vector<32x36xi32>
    %c2_i32_512 = arith.constant 2 : i32
    %1149 = vector.broadcast %c2_i32_512 : i32 to vector<32x36xi32>
    %1150 = arith.addi %1148, %1149 : vector<32x36xi32>
    %c0_i32_513 = arith.constant 0 : i32
    %1151 = vector.broadcast %c0_i32_513 : i32 to vector<32x36xi32>
    %1152 = arith.cmpi sge, %1150, %1151 : vector<32x36xi32>
    %c2_i32_514 = arith.constant 2 : i32
    %1153 = vector.broadcast %c2_i32_514 : i32 to vector<32x36xi32>
    %1154 = arith.addi %1148, %1153 : vector<32x36xi32>
    %c16_i32_515 = arith.constant 16 : i32
    %1155 = vector.broadcast %c16_i32_515 : i32 to vector<32x36xi32>
    %1156 = arith.cmpi slt, %1154, %1155 : vector<32x36xi32>
    %1157 = arith.andi %1152, %1156 : vector<32x36xi1>
    %cst_516 = arith.constant 0.000000e+00 : f32
    %1158 = vector.broadcast %cst_516 : f32 to vector<32x36xf32>
    %1159 = arith.select %1157, %1145, %1158 : vector<32x36xi1>, vector<32x36xf32>
    %c15_i32_517 = arith.constant 15 : i32
    %1160 = vector.broadcast %c15_i32_517 : i32 to vector<32x36xi32>
    %1161 = arith.cmpi slt, %1129, %1160 : vector<32x36xi32>
    %1162 = arith.subf %1144, %1120 : vector<32x36xf32>
    %cst_518 = arith.constant 0.000000e+00 : f32
    %1163 = vector.broadcast %cst_518 : f32 to vector<32x36xf32>
    %1164 = arith.select %1161, %1162, %1163 : vector<32x36xi1>, vector<32x36xf32>
    %1165 = math.absf %1164 : vector<32x36xf32>
    %1166 = vector.shape_cast %1165 : vector<32x36xf32> to vector<1x32x36xf32>
    %cst_519 = arith.constant dense<0.000000e+00> : vector<1xf32>
    %1167 = vector.multi_reduction <add>, %1166, %cst_519 [1, 2] : vector<1x32x36xf32> to vector<1xf32>
    %1168 = vector.shape_cast %1167 : vector<1xf32> to vector<1x1x1xf32>
    %1169 = vector.extract %1168[0, 0, 0] : f32 from vector<1x1x1xf32>
    %cst_520 = arith.constant 1.080000e+03 : f32
    %1170 = arith.divf %1169, %cst_520 : f32
    %c14_i32_521 = arith.constant 14 : i32
    %1171 = vector.broadcast %c14_i32_521 : i32 to vector<32x36xi32>
    %1172 = arith.cmpi slt, %1129, %1171 : vector<32x36xi32>
    %1173 = arith.addf %1159, %1120 : vector<32x36xf32>
    %cst_522 = arith.constant 2.000000e+00 : f32
    %1174 = vector.broadcast %cst_522 : f32 to vector<32x36xf32>
    %1175 = arith.mulf %1174, %1144 : vector<32x36xf32>
    %1176 = arith.subf %1173, %1175 : vector<32x36xf32>
    %cst_523 = arith.constant 0.000000e+00 : f32
    %1177 = vector.broadcast %cst_523 : f32 to vector<32x36xf32>
    %1178 = arith.select %1172, %1176, %1177 : vector<32x36xi1>, vector<32x36xf32>
    %1179 = math.absf %1178 : vector<32x36xf32>
    %1180 = vector.shape_cast %1179 : vector<32x36xf32> to vector<1x32x36xf32>
    %cst_524 = arith.constant dense<0.000000e+00> : vector<1xf32>
    %1181 = vector.multi_reduction <add>, %1180, %cst_524 [1, 2] : vector<1x32x36xf32> to vector<1xf32>
    %1182 = vector.shape_cast %1181 : vector<1xf32> to vector<1x1x1xf32>
    %1183 = vector.extract %1182[0, 0, 0] : f32 from vector<1x1x1xf32>
    %cst_525 = arith.constant 1.008000e+03 : f32
    %1184 = arith.divf %1183, %cst_525 : f32
    %c30_i32_526 = arith.constant 30 : i32
    %1185 = tpu.dynamic_rotate %1119 by %c30_i32_526 dim 0 : vector<32x36xf32>, i32 -> vector<32x36xf32>
    %1186 = tpu.iota {dimensions = array<i32: 0>} : vector<32x36xi32>
    %c15_i32_527 = arith.constant 15 : i32
    %1187 = vector.broadcast %c15_i32_527 : i32 to vector<32x36xi32>
    %1188 = arith.andi %1186, %1187 : vector<32x36xi32>
    %c2_i32_528 = arith.constant 2 : i32
    %1189 = vector.broadcast %c2_i32_528 : i32 to vector<32x36xi32>
    %1190 = arith.addi %1188, %1189 : vector<32x36xi32>
    %c0_i32_529 = arith.constant 0 : i32
    %1191 = vector.broadcast %c0_i32_529 : i32 to vector<32x36xi32>
    %1192 = arith.cmpi sge, %1190, %1191 : vector<32x36xi32>
    %c2_i32_530 = arith.constant 2 : i32
    %1193 = vector.broadcast %c2_i32_530 : i32 to vector<32x36xi32>
    %1194 = arith.addi %1188, %1193 : vector<32x36xi32>
    %c16_i32_531 = arith.constant 16 : i32
    %1195 = vector.broadcast %c16_i32_531 : i32 to vector<32x36xi32>
    %1196 = arith.cmpi slt, %1194, %1195 : vector<32x36xi32>
    %1197 = arith.andi %1192, %1196 : vector<32x36xi1>
    %cst_532 = arith.constant 0.000000e+00 : f32
    %1198 = vector.broadcast %cst_532 : f32 to vector<32x36xf32>
    %1199 = arith.select %1197, %1185, %1198 : vector<32x36xi1>, vector<32x36xf32>
    %1200 = arith.addf %1199, %1119 : vector<32x36xf32>
    %c31_i32_533 = arith.constant 31 : i32
    %1201 = tpu.dynamic_rotate %1119 by %c31_i32_533 dim 0 : vector<32x36xf32>, i32 -> vector<32x36xf32>
    %1202 = tpu.iota {dimensions = array<i32: 0>} : vector<32x36xi32>
    %c15_i32_534 = arith.constant 15 : i32
    %1203 = vector.broadcast %c15_i32_534 : i32 to vector<32x36xi32>
    %1204 = arith.andi %1202, %1203 : vector<32x36xi32>
    %c1_i32_535 = arith.constant 1 : i32
    %1205 = vector.broadcast %c1_i32_535 : i32 to vector<32x36xi32>
    %1206 = arith.addi %1204, %1205 : vector<32x36xi32>
    %c0_i32_536 = arith.constant 0 : i32
    %1207 = vector.broadcast %c0_i32_536 : i32 to vector<32x36xi32>
    %1208 = arith.cmpi sge, %1206, %1207 : vector<32x36xi32>
    %c1_i32_537 = arith.constant 1 : i32
    %1209 = vector.broadcast %c1_i32_537 : i32 to vector<32x36xi32>
    %1210 = arith.addi %1204, %1209 : vector<32x36xi32>
    %c16_i32_538 = arith.constant 16 : i32
    %1211 = vector.broadcast %c16_i32_538 : i32 to vector<32x36xi32>
    %1212 = arith.cmpi slt, %1210, %1211 : vector<32x36xi32>
    %1213 = arith.andi %1208, %1212 : vector<32x36xi1>
    %cst_539 = arith.constant 0.000000e+00 : f32
    %1214 = vector.broadcast %cst_539 : f32 to vector<32x36xf32>
    %1215 = arith.select %1213, %1201, %1214 : vector<32x36xi1>, vector<32x36xf32>
    %cst_540 = arith.constant 2.000000e+00 : f32
    %1216 = vector.broadcast %cst_540 : f32 to vector<32x36xf32>
    %1217 = arith.mulf %1216, %1215 : vector<32x36xf32>
    %1218 = arith.subf %1200, %1217 : vector<32x36xf32>
    %cst_541 = arith.constant 0.000000e+00 : f32
    %1219 = vector.broadcast %cst_541 : f32 to vector<32x36xf32>
    %1220 = arith.select %1172, %1218, %1219 : vector<32x36xi1>, vector<32x36xf32>
    %1221 = arith.mulf %1220, %1220 : vector<32x36xf32>
    %1222 = vector.shape_cast %1221 : vector<32x36xf32> to vector<1x32x36xf32>
    %cst_542 = arith.constant dense<0.000000e+00> : vector<1xf32>
    %1223 = vector.multi_reduction <add>, %1222, %cst_542 [1, 2] : vector<1x32x36xf32> to vector<1xf32>
    %1224 = vector.shape_cast %1223 : vector<1xf32> to vector<1x1x1xf32>
    %1225 = vector.extract %1224[0, 0, 0] : f32 from vector<1x1x1xf32>
    %cst_543 = arith.constant 1.008000e+03 : f32
    %1226 = arith.divf %1225, %cst_543 : f32
    %c8_544 = arith.constant 8 : index
    %1227 = memref.load %arg6[%c8_544] : memref<16xf32, #tpu.memory_space<smem>>
    memref.store %1126, %arg6[%c8_544] : memref<16xf32, #tpu.memory_space<smem>>
    %c9 = arith.constant 9 : index
    %1228 = memref.load %arg6[%c9] : memref<16xf32, #tpu.memory_space<smem>>
    memref.store %1226, %arg6[%c9] : memref<16xf32, #tpu.memory_space<smem>>
    %c10 = arith.constant 10 : index
    %1229 = memref.load %arg6[%c10] : memref<16xf32, #tpu.memory_space<smem>>
    memref.store %1170, %arg6[%c10] : memref<16xf32, #tpu.memory_space<smem>>
    %c11 = arith.constant 11 : index
    %1230 = memref.load %arg6[%c11] : memref<16xf32, #tpu.memory_space<smem>>
    memref.store %1184, %arg6[%c11] : memref<16xf32, #tpu.memory_space<smem>>
    %c12 = arith.constant 12 : index
    %1231 = memref.load %arg6[%c12] : memref<16xf32, #tpu.memory_space<smem>>
    memref.store %797, %arg6[%c12] : memref<16xf32, #tpu.memory_space<smem>>
    %cst_545 = arith.constant 0.000000e+00 : f32
    %c13 = arith.constant 13 : index
    %1232 = memref.load %arg6[%c13] : memref<16xf32, #tpu.memory_space<smem>>
    memref.store %cst_545, %arg6[%c13] : memref<16xf32, #tpu.memory_space<smem>>
    %cst_546 = arith.constant 0.000000e+00 : f32
    %c14 = arith.constant 14 : index
    %1233 = memref.load %arg6[%c14] : memref<16xf32, #tpu.memory_space<smem>>
    memref.store %cst_546, %arg6[%c14] : memref<16xf32, #tpu.memory_space<smem>>
    %cst_547 = arith.constant 0.000000e+00 : f32
    %c15 = arith.constant 15 : index
    %1234 = memref.load %arg6[%c15] : memref<16xf32, #tpu.memory_space<smem>>
    memref.store %cst_547, %arg6[%c15] : memref<16xf32, #tpu.memory_space<smem>>
    return
  }
}

</mosaic_0001>

<bundles_post_ra>
// kernel: forward.1
= control target key start
LH: loop header
LB: loop body
LE: loop exit
PB: predicated region body
PF: predicated region fallthrough
CT: control target
= control target key end

     0   :  { %12 = vsyncpa [#allocation3], 0  ;;  %s8371_s0 = inlined_call_operand.hbm [shape: f32[32,36], index: 0, kind: input, shape index: {}]   ;;  %s8372_s1 = inlined_call_operand.hbm [shape: f32[32,36], index: 1, kind: input, shape index: {}]   ;;  %s8373_s2 = inlined_call_operand.hbm [shape: f32[3392,128], index: 2, kind: input, shape index: {}]   ;;  %s8374_s3 = inlined_call_operand.hbm [shape: f32[224,128], index: 3, kind: input, shape index: {}]   ;;  %s8375_s4 = inlined_call_operand.vmem [shape: f32[128,32], index: 4, kind: input, shape index: {}]   ;;  %s8376_s5 = inlined_call_operand.vmem [shape: f32[32,39], index: 5, kind: output, shape index: {0}]   ;;  %s8377_s6 = inlined_call_operand.vmem [shape: f32[16], index: 6, kind: output, shape index: {1}]  }
   0x1   :  { %13 = vsyncpa [#allocation6], 0 }
   0x2   :  { %14 = vsyncpa [#allocation9], 0 }
   0x3   :  { %15 = vsyncpa [#allocation4], 0  ;;  %s6868_s21 = smov [#allocation5]   ;;  %s6869_s23 = smov [#allocation2]  }
   0x4   :  { %s33_s22 = sshll.u32 %s6868_s21, 4  ;;  %s21_s24 = sshll.u32 %s6869_s23, 4  ;;  %s34_s22 = int_to_ptr.vmem [resolvable:$true] %s33_s22  ;;  %s6920_s24 = int_to_ptr.vmem [resolvable:$true] %s21_s24 }
   0x5   :  { %s6760_s27 = scalar_lea.hbm %s8372_s1, 512 }
   0x6   :  { %p6761_p0 = scmp.ne.s32.totalorder %s8372_s1, %s6760_s27  ;;  %p6764_p1 = scmp.lt.u32.totalorder %s6760_s27, %s8372_s1 }
   0x8   :  { %p6766_p2 = pnand %p6764_p1, %p6761_p0 }
   0xa   :  { %6769 = shalt.err (!%p6766_p2)
}
   0xb   :  { %s6770_s8 = scalar_lea.vmem %s34_s22, 512  ;;  %p6775_p4 = scmp.lt.s32.totalorder %s34_s22, %s34_s22 }
   0xc   :  { %p6771_p3 = scmp.ne.s32.totalorder %s34_s22, %s6770_s8  ;;  %p6776_p5 = scmp.lt.s32.totalorder %s6770_s8, %s6770_s8 }
   0xe   :  { %p6777_p6 = por %p6776_p5, %p6775_p4 }
  0x10   :  { %p6778_p7 = pnand %p6777_p6, %p6771_p3 }
  0x12   :  { %6781 = shalt.err (!%p6778_p7)
}
  0x13   :  { %s6870_s9 = smov 128   ;;  %s6871_s10 = smov 8  }
  0x14   :  { %39 = dma.hbm_to_vmem [thread:$0]  %s8372_s1, 512, %s34_s22, [#allocation6], %s6870_s9, %s6870_s9, %s6871_s10  }
  0x15   :  { %s6782_s15 = scalar_lea.hbm %s8371_s0, 512 }
  0x16   :  { %p6783_p8 = scmp.ne.s32.totalorder %s8371_s0, %s6782_s15  ;;  %p6786_p9 = scmp.lt.u32.totalorder %s6782_s15, %s8371_s0 }
  0x18   :  { %p6788_p10 = pnand %p6786_p9, %p6783_p8 }
  0x1a   :  { %6791 = shalt.err (!%p6788_p10)
}
  0x1b   :  { %s6792_s20 = scalar_lea.vmem %s6920_s24, 512  ;;  %p6797_p12 = scmp.lt.s32.totalorder %s6920_s24, %s6920_s24 }
  0x1c   :  { %p6793_p11 = scmp.ne.s32.totalorder %s6920_s24, %s6792_s20  ;;  %p6798_p13 = scmp.lt.s32.totalorder %s6792_s20, %s6792_s20 }
  0x1e   :  { %p6799_p0 = por %p6798_p13, %p6797_p12 }
  0x20   :  { %p6800_p1 = pnand %p6799_p0, %p6793_p11 }
  0x22   :  { %6803 = shalt.err (!%p6800_p1)
}
  0x23   :  { %27 = dma.hbm_to_vmem [thread:$0]  %s8371_s0, 512, %s6920_s24, [#allocation3], %s6870_s9, %s6870_s9, %s6871_s10  }
  0x24   :  { %s6872_s22 = smov [#allocation7]   ;;  %s6873_s25 = smov [#allocation8]  }
  0x25   :  { %s45_s23 = sshll.u32 %s6872_s22, 4  ;;  %s57_s26 = sshll.u32 %s6873_s25, 4  ;;  %s46_s23 = int_to_ptr.vmem [resolvable:$true] %s45_s23  ;;  %s6957_s26 = int_to_ptr.vmem [resolvable:$true] %s57_s26 }
  0x26   :  { %s6804_s29 = scalar_lea.hbm %s8373_s2, 54272 }
  0x27   :  { %p6805_p2 = scmp.ne.s32.totalorder %s8373_s2, %s6804_s29  ;;  %p6808_p3 = scmp.lt.u32.totalorder %s6804_s29, %s8373_s2 }
  0x29   :  { %p6810_p4 = pnand %p6808_p3, %p6805_p2 }
  0x2b   :  { %6813 = shalt.err (!%p6810_p4)
}
  0x2c   :  { %s6814_s0 = scalar_lea.vmem %s46_s23, 54272  ;;  %p6819_p6 = scmp.lt.s32.totalorder %s46_s23, %s46_s23 }
  0x2d   :  { %p6815_p5 = scmp.ne.s32.totalorder %s46_s23, %s6814_s0  ;;  %p6820_p7 = scmp.lt.s32.totalorder %s6814_s0, %s6814_s0 }
  0x2f   :  { %p6821_p8 = por %p6820_p7, %p6819_p6 }
  0x31   :  { %p6822_p9 = pnand %p6821_p8, %p6815_p5 }
  0x33   :  { %6825 = shalt.err (!%p6822_p9)
}
  0x34   :  { %51 = dma.hbm_to_vmem [thread:$0]  %s8373_s2, 54272, %s46_s23, [#allocation6], %s6870_s9, %s6870_s9, %s6871_s10  }
  0x35   :  { %s6826_s15 = scalar_lea.hbm %s8374_s3, 3584 }
  0x36   :  { %p6827_p10 = scmp.ne.s32.totalorder %s8374_s3, %s6826_s15  ;;  %p6830_p11 = scmp.lt.u32.totalorder %s6826_s15, %s8374_s3 }
  0x38   :  { %p6832_p12 = pnand %p6830_p11, %p6827_p10 }
  0x3a   :  { %6835 = shalt.err (!%p6832_p12)
}
  0x3b   :  { %s6836_s20 = scalar_lea.vmem %s6957_s26, 3584  ;;  %p6841_p0 = scmp.lt.s32.totalorder %s6957_s26, %s6957_s26 }
  0x3c   :  { %p6837_p13 = scmp.ne.s32.totalorder %s6957_s26, %s6836_s20  ;;  %p6842_p1 = scmp.lt.s32.totalorder %s6836_s20, %s6836_s20 }
  0x3e   :  { %p6843_p2 = por %p6842_p1, %p6841_p0 }
  0x40   :  { %p6844_p3 = pnand %p6843_p2, %p6837_p13 }
  0x42   :  { %6847 = shalt.err (!%p6844_p3)
}
  0x43   :  { %63 = dma.hbm_to_vmem [thread:$0]  %s8374_s3, 3584, %s6957_s26, [#allocation9], %s6870_s9, %s6870_s9, %s6871_s10  }
  0x44   :  { %6860 = dma.done.wait [#allocation3], 512  }
  0x45   :  { %6861 = vsyncadd [#allocation3], 4294966784 }
  0x46   :  { %6862 = dma.done.wait [#allocation6], 54784  }
  0x47   :  { %6863 = vsyncadd [#allocation6], 4294912512 }
  0x48   :  { %6864 = dma.done.wait [#allocation9], 3584  }
  0x49   :  { %6865 = vsyncadd [#allocation9], 4294963712  ;;  %v90_v0 = vlaneseq  ;;  %v78_v5 = vld [vmem:[#allocation2] sm:$0xff]  ;;  %v79_v6 = vld [vmem:[#allocation2 + $0x8] sm:$0xff]  ;;  %s6874_s3 = smov 36   ;;  %s6875_s9 = smov 72  }
  0x4a   :  { %v80_v7 = vld [vmem:[#allocation2 + $0x10] sm:$0xff]  ;;  %v87_v9 = vrot.slane %v79_v6, 7  ;;  %v6656_v10 = vpack.i.bf16 %v79_v6, %v78_v5  ;;  %v86_v11 = vrot.slane %v78_v5, 7  ;;  %v81_v12 = vld [vmem:[#allocation2 + $0x18] sm:$0xff]  ;;  %v124_v18 = vrot.slane %v78_v5, 1  ;;  %s6876_s10 = smov 108  }
  0x4b   :  { %v6995_v1 = vshrl.u32 %v90_v0, 7  ;;  %v88_v13 = vrot.slane %v80_v7, 7  ;;  %v89_v14 = vrot.slane %v81_v12, 7  ;;  %v6661_v15 = vpack.i.bf16 %v81_v12, %v80_v7  ;;  %v349_v49 = vld [vmem:[#allocation7] sm:$0xff]  ;;  %v350_v50 = vld [vmem:[#allocation7 + $0x8] sm:$0xff]  ;;  %v351_v52 = vld [vmem:[#allocation7 + $0x10] sm:$0xff] }
  0x4c   :  { %v126_v16 = vrot.slane %v80_v7, 1  ;;  %v155_v17 = vrot.slane %v80_v7, 2  ;;  %6657 = vrot.lane.b32.xlu0 %v6656_v10, %s6874_s3  ;;  %v125_v19 = vrot.slane %v79_v6, 1  ;;  %v153_v21 = vrot.slane %v78_v5, 2  ;;  %v352_v53 = vld [vmem:[#allocation7 + $0x18] sm:$0xff]  ;;  %v353_v56 = vld [vmem:[#allocation7 + $0x20] sm:$0xff] }
  0x4d   :  { %v6998_v2 = vadd.s32 8, %v6995_v1  ;;  %v7001_v3 = vadd.s32 24, %v6995_v1  ;;  %vm92_vm0 = vcmp.lt.s32.totalorder %v6995_v1, 1  ;;  %vm128_vm1 = vcmp.lt.s32.totalorder %v6995_v1, 7  ;;  %6662 = vrot.lane.b32.xlu1 %v6661_v15, %s6874_s3  ;;  %v354_v57 = vld [vmem:[#allocation7 + $0x28] sm:$0xff]  ;;  %v355_v59 = vld [vmem:[#allocation7 + $0x30] sm:$0xff] }
  0x4e   :  { %vm8381_vm2 = vcmp.lt.s32.totalorder %v6995_v1, 6  ;;  %v154_v22 = vrot.slane %v79_v6, 2  ;;  %v127_v24 = vrot.slane %v81_v12, 1  ;;  %v130_v26 = vsel %vm128_vm1, %v125_v19, %v126_v16  ;;  %v356_v60 = vld [vmem:[#allocation7 + $0x38] sm:$0xff]  ;;  %v357_v62 = vld [vmem:[#allocation7 + $0x40] sm:$0xff]  ;;  %v358_v63 = vld [vmem:[#allocation7 + $0x48] sm:$0xff] }
  0x4f   :  { %v7005_v4 = vand.u32 15, %v6998_v2  ;;  %v7010_v8 = vand.u32 15, %v7001_v3  ;;  %v131_v27 = vsel %vm128_vm1, %v124_v18, %v125_v19  ;;  %v156_v28 = vrot.slane %v81_v12, 2  ;;  %v359_v6 = vld [vmem:[#allocation7 + $0x50] sm:$0xff]  ;;  %v360_v7 = vld [vmem:[#allocation7 + $0x58] sm:$0xff]  ;;  %v361_v10 = vld [vmem:[#allocation7 + $0x60] sm:$0xff] }
  0x50   :  { %v159_v30 = vsel %vm8381_vm2, %v154_v22, %v155_v17  ;;  %v160_v31 = vsel %vm8381_vm2, %v153_v21, %v154_v22  ;;  %v129_v34 = vsel %vm128_vm1, %v126_v16, %v127_v24  ;;  %v132_v35 = vsel %vm128_vm1, %v127_v24, %v124_v18  ;;  %s6879_s21 = smov 32   ;;  %s6880_s22 = smov 64  }
  0x51   :  { %v7013_v20 = vadd.s32 1, %v7005_v4  ;;  %v7016_v23 = vadd.s32 2, %v7005_v4  ;;  %v7019_v25 = vadd.s32 1, %v7010_v8  ;;  %v161_v38 = vsel %vm8381_vm2, %v156_v28, %v153_v21  ;;  %s6883_s3 = smov 0.0   ;;  %s4968_s29 = sshll.u32 %s8377_s6, 4  ;;  %s4969_s29 = int_to_ptr.vmem [resolvable:$true] %s4968_s29 }
  0x52   :  { %v7045_v39 = vadd.s32 2, %v7010_v8  ;;  %v7049_v40 = vsel %vm92_vm0, %v86_v11, %v87_v9  ;;  %v158_v42 = vsel %vm8381_vm2, %v155_v17, %v156_v28  ;;  %v7055_v43 = vsel %vm92_vm0, %v89_v14, %v86_v11  ;;  %v362_v11 = vld [vmem:[#allocation7 + $0x68] sm:$0xff]  ;;  %2170 = sst [smem:[#allocation10 + $0x5]] %s6883_s3  ;;  %s6848_s8 = scalar_lea.vmem %s4969_s29, 16 }
  0x53   :  { %8411 = vst [vmem:[#allocation15_spill] sm:$0xff] %v7016_v23  ;;  %vm142_vm3 = vcmp.lt.s32.totalorder %v7013_v20, 16  ;;  %vm8379_vm4 = vcmp.lt.s32.totalorder %v7016_v23, 16  ;;  %vm8382_vm5 = vcmp.lt.s32.totalorder %v7019_v25, 16  ;;  %v7059_v44 = vsel %vm92_vm0, %v88_v13, %v89_v14  ;;  %v364_v14 = vld [vmem:[#allocation7 + $0x78] sm:$0xff]  ;;  %2172 = sst [smem:[#allocation10 + $0x6]] %s6883_s3  ;;  %p6849_p4 = scmp.ne.s32.totalorder %s4969_s29, %s6848_s8 }
  0x54   :  { %v150_v29 = vsel %vm142_vm3, %v130_v26, 0.0  ;;  %v179_v33 = vsel %vm8379_vm4, %v159_v30, 0.0  ;;  %v152_v37 = vsel %vm8382_vm5, %v132_v35, 0.0  ;;  %vm8378_vm6 = vcmp.lt.s32.totalorder %v7045_v39, 16  ;;  %2174 = sst [smem:[#allocation10 + $0x7]] %s6883_s3  ;;  %p6853_p5 = scmp.lt.s32.totalorder %s4969_s29, %s4969_s29 }
  0x55   :  { %v6666_v32 = vpack.i.bf16 %v150_v29, %v131_v27  ;;  %v6671_v36 = vpack.i.bf16 %v179_v33, %v160_v31  ;;  %v6676_v41 = vpack.i.bf16 %v152_v37, %v129_v34  ;;  %v7064_v45 = vsel %vm92_vm0, %v87_v9, %v88_v13  ;;  %v363_v13 = vld [vmem:[#allocation7 + $0x70] sm:$0xff]  ;;  %4955 = sst [smem:[#allocation10 + $0xd]] %s6883_s3  ;;  %p6854_p6 = scmp.lt.s32.totalorder %s6848_s8, %s6848_s8 }
  0x56   :  { %v181_v46 = vsel %vm8378_vm6, %v161_v38, 0.0  ;;  %v8394_v47 = vmov 0.0   ;;  %v5911_v51 = vpack.c.bf16 %v350_v50, %v349_v49  ;;  %v8397_v54 = vmov 0.0|0.0   ;;  %4957 = sst [smem:[#allocation10 + $0xe]] %s6883_s3 }
  0x57   :  { %6667 = vrot.lane.b32.xlu0 %v6666_v32, %s6875_s9  ;;  %6672 = vrot.lane.b32.xlu1 %v6671_v36, %s6876_s10  ;;  %v6681_v48 = vpack.i.bf16 %v181_v46, %v158_v42  ;;  %v5914_v55 = vpack.c.bf16 %v352_v53, %v351_v52  ;;  %v5917_v58 = vpack.c.bf16 %v354_v57, %v353_v56  ;;  %v7079_v16 = vadd.s32 16, %v6995_v1  ;;  %4959 = sst [smem:[#allocation10 + $0xf]] %s6883_s3  ;;  %p6855_p7 = por %p6854_p6, %p6853_p5 }
  0x58   :  { %336 = vmatprep.mubr.f32.mxu0 %v8394_v47  ;;  %5910 = vmatprep.subr.bf16.mxu1 %v8397_v54  ;;  %v5920_v61 = vpack.c.bf16 %v356_v60, %v355_v59  ;;  %v5923_v5 = vpack.c.bf16 %v358_v63, %v357_v62  ;;  %v5926_v9 = vpack.c.bf16 %v360_v7, %v359_v6  ;;  %v7082_v17 = vand.u32 15, %v6995_v1 }
  0x59   :  { %5912 = vmatpush1.bf16.msra.mxu1 %v5911_v51  ;;  %v5929_v12 = vpack.c.bf16 %v362_v11, %v361_v10  ;;  %v5932_v15 = vpack.c.bf16 %v364_v14, %v363_v13  ;;  %v7085_v18 = vand.u32 15, %v7079_v16  ;;  %v7095_v26 = vand.u32 127, %v90_v0  ;;  %p6856_p8 = pnand %p6855_p7, %p6849_p4 }
  0x5a   :  { %5913 = vmatprep.subr.bf16.mxu1 %v8397_v54  ;;  %v7088_v19 = vadd.s32 4294967295, %v7082_v17  ;;  %v7098_v27 = vand.u32 7, %v6995_v1  ;;  %vm8380_vm8 = vcmask 293888   ;;  %vm235_vm9 = vcmask 588800  }
  0x5b   :  { %6677 = vrot.lane.b32.xlu0 %v6676_v41, %s6875_s9  ;;  %6682 = vrot.lane.b32.xlu1 %v6681_v48, %s6876_s10  ;;  %v7091_v22 = vadd.s32 4294967295, %v7085_v18  ;;  %vm240_vm11 = vcmask 883712   ;;  %v8391_v31 = vshra.s32 %v6995_v1, 3  ;;  %v249_v0 = vshra.s32 %v7095_v26, 4 }
  0x5c   :  { %vm8393_vm7 = vcmp.ge.s32.totalorder %v7088_v19, 0  ;;  %v252_v33 = vand.u32 15, %v7095_v26  ;;  %v255_v34 = vmul.u32 2, %v7098_v27  ;;  %v7109_v35 = vand.u32 7, %v6998_v2 }
  0x5d   :  { %5915 = vmatpush1.bf16.msra.mxu1 %v5914_v55  ;;  %8412 = vst [vmem:[#allocation16_spill] sm:$0xff] %v7091_v22  ;;  %v120_v30 = vsel %vm8393_vm7, %v7055_v43, 0.0  ;;  %vm8383_vm10 = vcmp.ge.s32.totalorder %v7091_v22, 0  ;;  %vm7124_vm12 = vcmp.eq.s32.totalorder %v8391_v31, %v249_v0 }
  0x5e   :  { %5916 = vmatprep.subr.bf16.mxu1 %v8397_v54  ;;  %v122_v50 = vsel %vm8383_vm10, %v7064_v45, 0.0  ;;  %vm7131_vm13 = vcmp.eq.s32.totalorder %v252_v33, %v255_v34  ;;  %v256_v6 = vmul.u32 2, %v7109_v35  ;;  %v505_v34 = vld [vmem:[#allocation7 + $0x90] sm:$0xff] }
  0x5f   :  { %vm259_vm14 = vmand %vm7124_vm12, %vm7131_vm13 }
  0x60   :  { %vm258_vm6 = vcmp.eq.s32.totalorder %v252_v33, %v256_v6 }
  0x61   :  { %5918 = vmatpush1.bf16.msra.mxu1 %v5917_v58  ;;  %v8390_v58 = vshra.s32 %v6998_v2, 3 }
  0x62   :  { %5919 = vmatprep.subr.bf16.mxu1 %v8397_v54 }
  0x63   :  { %vm251_vm15 = vcmp.eq.s32.totalorder %v8390_v58, %v249_v0 }
  0x64   :  { %vm260_vm4 = vmand %vm251_vm15, %vm258_vm6  ;;  %vm8384_vm15 = vcmask 785408  }
  0x65   :  { %5921 = vmatpush1.bf16.msra.mxu1 %v5920_v61 }
  0x66   :  { %5922 = vmatprep.subr.bf16.mxu1 %v8397_v54 }
  0x69   :  { %5924 = vmatpush1.bf16.msra.mxu1 %v5923_v5 }
  0x6a   :  { %5925 = vmatprep.subr.bf16.mxu1 %v8397_v54 }
  0x6d   :  { %5927 = vmatpush1.bf16.msra.mxu1 %v5926_v9 }
  0x6e   :  { %5928 = vmatprep.subr.bf16.mxu1 %v8397_v54 }
  0x71   :  { %5930 = vmatpush1.bf16.msra.mxu1 %v5929_v12 }
  0x72   :  { %5931 = vmatprep.subr.bf16.mxu1 %v8397_v54 }
  0x75   :  { %5933 = vmatpush1.bf16.msra.mxu1 %v5932_v15  ;;  %v4982_v15 = vsel %vm259_vm14, 1.0, %v8394_v47  ;;  %vm502_vm14 = vcmask 523264  }
  0x76   :  { %5934 = vmatprep.subr.bf16.mxu1 %v8397_v54 }
  0xbe   :  { %v6658_v21 = vpop.permute.xlu0 %6657 }
  0xbf   :  { %v6663_v24 = vpop.permute.xlu1 %6662  ;;  %v6660_v28 = vunpack.i.h.bf16 %v6658_v21  ;;  %v6659_v29 = vunpack.i.l.bf16 %v6658_v21  ;;  %v4983_v21 = vsel %vm260_vm4, 1.0, %v8394_v47 }
  0xc0   :  { %v6665_v36 = vunpack.i.h.bf16 %v6663_v24  ;;  %v6664_v37 = vunpack.i.l.bf16 %v6663_v24  ;;  %v365_v24 = vld [vmem:[#allocation7 + $0x80] sm:$0xff] }
  0xc1   :  { %v231_v43 = vsel %vm8380_vm8, %v120_v30, %v6659_v29  ;;  %v232_v46 = vsel %vm8380_vm8, %v7049_v40, %v6660_v28  ;;  %v366_v28 = vld [vmem:[#allocation7 + $0x88] sm:$0xff] }
  0xc2   :  { %v233_v45 = vsel %vm8380_vm8, %v122_v50, %v6664_v37  ;;  %v234_v62 = vsel %vm8380_vm8, %v7059_v44, %v6665_v36  ;;  %v5935_v29 = vpack.c.bf16 %v366_v28, %v365_v24  ;;  %v506_v36 = vld [vmem:[#allocation7 + $0x98] sm:$0xff]  ;;  %v507_v37 = vld [vmem:[#allocation7 + $0xa0] sm:$0xff]  ;;  %v512_v50 = vld [vmem:[#allocation7 + $0xc8] sm:$0xff] }
  0xc4   :  { %5936 = vmatpush1.bf16.msra.mxu1 %v5935_v29 }
  0xc9   :  { %v6668_v32 = vpop.permute.xlu0 %6667  ;;  %v6673_v42 = vpop.permute.xlu1 %6672 }
  0xca   :  { %v6670_v38 = vunpack.i.h.bf16 %v6668_v32  ;;  %v6669_v41 = vunpack.i.l.bf16 %v6668_v32  ;;  %v6675_v48 = vunpack.i.h.bf16 %v6673_v42  ;;  %v6674_v49 = vunpack.i.l.bf16 %v6673_v42 }
  0xcc   :  { %v236_v51 = vsel %vm235_vm9, %v231_v43, %v6669_v41  ;;  %v237_v52 = vsel %vm235_vm9, %v232_v46, %v6670_v38  ;;  %v5902_v55 = vpack.c.bf16 %v6675_v48, %v6674_v49  ;;  %v5937_v38 = vpack.c.bf16 %v506_v36, %v505_v34  ;;  %v508_v41 = vld [vmem:[#allocation7 + $0xa8] sm:$0xff]  ;;  %v509_v43 = vld [vmem:[#allocation7 + $0xb0] sm:$0xff]  ;;  %v510_v46 = vld [vmem:[#allocation7 + $0xb8] sm:$0xff] }
  0xcd   :  { %v6678_v53 = vpop.permute.xlu0 %6677  ;;  %v241_v56 = vsel %vm240_vm11, %v236_v51, %v6674_v49  ;;  %v242_v57 = vsel %vm240_vm11, %v237_v52, %v6675_v48  ;;  %v6683_v63 = vpop.permute.xlu1 %6682  ;;  %v5941_v42 = vpack.c.bf16 %v508_v41, %v507_v37  ;;  %v5945_v48 = vpack.c.bf16 %v510_v46, %v509_v43  ;;  %v511_v49 = vld [vmem:[#allocation7 + $0xc0] sm:$0xff]  ;;  %v513_v52 = vld [vmem:[#allocation7 + $0xd0] sm:$0xff] }
  0xce   :  { %v6680_v59 = vunpack.i.h.bf16 %v6678_v53  ;;  %v6679_v40 = vunpack.i.l.bf16 %v6678_v53  ;;  %v5904_v60 = vpack.c.bf16 %v242_v57, %v241_v56  ;;  %5903 = vmatprep.subr.bf16.mxu0 %v5902_v55  ;;  %v6685_v10 = vunpack.i.h.bf16 %v6683_v63  ;;  %v514_v53 = vld [vmem:[#allocation7 + $0xd8] sm:$0xff]  ;;  %v515_v56 = vld [vmem:[#allocation7 + $0xe0] sm:$0xff]  ;;  %v516_v57 = vld [vmem:[#allocation7 + $0xe8] sm:$0xff] }
  0xcf   :  { %v6684_v11 = vunpack.i.l.bf16 %v6683_v63  ;;  %v5949_v51 = vpack.c.bf16 %v512_v50, %v511_v49  ;;  %v5953_v55 = vpack.c.bf16 %v514_v53, %v513_v52  ;;  %v607_v63 = vld [vmem:[#allocation7 + $0xf8] sm:$0xff]  ;;  %v7199_v41 = vadd.s32 4294967295, %v7109_v35 }
  0xd0   :  { %v239_v7 = vsel %vm235_vm9, %v234_v62, %v6680_v59  ;;  %v238_v9 = vsel %vm235_vm9, %v233_v45, %v6679_v40  ;;  %5905 = vmatpush1.bf16.msra.mxu0 %v5904_v60  ;;  %vm8385_vm9 = vcmask 261120   ;;  %v5957_v59 = vpack.c.bf16 %v516_v57, %v515_v56  ;;  %v4986_v40 = vld [vmem:[#allocation8] ss:$0 sm:$0xff]  ;;  %v606_v62 = vld [vmem:[#allocation7 + $0xf0] sm:$0xff]  ;;  %v609_v57 = vld [vmem:[#allocation7 + $0x108] sm:$0xff] }
  0xd1   :  { %v5906_v12 = vpack.c.bf16 %v6685_v10, %v6684_v11  ;;  %v243_v13 = vsel %vm240_vm11, %v238_v9, %v6684_v11  ;;  %v244_v44 = vsel %vm240_vm11, %v239_v7, %v6685_v10  ;;  %vm372_vm11 = vcmask 130048   ;;  %v608_v56 = vld [vmem:[#allocation7 + $0x100] sm:$0xff]  ;;  %vm7223_vm8 = vmpackc.low %vm8385_vm9, %vm8385_vm9 }
  0xd2   :  { %v5908_v14 = vpack.c.bf16 %v244_v44, %v243_v13  ;;  %v5961_v6 = vpack.c.bf16 %v607_v63, %v606_v62  ;;  %v7169_v9 = vadd.s32 1, %v7109_v35  ;;  %v7172_v10 = vadd.s32 1, %v7098_v27 }
  0xd3   :  { %5907 = vmatprep.subr.bf16.mxu0 %v5906_v12  ;;  %vm8386_vm13 = vcmp.ge.s32.totalorder %v7199_v41, 0 }
  0xd4   :  { %5909 = vmatpush1.bf16.msra.mxu0 %v5908_v14  ;;  %vm8388_vm4 = vcmp.lt.s32.totalorder %v7169_v9, 8  ;;  %vm8389_vm6 = vcmp.lt.s32.totalorder %v7172_v10, 8 }
  0xd5   :  { %5938 = vmatprep.subr.bf16.mxu0 %v5937_v38 }
  0xd7   :  { %4984 = vmatmul.mubr.msk.f32.vlgmr.msra.gmra.mrb[0].mxu0 %vm8385_vm9, %v4982_v15 }
  0xd8   :  { %342 = vmatprep.mubr.f32.mxu0 %v8394_v47  ;;  %5940 = vmatpush3.bf16.msra.mxu0 %v5937_v38  ;;  %v7196_v38 = vadd.s32 4294967295, %v7098_v27 }
  0xd9   :  { %5942 = vmatprep.subr.bf16.mxu0 %v5941_v42 }
  0xda   :  { %vm8387_vm12 = vcmp.ge.s32.totalorder %v7196_v38, 0 }
  0xdb   :  { %4985 = vmatmul.mubr.msk.f32.gmra.mrb[2].mxu0 %vm8385_vm9, %v4983_v21 }
  0xdc   :  { %5944 = vmatpush3.bf16.msra.mxu0 %v5941_v42 }
  0xdd   :  { %5946 = vmatprep.subr.bf16.mxu0 %v5945_v48 }
  0xe0   :  { %5948 = vmatpush3.bf16.msra.mxu0 %v5945_v48 }
  0xe1   :  { %5950 = vmatprep.subr.bf16.mxu0 %v5949_v51 }
  0xe4   :  { %5952 = vmatpush3.bf16.msra.mxu0 %v5949_v51 }
  0xe5   :  { %5954 = vmatprep.subr.bf16.mxu0 %v5953_v55 }
  0xe8   :  { %5956 = vmatpush3.bf16.msra.mxu0 %v5953_v55 }
  0xe9   :  { %5958 = vmatprep.subr.bf16.mxu0 %v5957_v59 }
  0xec   :  { %5960 = vmatpush3.bf16.msra.mxu0 %v5957_v59  ;;  %v5965_v59 = vpack.c.bf16 %v609_v57, %v608_v56  ;;  %v830_v57 = vld [vmem:[%s8375_s4 + $0x10] sm:$0xff] }
  0xed   :  { %5962 = vmatprep.subr.bf16.mxu0 %v5961_v6 }
 0x1aa   :  { %v7151_v30 = vpop.f32.mrb[0].mxu0 }
 0x1ab   :  { %v7153_v32 = vpop.f32.mrb[1].mxu0 }
 0x1ac   :  { %4987 = vmatprep.mubr.msk.f32.mxu1 %vm372_vm11, %v7153_v32 }
 0x1ad   :  { %444 = vmatmul.mubr.f32.vlgmr.msra.gmra.mrb[0].mxu1 %v7151_v30 }
 0x1ae   :  { %v7158_v0 = vpop.f32.mrb[2].mxu0 }
 0x1af   :  { %v7160_v33 = vpop.f32.mrb[3].mxu0 }
 0x1b0   :  { %4988 = vmatprep.mubr.msk.f32.mxu1 %vm372_vm11, %v7160_v33 }
 0x1b1   :  { %449 = vmatmul.mubr.f32.gmra.mrb[2].mxu1 %v7158_v0 }
 0x280   :  { %v445_v60 = vpop.f32.mrb[0].mxu1 }
 0x281   :  { %v7165_v61 = vadd.f32 %v4986_v40, %v445_v60  ;;  %v447_v45 = vpop.f32.mrb[1].mxu1 }
 0x283   :  { %v454_v5 = vmax.f32 %v7165_v61, 0.0 }
 0x284   :  { %v450_v7 = vpop.f32.mrb[2].mxu1 }
 0x285   :  { %v7174_v11 = vadd.f32 %v4986_v40, %v450_v7  ;;  %486 = vrot.lane.b32.xlu0 %v454_v5, %s6879_s21  ;;  %v452_v12 = vpop.f32.mrb[3].mxu1  ;;  %v456_v44 = vrot.slane %v454_v5, 7  ;;  %v470_v14 = vrot.slane %v454_v5, 1  ;;  %v4989_v40 = vld [vmem:[#allocation8 + $0x8] ss:$0 sm:$0xff] }
 0x286   :  { %v730_v12 = vld [vmem:[#allocation7 + $0x110] sm:$0xff] }
 0x287   :  { %v455_v13 = vmax.f32 %v7174_v11, 0.0 }
 0x289   :  { %v457_v15 = vrot.slane %v455_v13, 7  ;;  %v471_v21 = vrot.slane %v455_v13, 1  ;;  %488 = vrot.lane.b32.xlu1 %v455_v13, %s6879_s21  ;;  %v731_v13 = vld [vmem:[#allocation7 + $0x118] sm:$0xff] }
 0x28b   :  { %v473_v24 = vsel %vm128_vm1, %v471_v21, %v470_v14  ;;  %v472_v28 = vsel %vm128_vm1, %v470_v14, %v471_v21  ;;  %v459_v29 = vsel %vm92_vm0, %v457_v15, %v456_v44  ;;  %v458_v34 = vsel %vm92_vm0, %v456_v44, %v457_v15  ;;  %v732_v44 = vld [vmem:[#allocation7 + $0x120] sm:$0xff]  ;;  %v733_v14 = vld [vmem:[#allocation7 + $0x128] sm:$0xff]  ;;  %v734_v21 = vld [vmem:[#allocation7 + $0x130] sm:$0xff] }
 0x28c   :  { %v483_v36 = vsel %vm8388_vm4, %v473_v24, 0.0  ;;  %v482_v37 = vsel %vm8389_vm6, %v472_v28, 0.0  ;;  %v468_v46 = vsel %vm8387_vm12, %v459_v29, 0.0  ;;  %v469_v48 = vsel %vm8386_vm13, %v458_v34, 0.0  ;;  %v735_v24 = vld [vmem:[#allocation7 + $0x138] sm:$0xff]  ;;  %v736_v29 = vld [vmem:[#allocation7 + $0x140] sm:$0xff] }
 0x28d   :  { %496 = vrot.lane.b32.xlu1 %v483_v36, %s6880_s22  ;;  %494 = vrot.lane.b32.xlu0 %v482_v37, %s6880_s22  ;;  %v5973_v15 = vpack.c.bf16 %v733_v14, %v732_v44  ;;  %v5977_v28 = vpack.c.bf16 %v735_v24, %v734_v21  ;;  %v737_v34 = vld [vmem:[#allocation7 + $0x148] sm:$0xff]  ;;  %v738_v37 = vld [vmem:[#allocation7 + $0x150] sm:$0xff] }
 0x28e   :  { %v5981_v36 = vpack.c.bf16 %v737_v34, %v736_v29  ;;  %v834_v34 = vld [vmem:[%s8375_s4 + $0x30] sm:$0xff] }
 0x2f7   :  { %v487_v42 = vpop.permute.xlu0 %486 }
 0x2f8   :  { %v500_v49 = vsel %vm8385_vm9, %v468_v46, %v487_v42  ;;  %v739_v42 = vld [vmem:[#allocation7 + $0x158] sm:$0xff]  ;;  %v740_v46 = vld [vmem:[#allocation7 + $0x160] sm:$0xff] }
 0x2fb   :  { %v489_v43 = vpop.permute.xlu1 %488 }
 0x2fc   :  { %v501_v50 = vsel %vm8385_vm9, %v469_v48, %v489_v43  ;;  %v5985_v43 = vpack.c.bf16 %v739_v42, %v738_v37  ;;  %v741_v48 = vld [vmem:[#allocation7 + $0x168] sm:$0xff] }
 0x2ff   :  { %v497_v51 = vpop.permute.xlu1 %496  ;;  %v495_v52 = vpop.permute.xlu0 %494 }
 0x300   :  { %v504_v53 = vsel %vm502_vm14, %v501_v50, %v497_v51  ;;  %v503_v55 = vsel %vm502_vm14, %v500_v49, %v495_v52  ;;  %v5989_v49 = vpack.c.bf16 %v741_v48, %v740_v46  ;;  %v4992_v50 = vld [vmem:[#allocation8 + $0x10] ss:$0 sm:$0xff]  ;;  %v828_v51 = vld [vmem:[%s8375_s4] sm:$0xff]  ;;  %v829_v52 = vld [vmem:[%s8375_s4 + $0x8] sm:$0xff] }
 0x301   :  { %5477 = vmatprep.mubr.msk.f32.mxu0 %vm8384_vm15, %v503_v55  ;;  %v5993_v56 = vpack.c.bf16 %v829_v52, %v828_v51 }
 0x302   :  { %5478 = vmatmul.mubr.msk.f32.vlgmr.msra.gmra.mrb[4].mxu0 %vm8384_vm15, %v504_v53  ;;  %v5055_v53 = vld [vmem:[#allocation8 + $0x88] ss:$0 sm:$0xff] }
 0x303   :  { %5964 = vmatpush3.bf16.msra.mxu0 %v5961_v6  ;;  %v5969_v6 = vpack.c.bf16 %v731_v13, %v730_v12  ;;  %v833_v12 = vld [vmem:[%s8375_s4 + $0x28] sm:$0xff] }
 0x304   :  { %5966 = vmatprep.subr.bf16.mxu0 %v5965_v59 }
 0x305   :  { %5970 = vmatprep.subr.bf16.mxu1 %v5969_v6 }
 0x306   :  { %5972 = vmatpush3.bf16.msra.mxu1 %v5969_v6 }
 0x307   :  { %5968 = vmatpush3.bf16.msra.mxu0 %v5965_v59  ;;  %5974 = vmatprep.subr.bf16.mxu1 %v5973_v15  ;;  %v831_v59 = vld [vmem:[%s8375_s4 + $0x18] sm:$0xff] }
 0x308   :  { %5995 = vmatprep.subr.msk.bf16.mxu0 %vm7223_vm8, %v5993_v56 }
 0x30a   :  { %5976 = vmatpush3.bf16.msra.mxu1 %v5973_v15 }
 0x30b   :  { %5978 = vmatprep.subr.bf16.mxu1 %v5977_v28 }
 0x30e   :  { %5980 = vmatpush3.bf16.msra.mxu1 %v5977_v28 }
 0x30f   :  { %5982 = vmatprep.subr.bf16.mxu1 %v5981_v36 }
 0x312   :  { %5984 = vmatpush3.bf16.msra.mxu1 %v5981_v36  ;;  %v835_v36 = vld [vmem:[%s8375_s4 + $0x38] sm:$0xff] }
 0x313   :  { %5986 = vmatprep.subr.bf16.mxu1 %v5985_v43  ;;  %v6011_v37 = vpack.c.bf16 %v835_v36, %v834_v34 }
 0x316   :  { %5988 = vmatpush3.bf16.msra.mxu1 %v5985_v43 }
 0x317   :  { %5990 = vmatprep.subr.bf16.mxu1 %v5989_v49 }
 0x31a   :  { %5992 = vmatpush3.bf16.msra.mxu1 %v5989_v49 }
 0x31b   :  { %6018 = vmatprep.subr.bf16.mxu1 %v5993_v56 }
 0x3d5   :  { %v5479_v60 = vpop.f32.mrb[4].mxu0 }
 0x3d6   :  { %v601_v45 = vadd.f32 %v5479_v60, %v4989_v40  ;;  %v595_v62 = vpop.f32.mrb[5].mxu0 }
 0x3d7   :  { %v596_v63 = vadd.f32 %v4989_v40, %v595_v62 }
 0x3d8   :  { %v605_v7 = vmax.f32 %v601_v45, 0.0  ;;  %v5999_v45 = vpack.c.bf16 %v831_v59, %v830_v57  ;;  %v4995_v59 = vld [vmem:[#allocation8 + $0x18] ss:$0 sm:$0xff] }
 0x3d9   :  { %v604_v5 = vmax.f32 %v596_v63, 0.0 }
 0x3db   :  { %5488 = vmatprep.mubr.msk.f32.mxu0 %vm8385_vm9, %v604_v5 }
 0x3dc   :  { %5489 = vmatmul.mubr.msk.f32.vlgmr.msra.gmra.mrb[6].mxu0 %vm8385_vm9, %v605_v7  ;;  %v832_v7 = vld [vmem:[%s8375_s4 + $0x20] sm:$0xff] }
 0x3dd   :  { %5998 = vmatpush3.bf16.xpose.msk.msra.mxu0 %vm7223_vm8, %v5993_v56 }
 0x3de   :  { %6001 = vmatprep.subr.msk.bf16.mxu0 %vm7223_vm8, %v5999_v45 }
 0x3e5   :  { %6004 = vmatpush3.bf16.xpose.msk.msra.mxu0 %vm7223_vm8, %v5999_v45 }
 0x4af   :  { %v5490_v55 = vpop.f32.mrb[6].mxu0 }
 0x4b0   :  { %v693_v40 = vadd.f32 %v5490_v55, %v4992_v50  ;;  %v687_v60 = vpop.f32.mrb[7].mxu0 }
 0x4b1   :  { %v688_v62 = vadd.f32 %v4992_v50, %v687_v60 }
 0x4b2   :  { %v697_v63 = vadd.f32 %v693_v40, %v7174_v11 }
 0x4b3   :  { %v696_v5 = vadd.f32 %v688_v62, %v7165_v61  ;;  %v6005_v61 = vpack.c.bf16 %v833_v12, %v832_v7 }
 0x4b4   :  { %v699_v13 = vrot.slane %v697_v63, 7  ;;  %v705_v44 = vrot.slane %v697_v63, 1  ;;  %714 = vrot.lane.b32.xlu1 %v697_v63, %s6879_s21 }
 0x4b5   :  { %v698_v11 = vrot.slane %v696_v5, 7  ;;  %v704_v6 = vrot.slane %v696_v5, 1  ;;  %712 = vrot.lane.b32.xlu0 %v696_v5, %s6879_s21  ;;  %6007 = vmatprep.subr.msk.bf16.mxu0 %vm7223_vm8, %v6005_v61 }
 0x4b6   :  { %6010 = vmatpush3.bf16.xpose.msk.msra.mxu0 %vm7223_vm8, %v6005_v61 }
 0x4b7   :  { %v707_v14 = vsel %vm128_vm1, %v705_v44, %v704_v6  ;;  %v706_v15 = vsel %vm128_vm1, %v704_v6, %v705_v44  ;;  %v700_v21 = vsel %vm92_vm0, %v698_v11, %v699_v13  ;;  %v701_v24 = vsel %vm92_vm0, %v699_v13, %v698_v11  ;;  %6013 = vmatprep.subr.msk.bf16.mxu0 %vm7223_vm8, %v6011_v37 }
 0x4b8   :  { %v709_v28 = vsel %vm8388_vm4, %v707_v14, 0.0  ;;  %v708_v29 = vsel %vm8389_vm6, %v706_v15, 0.0  ;;  %v703_v46 = vsel %vm8386_vm13, %v700_v21, 0.0  ;;  %v702_v48 = vsel %vm8387_vm12, %v701_v24, 0.0 }
 0x4b9   :  { %722 = vrot.lane.b32.xlu1 %v709_v28, %s6880_s22  ;;  %720 = vrot.lane.b32.xlu0 %v708_v29, %s6880_s22 }
 0x4be   :  { %6016 = vmatpush3.bf16.xpose.msk.msra.mxu0 %vm7223_vm8, %v6011_v37 }
 0x526   :  { %v715_v42 = vpop.permute.xlu1 %714 }
 0x527   :  { %v713_v43 = vpop.permute.xlu0 %712  ;;  %v727_v49 = vsel %vm8385_vm9, %v703_v46, %v715_v42 }
 0x528   :  { %v726_v50 = vsel %vm8385_vm9, %v702_v48, %v713_v43 }
 0x52b   :  { %v723_v51 = vpop.permute.xlu1 %722  ;;  %v721_v52 = vpop.permute.xlu0 %720 }
 0x52c   :  { %v729_v55 = vsel %vm502_vm14, %v727_v49, %v723_v51  ;;  %v728_v57 = vsel %vm502_vm14, %v726_v50, %v721_v52 }
 0x52d   :  { %5515 = vmatprep.mubr.msk.f32.mxu1 %vm8384_vm15, %v728_v57 }
 0x52e   :  { %5516 = vmatmul.mubr.msk.f32.vlgmr.msra.gmra.mrb[4].mxu1 %vm8384_vm15, %v729_v55 }
 0x52f   :  { %6020 = vmatpush3.bf16.msra.mxu1 %v5993_v56 }
 0x530   :  { %6022 = vmatprep.subr.bf16.mxu1 %v5999_v45 }
 0x533   :  { %6024 = vmatpush3.bf16.msra.mxu1 %v5999_v45  ;;  %v5008_v45 = vld [vmem:[#allocation8 + $0x48] ss:$0 sm:$0xff] }
 0x534   :  { %6026 = vmatprep.subr.bf16.mxu1 %v6005_v61 }
 0x537   :  { %6028 = vmatpush3.bf16.msra.mxu1 %v6005_v61 }
 0x538   :  { %6030 = vmatprep.subr.bf16.mxu1 %v6011_v37 }
 0x53b   :  { %6032 = vmatpush3.bf16.msra.mxu1 %v6011_v37 }
 0x53c   :  { %6057 = vmatprep.subr.bf16.mxu1 %v8397_v54 }
 0x601   :  { %v5517_v40 = vpop.f32.mrb[4].mxu1 }
 0x602   :  { %v819_v60 = vpop.f32.mrb[5].mxu1  ;;  %v7292_v63 = vadd.f32 %v5517_v40, %v4995_v59 }
 0x603   :  { %v7290_v62 = vadd.f32 %v4995_v59, %v819_v60 }
 0x605   :  { %5534 = vmatprep.mubr.msk.f32.mxu0 %vm8385_vm9, %v7290_v62 }
 0x606   :  { %5535 = vmatmul.mubr.msk.f32.vlgmr.msra.gmra.mrb[8].mxu0 %vm8385_vm9, %v7292_v63 }
 0x6d9   :  { %v5536_v56 = vpop.f32.mrb[8].mxu0 }
 0x6da   :  { %v943_v5 = vmul.f32 2.0, %v5536_v56  ;;  %v932_v7 = vpop.f32.mrb[9].mxu0 }
 0x6db   :  { %v942_v12 = vmul.f32 2.0, %v932_v7 }
 0x6dc   :  { %v949_v13 = vsub.f32 %v5008_v45, %v943_v5 }
 0x6dd   :  { %v948_v44 = vsub.f32 %v5008_v45, %v942_v12 }
 0x6de   :  { %v953_v11 = vsel %vm502_vm14, %v949_v13, inf }
 0x6df   :  { %954 = vmin.xlane.f32.xlu1 %v953_v11  ;;  %v950_v6 = vsel %vm502_vm14, %v948_v44, inf  ;;  %v1128_v11 = vld [vmem:[#allocation7 + $0x170] sm:$0xff] }
 0x6e0   :  { %951 = vmin.xlane.f32.xlu0 %v950_v6  ;;  %v1129_v6 = vld [vmem:[#allocation7 + $0x178] sm:$0xff] }
 0x76c   :  { %v955_v61 = vpop.xlane.xlu1 %954 }
 0x76d   :  { %vm957_vm2 = vcmp.le.f32.partialorder %v949_v13, %v955_v61  ;;  %v952_v14 = vpop.xlane.xlu0 %951  ;;  %v1130_v61 = vld [vmem:[#allocation7 + $0x180] sm:$0xff] }
 0x76e   :  { %v959_v15 = vsel %vm957_vm2, %v7095_v26, 64  ;;  %vm956_vm5 = vcmp.le.f32.partialorder %v948_v44, %v952_v14  ;;  %v6033_v14 = vpack.c.bf16 %v1129_v6, %v1128_v11 }
 0x76f   :  { %v958_v21 = vsel %vm956_vm5, %v7095_v26, 64  ;;  %v975_v24 = vsel %vm502_vm14, %v959_v15, 2147483647  ;;  %v1131_v15 = vld [vmem:[#allocation7 + $0x188] sm:$0xff] }
 0x770   :  { %v960_v28 = vsel %vm502_vm14, %v958_v21, 2147483647  ;;  %v977_v36 = vshra.s32 %v975_v24, 16  ;;  %v976_v48 = vand.u32 65535, %v975_v24  ;;  %v6037_v21 = vpack.c.bf16 %v1131_v15, %v1130_v61  ;;  %v1132_v24 = vld [vmem:[#allocation7 + $0x190] sm:$0xff]  ;;  %6034 = vmatprep.subr.bf16.mxu0 %v6033_v14 }
 0x771   :  { %v962_v29 = vshra.s32 %v960_v28, 16  ;;  %v961_v42 = vand.u32 65535, %v960_v28  ;;  %v1133_v28 = vld [vmem:[#allocation7 + $0x198] sm:$0xff]  ;;  %6036 = vmatpush3.bf16.msra.mxu0 %v6033_v14 }
 0x772   :  { %v979_v37 = vcvt.s32.f32 %v977_v36  ;;  %v978_v51 = vcvt.s32.f32 %v976_v48  ;;  %6038 = vmatprep.subr.bf16.mxu0 %v6037_v21  ;;  %v1135_v36 = vld [vmem:[#allocation7 + $0x1a8] sm:$0xff]  ;;  %v1138_v48 = vld [vmem:[#allocation7 + $0x1c0] sm:$0xff] }
 0x773   :  { %v964_v34 = vcvt.s32.f32 %v962_v29  ;;  %v963_v46 = vcvt.s32.f32 %v961_v42  ;;  %v6041_v29 = vpack.c.bf16 %v1133_v28, %v1132_v24  ;;  %v1136_v42 = vld [vmem:[#allocation7 + $0x1b0] sm:$0xff] }
 0x775   :  { %965 = vmin.xlane.f32.xlu0 %v964_v34  ;;  %6040 = vmatpush3.bf16.msra.mxu0 %v6037_v21 }
 0x776   :  { %6042 = vmatprep.subr.bf16.mxu0 %v6041_v29 }
 0x779   :  { %980 = vmin.xlane.f32.xlu0 %v979_v37  ;;  %6044 = vmatpush3.bf16.msra.mxu0 %v6041_v29 }
 0x802   :  { %v966_v43 = vpop.xlane.xlu0 %965 }
 0x803   :  { %vm967_vm10 = vcmp.eq.f32.partialorder %v964_v34, %v966_v43  ;;  %v972_v55 = vcvt.f32.s32 %v966_v43  ;;  %v1134_v34 = vld [vmem:[#allocation7 + $0x1a0] sm:$0xff]  ;;  %v1137_v43 = vld [vmem:[#allocation7 + $0x1b8] sm:$0xff] }
 0x804   :  { %v968_v49 = vsel %vm967_vm10, %v963_v46, inf  ;;  %v6049_v46 = vpack.c.bf16 %v1137_v43, %v1136_v42  ;;  %v1250_v43 = vld [vmem:[#allocation7 + $0x1d0] sm:$0xff] }
 0x805   :  { %969 = vmin.xlane.f32.xlu1 %v968_v49  ;;  %v973_v59 = vshll.u32 %v972_v55, 16  ;;  %v1139_v49 = vld [vmem:[#allocation7 + $0x1c8] sm:$0xff] }
 0x806   :  { %v981_v50 = vpop.xlane.xlu0 %980 }
 0x807   :  { %vm982_vm2 = vcmp.eq.f32.partialorder %v979_v37, %v981_v50  ;;  %v987_v40 = vcvt.f32.s32 %v981_v50  ;;  %v6045_v37 = vpack.c.bf16 %v1135_v36, %v1134_v34  ;;  %v6053_v50 = vpack.c.bf16 %v1139_v49, %v1138_v48  ;;  %v1252_v48 = vld [vmem:[#allocation7 + $0x1e0] sm:$0xff] }
 0x808   :  { %v983_v52 = vsel %vm982_vm2, %v978_v51, inf }
 0x809   :  { %984 = vmin.xlane.f32.xlu0 %v983_v52  ;;  %v988_v5 = vshll.u32 %v987_v40, 16  ;;  %6046 = vmatprep.subr.bf16.mxu0 %v6045_v37 }
 0x80a   :  { %6048 = vmatpush3.bf16.msra.mxu0 %v6045_v37 }
 0x80b   :  { %6050 = vmatprep.subr.bf16.mxu0 %v6049_v46 }
 0x80e   :  { %6052 = vmatpush3.bf16.msra.mxu0 %v6049_v46  ;;  %v1251_v46 = vld [vmem:[#allocation7 + $0x1d8] sm:$0xff] }
 0x80f   :  { %6054 = vmatprep.subr.bf16.mxu0 %v6053_v50  ;;  %v6058_v49 = vpack.c.bf16 %v1251_v46, %v1250_v43  ;;  %v1272_v43 = vld [vmem:[#allocation7 + $0x280] sm:$0xff]  ;;  %v1273_v46 = vld [vmem:[#allocation7 + $0x288] sm:$0xff] }
 0x812   :  { %6056 = vmatpush3.bf16.msra.mxu0 %v6053_v50  ;;  %v1253_v50 = vld [vmem:[#allocation7 + $0x1e8] sm:$0xff] }
 0x892   :  { %v970_v57 = vpop.xlane.xlu1 %969 }
 0x893   :  { %v971_v60 = vcvt.f32.s32 %v970_v57 }
 0x895   :  { %v974_v56 = vadd.s32 %v973_v59, %v971_v60 }
 0x896   :  { %v985_v45 = vpop.xlane.xlu0 %984 }
 0x897   :  { %v986_v7 = vcvt.f32.s32 %v985_v45  ;;  %vm990_vm5 = vcmp.eq.s32.totalorder %v7095_v26, %v974_v56 }
 0x898   :  { %v5009_v12 = vsel %vm990_vm5, 1.0, %v8394_v47 }
 0x899   :  { %v989_v13 = vadd.s32 %v988_v5, %v986_v7  ;;  %5553 = vmatprep.mubr.msk.f32.mxu1 %vm502_vm14, %v5009_v12 }
 0x89b   :  { %vm991_vm10 = vcmp.eq.s32.totalorder %v7095_v26, %v989_v13 }
 0x89c   :  { %v5010_v44 = vsel %vm991_vm10, 1.0, %v8394_v47 }
 0x89d   :  { %5554 = vmatmul.mubr.msk.f32.vlgmr.msra.gmra.mrb[6].mxu1 %vm502_vm14, %v5010_v44 }
 0x89e   :  { %6059 = vmatpush1.bf16.msra.mxu1 %v6058_v49  ;;  %v5013_v49 = vld [vmem:[#allocation8 + $0x20] ss:$0 sm:$0xff] }
 0x89f   :  { %6060 = vmatprep.subr.bf16.mxu1 %v8397_v54 }
 0x970   :  { %v5555_v51 = vpop.f32.mrb[6].mxu1 }
 0x971   :  { %v1097_v52 = vrot.slane %v5555_v51, 7  ;;  %v1103_v55 = vrot.slane %v5555_v51, 1  ;;  %1112 = vrot.lane.b32.xlu0 %v5555_v51, %s6879_s21  ;;  %v1068_v57 = vpop.f32.mrb[7].mxu1  ;;  %v1078_v59 = vsub.f32 %v5555_v51, %v7292_v63  ;;  %v6061_v51 = vpack.c.bf16 %v1253_v50, %v1252_v48  ;;  %v1362_v50 = vld [vmem:[#allocation7 + $0x290] sm:$0xff] }
 0x972   :  { %v1096_v40 = vrot.slane %v1068_v57, 7  ;;  %v1102_v60 = vrot.slane %v1068_v57, 1  ;;  %1110 = vrot.lane.b32.xlu1 %v1068_v57, %s6879_s21  ;;  %v1077_v56 = vsub.f32 %v1068_v57, %v7290_v62  ;;  %v6091_v48 = vpack.c.bf16 %v1273_v46, %v1272_v43  ;;  %v1367_v43 = vld [vmem:[#allocation7 + $0x2b8] sm:$0xff] }
 0x973   :  { %v1080_v45 = vmul.f32 %v1078_v59, %v1078_v59  ;;  %6062 = vmatpush1.bf16.msra.mxu1 %v6061_v51  ;;  %v1256_v59 = vld [vmem:[#allocation7 + $0x200] sm:$0xff]  ;;  %v1363_v51 = vld [vmem:[#allocation7 + $0x298] sm:$0xff] }
 0x974   :  { %v1104_v5 = vsel %vm128_vm1, %v1102_v60, %v1103_v55  ;;  %v1105_v7 = vsel %vm128_vm1, %v1103_v55, %v1102_v60  ;;  %v1098_v12 = vsel %vm92_vm0, %v1096_v40, %v1097_v52  ;;  %v1099_v13 = vsel %vm92_vm0, %v1097_v52, %v1096_v40  ;;  %v1254_v52 = vld [vmem:[#allocation7 + $0x1f0] sm:$0xff]  ;;  %v1255_v55 = vld [vmem:[#allocation7 + $0x1f8] sm:$0xff]  ;;  %6063 = vmatprep.subr.bf16.mxu1 %v8397_v54  ;;  %v1257_v40 = vld [vmem:[#allocation7 + $0x208] sm:$0xff] }
 0x975   :  { %v1106_v63 = vsel %vm8389_vm6, %v1104_v5, 0.0  ;;  %v1079_v44 = vmul.f32 %v1077_v56, %v1077_v56  ;;  %v1082_v62 = vsel %vm8385_vm9, %v1080_v45, 0.0  ;;  %v1107_v6 = vsel %vm8388_vm4, %v1105_v7, 0.0  ;;  %v1258_v56 = vld [vmem:[#allocation7 + $0x210] sm:$0xff]  ;;  %v1259_v45 = vld [vmem:[#allocation7 + $0x218] sm:$0xff]  ;;  %v1260_v7 = vld [vmem:[#allocation7 + $0x220] sm:$0xff] }
 0x976   :  { %1118 = vrot.lane.b32.xlu1 %v1106_v63, %s6880_s22  ;;  %v1100_v15 = vsel %vm8387_vm12, %v1099_v13, 0.0  ;;  %v1101_v34 = vsel %vm8386_vm13, %v1098_v12, 0.0  ;;  %v6064_v57 = vpack.c.bf16 %v1255_v55, %v1254_v52  ;;  %v6067_v60 = vpack.c.bf16 %v1257_v40, %v1256_v59  ;;  %v1261_v12 = vld [vmem:[#allocation7 + $0x228] sm:$0xff]  ;;  %v1262_v63 = vld [vmem:[#allocation7 + $0x230] sm:$0xff]  ;;  %v1364_v52 = vld [vmem:[#allocation7 + $0x2a0] sm:$0xff] }
 0x977   :  { %v1081_v11 = vsel %vm8385_vm9, %v1079_v44, 0.0  ;;  %v6070_v5 = vpack.c.bf16 %v1259_v45, %v1258_v56  ;;  %v6073_v13 = vpack.c.bf16 %v1261_v12, %v1260_v7  ;;  %v1263_v44 = vld [vmem:[#allocation7 + $0x238] sm:$0xff]  ;;  %v6093_v55 = vpack.c.bf16 %v1363_v51, %v1362_v50  ;;  %v5016_v51 = vld [vmem:[#allocation8 + $0x28] ss:$0 sm:$0xff] }
 0x978   :  { %v7329_v61 = vadd.f32 %v1082_v62, %v1081_v11  ;;  %6065 = vmatpush1.bf16.msra.mxu1 %v6064_v57  ;;  %v6076_v62 = vpack.c.bf16 %v1263_v44, %v1262_v63  ;;  %v1264_v11 = vld [vmem:[#allocation7 + $0x240] sm:$0xff]  ;;  %v1365_v57 = vld [vmem:[#allocation7 + $0x2a8] sm:$0xff] }
 0x979   :  { %6066 = vmatprep.subr.bf16.mxu1 %v8397_v54  ;;  %v6097_v40 = vpack.c.bf16 %v1365_v57, %v1364_v52  ;;  %6094 = vmatprep.subr.bf16.mxu0 %v6093_v55 }
 0x97a   :  { %8419 = vst [vmem:[#allocation17_spill] sm:$0xff] %v7329_v61  ;;  %1120 = vrot.lane.b32.xlu1 %v1107_v6, %s6880_s22  ;;  %v1265_v6 = vld [vmem:[#allocation7 + $0x248] sm:$0xff] }
 0x97c   :  { %6068 = vmatpush1.bf16.msra.mxu1 %v6067_v60 }
 0x97d   :  { %6069 = vmatprep.subr.bf16.mxu1 %v8397_v54 }
 0x980   :  { %6071 = vmatpush1.bf16.msra.mxu1 %v6070_v5 }
 0x981   :  { %6072 = vmatprep.subr.bf16.mxu1 %v8397_v54 }
 0x984   :  { %6074 = vmatpush1.bf16.msra.mxu1 %v6073_v13 }
 0x985   :  { %6075 = vmatprep.subr.bf16.mxu1 %v8397_v54 }
 0x988   :  { %6077 = vmatpush1.bf16.msra.mxu1 %v6076_v62 }
 0x989   :  { %6078 = vmatprep.subr.bf16.mxu1 %v8397_v54 }
 0x9e3   :  { %v1113_v28 = vpop.permute.xlu0 %1112 }
 0x9e4   :  { %v1111_v14 = vpop.permute.xlu1 %1110  ;;  %v1125_v36 = vsel %vm8385_vm9, %v1101_v34, %v1113_v28  ;;  %v1268_v28 = vld [vmem:[#allocation7 + $0x260] sm:$0xff] }
 0x9e5   :  { %v1124_v21 = vsel %vm8385_vm9, %v1100_v15, %v1111_v14  ;;  %v6079_v14 = vpack.c.bf16 %v1265_v6, %v1264_v11  ;;  %v1266_v15 = vld [vmem:[#allocation7 + $0x250] sm:$0xff] }
 0x9e7   :  { %6080 = vmatpush1.bf16.msra.mxu1 %v6079_v14 }
 0x9e8   :  { %v1119_v24 = vpop.permute.xlu1 %1118  ;;  %6081 = vmatprep.subr.bf16.mxu1 %v8397_v54 }
 0x9e9   :  { %v1126_v29 = vsel %vm502_vm14, %v1124_v21, %v1119_v24  ;;  %v1267_v21 = vld [vmem:[#allocation7 + $0x258] sm:$0xff] }
 0x9ea   :  { %5580 = vmatprep.mubr.msk.f32.mxu0 %vm8384_vm15, %v1126_v29  ;;  %v6082_v24 = vpack.c.bf16 %v1267_v21, %v1266_v15  ;;  %v1269_v29 = vld [vmem:[#allocation7 + $0x268] sm:$0xff] }
 0x9eb   :  { %v6085_v34 = vpack.c.bf16 %v1269_v29, %v1268_v28 }
 0x9ec   :  { %v1121_v37 = vpop.permute.xlu1 %1120  ;;  %6083 = vmatpush1.bf16.msra.mxu1 %v6082_v24 }
 0x9ed   :  { %v1127_v42 = vsel %vm502_vm14, %v1125_v36, %v1121_v37  ;;  %6084 = vmatprep.subr.bf16.mxu1 %v8397_v54  ;;  %v1270_v36 = vld [vmem:[#allocation7 + $0x270] sm:$0xff]  ;;  %v1271_v37 = vld [vmem:[#allocation7 + $0x278] sm:$0xff] }
 0x9ee   :  { %5581 = vmatmul.mubr.msk.f32.vlgmr.msra.gmra.mrb[10].mxu0 %vm8384_vm15, %v1127_v42  ;;  %v6088_v42 = vpack.c.bf16 %v1271_v37, %v1270_v36 }
 0x9ef   :  { %6096 = vmatpush3.bf16.msra.mxu0 %v6093_v55 }
 0x9f0   :  { %6086 = vmatpush1.bf16.msra.mxu1 %v6085_v34  ;;  %6098 = vmatprep.subr.bf16.mxu0 %v6097_v40 }
 0x9f1   :  { %6087 = vmatprep.subr.bf16.mxu1 %v8397_v54 }
 0x9f3   :  { %6100 = vmatpush3.bf16.msra.mxu0 %v6097_v40 }
 0x9f4   :  { %6089 = vmatpush1.bf16.msra.mxu1 %v6088_v42  ;;  %v1366_v42 = vld [vmem:[#allocation7 + $0x2b0] sm:$0xff] }
 0x9f5   :  { %6090 = vmatprep.subr.bf16.mxu1 %v8397_v54  ;;  %v6101_v46 = vpack.c.bf16 %v1367_v43, %v1366_v42  ;;  %v1692_v42 = vld [vmem:[#allocation7 + $0x358] sm:$0xff]  ;;  %v1675_v43 = vld [vmem:[#allocation7 + $0x2d0] sm:$0xff] }
 0x9f7   :  { %6102 = vmatprep.subr.bf16.mxu0 %v6101_v46 }
 0x9f8   :  { %6092 = vmatpush1.bf16.msra.mxu1 %v6091_v48  ;;  %6104 = vmatpush3.bf16.msra.mxu0 %v6101_v46  ;;  %v1368_v48 = vld [vmem:[#allocation7 + $0x2c0] sm:$0xff] }
 0x9f9   :  { %6145 = vmatprep.subr.bf16.mxu1 %v8397_v54 }
 0xac1   :  { %v5582_v59 = vpop.f32.mrb[10].mxu0 }
 0xac2   :  { %v7354_v60 = vadd.f32 %v5582_v59, %v5013_v49  ;;  %v1217_v56 = vpop.f32.mrb[11].mxu0 }
 0xac3   :  { %v7356_v45 = vadd.f32 %v5013_v49, %v1217_v56  ;;  %v1369_v49 = vld [vmem:[#allocation7 + $0x2c8] sm:$0xff] }
 0xac4   :  { %v1227_v5 = vmax.f32 %v7354_v60, 0.0  ;;  %v6105_v50 = vpack.c.bf16 %v1369_v49, %v1368_v48  ;;  %v1676_v48 = vld [vmem:[#allocation7 + $0x2d8] sm:$0xff]  ;;  %v1693_v49 = vld [vmem:[#allocation7 + $0x360] sm:$0xff] }
 0xac5   :  { %v1226_v7 = vmax.f32 %v7356_v45, 0.0 }
 0xac6   :  { %v1229_v12 = vrot.slane %v1227_v5, 7  ;;  %v1235_v13 = vrot.slane %v1227_v5, 1  ;;  %1244 = vrot.lane.b32.xlu1 %v1227_v5, %s6880_s22  ;;  %6106 = vmatprep.subr.bf16.mxu0 %v6105_v50 }
 0xac7   :  { %v1228_v63 = vrot.slane %v1226_v7, 7  ;;  %v1234_v44 = vrot.slane %v1226_v7, 1  ;;  %1242 = vrot.lane.b32.xlu0 %v1226_v7, %s6880_s22  ;;  %6108 = vmatpush3.bf16.msra.mxu0 %v6105_v50  ;;  %v1694_v50 = vld [vmem:[#allocation7 + $0x368] sm:$0xff] }
 0xac9   :  { %v1236_v62 = vsel %vm128_vm1, %v1234_v44, %v1235_v13  ;;  %v1231_v11 = vsel %vm92_vm0, %v1229_v12, %v1228_v63  ;;  %v1237_v6 = vsel %vm128_vm1, %v1235_v13, %v1234_v44  ;;  %v1230_v14 = vsel %vm92_vm0, %v1228_v63, %v1229_v12 }
 0xaca   :  { %v1238_v15 = vsel %vm8389_vm6, %v1236_v62, 0.0  ;;  %v1232_v24 = vsel %vm8387_vm12, %v1231_v11, 0.0  ;;  %v1239_v34 = vsel %vm8388_vm4, %v1237_v6, 0.0  ;;  %v1233_v36 = vsel %vm8386_vm13, %v1230_v14, 0.0  ;;  %v5019_v11 = vld [vmem:[#allocation8 + $0x30] ss:$0 sm:$0xff] }
 0xacb   :  { %5017 = vmatprep.mubr.msk.f32.mxu1 %vm502_vm14, %v1238_v15  ;;  %v8392_v12 = vand.u32 7, %v7095_v26  ;;  %v1458_v13 = vshra.s32 %v6995_v1, 4  ;;  %v7387_v63 = vshra.s32 %v7095_v26, 3  ;;  %v1459_v6 = vshra.s32 %v6998_v2, 4 }
 0xacc   :  { %v1460_v15 = vshra.s32 %v7079_v16, 4 }
 0xacd   :  { %v1468_v44 = vmul.u32 2, %v8392_v12  ;;  %vm1463_vm2 = vcmp.eq.s32.totalorder %v1458_v13, %v7387_v63  ;;  %vm1464_vm15 = vcmp.eq.s32.totalorder %v1459_v6, %v7387_v63  ;;  %v1680_v13 = vld [vmem:[#allocation7 + $0x2f8] sm:$0xff] }
 0xacf   :  { %vm1469_vm5 = vcmp.eq.s32.totalorder %v7082_v17, %v1468_v44  ;;  %vm1472_vm4 = vcmp.eq.s32.totalorder %v7010_v8, %v1468_v44 }
 0xad0   :  { %vm1473_vm10 = vmand %vm1463_vm2, %vm1469_vm5  ;;  %vm1470_vm2 = vcmp.eq.s32.totalorder %v7005_v4, %v1468_v44  ;;  %vm1465_vm5 = vcmp.eq.s32.totalorder %v1460_v15, %v7387_v63  ;;  %v1681_v15 = vld [vmem:[#allocation7 + $0x300] sm:$0xff] }
 0xad1   :  { %v7394_v62 = vsel %vm1473_vm10, 1.0, %v8394_v47  ;;  %vm1471_vm10 = vcmp.eq.s32.totalorder %v7085_v18, %v1468_v44  ;;  %vm1474_vm9 = vmand %vm1464_vm15, %vm1470_vm2  ;;  %v1697_v44 = vld [vmem:[#allocation7 + $0x380] sm:$0xff]  ;;  %vm8422_vm15 = vcmp.lt.s32.totalorder %v7172_v10, 8  ;;  %vm8423_vm2 = vcmp.lt.s32.totalorder %v7169_v9, 8 }
 0xad2   :  { %vm1475_vm13 = vmand %vm1465_vm5, %vm1471_vm10  ;;  %v7410_v16 = vsel %vm1474_vm9, 1.0, %v8394_v47  ;;  %vm1610_vm9 = vcmp.lt.s32.totalorder %v6995_v1, 2 }
 0xb38   :  { %v1245_v29 = vpop.permute.xlu1 %1244 }
 0xb39   :  { %v1243_v21 = vpop.permute.xlu0 %1242  ;;  %v1249_v37 = vsel %vm502_vm14, %v1233_v36, %v1245_v29 }
 0xb3a   :  { %v1248_v28 = vsel %vm502_vm14, %v1232_v24, %v1243_v21 }
 0xb3b   :  { %1350 = vmatmul.mubr.f32.vlgmr.msra.gmra.mrb[8].mxu1 %v1248_v28 }
 0xb3c   :  { %5018 = vmatprep.mubr.msk.f32.mxu1 %vm502_vm14, %v1239_v34  ;;  %v1461_v34 = vshra.s32 %v7001_v3, 4  ;;  %v7413_v3 = vsel %vm1475_vm13, 1.0, %v8394_v47  ;;  %vm8421_vm13 = vcmp.lt.s32.totalorder %v7019_v25, 16 }
 0xb3d   :  { %vm8425_vm10 = vmmov %vm8421_vm13 }
 0xb3e   :  { %vm1466_vm12 = vcmp.eq.s32.totalorder %v1461_v34, %v7387_v63 }
 0xb3f   :  { %1355 = vmatmul.mubr.f32.gmra.mrb[10].mxu1 %v1249_v37  ;;  %vm1476_vm6 = vmand %vm1466_vm12, %vm1472_vm4  ;;  %vm8420_vm12 = vcmp.ge.s32.totalorder %v7091_v22, 0 }
 0xb40   :  { %vm8424_vm5 = vmmov %vm8420_vm12 }
 0xc0e   :  { %v1351_v52 = vpop.f32.mrb[8].mxu1 }
 0xc0f   :  { %v1352_v55 = vadd.f32 %v5016_v51, %v1351_v52  ;;  %v1353_v57 = vpop.f32.mrb[9].mxu1  ;;  %v6117_v52 = vpack.c.bf16 %v1694_v50, %v1693_v49  ;;  %v1686_v49 = vld [vmem:[#allocation7 + $0x328] sm:$0xff]  ;;  %v1703_v50 = vld [vmem:[#allocation7 + $0x3b0] sm:$0xff] }
 0xc10   :  { %v1678_v57 = vld [vmem:[#allocation7 + $0x2e8] sm:$0xff] }
 0xc11   :  { %v1360_v59 = vmax.f32 %v1352_v55, 0.0  ;;  %v1677_v55 = vld [vmem:[#allocation7 + $0x2e0] sm:$0xff] }
 0xc12   :  { %v1356_v40 = vpop.f32.mrb[10].mxu1 }
 0xc13   :  { %v1357_v56 = vadd.f32 %v5016_v51, %v1356_v40  ;;  %v1358_v5 = vpop.f32.mrb[11].mxu1  ;;  %5599 = vmatprep.mubr.msk.f32.mxu0 %vm502_vm14, %v1360_v59  ;;  %v6115_v51 = vpack.c.bf16 %v1676_v48, %v1675_v43  ;;  %v1695_v59 = vld [vmem:[#allocation7 + $0x370] sm:$0xff]  ;;  %v1696_v40 = vld [vmem:[#allocation7 + $0x378] sm:$0xff]  ;;  %v1685_v48 = vld [vmem:[#allocation7 + $0x320] sm:$0xff] }
 0xc14   :  { %v6121_v5 = vpack.c.bf16 %v1696_v40, %v1695_v59  ;;  %v1688_v59 = vld [vmem:[#allocation7 + $0x338] sm:$0xff] }
 0xc15   :  { %v1361_v7 = vmax.f32 %v1357_v56, 0.0  ;;  %v6119_v56 = vpack.c.bf16 %v1678_v57, %v1677_v55  ;;  %v1687_v57 = vld [vmem:[#allocation7 + $0x330] sm:$0xff] }
 0xc16   :  { %v6139_v40 = vpack.c.bf16 %v1688_v59, %v1687_v57 }
 0xc17   :  { %5600 = vmatmul.mubr.msk.f32.vlgmr.msra.gmra.mrb[12].mxu0 %vm502_vm14, %v1361_v7  ;;  %v1679_v7 = vld [vmem:[#allocation7 + $0x2f0] sm:$0xff] }
 0xc18   :  { %5606 = vmatprep.mubr.msk.f32.mxu0 %vm372_vm11, %v7394_v62  ;;  %v6123_v6 = vpack.c.bf16 %v1680_v13, %v1679_v7  ;;  %v1689_v13 = vld [vmem:[#allocation7 + $0x340] sm:$0xff] }
 0xcea   :  { %v5601_v14 = vpop.f32.mrb[12].mxu0 }
 0xceb   :  { %v1453_v21 = vadd.f32 %v5601_v14, %v5019_v11  ;;  %v1447_v24 = vpop.f32.mrb[13].mxu0 }
 0xcec   :  { %v1448_v28 = vadd.f32 %v5019_v11, %v1447_v24  ;;  %v1698_v11 = vld [vmem:[#allocation7 + $0x388] sm:$0xff]  ;;  %v1699_v24 = vld [vmem:[#allocation7 + $0x390] sm:$0xff] }
 0xced   :  { %v1457_v29 = vadd.f32 %v1453_v21, %v7354_v60  ;;  %v7420_v60 = vsel %vm1476_vm6, 1.0, %v8394_v47  ;;  %v6125_v14 = vpack.c.bf16 %v1698_v11, %v1697_v44  ;;  %v1682_v21 = vld [vmem:[#allocation7 + $0x308] sm:$0xff] }
 0xcee   :  { %v1456_v36 = vadd.f32 %v1448_v28, %v7356_v45  ;;  %v1691_v45 = vld [vmem:[#allocation7 + $0x350] sm:$0xff]  ;;  %v1700_v28 = vld [vmem:[#allocation7 + $0x398] sm:$0xff]  ;;  %v1690_v44 = vld [vmem:[#allocation7 + $0x348] sm:$0xff] }
 0xcef   :  { %v6113_v46 = vpack.c.bf16 %v1692_v42, %v1691_v45  ;;  %v6129_v34 = vpack.c.bf16 %v1700_v28, %v1699_v24  ;;  %v1701_v45 = vld [vmem:[#allocation7 + $0x3a0] sm:$0xff]  ;;  %v1702_v42 = vld [vmem:[#allocation7 + $0x3a8] sm:$0xff]  ;;  %v6143_v11 = vpack.c.bf16 %v1690_v44, %v1689_v13 }
 0xcf0   :  { %v6109_v37 = vpack.c.bf16 %v1457_v29, %v1456_v36  ;;  %v6127_v29 = vpack.c.bf16 %v1682_v21, %v1681_v15  ;;  %v1683_v36 = vld [vmem:[#allocation7 + $0x310] sm:$0xff] }
 0xcf2   :  { %6110 = vmatprep.subr.bf16.mxu0 %v6109_v37 }
 0xcf3   :  { %6112 = vmatpush3.bf16.msra.mxu0 %v6109_v37  ;;  %v1684_v37 = vld [vmem:[#allocation7 + $0x318] sm:$0xff] }
 0xcf4   :  { %6114 = vmatprep.subr.bf16.mxu0 %v6113_v46  ;;  %v6131_v43 = vpack.c.bf16 %v1684_v37, %v1683_v36  ;;  %v6133_v46 = vpack.c.bf16 %v1702_v42, %v1701_v45  ;;  %v7430_v37 = vadd.s32 4294967294, %v7085_v18 }
 0xcf6   :  { %5607 = vmatmul.mubr.msk.f32.vlgmr.msra.gmra.mrb[14].mxu0 %vm372_vm11, %v7410_v16  ;;  %vm8396_vm6 = vcmp.ge.s32.totalorder %v7430_v37, 0 }
 0xcf7   :  { %5609 = vmatprep.mubr.msk.f32.mxu0 %vm372_vm11, %v7413_v3  ;;  %6116 = vmatpush3.bf16.msra.mxu0 %v6115_v51  ;;  %v1704_v51 = vld [vmem:[#allocation7 + $0x3b8] sm:$0xff] }
 0xcf8   :  { %6118 = vmatprep.subr.bf16.mxu0 %v6117_v52  ;;  %v6135_v52 = vpack.c.bf16 %v1686_v49, %v1685_v48  ;;  %v6137_v55 = vpack.c.bf16 %v1704_v51, %v1703_v50 }
 0xcfa   :  { %5610 = vmatmul.mubr.msk.f32.gmra.mrb[16].mxu0 %vm372_vm11, %v7420_v60 }
 0xcfb   :  { %6120 = vmatpush3.bf16.msra.mxu0 %v6119_v56  ;;  %v1705_v56 = vld [vmem:[#allocation7 + $0x3c0] sm:$0xff] }
 0xcfc   :  { %6122 = vmatprep.subr.bf16.mxu0 %v6121_v5  ;;  %v1706_v5 = vld [vmem:[#allocation7 + $0x3c8] sm:$0xff] }
 0xcfd   :  { %v6141_v7 = vpack.c.bf16 %v1706_v5, %v1705_v56 }
 0xcff   :  { %6124 = vmatpush3.bf16.msra.mxu0 %v6123_v6 }
 0xd00   :  { %6126 = vmatprep.subr.bf16.mxu0 %v6125_v14  ;;  %v7426_v14 = vadd.s32 4294967294, %v7082_v17 }
 0xd02   :  { %vm1619_vm4 = vcmp.ge.s32.totalorder %v7426_v14, 0 }
 0xd03   :  { %6128 = vmatpush3.bf16.msra.mxu0 %v6127_v29 }
 0xd04   :  { %6130 = vmatprep.subr.bf16.mxu0 %v6129_v34 }
 0xd07   :  { %6132 = vmatpush3.bf16.msra.mxu0 %v6131_v43 }
 0xd08   :  { %6134 = vmatprep.subr.bf16.mxu0 %v6133_v46 }
 0xd0b   :  { %6136 = vmatpush3.bf16.msra.mxu0 %v6135_v52 }
 0xd0c   :  { %6138 = vmatprep.subr.bf16.mxu0 %v6137_v55 }
 0xd0f   :  { %6140 = vmatpush3.bf16.msra.mxu0 %v6139_v40 }
 0xd10   :  { %6142 = vmatprep.subr.bf16.mxu0 %v6141_v7 }
 0xd13   :  { %6144 = vmatpush3.bf16.msra.mxu0 %v6143_v11 }
 0xd14   :  { %6181 = vmatprep.subr.bf16.mxu0 %v8397_v54 }
 0xdc9   :  { %v5608_v6 = vpop.f32.mrb[14].mxu0 }
 0xdca   :  { %v1583_v15 = vrot.slane %v5608_v6, 1  ;;  %v1595_v21 = vrot.slane %v5608_v6, 7  ;;  %v1607_v24 = vrot.slane %v5608_v6, 6  ;;  %v1563_v28 = vpop.f32.mrb[15].mxu0 }
 0xdcb   :  { %v1582_v29 = vrot.slane %v1563_v28, 1  ;;  %v1594_v34 = vrot.slane %v1563_v28, 7  ;;  %v1606_v36 = vrot.slane %v1563_v28, 6 }
 0xdcd   :  { %v5611_v45 = vpop.f32.mrb[16].mxu0  ;;  %v1613_v42 = vsel %vm1610_vm9, %v1606_v36, %v1607_v24  ;;  %v1588_v17 = vsel %vm128_vm1, %v1582_v29, %v1583_v15  ;;  %v1600_v43 = vsel %vm92_vm0, %v1594_v34, %v1595_v21 }
 0xdce   :  { %v1585_v46 = vrot.slane %v5611_v45, 1  ;;  %v1597_v48 = vrot.slane %v5611_v45, 7  ;;  %v1609_v49 = vrot.slane %v5611_v45, 6  ;;  %v1573_v50 = vpop.f32.mrb[17].mxu0  ;;  %v6691_v51 = vpack.i.bf16 %v5608_v6, %v1613_v42  ;;  %v2181_v42 = vld [vmem:[#allocation7 + $0x498] sm:$0xff] }
 0xdcf   :  { %v1584_v52 = vrot.slane %v1573_v50, 1  ;;  %v1596_v18 = vrot.slane %v1573_v50, 7  ;;  %v1608_v55 = vrot.slane %v1573_v50, 6 }
 0xdd0   :  { %6692 = vrot.lane.b32.xlu1 %v6691_v51, %s6880_s22  ;;  %v1614_v57 = vsel %vm1610_vm9, %v1609_v49, %v1606_v36  ;;  %v1601_v59 = vsel %vm92_vm0, %v1597_v48, %v1594_v34  ;;  %v1589_v40 = vsel %vm128_vm1, %v1585_v46, %v1582_v29 }
 0xdd1   :  { %v1631_v56 = vsel %vm1619_vm4, %v1614_v57, 0.0  ;;  %v1611_v5 = vsel %vm1610_vm9, %v1608_v55, %v1609_v49  ;;  %v1612_v7 = vsel %vm1610_vm9, %v1607_v24, %v1608_v55  ;;  %v1587_v6 = vsel %vm128_vm1, %v1583_v15, %v1584_v52  ;;  %v2182_v57 = vld [vmem:[#allocation7 + $0x4a0] sm:$0xff] }
 0xdd2   :  { %v6686_v13 = vpack.i.bf16 %v1563_v28, %v1631_v56  ;;  %v6701_v44 = vpack.i.bf16 %v5611_v45, %v1611_v5  ;;  %v1633_v11 = vsel %vm8396_vm6, %v1612_v7, 0.0  ;;  %v1599_v29 = vsel %vm92_vm0, %v1595_v21, %v1596_v18  ;;  %v2180_v45 = vld [vmem:[#allocation7 + $0x490] sm:$0xff]  ;;  %v2183_v56 = vld [vmem:[#allocation7 + $0x4a8] sm:$0xff] }
 0xdd3   :  { %v6696_v34 = vpack.i.bf16 %v1573_v50, %v1633_v11  ;;  %v1586_v36 = vsel %vm128_vm1, %v1584_v52, %v1585_v46  ;;  %v1598_v24 = vsel %vm92_vm0, %v1596_v18, %v1597_v48  ;;  %v1602_v21 = vsel %vm8393_vm7, %v1601_v59, 0.0  ;;  %v2184_v11 = vld [vmem:[#allocation7 + $0x4b0] sm:$0xff] }
 0xdd4   :  { %6687 = vrot.lane.b32.xlu0 %v6686_v13, %s6880_s22  ;;  %6702 = vrot.lane.b32.xlu1 %v6701_v44, %s6880_s22  ;;  %v6182_v46 = vpack.c.bf16 %v2181_v42, %v2180_v45  ;;  %v6185_v44 = vpack.c.bf16 %v2183_v56, %v2182_v57  ;;  %v1591_v59 = vsel %vm142_vm3, %v1587_v6, 0.0  ;;  %v1604_v45 = vsel %vm8420_vm12, %v1599_v29, 0.0  ;;  %v2191_v56 = vld [vmem:[#allocation7 + $0x4e8] sm:$0xff] }
 0xdd5   :  { %vm8426_vm12 = vcmp.ge.s32.totalorder %v7196_v38, 0  ;;  %vm8408_vm6 = vcmp.lt.s32.totalorder %v7010_v8, 14 }
 0xdd8   :  { %6697 = vrot.lane.b32.xlu0 %v6696_v34, %s6880_s22 }
 0xe42   :  { %v6693_v28 = vpop.permute.xlu1 %6692 }
 0xe43   :  { %v6694_v49 = vunpack.i.l.bf16 %v6693_v28  ;;  %v6695_v48 = vunpack.i.h.bf16 %v6693_v28 }
 0xe45   :  { %v1672_v7 = vsel %vm502_vm14, %v1600_v43, %v6694_v49  ;;  %v1668_v28 = vsel %vm502_vm14, %v1591_v59, %v6695_v48  ;;  %v2186_v49 = vld [vmem:[#allocation7 + $0x4c0] sm:$0xff]  ;;  %v2197_v59 = vld [vmem:[#allocation7 + $0x518] sm:$0xff] }
 0xe46   :  { %v6688_v15 = vpop.permute.xlu0 %6687  ;;  %v6703_v13 = vpop.permute.xlu1 %6702 }
 0xe47   :  { %v6690_v50 = vunpack.i.h.bf16 %v6688_v15  ;;  %v6689_v51 = vunpack.i.l.bf16 %v6688_v15  ;;  %v6704_v42 = vunpack.i.l.bf16 %v6703_v13  ;;  %v6705_v6 = vunpack.i.h.bf16 %v6703_v13  ;;  %v2195_v13 = vld [vmem:[#allocation7 + $0x508] sm:$0xff] }
 0xe49   :  { %v1671_v52 = vsel %vm502_vm14, %v1602_v21, %v6689_v51  ;;  %v1667_v55 = vsel %vm502_vm14, %v1588_v17, %v6690_v50  ;;  %v2185_v17 = vld [vmem:[#allocation7 + $0x4b8] sm:$0xff]  ;;  %v2187_v50 = vld [vmem:[#allocation7 + $0x4c8] sm:$0xff]  ;;  %v1674_v21 = vsel %vm502_vm14, %v1598_v24, %v6704_v42  ;;  %v2190_v24 = vld [vmem:[#allocation7 + $0x4e0] sm:$0xff] }
 0xe4a   :  { %1776 = vmatprep.mubr.f32.mxu0 %v1671_v52  ;;  %v6698_v18 = vpop.permute.xlu0 %6697  ;;  %v6188_v15 = vpack.c.bf16 %v2185_v17, %v2184_v11  ;;  %v6191_v29 = vpack.c.bf16 %v2187_v50, %v2186_v49  ;;  %v2188_v52 = vld [vmem:[#allocation7 + $0x4d0] sm:$0xff]  ;;  %v6197_v48 = vpack.c.bf16 %v2191_v56, %v2190_v24  ;;  %v1844_v42 = vld [vmem:[#allocation7 + $0x3e8] sm:$0xff]  ;;  %v1846_v49 = vld [vmem:[#allocation7 + $0x3f8] sm:$0xff] }
 0xe4b   :  { %v6699_v5 = vunpack.i.l.bf16 %v6698_v18  ;;  %1777 = vmatmul.mubr.f32.vlgmr.msra.gmra.mrb[18].mxu0 %v1667_v55  ;;  %v6700_v34 = vunpack.i.h.bf16 %v6698_v18  ;;  %v2189_v55 = vld [vmem:[#allocation7 + $0x4d8] sm:$0xff]  ;;  %v2192_v18 = vld [vmem:[#allocation7 + $0x4f0] sm:$0xff]  ;;  %v1855_v24 = vld [vmem:[#allocation7 + $0x440] sm:$0xff] }
 0xe4c   :  { %6183 = vmatpush1.bf16.msra.mxu0 %v6182_v46  ;;  %1781 = vmatprep.mubr.f32.mxu0 %v1672_v7  ;;  %v1593_v46 = vsel %vm8421_vm13, %v1589_v40, 0.0  ;;  %v2193_v40 = vld [vmem:[#allocation7 + $0x4f8] sm:$0xff]  ;;  %v2194_v7 = vld [vmem:[#allocation7 + $0x500] sm:$0xff]  ;;  %v1841_v17 = vld [vmem:[#allocation7 + $0x3d0] sm:$0xff]  ;;  %vm8427_vm13 = vcmp.ge.s32.totalorder %v7199_v41, 0 }
 0xe4d   :  { %6184 = vmatprep.subr.bf16.mxu0 %v8397_v54  ;;  %v1673_v43 = vsel %vm502_vm14, %v1604_v45, %v6699_v5  ;;  %v1669_v51 = vsel %vm502_vm14, %v1586_v36, %v6700_v34  ;;  %v1670_v57 = vsel %vm502_vm14, %v1593_v46, %v6705_v6  ;;  %v6194_v36 = vpack.c.bf16 %v2189_v55, %v2188_v52  ;;  %v1842_v34 = vld [vmem:[#allocation7 + $0x3d8] sm:$0xff]  ;;  %v1848_v6 = vld [vmem:[#allocation7 + $0x408] sm:$0xff]  ;;  %v1853_v55 = vld [vmem:[#allocation7 + $0x430] sm:$0xff] }
 0xe4e   :  { %v6200_v5 = vpack.c.bf16 %v2193_v40, %v2192_v18  ;;  %v6146_v45 = vpack.c.bf16 %v1842_v34, %v1841_v17  ;;  %v1852_v46 = vld [vmem:[#allocation7 + $0x428] sm:$0xff]  ;;  %v1857_v18 = vld [vmem:[#allocation7 + $0x450] sm:$0xff]  ;;  %v1858_v40 = vld [vmem:[#allocation7 + $0x458] sm:$0xff] }
 0xe4f   :  { %1782 = vmatmul.mubr.f32.gmra.mrb[20].mxu0 %v1668_v28  ;;  %v1843_v28 = vld [vmem:[#allocation7 + $0x3e0] sm:$0xff]  ;;  %v1856_v56 = vld [vmem:[#allocation7 + $0x448] sm:$0xff] }
 0xe50   :  { %6186 = vmatpush1.bf16.msra.mxu0 %v6185_v44  ;;  %1786 = vmatprep.mubr.f32.mxu0 %v1673_v43  ;;  %v6203_v44 = vpack.c.bf16 %v2195_v13, %v2194_v7  ;;  %v6149_v43 = vpack.c.bf16 %v1844_v42, %v1843_v28  ;;  %v1859_v7 = vld [vmem:[#allocation7 + $0x460] sm:$0xff]  ;;  %v1860_v13 = vld [vmem:[#allocation7 + $0x468] sm:$0xff]  ;;  %v5030_v42 = vld [vmem:[#allocation8 + $0x38] ss:$0 sm:$0xff] }
 0xe51   :  { %6187 = vmatprep.subr.bf16.mxu0 %v8397_v54  ;;  %6147 = vmatpush1.bf16.msra.mxu1 %v6146_v45  ;;  %v1863_v17 = vld [vmem:[#allocation7 + $0x480] sm:$0xff]  ;;  %v1864_v34 = vld [vmem:[#allocation7 + $0x488] sm:$0xff] }
 0xe52   :  { %6148 = vmatprep.subr.bf16.mxu1 %v8397_v54  ;;  %v6179_v28 = vpack.c.bf16 %v1864_v34, %v1863_v17 }
 0xe53   :  { %1787 = vmatmul.mubr.f32.gmra.mrb[22].mxu0 %v1669_v51  ;;  %v1850_v51 = vld [vmem:[#allocation7 + $0x418] sm:$0xff] }
 0xe54   :  { %6189 = vmatpush1.bf16.msra.mxu0 %v6188_v15  ;;  %1791 = vmatprep.mubr.f32.mxu0 %v1674_v21  ;;  %v1845_v15 = vld [vmem:[#allocation7 + $0x3f0] sm:$0xff] }
 0xe55   :  { %6190 = vmatprep.subr.bf16.mxu0 %v8397_v54  ;;  %6150 = vmatpush1.bf16.msra.mxu1 %v6149_v43  ;;  %v6152_v50 = vpack.c.bf16 %v1846_v49, %v1845_v15 }
 0xe56   :  { %6151 = vmatprep.subr.bf16.mxu1 %v8397_v54 }
 0xe57   :  { %1792 = vmatmul.mubr.f32.gmra.mrb[24].mxu0 %v1670_v57  ;;  %v1854_v57 = vld [vmem:[#allocation7 + $0x438] sm:$0xff] }
 0xe58   :  { %6192 = vmatpush1.bf16.msra.mxu0 %v6191_v29  ;;  %5037 = vmatprep.mubr.msk.f32.mxu0 %vm372_vm11, %v7153_v32  ;;  %v2196_v32 = vld [vmem:[#allocation7 + $0x510] sm:$0xff]  ;;  %v1851_v29 = vld [vmem:[#allocation7 + $0x420] sm:$0xff] }
 0xe59   :  { %6193 = vmatprep.subr.bf16.mxu0 %v8397_v54  ;;  %v6206_v11 = vpack.c.bf16 %v2197_v59, %v2196_v32  ;;  %6153 = vmatpush1.bf16.msra.mxu1 %v6152_v50  ;;  %v6161_v52 = vpack.c.bf16 %v1852_v46, %v1851_v29  ;;  %v1861_v32 = vld [vmem:[#allocation7 + $0x470] sm:$0xff]  ;;  %v1862_v59 = vld [vmem:[#allocation7 + $0x478] sm:$0xff] }
 0xe5a   :  { %6154 = vmatprep.subr.bf16.mxu1 %v8397_v54 }
 0xe5c   :  { %6195 = vmatpush1.bf16.msra.mxu0 %v6194_v36  ;;  %v6164_v36 = vpack.c.bf16 %v1854_v57, %v1853_v55  ;;  %v2312_v57 = vld [vmem:[#allocation7 + $0x520] sm:$0xff] }
 0xe5d   :  { %6196 = vmatprep.subr.bf16.mxu0 %v8397_v54 }
 0xe60   :  { %6198 = vmatpush1.bf16.msra.mxu0 %v6197_v48  ;;  %v6167_v48 = vpack.c.bf16 %v1856_v56, %v1855_v24 }
 0xe61   :  { %6199 = vmatprep.subr.bf16.mxu0 %v8397_v54 }
 0xe64   :  { %6201 = vmatpush1.bf16.msra.mxu0 %v6200_v5  ;;  %v6170_v5 = vpack.c.bf16 %v1858_v40, %v1857_v18 }
 0xe65   :  { %6202 = vmatprep.subr.bf16.mxu0 %v8397_v54 }
 0xe68   :  { %6204 = vmatpush1.bf16.msra.mxu0 %v6203_v44  ;;  %v6173_v44 = vpack.c.bf16 %v1860_v13, %v1859_v7 }
 0xe69   :  { %6205 = vmatprep.subr.bf16.mxu0 %v8397_v54 }
 0xe6c   :  { %6207 = vmatpush1.bf16.msra.mxu0 %v6206_v11  ;;  %v6176_v11 = vpack.c.bf16 %v1862_v59, %v1861_v32 }
 0xe6f   :  { %2268 = vmatmul.mubr.f32.vlgmr.msra.gmra.mrb[26].mxu0 %v7151_v30  ;;  %v1847_v30 = vld [vmem:[#allocation7 + $0x400] sm:$0xff] }
 0xe70   :  { %5038 = vmatprep.mubr.msk.f32.mxu0 %vm372_vm11, %v7160_v33  ;;  %v6155_v33 = vpack.c.bf16 %v1848_v6, %v1847_v30 }
 0xe72   :  { %6156 = vmatpush1.bf16.msra.mxu1 %v6155_v33 }
 0xe73   :  { %2273 = vmatmul.mubr.f32.gmra.mrb[28].mxu0 %v7158_v0  ;;  %v1849_v0 = vld [vmem:[#allocation7 + $0x410] sm:$0xff]  ;;  %6157 = vmatprep.subr.bf16.mxu1 %v8397_v54 }
 0xe74   :  { %v6158_v21 = vpack.c.bf16 %v1850_v51, %v1849_v0 }
 0xe76   :  { %6159 = vmatpush1.bf16.msra.mxu1 %v6158_v21 }
 0xe77   :  { %6160 = vmatprep.subr.bf16.mxu1 %v8397_v54 }
 0xe7a   :  { %6162 = vmatpush1.bf16.msra.mxu1 %v6161_v52 }
 0xe7b   :  { %6163 = vmatprep.subr.bf16.mxu1 %v8397_v54 }
 0xe7e   :  { %6165 = vmatpush1.bf16.msra.mxu1 %v6164_v36  ;;  %v2313_v36 = vld [vmem:[#allocation7 + $0x528] sm:$0xff] }
 0xe7f   :  { %6166 = vmatprep.subr.bf16.mxu1 %v8397_v54  ;;  %v6208_v40 = vpack.c.bf16 %v2313_v36, %v2312_v57 }
 0xe82   :  { %6168 = vmatpush1.bf16.msra.mxu1 %v6167_v48 }
 0xe83   :  { %6169 = vmatprep.subr.bf16.mxu1 %v8397_v54 }
 0xe86   :  { %6171 = vmatpush1.bf16.msra.mxu1 %v6170_v5 }
 0xe87   :  { %6172 = vmatprep.subr.bf16.mxu1 %v8397_v54 }
 0xe8a   :  { %6174 = vmatpush1.bf16.msra.mxu1 %v6173_v44 }
 0xe8b   :  { %6175 = vmatprep.subr.bf16.mxu1 %v8397_v54 }
 0xe8e   :  { %6177 = vmatpush1.bf16.msra.mxu1 %v6176_v11 }
 0xe8f   :  { %6178 = vmatprep.subr.bf16.mxu1 %v8397_v54 }
 0xe92   :  { %6180 = vmatpush1.bf16.msra.mxu1 %v6179_v28 }
 0xe93   :  { %6209 = vmatprep.subr.bf16.mxu1 %v6208_v40 }
 0xf1e   :  { %v5215_v45 = vpop.f32.mrb[18].mxu0 }
 0xf1f   :  { %v5216_v43 = vpop.f32.mrb[19].mxu0 }
 0xf20   :  { %v5217_v15 = vadd.f32 %v5216_v43, %v5215_v45 }
 0xf22   :  { %v1779_v49 = vadd.f32 %v5217_v15, %v5030_v42  ;;  %v5218_v50 = vpop.f32.mrb[20].mxu0 }
 0xf23   :  { %v5219_v30 = vpop.f32.mrb[21].mxu0 }
 0xf24   :  { %v5220_v6 = vadd.f32 %v5219_v30, %v5218_v50  ;;  %1825 = vrot.lane.b32.xlu0 %v1779_v49, %s6880_s22  ;;  %v1797_v51 = vrot.slane %v1779_v49, 7  ;;  %v1809_v29 = vrot.slane %v1779_v49, 1  ;;  %v5036_v49 = vld [vmem:[#allocation8 + $0x50] ss:$0 sm:$0xff] }
 0xf26   :  { %v1784_v33 = vadd.f32 %v5220_v6, %v5030_v42  ;;  %v5221_v0 = vpop.f32.mrb[22].mxu0 }
 0xf27   :  { %v5222_v21 = vpop.f32.mrb[23].mxu0 }
 0xf28   :  { %v1798_v46 = vrot.slane %v1784_v33, 7  ;;  %v1810_v52 = vrot.slane %v1784_v33, 1  ;;  %v5223_v55 = vadd.f32 %v5222_v21, %v5221_v0  ;;  %1827 = vrot.lane.b32.xlu1 %v1784_v33, %s6880_s22 }
 0xf2a   :  { %v1789_v24 = vadd.f32 %v5223_v55, %v5030_v42  ;;  %v5224_v56 = vpop.f32.mrb[24].mxu0  ;;  %v1815_v48 = vsel %vm128_vm1, %v1809_v29, %v1810_v52  ;;  %v1803_v18 = vsel %vm92_vm0, %v1797_v51, %v1798_v46 }
 0xf2b   :  { %v5225_v5 = vpop.f32.mrb[25].mxu0  ;;  %5032 = vmatprep.mubr.msk.f32.mxu1 %vm502_vm14, %v1815_v48 }
 0xf2c   :  { %v1799_v7 = vrot.slane %v1789_v24, 7  ;;  %v1811_v13 = vrot.slane %v1789_v24, 1  ;;  %v5226_v44 = vadd.f32 %v5225_v5, %v5224_v56 }
 0xf2e   :  { %v1794_v32 = vadd.f32 %v5226_v44, %v5030_v42  ;;  %v1814_v59 = vsel %vm128_vm1, %v1810_v52, %v1811_v13  ;;  %v7518_v11 = vsel %vm92_vm0, %v1798_v46, %v1799_v7  ;;  %v2315_v44 = vld [vmem:[#allocation7 + $0x538] sm:$0xff] }
 0xf30   :  { %v1800_v17 = vrot.slane %v1794_v32, 7  ;;  %v1812_v34 = vrot.slane %v1794_v32, 1  ;;  %v6706_v28 = vpack.i.bf16 %v1794_v32, %v1789_v24 }
 0xf32   :  { %6707 = vrot.lane.b32.xlu0 %v6706_v28, %s6880_s22  ;;  %v1804_v45 = vsel %vm92_vm0, %v1800_v17, %v1797_v51  ;;  %v1813_v43 = vsel %vm128_vm1, %v1811_v13, %v1812_v34  ;;  %v7527_v42 = vsel %vm128_vm1, %v1812_v34, %v1809_v29  ;;  %v7531_v15 = vsel %vm92_vm0, %v1799_v7, %v1800_v17  ;;  %v2314_v13 = vld [vmem:[#allocation7 + $0x530] sm:$0xff] }
 0xf33   :  { %v1805_v17 = vsel %vm8393_vm7, %v1804_v45, 0.0  ;;  %v6212_v34 = vpack.c.bf16 %v2315_v44, %v2314_v13  ;;  %v1820_v13 = vsel %vm8425_vm10, %v7527_v42, 0.0  ;;  %vm8441_vm7 = vcmp.lt.s32.totalorder %v7016_v23, 16 }
 0xf42   :  { %v2269_v50 = vpop.f32.mrb[26].mxu0 }
 0xf43   :  { %v7533_v30 = vadd.f32 %v5036_v49, %v2269_v50  ;;  %v2271_v6 = vpop.f32.mrb[27].mxu0  ;;  %v2317_v50 = vld [vmem:[#allocation7 + $0x548] sm:$0xff] }
 0xf44   :  { %v1818_v6 = vsel %vm142_vm3, %v1814_v59, 0.0 }
 0xf45   :  { %v2278_v33 = vmax.f32 %v7533_v30, 0.0 }
 0xf46   :  { %v2274_v0 = vpop.f32.mrb[28].mxu0 }
 0xf47   :  { %v7536_v51 = vadd.f32 %v5036_v49, %v2274_v0  ;;  %v2276_v21 = vpop.f32.mrb[29].mxu0  ;;  %2294 = vrot.lane.b32.xlu1 %v2278_v33, %s6879_s21  ;;  %v2280_v46 = vrot.slane %v2278_v33, 7  ;;  %v2286_v52 = vrot.slane %v2278_v33, 1  ;;  %v2316_v49 = vld [vmem:[#allocation7 + $0x540] sm:$0xff] }
 0xf48   :  { %v6216_v0 = vpack.c.bf16 %v2317_v50, %v2316_v49 }
 0xf49   :  { %v2279_v29 = vmax.f32 %v7536_v51, 0.0 }
 0xf4b   :  { %v2281_v55 = vrot.slane %v2279_v29, 7  ;;  %v2287_v57 = vrot.slane %v2279_v29, 1  ;;  %2296 = vrot.lane.b32.xlu0 %v2279_v29, %s6879_s21  ;;  %v2318_v29 = vld [vmem:[#allocation7 + $0x550] sm:$0xff] }
 0xf4d   :  { %v2288_v36 = vsel %vm128_vm1, %v2286_v52, %v2287_v57  ;;  %v2289_v24 = vsel %vm128_vm1, %v2287_v57, %v2286_v52  ;;  %v2283_v56 = vsel %vm92_vm0, %v2281_v55, %v2280_v46  ;;  %v2282_v48 = vsel %vm92_vm0, %v2280_v46, %v2281_v55  ;;  %v2319_v46 = vld [vmem:[#allocation7 + $0x558] sm:$0xff]  ;;  %v2320_v52 = vld [vmem:[#allocation7 + $0x560] sm:$0xff]  ;;  %v2321_v55 = vld [vmem:[#allocation7 + $0x568] sm:$0xff] }
 0xf4e   :  { %v2290_v5 = vsel %vm8422_vm15, %v2288_v36, 0.0  ;;  %v2291_v7 = vsel %vm8423_vm2, %v2289_v24, 0.0  ;;  %v6220_v45 = vpack.c.bf16 %v2319_v46, %v2318_v29  ;;  %v6224_v59 = vpack.c.bf16 %v2321_v55, %v2320_v52  ;;  %v2322_v57 = vld [vmem:[#allocation7 + $0x570] sm:$0xff]  ;;  %v5031_v46 = vld [vmem:[#allocation8 + $0x40] ss:$0 sm:$0xff] }
 0xf4f   :  { %2302 = vrot.lane.b32.xlu1 %v2290_v5, %s6880_s22  ;;  %2304 = vrot.lane.b32.xlu0 %v2291_v7, %s6880_s22  ;;  %vm8428_vm15 = vcmask 261120  }
 0xf50   :  { %vm8429_vm2 = vmmov %vm8428_vm15 }
 0xf96   :  { %v1826_v32 = vpop.permute.xlu0 %1825 }
 0xf97   :  { %v1837_v28 = vsel %vm502_vm14, %v1805_v17, %v1826_v32  ;;  %v2284_v17 = vsel %vm8426_vm12, %v2283_v56, 0.0  ;;  %vm2175_vm12 = vcmask 318464  }
 0xf98   :  { %1947 = vmatmul.mubr.f32.vlgmr.msra.gmra.mrb[12].mxu1 %v1837_v28 }
 0xf99   :  { %5033 = vmatprep.mubr.msk.f32.mxu1 %vm502_vm14, %v1818_v6  ;;  %6211 = vmatpush3.bf16.msra.mxu1 %v6208_v40  ;;  %v2323_v40 = vld [vmem:[#allocation7 + $0x578] sm:$0xff] }
 0xf9a   :  { %v1828_v33 = vpop.permute.xlu1 %1827  ;;  %6213 = vmatprep.subr.bf16.mxu1 %v6212_v34  ;;  %v6228_v5 = vpack.c.bf16 %v2323_v40, %v2322_v57  ;;  %v83_v40 = vld [vmem:[#allocation5 + $0x8] sm:$0xff] }
 0xf9b   :  { %v1838_v21 = vsel %vm502_vm14, %v1803_v18, %v1828_v33  ;;  %v1807_v18 = vsel %vm8424_vm5, %v7518_v11, 0.0  ;;  %vm8430_vm5 = vcmask 785408   ;;  %v2412_v33 = vld [vmem:[#allocation7 + $0x580] sm:$0xff] }
 0xf9c   :  { %1952 = vmatmul.mubr.f32.gmra.mrb[14].mxu1 %v1838_v21  ;;  %vm8431_vm10 = vmmov %vm8430_vm5  ;;  %v2415_v21 = vld [vmem:[#allocation7 + $0x598] sm:$0xff] }
 0xf9d   :  { %5034 = vmatprep.mubr.msk.f32.mxu1 %vm502_vm14, %v1813_v43  ;;  %6215 = vmatpush3.bf16.msra.mxu1 %v6212_v34  ;;  %v2285_v34 = vsel %vm8427_vm13, %v2282_v48, 0.0  ;;  %v2414_v48 = vld [vmem:[#allocation7 + $0x590] sm:$0xff]  ;;  %vm8432_vm13 = vcmp.lt.s32.totalorder %v6995_v1, 6 }
 0xf9e   :  { %6217 = vmatprep.subr.bf16.mxu1 %v6216_v0  ;;  %v6236_v29 = vpack.c.bf16 %v2415_v21, %v2414_v48 }
 0xfa1   :  { %6219 = vmatpush3.bf16.msra.mxu1 %v6216_v0  ;;  %v2413_v0 = vld [vmem:[#allocation7 + $0x588] sm:$0xff] }
 0xfa2   :  { %6221 = vmatprep.subr.bf16.mxu1 %v6220_v45  ;;  %v6232_v56 = vpack.c.bf16 %v2413_v0, %v2412_v33 }
 0xfa4   :  { %v6708_v36 = vpop.permute.xlu0 %6707  ;;  %6233 = vmatprep.subr.bf16.mxu0 %v6232_v56 }
 0xfa5   :  { %v6709_v24 = vunpack.i.l.bf16 %v6708_v36  ;;  %6223 = vmatpush3.bf16.msra.mxu1 %v6220_v45  ;;  %v6710_v43 = vunpack.i.h.bf16 %v6708_v36  ;;  %6235 = vmatpush3.bf16.msra.mxu0 %v6232_v56  ;;  %v82_v45 = vld [vmem:[#allocation5] sm:$0xff] }
 0xfa6   :  { %6225 = vmatprep.subr.bf16.mxu1 %v6224_v59  ;;  %6237 = vmatprep.subr.bf16.mxu0 %v6236_v29 }
 0xfa7   :  { %v1839_v7 = vsel %vm502_vm14, %v1807_v18, %v6709_v24  ;;  %v1840_v44 = vsel %vm502_vm14, %v7531_v15, %v6710_v43 }
 0xfa8   :  { %1957 = vmatmul.mubr.f32.gmra.mrb[16].mxu1 %v1839_v7 }
 0xfa9   :  { %5035 = vmatprep.mubr.msk.f32.mxu1 %vm502_vm14, %v1820_v13  ;;  %6227 = vmatpush3.bf16.msra.mxu1 %v6224_v59 }
 0xfaa   :  { %6229 = vmatprep.subr.bf16.mxu1 %v6228_v5  ;;  %6239 = vmatpush3.bf16.msra.mxu0 %v6236_v29 }
 0xfac   :  { %1962 = vmatmul.mubr.f32.gmra.mrb[18].mxu1 %v1840_v44 }
 0xfad   :  { %6231 = vmatpush3.bf16.msra.mxu1 %v6228_v5 }
 0xfae   :  { %6264 = vmatprep.subr.bf16.mxu1 %v8397_v54 }
 0xfb9   :  { %v2295_v11 = vpop.permute.xlu1 %2294 }
 0xfba   :  { %v2308_v42 = vsel %vm8428_vm15, %v2284_v17, %v2295_v11  ;;  %vm8433_vm15 = vcmask 293888  }
 0xfbd   :  { %v2297_v32 = vpop.permute.xlu0 %2296 }
 0xfbe   :  { %v2309_v28 = vsel %vm8429_vm2, %v2285_v34, %v2297_v32  ;;  %vm8434_vm2 = vmmov %vm8432_vm13 }
 0xfc1   :  { %v2303_v49 = vpop.permute.xlu1 %2302  ;;  %v2305_v50 = vpop.permute.xlu0 %2304 }
 0xfc2   :  { %v2310_v15 = vsel %vm502_vm14, %v2308_v42, %v2303_v49  ;;  %v2311_v6 = vsel %vm502_vm14, %v2309_v28, %v2305_v50 }
 0xfc3   :  { %5636 = vmatprep.mubr.msk.f32.mxu1 %vm8430_vm5, %v2310_v15  ;;  %vm8435_vm5 = vmmov %vm8433_vm15 }
 0xfc4   :  { %5637 = vmatmul.mubr.msk.f32.vlgmr.msra.gmra.mrb[20].mxu1 %vm8431_vm10, %v2311_v6  ;;  %vm8401_vm10 = vcmp.lt.s32.totalorder %v7005_v4, 15 }
0x106b   :  { %v1948_v52 = vpop.f32.mrb[12].mxu1 }
0x106c   :  { %v7584_v55 = vadd.f32 %v5031_v46, %v1948_v52  ;;  %v1950_v59 = vpop.f32.mrb[13].mxu1 }
0x106e   :  { %v7587_v57 = vsub.f32 %v7584_v55, %v82_v45  ;;  %2176 = vst.msk [vmem:[%s8376_s5] sm:$0xff] %vm2175_vm12, %v7584_v55  ;;  %v8402_v43 = vrot.slane %v7584_v55, 2  ;;  %v8399_v11 = vrot.slane %v7584_v55, 1 }
0x106f   :  { %v1953_v36 = vpop.f32.mrb[14].mxu1 }
0x1070   :  { %v7594_v24 = vadd.f32 %v5031_v46, %v1953_v36  ;;  %v1955_v18 = vpop.f32.mrb[15].mxu1  ;;  %v1971_v5 = vand.u32 2147483647, %v7587_v57  ;;  %v1994_v32 = vrot.slane %v7587_v57, 1  ;;  %v2006_v17 = vrot.slane %v7587_v57, 2  ;;  %v84_v36 = vld [vmem:[#allocation5 + $0x10] sm:$0xff] }
0x1072   :  { %v7599_v7 = vsub.f32 %v7594_v24, %v83_v40  ;;  %v2097_v13 = vrot.slane %v7594_v24, 2  ;;  %v2113_v44 = vrot.slane %v7594_v24, 1  ;;  %2177 = vst.msk [vmem:[%s8376_s5 + $0x8] sm:$0xff] %vm2175_vm12, %v7594_v24  ;;  %v1975_v50 = vsel %vm8433_vm15, %v1971_v5, 0.0  ;;  %vm8436_vm15 = vmmov %vm8435_vm5 }
0x1074   :  { %v1995_v34 = vrot.slane %v7599_v7, 1  ;;  %v2007_v42 = vrot.slane %v7599_v7, 2  ;;  %v1972_v28 = vand.u32 2147483647, %v7599_v7  ;;  %v2102_v49 = vsel %vm8432_vm13, %v8402_v43, %v2097_v13 }
0x1075   :  { %v2108_v15 = vadd.f32 %v2102_v49, %v7584_v55  ;;  %v2118_v6 = vsel %vm128_vm1, %v8399_v11, %v2113_v44  ;;  %vm8410_vm13 = vcmp.lt.s32.totalorder %v7010_v8, 15 }
0x1076   :  { %v2000_v33 = vsel %vm128_vm1, %v1994_v32, %v1995_v34  ;;  %v2012_v0 = vsel %vm8434_vm2, %v2006_v17, %v2007_v42  ;;  %v1976_v56 = vsel %vm8435_vm5, %v1972_v28, 0.0  ;;  %v2124_v48 = vmul.f32 2.0, %v2118_v6  ;;  %vm8437_vm2 = vmmov %vm8435_vm5 }
0x1077   :  { %v2022_v21 = vsub.f32 %v2000_v33, %v7587_v57  ;;  %v2057_v29 = vadd.f32 %v2012_v0, %v7587_v57  ;;  %v2061_v45 = vmul.f32 2.0, %v2000_v33  ;;  %v1977_v52 = vadd.f32 %v1976_v56, %v1975_v50  ;;  %v85_v50 = vld [vmem:[#allocation5 + $0x18] sm:$0xff] }
0x1078   :  { %v7635_v59 = vsub.f32 %v2108_v15, %v2124_v48  ;;  %vm8438_vm5 = vcmp.lt.s32.totalorder %v6995_v1, 6 }
0x1079   :  { %v2065_v40 = vsub.f32 %v2057_v29, %v2061_v45  ;;  %v2030_v58 = vand.u32 2147483647, %v2022_v21 }
0x107b   :  { %v1958_v18 = vpop.f32.mrb[16].mxu1  ;;  %v2073_v31 = vand.u32 2147483647, %v2065_v40  ;;  %v2034_v29 = vsel %vm8436_vm15, %v2030_v58, 0.0  ;;  %vm8439_vm15 = vmmov %vm8438_vm5 }
0x107c   :  { %v7637_v5 = vadd.f32 %v5031_v46, %v1958_v18  ;;  %v1960_v49 = vpop.f32.mrb[17].mxu1 }
0x107d   :  { %v2077_v45 = vsel %vm8437_vm2, %v2073_v31, 0.0  ;;  %vm8409_vm2 = vcmp.lt.s32.totalorder %v7005_v4, 14 }
0x107e   :  { %v1969_v12 = vsub.f32 %v7637_v5, %v84_v36  ;;  %v8403_v28 = vrot.slane %v7637_v5, 2  ;;  %v8400_v6 = vrot.slane %v7637_v5, 1  ;;  %2178 = vst.msk [vmem:[%s8376_s5 + $0x10] sm:$0xff] %vm2175_vm12, %v7637_v5 }
0x107f   :  { %v1963_v15 = vpop.f32.mrb[18].mxu1 }
0x1080   :  { %v7649_v33 = vadd.f32 %v5031_v46, %v1963_v15  ;;  %v1965_v0 = vpop.f32.mrb[19].mxu1  ;;  %v1996_v56 = vrot.slane %v1969_v12, 1  ;;  %v2008_v48 = vrot.slane %v1969_v12, 2  ;;  %v1973_v21 = vand.u32 2147483647, %v1969_v12 }
0x1081   :  { %v2101_v40 = vsel %vm8438_vm5, %v2097_v13, %v8403_v28  ;;  %v7661_v36 = vsel %vm128_vm1, %v2113_v44, %v8400_v6  ;;  %vm8440_vm5 = vcmask 293888  }
0x1082   :  { %v1970_v46 = vsub.f32 %v7649_v33, %v85_v50  ;;  %v2099_v18 = vrot.slane %v7649_v33, 2  ;;  %v2115_v49 = vrot.slane %v7649_v33, 1  ;;  %2179 = vst.msk [vmem:[%s8376_s5 + $0x18] sm:$0xff] %vm2175_vm12, %v7649_v33  ;;  %v1999_v31 = vsel %vm128_vm1, %v1995_v34, %v1996_v56  ;;  %vm8442_vm12 = vmmov %vm8441_vm7  ;;  %s6882_s5 = smov 96  }
0x1083   :  { %v2003_v58 = vsel %vm142_vm3, %v1999_v31, 0.0  ;;  %v2011_v13 = vsel %vm8439_vm15, %v2007_v42, %v2008_v48  ;;  %v1978_v44 = vsel %vm8440_vm5, %v1973_v21, 0.0  ;;  %v2105_v50 = vsel %vm8441_vm7, %v2101_v40, 0.0  ;;  %vm8443_vm7 = vmmov %vm8439_vm15 }
0x1084   :  { %v1997_v15 = vrot.slane %v1970_v46, 1  ;;  %v2023_v0 = vsub.f32 %v2003_v58, %v7599_v7  ;;  %v2009_v47 = vrot.slane %v1970_v46, 2  ;;  %v2015_v34 = vsel %vm8442_vm12, %v2011_v13, 0.0  ;;  %vm8445_vm5 = vmmov %vm8443_vm7 }
0x1085   :  { %v2058_v31 = vadd.f32 %v2015_v34, %v7599_v7  ;;  %v2062_v54 = vmul.f32 2.0, %v2003_v58  ;;  %v1974_v42 = vand.u32 2147483647, %v1970_v46  ;;  %v1979_v11 = vadd.f32 %v1978_v44, %v1977_v52 }
0x1086   :  { %v1998_v21 = vsel %vm128_vm1, %v1996_v56, %v1997_v15  ;;  %v2001_v40 = vsel %vm128_vm1, %v1997_v15, %v1994_v32  ;;  %v2027_v6 = vsel %vm8401_vm10, %v2023_v0, 0.0  ;;  %v2010_v13 = vsel %vm8443_vm7, %v2008_v48, %v2009_v47 }
0x1087   :  { %vm8444_vm15 = vcmp.lt.s32.totalorder %v7019_v25, 16  ;;  %v2024_v58 = vsub.f32 %v1998_v21, %v1969_v12  ;;  %v2031_v34 = vand.u32 2147483647, %v2027_v6  ;;  %v2013_v52 = vsel %vm8445_vm5, %v2009_v47, %v2006_v17 }
0x1088   :  { %v2005_v7 = vsel %vm8444_vm15, %v2001_v40, 0.0  ;;  %vm8446_vm12 = vcmp.lt.s32.totalorder %v7045_v39, 16  ;;  %v2059_v44 = vadd.f32 %v2010_v13, %v1969_v12  ;;  %v2063_v15 = vmul.f32 2.0, %v1998_v21 }
0x1089   :  { %v2025_v56 = vsub.f32 %v2005_v7, %v1970_v46  ;;  %v2017_v32 = vsel %vm8446_vm12, %v2013_v52, 0.0  ;;  %v2032_v0 = vand.u32 2147483647, %v2024_v58  ;;  %vm8447_vm10 = vcmask 293888  }
0x108a   :  { %v2035_v43 = vsel %vm8447_vm10, %v2031_v34, 0.0  ;;  %v2060_v48 = vadd.f32 %v2017_v32, %v1970_v46  ;;  %v2064_v28 = vmul.f32 2.0, %v2005_v7  ;;  %v2066_v23 = vsub.f32 %v2058_v31, %v2062_v54  ;;  %vm8448_vm7 = vmmov %vm8447_vm10 }
0x108b   :  { %v2029_v40 = vsel %vm8410_vm13, %v2025_v56, 0.0  ;;  %v2036_v6 = vadd.f32 %v2035_v43, %v2034_v29  ;;  %v2067_v57 = vsub.f32 %v2059_v44, %v2063_v15  ;;  %v2037_v47 = vsel %vm8448_vm7, %v2032_v0, 0.0  ;;  %vm8449_vm15 = vmmov %vm8448_vm7 }
0x108c   :  { %v2033_v61 = vand.u32 2147483647, %v2029_v40  ;;  %v2068_v17 = vsub.f32 %v2060_v48, %v2064_v28  ;;  %v1980_v22 = vsel %vm8449_vm15, %v1974_v42, 0.0  ;;  %v2070_v12 = vsel %vm8409_vm2, %v2066_v23, 0.0  ;;  %vm8450_vm10 = vmmov %vm8448_vm7 }
0x108d   :  { %v2038_v52 = vadd.f32 %v2037_v47, %v2036_v6  ;;  %v2075_v21 = vand.u32 2147483647, %v2067_v57  ;;  %v7711_v13 = vadd.f32 %v1980_v22, %v1979_v11  ;;  %v2074_v54 = vand.u32 2147483647, %v2070_v12  ;;  %vm8452_vm12 = vmmov %vm8448_vm7 }
0x108e   :  { %v2039_v46 = vsel %vm8450_vm10, %v2033_v61, 0.0  ;;  %v2072_v43 = vsel %vm8408_vm6, %v2068_v17, 0.0  ;;  %v8451_v29 = vrot.slane %v7637_v5, 2  ;;  %v8453_v23 = vrot.slane %v7584_v55, 2  ;;  %vm8454_vm7 = vmmov %vm8445_vm5  ;;  %v5039_v17 = vld [vmem:[#allocation8 + $0x58] ss:$0 sm:$0xff] }
0x108f   :  { %v7720_v31 = vadd.f32 %v2039_v46, %v2038_v52  ;;  %v2076_v42 = vand.u32 2147483647, %v2072_v43  ;;  %v2080_v7 = vsel %vm8452_vm12, %v2075_v21, 0.0  ;;  %vm8455_vm15 = vmmov %vm8450_vm10  ;;  %vm8456_vm10 = vcmp.lt.s32.totalorder %v7045_v39, 16 }
0x1090   :  { %v2100_v28 = vsel %vm8445_vm5, %v8451_v29, %v2099_v18  ;;  %v2103_v22 = vsel %vm8454_vm7, %v2099_v18, %v8453_v23  ;;  %v2078_v61 = vsel %vm8455_vm15, %v2074_v54, 0.0  ;;  %v2109_v58 = vadd.f32 %v2105_v50, %v7594_v24  ;;  %vm8458_vm5 = vmmov %vm8452_vm12 }
0x1091   :  { %v2107_v11 = vsel %vm8456_vm10, %v2103_v22, 0.0  ;;  %v2110_v34 = vadd.f32 %v2100_v28, %v7637_v5  ;;  %v2079_v56 = vadd.f32 %v2078_v61, %v2077_v45  ;;  %v8457_v44 = vrot.slane %v7637_v5, 1  ;;  %vm8461_vm7 = vmmov %vm8458_vm5 }
0x1092   :  { %v2111_v32 = vadd.f32 %v2107_v11, %v7649_v33  ;;  %v2082_v0 = vsel %vm8458_vm5, %v2076_v42, 0.0  ;;  %v8459_v18 = vrot.slane %v7584_v55, 1  ;;  %v2121_v24 = vsel %vm142_vm3, %v7661_v36, 0.0  ;;  %vm8462_vm15 = vmmov %vm8458_vm5 }
0x1093   :  { %v2116_v15 = vsel %vm128_vm1, %v8457_v44, %v2115_v49  ;;  %v2081_v45 = vadd.f32 %v2080_v7, %v2079_v56  ;;  %vm8460_vm12 = vcmp.lt.s32.totalorder %v7019_v25, 16  ;;  %v2125_v5 = vmul.f32 2.0, %v2121_v24  ;;  %vm8463_vm10 = vmmov %vm8458_vm5  ;;  %v2536_v56 = vld [vmem:[#allocation7 + $0x5a0] sm:$0xff]  ;;  %v2538_v44 = vld [vmem:[#allocation7 + $0x5b0] sm:$0xff] }
0x1094   :  { %v2119_v48 = vsel %vm128_vm1, %v2115_v49, %v8459_v18  ;;  %v2126_v50 = vmul.f32 2.0, %v2116_v15  ;;  %v2136_v49 = vmul.f32 %v7635_v59, %v7635_v59  ;;  %v2541_v24 = vld [vmem:[#allocation7 + $0x5c8] sm:$0xff] }
0x1095   :  { %v2123_v33 = vsel %vm8460_vm12, %v2119_v48, 0.0  ;;  %v7747_v57 = vadd.f32 %v2082_v0, %v2081_v45  ;;  %v2129_v47 = vsub.f32 %v2109_v58, %v2125_v5  ;;  %vm8464_vm12 = vcmask 261120   ;;  %v2539_v0 = vld [vmem:[#allocation7 + $0x5b8] sm:$0xff]  ;;  %v2540_v48 = vld [vmem:[#allocation7 + $0x5c0] sm:$0xff]  ;;  %v2542_v45 = vld [vmem:[#allocation7 + $0x5d0] sm:$0xff] }
0x1096   :  { %v2127_v40 = vmul.f32 2.0, %v2123_v33  ;;  %v2130_v6 = vsub.f32 %v2110_v34, %v2126_v50  ;;  %v2140_v42 = vsel %vm8461_vm7, %v2136_v49, 0.0  ;;  %v6244_v18 = vpack.c.bf16 %v2539_v0, %v2538_v44  ;;  %v2543_v33 = vld [vmem:[#allocation7 + $0x5d8] sm:$0xff] }
0x1097   :  { %v2133_v36 = vsel %vm8409_vm2, %v2129_v47, 0.0  ;;  %v5638_v12 = vpop.f32.mrb[20].mxu1  ;;  %v6248_v50 = vpack.c.bf16 %v2541_v24, %v2540_v48  ;;  %v6252_v5 = vpack.c.bf16 %v2543_v33, %v2542_v45  ;;  %vm8468_vm7 = vcmp.lt.s32.totalorder %v7172_v10, 8  ;;  %v5045_v45 = vld [vmem:[#allocation8 + $0x68] ss:$0 sm:$0xff] }
0x1098   :  { %v2131_v55 = vsub.f32 %v2111_v32, %v2127_v40  ;;  %v2138_v52 = vmul.f32 %v2130_v6, %v2130_v6  ;;  %v2137_v46 = vmul.f32 %v2133_v36, %v2133_v36  ;;  %v2407_v43 = vadd.f32 %v5638_v12, %v5039_v17  ;;  %v2401_v54 = vpop.f32.mrb[21].mxu1  ;;  %v2537_v32 = vld [vmem:[#allocation7 + $0x5a8] sm:$0xff]  ;;  %v2544_v40 = vld [vmem:[#allocation7 + $0x5e0] sm:$0xff] }
0x1099   :  { %v2402_v28 = vadd.f32 %v5039_v17, %v2401_v54  ;;  %v6240_v15 = vpack.c.bf16 %v2537_v32, %v2536_v56  ;;  %v2545_v6 = vld [vmem:[#allocation7 + $0x5e8] sm:$0xff]  ;;  %v2546_v17 = vld [vmem:[#allocation7 + $0x5f0] sm:$0xff]  ;;  %v8466_v36 = vmov 0.0|0.0   ;;  %v2650_v33 = vadd.s32 2, %v7098_v27 }
0x109a   :  { %v2135_v21 = vsel %vm8408_vm6, %v2131_v55, 0.0  ;;  %v2141_v7 = vsel %vm8462_vm15, %v2137_v46, 0.0  ;;  %v2143_v23 = vsel %vm8463_vm10, %v2138_v52, 0.0  ;;  %v2411_v11 = vmax.f32 %v2407_v43, 0.0  ;;  %vm8465_vm6 = vmmov %vm8464_vm12  ;;  %v2547_v55 = vld [vmem:[#allocation7 + $0x5f8] sm:$0xff] }
0x109b   :  { %v2139_v29 = vmul.f32 %v2135_v21, %v2135_v21  ;;  %v2142_v59 = vadd.f32 %v2141_v7, %v2140_v42  ;;  %v2410_v22 = vmax.f32 %v2402_v28, 0.0  ;;  %6241 = vmatprep.subr.bf16.mxu0 %v6240_v15  ;;  %v6256_v47 = vpack.c.bf16 %v2545_v6, %v2544_v40  ;;  %v5042_v52 = vld [vmem:[#allocation8 + $0x60] ss:$0 sm:$0xff] }
0x109c   :  { %v6260_v49 = vpack.c.bf16 %v2547_v55, %v2546_v17  ;;  %vm8469_vm15 = vcmp.ge.s32.totalorder %v7199_v41, 0  ;;  %vm8470_vm10 = vcmp.ge.s32.totalorder %v7196_v38, 0  ;;  %vm8479_vm2 = vcmp.lt.s32.totalorder %v7169_v9, 8 }
0x109d   :  { %v2145_v61 = vsel %vm8458_vm5, %v2139_v29, 0.0  ;;  %v2144_v58 = vadd.f32 %v2143_v23, %v2142_v59  ;;  %5647 = vmatprep.mubr.msk.f32.mxu0 %vm8464_vm12, %v2410_v22  ;;  %vm8471_vm5 = vmmov %vm8464_vm12 }
0x109e   :  { %5648 = vmatmul.mubr.msk.f32.vlgmr.msra.gmra.mrb[30].mxu0 %vm8465_vm6, %v2411_v11  ;;  %vm8467_vm6 = vcmp.lt.s32.totalorder %v7169_v9, 8  ;;  %vm8472_vm12 = vmmov %vm8471_vm5 }
0x109f   :  { %v7761_v34 = vadd.f32 %v2145_v61, %v2144_v58  ;;  %6243 = vmatpush3.bf16.msra.mxu0 %v6240_v15 }
0x10a0   :  { %6245 = vmatprep.subr.bf16.mxu0 %v6244_v18 }
0x10a3   :  { %6247 = vmatpush3.bf16.msra.mxu0 %v6244_v18 }
0x10a4   :  { %6249 = vmatprep.subr.bf16.mxu0 %v6248_v50 }
0x10a7   :  { %6251 = vmatpush3.bf16.msra.mxu0 %v6248_v50 }
0x10a8   :  { %6253 = vmatprep.subr.bf16.mxu0 %v6252_v5 }
0x10ab   :  { %6255 = vmatpush3.bf16.msra.mxu0 %v6252_v5  ;;  %v2651_v5 = vadd.s32 2, %v7109_v35 }
0x10ac   :  { %6257 = vmatprep.subr.bf16.mxu0 %v6256_v47 }
0x10af   :  { %6259 = vmatpush3.bf16.msra.mxu0 %v6256_v47 }
0x10b0   :  { %6261 = vmatprep.subr.bf16.mxu0 %v6260_v49 }
0x10b3   :  { %6263 = vmatpush3.bf16.msra.mxu0 %v6260_v49 }
0x10b4   :  { %6291 = vmatprep.subr.bf16.mxu0 %v8466_v36 }
0x1171   :  { %v5649_v12 = vpop.f32.mrb[30].mxu0 }
0x1172   :  { %v2499_v21 = vadd.f32 %v5649_v12, %v5042_v52  ;;  %v2493_v46 = vpop.f32.mrb[31].mxu0 }
0x1173   :  { %v2494_v43 = vadd.f32 %v5042_v52, %v2493_v46 }
0x1174   :  { %v2503_v54 = vadd.f32 %v2499_v21, %v7536_v51 }
0x1175   :  { %v2502_v29 = vadd.f32 %v2494_v43, %v7533_v30 }
0x1176   :  { %v2505_v28 = vrot.slane %v2503_v54, 7  ;;  %v2511_v42 = vrot.slane %v2503_v54, 1  ;;  %2520 = vrot.lane.b32.xlu0 %v2503_v54, %s6879_s21  ;;  %v8475_v54 = vmov 0.0  }
0x1177   :  { %v2504_v7 = vrot.slane %v2502_v29, 7  ;;  %v2510_v23 = vrot.slane %v2502_v29, 1  ;;  %2518 = vrot.lane.b32.xlu1 %v2502_v29, %s6879_s21 }
0x1179   :  { %v2513_v59 = vsel %vm128_vm1, %v2511_v42, %v2510_v23  ;;  %v2512_v22 = vsel %vm128_vm1, %v2510_v23, %v2511_v42  ;;  %v2506_v61 = vsel %vm92_vm0, %v2504_v7, %v2505_v28  ;;  %v2507_v30 = vsel %vm92_vm0, %v2505_v28, %v2504_v7 }
0x117a   :  { %v2515_v51 = vsel %vm8467_vm6, %v2513_v59, 0.0  ;;  %v2514_v11 = vsel %vm8468_vm7, %v2512_v22, 0.0  ;;  %v2509_v32 = vsel %vm8469_vm15, %v2506_v61, 0.0  ;;  %v2508_v44 = vsel %vm8470_vm10, %v2507_v30, 0.0 }
0x117b   :  { %2528 = vrot.lane.b32.xlu0 %v2515_v51, %s6880_s22  ;;  %2526 = vrot.lane.b32.xlu1 %v2514_v11, %s6880_s22  ;;  %vm8473_vm6 = vcmask 785408   ;;  %vm2654_vm15 = vcmp.lt.s32.totalorder %v2650_v33, 8  ;;  %vm2655_vm10 = vcmp.lt.s32.totalorder %v2651_v5, 8  ;;  %v8484_v5 = vand.u32 7, %v7095_v26 }
0x117c   :  { %vm8474_vm7 = vmmov %vm8473_vm6 }
0x11e8   :  { %v2521_v58 = vpop.permute.xlu0 %2520 }
0x11e9   :  { %v2519_v56 = vpop.permute.xlu1 %2518  ;;  %v2533_v15 = vsel %vm8471_vm5, %v2509_v32, %v2521_v58  ;;  %vm6881_vm5 = vmmov 0  }
0x11ea   :  { %v2532_v0 = vsel %vm8472_vm12, %v2508_v44, %v2519_v56  ;;  %5681 = vmatprep.mubr.msk.f32.mxu1 %vm6881_vm5, %v8475_v54  ;;  %vm8476_vm12 = vcmp.lt.s32.totalorder %v6995_v1, 6  ;;  %v7819_v56 = vand.u32 3, %v6995_v1  ;;  %v2690_v44 = vshra.s32 %v6995_v1, 2 }
0x11ed   :  { %v2529_v18 = vpop.permute.xlu0 %2528  ;;  %v2527_v48 = vpop.permute.xlu1 %2526 }
0x11ee   :  { %v2535_v24 = vsel %vm502_vm14, %v2533_v15, %v2529_v18  ;;  %v2534_v50 = vsel %vm502_vm14, %v2532_v0, %v2527_v48  ;;  %v2693_v15 = vmul.u32 2, %v7819_v56 }
0x11ef   :  { %5674 = vmatprep.mubr.msk.f32.mxu0 %vm8473_vm6, %v2534_v50  ;;  %vm8477_vm6 = vmmov %vm8476_vm12 }
0x11f0   :  { %5675 = vmatmul.mubr.msk.f32.vlgmr.msra.gmra.mrb[32].mxu0 %vm8474_vm7, %v2535_v24  ;;  %vm8478_vm7 = vcmp.lt.s32.totalorder %v7172_v10, 8 }
0x11f1   :  { %5743 = vmatprep.mubr.msk.f32.mxu0 %vm6881_vm5, %v8475_v54 }
0x12c3   :  { %v5676_v40 = vpop.f32.mrb[32].mxu0 }
0x12c4   :  { %v2631_v6 = vadd.f32 %v5676_v40, %v5045_v45  ;;  %v2625_v47 = vpop.f32.mrb[33].mxu0  ;;  %v2786_v40 = vld [vmem:[#allocation7 + $0x678] sm:$0xff] }
0x12c5   :  { %v2626_v17 = vadd.f32 %v5045_v45, %v2625_v47 }
0x12c6   :  { %v2635_v55 = vrot.slane %v2631_v6, 7  ;;  %v2641_v49 = vrot.slane %v2631_v6, 1  ;;  %v2647_v52 = vrot.slane %v2631_v6, 2 }
0x12c7   :  { %v2634_v12 = vrot.slane %v2626_v17, 7  ;;  %v2640_v21 = vrot.slane %v2626_v17, 1  ;;  %v2646_v46 = vrot.slane %v2626_v17, 2  ;;  %v6711_v43 = vpack.i.bf16 %v2631_v6, %v2626_v17 }
0x12c9   :  { %6712 = vrot.lane.b32.xlu1 %v6711_v43, %s6879_s21  ;;  %v2648_v29 = vsel %vm8476_vm12, %v2646_v46, %v2647_v52  ;;  %v2649_v28 = vsel %vm8477_vm6, %v2647_v52, %v2646_v46  ;;  %v2642_v42 = vsel %vm128_vm1, %v2640_v21, %v2641_v49  ;;  %v2643_v7 = vsel %vm128_vm1, %v2641_v49, %v2640_v21  ;;  %v2771_v43 = vld [vmem:[#allocation7 + $0x600] sm:$0xff] }
0x12ca   :  { %v2658_v23 = vsel %vm2654_vm15, %v2648_v29, 0.0  ;;  %v2659_v59 = vsel %vm2655_vm10, %v2649_v28, 0.0  ;;  %v2644_v22 = vsel %vm8478_vm7, %v2642_v42, 0.0  ;;  %v2645_v61 = vsel %vm8479_vm2, %v2643_v7, 0.0  ;;  %v2772_v29 = vld [vmem:[#allocation7 + $0x608] sm:$0xff] }
0x12cb   :  { %v6721_v30 = vpack.i.bf16 %v2659_v59, %v2658_v23  ;;  %v6716_v51 = vpack.i.bf16 %v2645_v61, %v2644_v22  ;;  %v2636_v11 = vsel %vm92_vm0, %v2634_v12, %v2635_v55  ;;  %v2637_v58 = vsel %vm92_vm0, %v2635_v55, %v2634_v12  ;;  %v2773_v23 = vld [vmem:[#allocation7 + $0x610] sm:$0xff]  ;;  %v2774_v59 = vld [vmem:[#allocation7 + $0x618] sm:$0xff]  ;;  %v2775_v61 = vld [vmem:[#allocation7 + $0x620] sm:$0xff] }
0x12cc   :  { %vm8480_vm2 = vcmp.ge.s32.totalorder %v7196_v38, 0  ;;  %vm8481_vm15 = vcmp.ge.s32.totalorder %v7199_v41, 0  ;;  %vm7828_vm10 = vcmp.eq.s32.totalorder %v2690_v44, %v7387_v63  ;;  %vm7834_vm12 = vcmp.eq.s32.totalorder %v8484_v5, %v2693_v15  ;;  %v2779_v44 = vld [vmem:[#allocation7 + $0x640] sm:$0xff]  ;;  %v2780_v15 = vld [vmem:[#allocation7 + $0x648] sm:$0xff]  ;;  %v2785_v5 = vld [vmem:[#allocation7 + $0x670] sm:$0xff] }
0x12cd   :  { %6722 = vrot.lane.b32.xlu1 %v6721_v30, %s6882_s5  ;;  %6717 = vrot.lane.b32.xlu0 %v6716_v51, %s6880_s22  ;;  %v2638_v48 = vsel %vm8480_vm2, %v2637_v58, 0.0  ;;  %v2639_v24 = vsel %vm8481_vm15, %v2636_v11, 0.0  ;;  %vm8487_vm6 = vcmask 261120   ;;  %vm8489_vm2 = vcmask 785408   ;;  %vm2695_vm13 = vmand %vm7828_vm10, %vm7834_vm12  ;;  %v2776_v30 = vld [vmem:[#allocation7 + $0x628] sm:$0xff]  ;;  %v2777_v11 = vld [vmem:[#allocation7 + $0x630] sm:$0xff] }
0x12ce   :  { %vm8488_vm7 = vmmov %vm8487_vm6  ;;  %v5048_v42 = vsel %vm2695_vm13, 1.0, %v8475_v54  ;;  %v6268_v7 = vpack.c.bf16 %v2772_v29, %v2771_v43  ;;  %v6271_v22 = vpack.c.bf16 %v2774_v59, %v2773_v23  ;;  %v6274_v51 = vpack.c.bf16 %v2776_v30, %v2775_v61  ;;  %v2778_v58 = vld [vmem:[#allocation7 + $0x638] sm:$0xff]  ;;  %v2890_v43 = vld [vmem:[#allocation7 + $0x6a8] sm:$0xff] }
0x12cf   :  { %vm8490_vm15 = vmmov %vm8489_vm2  ;;  %v2893_v23 = vld [vmem:[#allocation7 + $0x6c0] sm:$0xff]  ;;  %v2894_v59 = vld [vmem:[#allocation7 + $0x6c8] sm:$0xff] }
0x12d0   :  { %v2895_v61 = vld [vmem:[#allocation7 + $0x6d0] sm:$0xff]  ;;  %v2896_v30 = vld [vmem:[#allocation7 + $0x6d8] sm:$0xff]  ;;  %vm8491_vm12 = vmmov %vm8487_vm6 }
0x133b   :  { %v6713_v32 = vpop.permute.xlu1 %6712 }
0x133c   :  { %v6715_v0 = vunpack.i.h.bf16 %v6713_v32  ;;  %v6714_v18 = vunpack.i.l.bf16 %v6713_v32  ;;  %v6277_v32 = vpack.c.bf16 %v2778_v58, %v2777_v11  ;;  %v5050_v11 = vld [vmem:[#allocation8 + $0x70] ss:$0 sm:$0xff] }
0x133e   :  { %v2684_v49 = vsel %vm8487_vm6, %v2638_v48, %v6714_v18  ;;  %v2685_v52 = vsel %vm8488_vm7, %v2639_v24, %v6715_v0  ;;  %v6280_v0 = vpack.c.bf16 %v2780_v15, %v2779_v44  ;;  %v2781_v18 = vld [vmem:[#allocation7 + $0x650] sm:$0xff]  ;;  %v2782_v48 = vld [vmem:[#allocation7 + $0x658] sm:$0xff]  ;;  %vm8492_vm6 = vmmov %vm8489_vm2 }
0x133f   :  { %v6723_v50 = vpop.permute.xlu1 %6722  ;;  %v6718_v45 = vpop.permute.xlu0 %6717  ;;  %v6283_v24 = vpack.c.bf16 %v2782_v48, %v2781_v18 }
0x1340   :  { %v6725_v6 = vunpack.i.h.bf16 %v6723_v50  ;;  %v6724_v47 = vunpack.i.l.bf16 %v6723_v50  ;;  %v6720_v17 = vunpack.i.h.bf16 %v6718_v45  ;;  %v6719_v55 = vunpack.i.l.bf16 %v6718_v45  ;;  %v2783_v50 = vld [vmem:[#allocation7 + $0x660] sm:$0xff]  ;;  %v2784_v45 = vld [vmem:[#allocation7 + $0x668] sm:$0xff] }
0x1341   :  { %v6286_v33 = vpack.c.bf16 %v2784_v45, %v2783_v50  ;;  %v2976_v45 = vld [vmem:[#allocation7 + $0x6e0] sm:$0xff] }
0x1342   :  { %v2686_v12 = vsel %vm502_vm14, %v2684_v49, %v6719_v55  ;;  %v2687_v63 = vsel %vm502_vm14, %v2685_v52, %v6720_v17  ;;  %v2885_v55 = vld [vmem:[#allocation7 + $0x680] sm:$0xff]  ;;  %v2886_v49 = vld [vmem:[#allocation7 + $0x688] sm:$0xff]  ;;  %v2887_v52 = vld [vmem:[#allocation7 + $0x690] sm:$0xff] }
0x1343   :  { %v2688_v21 = vsel %vm8489_vm2, %v2686_v12, %v6724_v47  ;;  %v2689_v46 = vsel %vm8490_vm15, %v2687_v63, %v6725_v6  ;;  %v6289_v6 = vpack.c.bf16 %v2786_v40, %v2785_v5  ;;  %v6292_v12 = vpack.c.bf16 %v2886_v49, %v2885_v55  ;;  %v2888_v63 = vld [vmem:[#allocation7 + $0x698] sm:$0xff]  ;;  %vm8493_vm2 = vmmov %vm8488_vm7 }
0x1344   :  { %v6265_v28 = vpack.c.bf16 %v2689_v46, %v2688_v21  ;;  %v6295_v21 = vpack.c.bf16 %v2888_v63, %v2887_v52  ;;  %v2889_v46 = vld [vmem:[#allocation7 + $0x6a0] sm:$0xff]  ;;  %v2979_v49 = vld [vmem:[#allocation7 + $0x6f8] sm:$0xff]  ;;  %vm8494_vm15 = vmmov %vm8492_vm6 }
0x1345   :  { %6293 = vmatpush3.bf16.msra.mxu0 %v6292_v12  ;;  %v6298_v29 = vpack.c.bf16 %v2890_v43, %v2889_v46  ;;  %v5051_v12 = vld [vmem:[#allocation8 + $0x78] ss:$0 sm:$0xff] }
0x1346   :  { %6266 = vmatpush3.bf16.msra.mxu1 %v6265_v28  ;;  %6294 = vmatprep.subr.bf16.mxu0 %v8466_v36  ;;  %v2891_v28 = vld [vmem:[#allocation7 + $0x6b0] sm:$0xff] }
0x1347   :  { %6267 = vmatprep.subr.bf16.mxu1 %v8466_v36 }
0x1349   :  { %5682 = vmatmul.mubr.msk.f32.vlgmr.msra.gmra.mrb[22].mxu1 %vm372_vm11, %v5048_v42  ;;  %6296 = vmatpush3.bf16.msra.mxu0 %v6295_v21  ;;  %v2892_v42 = vld [vmem:[#allocation7 + $0x6b8] sm:$0xff] }
0x134a   :  { %6269 = vmatpush3.bf16.msra.mxu1 %v6268_v7  ;;  %5716 = vmatprep.mubr.msk.f32.mxu1 %vm6881_vm5, %v8475_v54  ;;  %v6301_v7 = vpack.c.bf16 %v2892_v42, %v2891_v28  ;;  %v3074_v28 = vld [vmem:[#allocation7 + $0x708] sm:$0xff]  ;;  %v3075_v42 = vld [vmem:[#allocation7 + $0x710] sm:$0xff] }
0x134b   :  { %6270 = vmatprep.subr.bf16.mxu1 %v8466_v36  ;;  %6297 = vmatprep.subr.bf16.mxu0 %v8466_v36 }
0x134d   :  { %6299 = vmatpush3.bf16.msra.mxu0 %v6298_v29  ;;  %v3073_v29 = vld [vmem:[#allocation7 + $0x700] sm:$0xff] }
0x134e   :  { %6272 = vmatpush3.bf16.msra.mxu1 %v6271_v22  ;;  %6300 = vmatprep.subr.bf16.mxu0 %v8466_v36  ;;  %v6304_v22 = vpack.c.bf16 %v2894_v59, %v2893_v23  ;;  %v3076_v23 = vld [vmem:[#allocation7 + $0x718] sm:$0xff] }
0x134f   :  { %6273 = vmatprep.subr.bf16.mxu1 %v8466_v36  ;;  %v6319_v59 = vpack.c.bf16 %v3076_v23, %v3075_v42 }
0x1351   :  { %6302 = vmatpush3.bf16.msra.mxu0 %v6301_v7  ;;  %v6316_v7 = vpack.c.bf16 %v3074_v28, %v3073_v29  ;;  %v3169_v29 = vld [vmem:[%s8375_s4 + $0x70] sm:$0xff]  ;;  %v3170_v28 = vld [vmem:[%s8375_s4 + $0x78] sm:$0xff] }
0x1352   :  { %6275 = vmatpush3.bf16.msra.mxu1 %v6274_v51  ;;  %6303 = vmatprep.subr.bf16.mxu0 %v8466_v36  ;;  %v6307_v51 = vpack.c.bf16 %v2896_v30, %v2895_v61  ;;  %v3078_v61 = vld [vmem:[#allocation7 + $0x728] sm:$0xff]  ;;  %v6346_v42 = vpack.c.bf16 %v3170_v28, %v3169_v29  ;;  %v3402_v28 = vld [vmem:[#allocation7 + $0x770] sm:$0xff] }
0x1353   :  { %6276 = vmatprep.subr.bf16.mxu1 %v8466_v36  ;;  %v3401_v29 = vld [vmem:[#allocation7 + $0x768] sm:$0xff] }
0x1355   :  { %6305 = vmatpush3.bf16.msra.mxu0 %v6304_v22  ;;  %v3077_v22 = vld [vmem:[#allocation7 + $0x720] sm:$0xff] }
0x1356   :  { %6278 = vmatpush3.bf16.msra.mxu1 %v6277_v32  ;;  %6306 = vmatprep.subr.bf16.mxu0 %v8466_v36  ;;  %v7870_v32 = vadd.s32 1, %v7819_v56  ;;  %v6322_v30 = vpack.c.bf16 %v3078_v61, %v3077_v22 }
0x1357   :  { %6279 = vmatprep.subr.bf16.mxu1 %v8466_v36 }
0x1358   :  { %vm2872_vm13 = vcmp.lt.s32.totalorder %v7870_v32, 4 }
0x1359   :  { %6308 = vmatpush3.bf16.msra.mxu0 %v6307_v51  ;;  %v3079_v51 = vld [vmem:[#allocation7 + $0x730] sm:$0xff] }
0x135a   :  { %6281 = vmatpush3.bf16.msra.mxu1 %v6280_v0  ;;  %6309 = vmatprep.subr.bf16.mxu0 %v8466_v36 }
0x135b   :  { %6282 = vmatprep.subr.bf16.mxu1 %v8466_v36 }
0x135e   :  { %6284 = vmatpush3.bf16.msra.mxu1 %v6283_v24  ;;  %v7881_v24 = vadd.s32 4294967295, %v7819_v56  ;;  %v2978_v56 = vld [vmem:[#allocation7 + $0x6f0] sm:$0xff] }
0x135f   :  { %6285 = vmatprep.subr.bf16.mxu1 %v8466_v36  ;;  %v6313_v52 = vpack.c.bf16 %v2979_v49, %v2978_v56 }
0x1360   :  { %vm2865_vm10 = vcmp.ge.s32.totalorder %v7881_v24, 0 }
0x1362   :  { %6287 = vmatpush3.bf16.msra.mxu1 %v6286_v33  ;;  %v2977_v33 = vld [vmem:[#allocation7 + $0x6e8] sm:$0xff] }
0x1363   :  { %6288 = vmatprep.subr.bf16.mxu1 %v8466_v36 }
0x1366   :  { %6290 = vmatpush3.bf16.msra.mxu1 %v6289_v6  ;;  %v6310_v6 = vpack.c.bf16 %v2977_v33, %v2976_v45  ;;  %v3163_v33 = vld [vmem:[%s8375_s4 + $0x40] sm:$0xff] }
0x1367   :  { %6333 = vmatprep.subr.bf16.mxu1 %v8466_v36 }
0x141c   :  { %v2767_v47 = vpop.f32.mrb[22].mxu1 }
0x141d   :  { %v5683_v17 = vpop.f32.mrb[23].mxu1  ;;  %5717 = vmatmul.mubr.f32.vlgmr.msra.gmra.mrb[24].mxu1 %v2767_v47 }
0x141e   :  { %5800 = vmatprep.mubr.msk.f32.mxu1 %vm6881_vm5, %v8475_v54 }
0x14f0   :  { %v2858_v58 = vpop.f32.mrb[24].mxu1 }
0x14f1   :  { %v7872_v44 = vadd.f32 %v5050_v11, %v2858_v58  ;;  %v5718_v15 = vpop.f32.mrb[25].mxu1  ;;  %v3080_v11 = vld [vmem:[#allocation7 + $0x738] sm:$0xff] }
0x14f2   :  { %v6325_v58 = vpack.c.bf16 %v3080_v11, %v3079_v51  ;;  %v3081_v15 = vld [vmem:[#allocation7 + $0x740] sm:$0xff] }
0x14f3   :  { %v2862_v0 = vmax.f32 %v7872_v44, 0.0 }
0x14f5   :  { %2876 = vrot.lane.b32.xlu0 %v2862_v0, %s6879_s21  ;;  %v2869_v18 = vrot.slane %v2862_v0, 1  ;;  %v2863_v50 = vrot.slane %v2862_v0, 7  ;;  %v3082_v0 = vld [vmem:[#allocation7 + $0x748] sm:$0xff] }
0x14f7   :  { %v2874_v48 = vsel %vm2872_vm13, %v2869_v18, 0.0  ;;  %v2868_v40 = vsel %vm2865_vm10, %v2863_v50, 0.0  ;;  %v6328_v18 = vpack.c.bf16 %v3082_v0, %v3081_v15  ;;  %v3084_v50 = vld [vmem:[#allocation7 + $0x758] sm:$0xff] }
0x14f8   :  { %2880 = vrot.lane.b32.xlu1 %v2874_v48, %s6880_s22  ;;  %v3083_v48 = vld [vmem:[#allocation7 + $0x750] sm:$0xff]  ;;  %v5066_v0 = vld [vmem:[#allocation8 + $0xd8] ss:$0 sm:$0xff] }
0x14f9   :  { %v6331_v45 = vpack.c.bf16 %v3084_v50, %v3083_v48 }
0x1567   :  { %v2877_v5 = vpop.permute.xlu0 %2876 }
0x1568   :  { %v2883_v47 = vsel %vm8491_vm12, %v2868_v40, %v2877_v5  ;;  %v3164_v5 = vld [vmem:[%s8375_s4 + $0x48] sm:$0xff] }
0x1569   :  { %v6334_v40 = vpack.c.bf16 %v3164_v5, %v3163_v33 }
0x156a   :  { %v2881_v17 = vpop.permute.xlu1 %2880 }
0x156b   :  { %v2884_v55 = vsel %vm502_vm14, %v2883_v47, %v2881_v17  ;;  %6336 = vmatpush3.bf16.xpose.msk.msra.mxu1 %vm7223_vm8, %v6334_v40  ;;  %v3165_v17 = vld [vmem:[%s8375_s4 + $0x50] sm:$0xff] }
0x156c   :  { %5744 = vmatmul.mubr.msk.f32.vlgmr.msra.gmra.mrb[34].mxu0 %vm8492_vm6, %v2884_v55  ;;  %6337 = vmatprep.subr.bf16.mxu1 %v8466_v36  ;;  %v3166_v55 = vld [vmem:[%s8375_s4 + $0x58] sm:$0xff] }
0x156d   :  { %6311 = vmatpush3.bf16.msra.mxu0 %v6310_v6  ;;  %5754 = vmatprep.mubr.msk.f32.mxu0 %vm6881_vm5, %v8475_v54  ;;  %v5053_v6 = vld [vmem:[#allocation8 + $0x80] ss:$0 sm:$0xff] }
0x156e   :  { %6312 = vmatprep.subr.bf16.mxu0 %v8466_v36 }
0x1571   :  { %6314 = vmatpush3.bf16.msra.mxu0 %v6313_v52 }
0x1572   :  { %6315 = vmatprep.subr.bf16.mxu0 %v8466_v36 }
0x163f   :  { %v2971_v63 = vpop.f32.mrb[34].mxu0 }
0x1640   :  { %v2972_v21 = vadd.f32 %v5051_v12, %v2971_v63  ;;  %v5745_v46 = vpop.f32.mrb[35].mxu0  ;;  %v6338_v12 = vpack.c.bf16 %v3166_v55, %v3165_v17 }
0x1641   :  { %v3167_v46 = vld [vmem:[%s8375_s4 + $0x60] sm:$0xff] }
0x1642   :  { %v2975_v43 = vmax.f32 %v2972_v21, 0.0  ;;  %6340 = vmatpush3.bf16.xpose.msk.msra.mxu1 %vm7223_vm8, %v6338_v12 }
0x1643   :  { %6341 = vmatprep.subr.bf16.mxu1 %v8466_v36 }
0x1644   :  { %5755 = vmatmul.mubr.msk.f32.vlgmr.msra.gmra.mrb[36].mxu0 %vm8488_vm7, %v2975_v43 }
0x1645   :  { %5781 = vmatprep.mubr.msk.f32.mxu0 %vm6881_vm5, %v8475_v54  ;;  %6317 = vmatpush3.bf16.msra.mxu0 %v6316_v7 }
0x1646   :  { %6318 = vmatprep.subr.bf16.mxu0 %v8466_v36 }
0x1649   :  { %6320 = vmatpush3.bf16.msra.mxu0 %v6319_v59 }
0x164a   :  { %6321 = vmatprep.subr.bf16.mxu0 %v8466_v36 }
0x164d   :  { %6323 = vmatpush3.bf16.msra.mxu0 %v6322_v30 }
0x164e   :  { %6324 = vmatprep.subr.bf16.mxu0 %v8466_v36 }
0x1651   :  { %6326 = vmatpush3.bf16.msra.mxu0 %v6325_v58 }
0x1652   :  { %6327 = vmatprep.subr.bf16.mxu0 %v8466_v36 }
0x1655   :  { %6329 = vmatpush3.bf16.msra.mxu0 %v6328_v18 }
0x1656   :  { %6330 = vmatprep.subr.bf16.mxu0 %v8466_v36 }
0x1659   :  { %6332 = vmatpush3.bf16.msra.mxu0 %v6331_v45 }
0x165a   :  { %6349 = vmatprep.subr.bf16.mxu0 %v8466_v36 }
0x1717   :  { %v3054_v47 = vpop.f32.mrb[36].mxu0 }
0x1718   :  { %v3055_v56 = vadd.f32 %v5053_v6, %v3054_v47  ;;  %v5756_v49 = vpop.f32.mrb[37].mxu0 }
0x171a   :  { %v3058_v52 = vadd.f32 %v3055_v56, %v7872_v44  ;;  %v3168_v44 = vld [vmem:[%s8375_s4 + $0x68] sm:$0xff] }
0x171b   :  { %v6342_v43 = vpack.c.bf16 %v3168_v44, %v3167_v46 }
0x171c   :  { %3064 = vrot.lane.b32.xlu0 %v3058_v52, %s6879_s21  ;;  %v3061_v63 = vrot.slane %v3058_v52, 1  ;;  %v3059_v7 = vrot.slane %v3058_v52, 7 }
0x171d   :  { %6344 = vmatpush3.bf16.xpose.msk.msra.mxu1 %vm7223_vm8, %v6342_v43 }
0x171e   :  { %v3062_v21 = vsel %vm2872_vm13, %v3061_v63, 0.0  ;;  %6345 = vmatprep.subr.bf16.mxu1 %v8466_v36  ;;  %v3060_v59 = vsel %vm2865_vm10, %v3059_v7, 0.0  ;;  %v3403_v7 = vld [vmem:[#allocation7 + $0x778] sm:$0xff] }
0x171f   :  { %3068 = vrot.lane.b32.xlu1 %v3062_v21, %s6880_s22 }
0x1725   :  { %6348 = vmatpush3.bf16.xpose.msk.msra.mxu1 %vm7223_vm8, %v6346_v42  ;;  %vm8495_vm8 = vmmov %vm8493_vm2 }
0x1726   :  { %6361 = vmatprep.subr.bf16.mxu1 %v8466_v36 }
0x178e   :  { %v3065_v23 = vpop.permute.xlu0 %3064 }
0x178f   :  { %v3071_v22 = vsel %vm8493_vm2, %v3060_v59, %v3065_v23  ;;  %v6365_v23 = vpack.c.bf16 %v3403_v7, %v3402_v28  ;;  %v3404_v59 = vld [vmem:[#allocation7 + $0x780] sm:$0xff]  ;;  %v3507_v7 = vld [vmem:[#allocation7 + $0x7f8] sm:$0xff] }
0x1791   :  { %v3069_v61 = vpop.permute.xlu1 %3068 }
0x1792   :  { %v3072_v30 = vsel %vm502_vm14, %v3071_v22, %v3069_v61  ;;  %v3405_v22 = vld [vmem:[#allocation7 + $0x788] sm:$0xff] }
0x1793   :  { %5782 = vmatmul.mubr.msk.f32.vlgmr.msra.gmra.mrb[38].mxu0 %vm8494_vm15, %v3072_v30  ;;  %v6368_v61 = vpack.c.bf16 %v3405_v22, %v3404_v59  ;;  %v3406_v30 = vld [vmem:[#allocation7 + $0x790] sm:$0xff]  ;;  %v3508_v59 = vld [vmem:[#allocation7 + $0x800] sm:$0xff]  ;;  %v3509_v22 = vld [vmem:[#allocation7 + $0x808] sm:$0xff] }
0x1794   :  { %6351 = vmatpush3.bf16.msra.mxu0 %v6334_v40  ;;  %5819 = vmatprep.mubr.msk.f32.mxu0 %vm6881_vm5, %v8475_v54 }
0x1795   :  { %6352 = vmatprep.subr.bf16.mxu0 %v8466_v36 }
0x1798   :  { %6354 = vmatpush3.bf16.msra.mxu0 %v6338_v12 }
0x1799   :  { %6355 = vmatprep.subr.bf16.mxu0 %v8466_v36 }
0x179c   :  { %6357 = vmatpush3.bf16.msra.mxu0 %v6342_v43  ;;  %v3400_v43 = vld [vmem:[#allocation7 + $0x760] sm:$0xff] }
0x179d   :  { %6358 = vmatprep.subr.bf16.mxu0 %v8466_v36 }
0x17a0   :  { %6360 = vmatpush3.bf16.msra.mxu0 %v6346_v42  ;;  %v6362_v42 = vpack.c.bf16 %v3401_v29, %v3400_v43  ;;  %v3504_v43 = vld [vmem:[#allocation7 + $0x7e0] sm:$0xff]  ;;  %v3505_v29 = vld [vmem:[#allocation7 + $0x7e8] sm:$0xff] }
0x17a1   :  { %6379 = vmatprep.subr.bf16.mxu0 %v8466_v36  ;;  %v6386_v28 = vpack.c.bf16 %v3505_v29, %v3504_v43  ;;  %v3606_v29 = vld [vmem:[#allocation7 + $0x898] sm:$0xff] }
0x1866   :  { %v3159_v51 = vpop.f32.mrb[38].mxu0 }
0x1867   :  { %v7954_v11 = vadd.f32 %v5055_v53, %v3159_v51  ;;  %v5783_v58 = vpop.f32.mrb[39].mxu0  ;;  %v3407_v53 = vld [vmem:[#allocation7 + $0x798] sm:$0xff] }
0x1868   :  { %v6371_v51 = vpack.c.bf16 %v3407_v53, %v3406_v30  ;;  %v3408_v58 = vld [vmem:[#allocation7 + $0x7a0] sm:$0xff]  ;;  %v3510_v30 = vld [vmem:[#allocation7 + $0x810] sm:$0xff]  ;;  %v3511_v53 = vld [vmem:[#allocation7 + $0x818] sm:$0xff] }
0x1869   :  { %5801 = vmatmul.mubr.msk.f32.vlgmr.msra.gmra.mrb[26].mxu1 %vm8495_vm8, %v7954_v11  ;;  %vm3703_vm8 = vcmask 64512  }
0x186a   :  { %5846 = vmatprep.mubr.msk.f32.mxu1 %vm6881_vm5, %v8475_v54  ;;  %6363 = vmatpush3.bf16.msra.mxu1 %v6362_v42  ;;  %v3506_v42 = vld [vmem:[#allocation7 + $0x7f0] sm:$0xff] }
0x186b   :  { %6364 = vmatprep.subr.bf16.mxu1 %v8466_v36 }
0x186e   :  { %6366 = vmatpush3.bf16.msra.mxu1 %v6365_v23  ;;  %v6389_v23 = vpack.c.bf16 %v3507_v7, %v3506_v42  ;;  %v3607_v42 = vld [vmem:[#allocation7 + $0x8a0] sm:$0xff]  ;;  %v3608_v7 = vld [vmem:[#allocation7 + $0x8a8] sm:$0xff] }
0x186f   :  { %6367 = vmatprep.subr.bf16.mxu1 %v8466_v36 }
0x1872   :  { %6369 = vmatpush3.bf16.msra.mxu1 %v6368_v61  ;;  %v6392_v61 = vpack.c.bf16 %v3509_v22, %v3508_v59  ;;  %v6422_v22 = vpack.c.bf16 %v3608_v7, %v3607_v42  ;;  %v3832_v7 = vld [vmem:[#allocation7 + $0x8c8] sm:$0xff] }
0x1873   :  { %6370 = vmatprep.subr.bf16.mxu1 %v8466_v36 }
0x1876   :  { %6372 = vmatpush3.bf16.msra.mxu1 %v6371_v51  ;;  %v6395_v51 = vpack.c.bf16 %v3511_v53, %v3510_v30 }
0x1877   :  { %6373 = vmatprep.subr.bf16.mxu1 %v8466_v36 }
0x193c   :  { %v3264_v15 = vpop.f32.mrb[26].mxu1 }
0x193d   :  { %v3269_v18 = vmul.f32 2.0, %v3264_v15  ;;  %v5802_v48 = vpop.f32.mrb[27].mxu1  ;;  %v3409_v15 = vld [vmem:[#allocation7 + $0x7a8] sm:$0xff] }
0x193e   :  { %v3411_v48 = vld [vmem:[#allocation7 + $0x7b8] sm:$0xff] }
0x193f   :  { %v3274_v50 = vsub.f32 %v5066_v0, %v3269_v18  ;;  %v6374_v0 = vpack.c.bf16 %v3409_v15, %v3408_v58  ;;  %v3410_v18 = vld [vmem:[#allocation7 + $0x7b0] sm:$0xff]  ;;  %v3512_v58 = vld [vmem:[#allocation7 + $0x820] sm:$0xff]  ;;  %v3513_v15 = vld [vmem:[#allocation7 + $0x828] sm:$0xff] }
0x1941   :  { %v3275_v45 = vsel %vm502_vm14, %v3274_v50, inf  ;;  %6375 = vmatpush3.bf16.msra.mxu1 %v6374_v0  ;;  %v6398_v0 = vpack.c.bf16 %v3513_v15, %v3512_v58 }
0x1942   :  { %3276 = vmin.xlane.f32.xlu0 %v3275_v45  ;;  %6376 = vmatprep.subr.bf16.mxu1 %v8466_v36 }
0x19cf   :  { %v3277_v33 = vpop.xlane.xlu0 %3276 }
0x19d0   :  { %vm3278_vm12 = vcmp.le.f32.partialorder %v3274_v50, %v3277_v33  ;;  %v6377_v50 = vpack.c.bf16 %v3411_v48, %v3410_v18  ;;  %v3514_v18 = vld [vmem:[#allocation7 + $0x830] sm:$0xff]  ;;  %v3515_v48 = vld [vmem:[#allocation7 + $0x838] sm:$0xff] }
0x19d1   :  { %v3279_v5 = vsel %vm3278_vm12, %v7095_v26, 64 }
0x19d2   :  { %v3280_v40 = vsel %vm502_vm14, %v3279_v5, 2147483647  ;;  %6378 = vmatpush3.bf16.msra.mxu1 %v6377_v50  ;;  %v6401_v50 = vpack.c.bf16 %v3515_v48, %v3514_v18 }
0x19d3   :  { %v3282_v6 = vshra.s32 %v3280_v40, 16  ;;  %v3281_v17 = vand.u32 65535, %v3280_v40  ;;  %6415 = vmatprep.subr.bf16.mxu1 %v8466_v36 }
0x19d5   :  { %v3284_v47 = vcvt.s32.f32 %v3282_v6  ;;  %v3283_v56 = vcvt.s32.f32 %v3281_v17 }
0x19d7   :  { %3285 = vmin.xlane.f32.xlu1 %v3284_v47 }
0x1a64   :  { %v3286_v55 = vpop.xlane.xlu1 %3285 }
0x1a65   :  { %vm3287_vm6 = vcmp.eq.f32.partialorder %v3284_v47, %v3286_v55  ;;  %v3292_v52 = vcvt.f32.s32 %v3286_v55 }
0x1a66   :  { %v3288_v49 = vsel %vm3287_vm6, %v3283_v56, inf }
0x1a67   :  { %3289 = vmin.xlane.f32.xlu0 %v3288_v49  ;;  %v3293_v63 = vshll.u32 %v3292_v52, 16  ;;  %v3500_v52 = vld [vmem:[#allocation7 + $0x7c0] sm:$0xff] }
0x1af4   :  { %v3290_v12 = vpop.xlane.xlu0 %3289 }
0x1af5   :  { %v3291_v21 = vcvt.f32.s32 %v3290_v12  ;;  %v3501_v12 = vld [vmem:[#allocation7 + $0x7c8] sm:$0xff] }
0x1af7   :  { %v3294_v46 = vadd.s32 %v3293_v63, %v3291_v21  ;;  %v3502_v63 = vld [vmem:[#allocation7 + $0x7d0] sm:$0xff]  ;;  %v6380_v21 = vpack.c.bf16 %v3501_v12, %v3500_v52  ;;  %v3523_v12 = vld [vmem:[#allocation7 + $0x878] sm:$0xff] }
0x1af8   :  { %v3522_v52 = vld [vmem:[#allocation7 + $0x870] sm:$0xff] }
0x1af9   :  { %vm3295_vm7 = vcmp.eq.s32.totalorder %v7095_v26, %v3294_v46  ;;  %v3503_v46 = vld [vmem:[#allocation7 + $0x7d8] sm:$0xff] }
0x1afa   :  { %v5067_v44 = vsel %vm3295_vm7, 1.0, %v8475_v54 }
0x1afb   :  { %5820 = vmatmul.mubr.msk.f32.vlgmr.msra.gmra.mrb[40].mxu0 %vm502_vm14, %v5067_v44  ;;  %v6383_v44 = vpack.c.bf16 %v3503_v46, %v3502_v63  ;;  %v6413_v63 = vpack.c.bf16 %v3523_v12, %v3522_v52  ;;  %v3604_v46 = vld [vmem:[#allocation7 + $0x888] sm:$0xff]  ;;  %v8497_v52 = vshra.s32 %v6998_v2, 3  ;;  %v3831_v2 = vld [vmem:[#allocation7 + $0x8c0] sm:$0xff] }
0x1afc   :  { %6381 = vmatpush1.bf16.msra.mxu0 %v6380_v21  ;;  %v3603_v21 = vld [vmem:[#allocation7 + $0x880] sm:$0xff] }
0x1afd   :  { %6382 = vmatprep.subr.bf16.mxu0 %v8466_v36  ;;  %v6416_v43 = vpack.c.bf16 %v3604_v46, %v3603_v21 }
0x1b00   :  { %6384 = vmatpush1.bf16.msra.mxu0 %v6383_v44  ;;  %v3605_v44 = vld [vmem:[#allocation7 + $0x890] sm:$0xff] }
0x1b01   :  { %6385 = vmatprep.subr.bf16.mxu0 %v8466_v36 }
0x1b04   :  { %6387 = vmatpush1.bf16.msra.mxu0 %v6386_v28  ;;  %v6419_v28 = vpack.c.bf16 %v3606_v29, %v3605_v44  ;;  %v3847_v29 = vld [vmem:[#allocation7 + $0x940] sm:$0xff] }
0x1b05   :  { %6388 = vmatprep.subr.bf16.mxu0 %v8466_v36 }
0x1b08   :  { %6390 = vmatpush1.bf16.msra.mxu0 %v6389_v23  ;;  %v5069_v23 = vld [vmem:[#allocation8 + $0x90] ss:$0 sm:$0xff] }
0x1b09   :  { %6391 = vmatprep.subr.bf16.mxu0 %v8466_v36 }
0x1b0c   :  { %6393 = vmatpush1.bf16.msra.mxu0 %v6392_v61 }
0x1b0d   :  { %6394 = vmatprep.subr.bf16.mxu0 %v8466_v36 }
0x1b10   :  { %6396 = vmatpush1.bf16.msra.mxu0 %v6395_v51 }
0x1b11   :  { %6397 = vmatprep.subr.bf16.mxu0 %v8466_v36 }
0x1b14   :  { %6399 = vmatpush1.bf16.msra.mxu0 %v6398_v0 }
0x1b15   :  { %6400 = vmatprep.subr.bf16.mxu0 %v8466_v36 }
0x1b18   :  { %6402 = vmatpush1.bf16.msra.mxu0 %v6401_v50  ;;  %v3609_v50 = vld [vmem:[#allocation7 + $0x8b0] sm:$0xff] }
0x1b19   :  { %6403 = vmatprep.subr.bf16.mxu0 %v8466_v36 }
0x1bce   :  { %v7972_v45 = vpop.f32.mrb[40].mxu0 }
0x1bcf   :  { %3391 = vrot.lane.b32.xlu0 %v7972_v45, %s6879_s21  ;;  %v5821_v33 = vpop.f32.mrb[41].mxu0  ;;  %v3388_v5 = vrot.slane %v7972_v45, 1  ;;  %v3386_v6 = vrot.slane %v7972_v45, 7 }
0x1bd0   :  { %v3516_v33 = vld [vmem:[#allocation7 + $0x840] sm:$0xff] }
0x1bd1   :  { %v3389_v40 = vsel %vm2872_vm13, %v3388_v5, 0.0  ;;  %v3387_v17 = vsel %vm2865_vm10, %v3386_v6, 0.0  ;;  %v3517_v5 = vld [vmem:[#allocation7 + $0x848] sm:$0xff]  ;;  %v3518_v6 = vld [vmem:[#allocation7 + $0x850] sm:$0xff] }
0x1bd2   :  { %3395 = vrot.lane.b32.xlu1 %v3389_v40, %s6880_s22  ;;  %v6404_v40 = vpack.c.bf16 %v3517_v5, %v3516_v33  ;;  %v3610_v33 = vld [vmem:[#allocation7 + $0x8b8] sm:$0xff] }
0x1bd3   :  { %v6425_v5 = vpack.c.bf16 %v3610_v33, %v3609_v50  ;;  %v3854_v50 = vld [vmem:[#allocation7 + $0x978] sm:$0xff] }
0x1bd4   :  { %6405 = vmatpush1.bf16.msra.mxu0 %v6404_v40  ;;  %v5071_v40 = vld [vmem:[#allocation8 + $0x98] ss:$0 sm:$0xff] }
0x1bd5   :  { %6406 = vmatprep.subr.bf16.mxu0 %v8466_v36 }
0x1c41   :  { %v3392_v47 = vpop.permute.xlu0 %3391 }
0x1c42   :  { %v3398_v55 = vsel %vm8493_vm2, %v3387_v17, %v3392_v47  ;;  %v3519_v47 = vld [vmem:[#allocation7 + $0x858] sm:$0xff] }
0x1c43   :  { %v6407_v17 = vpack.c.bf16 %v3519_v47, %v3518_v6 }
0x1c44   :  { %v3396_v56 = vpop.permute.xlu1 %3395 }
0x1c45   :  { %v3399_v49 = vsel %vm502_vm14, %v3398_v55, %v3396_v56  ;;  %v3520_v55 = vld [vmem:[#allocation7 + $0x860] sm:$0xff]  ;;  %v3521_v56 = vld [vmem:[#allocation7 + $0x868] sm:$0xff]  ;;  %6408 = vmatpush1.bf16.msra.mxu0 %v6407_v17 }
0x1c46   :  { %5847 = vmatmul.mubr.msk.f32.vlgmr.msra.gmra.mrb[28].mxu1 %vm8494_vm15, %v3399_v49  ;;  %v6410_v49 = vpack.c.bf16 %v3521_v56, %v3520_v55  ;;  %6409 = vmatprep.subr.bf16.mxu0 %v8466_v36  ;;  %v3693_v55 = vand.u32 3, %v7095_v26  ;;  %v3690_v56 = vshra.s32 %v7095_v26, 2 }
0x1c47   :  { %5865 = vmatprep.mubr.msk.f32.mxu1 %vm6881_vm5, %v8475_v54  ;;  %6417 = vmatpush3.bf16.msra.mxu1 %v6416_v43 }
0x1c48   :  { %6418 = vmatprep.subr.bf16.mxu1 %v8466_v36  ;;  %v3694_v24 = vmul.u32 2, %v3693_v55  ;;  %vm3692_vm12 = vcmp.eq.s32.totalorder %v8497_v52, %v3690_v56  ;;  %v3858_v52 = vld [vmem:[#allocation7 + $0x998] sm:$0xff] }
0x1c49   :  { %6411 = vmatpush1.bf16.msra.mxu0 %v6410_v49  ;;  %v8496_v49 = vshra.s32 %v6995_v1, 3 }
0x1c4a   :  { %6412 = vmatprep.subr.bf16.mxu0 %v8466_v36  ;;  %vm3696_vm6 = vcmp.eq.s32.totalorder %v7109_v35, %v3694_v24 }
0x1c4b   :  { %6420 = vmatpush3.bf16.msra.mxu1 %v6419_v28  ;;  %vm3691_vm5 = vcmp.eq.s32.totalorder %v8496_v49, %v3690_v56  ;;  %vm3698_vm7 = vmand %vm3692_vm12, %vm3696_vm6  ;;  %v3848_v28 = vld [vmem:[#allocation7 + $0x948] sm:$0xff]  ;;  %v3839_v56 = vld [vmem:[#allocation7 + $0x900] sm:$0xff] }
0x1c4c   :  { %6421 = vmatprep.subr.bf16.mxu1 %v8466_v36  ;;  %v5076_v43 = vsel %vm3698_vm7, 1.0, %v8475_v54  ;;  %v6427_v42 = vpack.c.bf16 %v3848_v28, %v3847_v29  ;;  %v3857_v49 = vld [vmem:[#allocation7 + $0x990] sm:$0xff]  ;;  %v3843_v28 = vld [vmem:[#allocation7 + $0x920] sm:$0xff] }
0x1c4d   :  { %6414 = vmatpush1.bf16.msra.mxu0 %v6413_v63  ;;  %v5073_v63 = vld [vmem:[#allocation8 + $0xa0] ss:$0 sm:$0xff] }
0x1c4e   :  { %6459 = vmatprep.subr.bf16.mxu0 %v8466_v36 }
0x1c4f   :  { %6423 = vmatpush3.bf16.msra.mxu1 %v6422_v22  ;;  %v6429_v22 = vpack.c.bf16 %v3832_v7, %v3831_v2  ;;  %v3844_v2 = vld [vmem:[#allocation7 + $0x928] sm:$0xff]  ;;  %v3861_v7 = vld [vmem:[#allocation7 + $0x9b0] sm:$0xff] }
0x1c50   :  { %6424 = vmatprep.subr.bf16.mxu1 %v8466_v36 }
0x1c53   :  { %6426 = vmatpush3.bf16.msra.mxu1 %v6425_v5 }
0x1d19   :  { %v3486_v59 = vpop.f32.mrb[28].mxu1 }
0x1d1a   :  { %v3487_v61 = vadd.f32 %v5069_v23, %v3486_v59  ;;  %v5848_v30 = vpop.f32.mrb[29].mxu1  ;;  %v3849_v23 = vld [vmem:[#allocation7 + $0x950] sm:$0xff]  ;;  %v3850_v59 = vld [vmem:[#allocation7 + $0x958] sm:$0xff] }
0x1d1b   :  { %v6431_v30 = vpack.c.bf16 %v3850_v59, %v3849_v23  ;;  %v3862_v23 = vld [vmem:[#allocation7 + $0x9b8] sm:$0xff] }
0x1d1c   :  { %v3490_v53 = vmax.f32 %v3487_v61, 0.0  ;;  %v6455_v59 = vpack.c.bf16 %v3862_v23, %v3861_v7  ;;  %v3965_v7 = vld [vmem:[#allocation7 + $0x9c0] sm:$0xff]  ;;  %v3966_v23 = vld [vmem:[#allocation7 + $0x9c8] sm:$0xff] }
0x1d1e   :  { %3496 = vrot.lane.b32.xlu1 %v3490_v53, %s6880_s22  ;;  %v3493_v51 = vrot.slane %v3490_v53, 1  ;;  %v3491_v15 = vrot.slane %v3490_v53, 7  ;;  %v3833_v53 = vld [vmem:[#allocation7 + $0x8d0] sm:$0xff] }
0x1d20   :  { %v3494_v58 = vsel %vm2872_vm13, %v3493_v51, 0.0  ;;  %v3492_v18 = vsel %vm2865_vm10, %v3491_v15, 0.0  ;;  %vm3695_vm13 = vcmp.eq.s32.totalorder %v7098_v27, %v3694_v24  ;;  %v3834_v51 = vld [vmem:[#allocation7 + $0x8d8] sm:$0xff]  ;;  %v3852_v15 = vld [vmem:[#allocation7 + $0x968] sm:$0xff] }
0x1d21   :  { %5072 = vmatprep.mubr.msk.f32.mxu0 %vm502_vm14, %v3494_v58  ;;  %vm3697_vm10 = vmand %vm3691_vm5, %vm3695_vm13  ;;  %v3851_v58 = vld [vmem:[#allocation7 + $0x960] sm:$0xff]  ;;  %v3840_v24 = vld [vmem:[#allocation7 + $0x908] sm:$0xff]  ;;  %vm8498_vm5 = vcmp.ge.s32.totalorder %v7196_v38, 0  ;;  %vm8499_vm13 = vcmp.lt.s32.totalorder %v7172_v10, 8 }
0x1d22   :  { %v5075_v12 = vsel %vm3697_vm10, 1.0, %v8475_v54  ;;  %v6435_v54 = vpack.c.bf16 %v3852_v15, %v3851_v58  ;;  %v3802_v58 = vadd.s32 4294967294, %v7109_v35  ;;  %vm8500_vm10 = vcmp.ge.s32.totalorder %v7199_v41, 0  ;;  %vm8502_vm12 = vmmov %vm8499_vm13  ;;  %v4217_v38 = vld [vmem:[#allocation7 + $0xb70] sm:$0xff] }
0x1d23   :  { %vm8503_vm6 = vmmov %vm8498_vm5 }
0x1d24   :  { %vm3804_vm15 = vcmp.ge.s32.totalorder %v3802_v58, 0  ;;  %v3970_v58 = vld [vmem:[#allocation7 + $0x9e8] sm:$0xff] }
0x1d90   :  { %v3497_v0 = vpop.permute.xlu1 %3496 }
0x1d91   :  { %v3499_v48 = vsel %vm502_vm14, %v3492_v18, %v3497_v0  ;;  %v3835_v0 = vld [vmem:[#allocation7 + $0x8e0] sm:$0xff]  ;;  %v3836_v18 = vld [vmem:[#allocation7 + $0x8e8] sm:$0xff] }
0x1d92   :  { %3597 = vmatmul.mubr.f32.vlgmr.msra.gmra.mrb[42].mxu0 %v3499_v48  ;;  %v3853_v48 = vld [vmem:[#allocation7 + $0x970] sm:$0xff]  ;;  %v6437_v33 = vpack.c.bf16 %v3836_v18, %v3835_v0 }
0x1d93   :  { %v6439_v5 = vpack.c.bf16 %v3854_v50, %v3853_v48 }
0x1e65   :  { %v3598_v6 = vpop.f32.mrb[42].mxu0 }
0x1e66   :  { %v3599_v47 = vadd.f32 %v5071_v40, %v3598_v6  ;;  %v3600_v17 = vpop.f32.mrb[43].mxu0  ;;  %v3837_v40 = vld [vmem:[#allocation7 + $0x8f0] sm:$0xff]  ;;  %v3838_v6 = vld [vmem:[#allocation7 + $0x8f8] sm:$0xff] }
0x1e67   :  { %v3856_v17 = vld [vmem:[#allocation7 + $0x988] sm:$0xff] }
0x1e68   :  { %v3602_v32 = vmax.f32 %v3599_v47, 0.0  ;;  %v3855_v47 = vld [vmem:[#allocation7 + $0x980] sm:$0xff] }
0x1e69   :  { %v6443_v55 = vpack.c.bf16 %v3856_v17, %v3855_v47 }
0x1e6a   :  { %5866 = vmatmul.mubr.msk.f32.vlgmr.msra.gmra.mrb[30].mxu1 %vm502_vm14, %v3602_v32  ;;  %v6441_v32 = vpack.c.bf16 %v3838_v6, %v3837_v40 }
0x1e6b   :  { %5870 = vmatprep.mubr.msk.f32.mxu1 %vm3703_vm8, %v5075_v12  ;;  %v6445_v12 = vpack.c.bf16 %v3840_v24, %v3839_v56 }
0x1f3d   :  { %v3685_v21 = vpop.f32.mrb[30].mxu1 }
0x1f3e   :  { %v3686_v26 = vadd.f32 %v5073_v63, %v3685_v21  ;;  %v5867_v46 = vpop.f32.mrb[31].mxu1  ;;  %v6447_v63 = vpack.c.bf16 %v3858_v52, %v3857_v49  ;;  %v3841_v21 = vld [vmem:[#allocation7 + $0x910] sm:$0xff] }
0x1f3f   :  { %v3859_v46 = vld [vmem:[#allocation7 + $0x9a0] sm:$0xff] }
0x1f40   :  { %v3689_v44 = vadd.f32 %v3686_v26, %v3487_v61  ;;  %v6433_v61 = vpack.c.bf16 %v3834_v51, %v3833_v53  ;;  %v3842_v26 = vld [vmem:[#allocation7 + $0x918] sm:$0xff]  ;;  %v3801_v51 = vadd.s32 4294967294, %v7098_v27 }
0x1f42   :  { %5868 = vmatprep.subr.mxu1 %v3689_v44  ;;  %vm3803_vm2 = vcmp.ge.s32.totalorder %v3801_v51, 0  ;;  %v3969_v51 = vld [vmem:[#allocation7 + $0x9e0] sm:$0xff] }
0x1f43   :  { %5869 = vmatpush3.msra.mxu1 %v3689_v44  ;;  %v3860_v44 = vld [vmem:[#allocation7 + $0x9a8] sm:$0xff] }
0x1f44   :  { %5871 = vmatmul.mubr.msk.f32.vlgmr.msra.gmra.mrb[32].mxu1 %vm3703_vm8, %v5076_v43  ;;  %6428 = vmatprep.subr.bf16.mxu1 %v6427_v42  ;;  %v6449_v43 = vpack.c.bf16 %v3842_v26, %v3841_v21  ;;  %v6451_v29 = vpack.c.bf16 %v3860_v44, %v3859_v46  ;;  %v6453_v42 = vpack.c.bf16 %v3844_v2, %v3843_v28  ;;  %vm8501_vm8 = vcmp.lt.s32.totalorder %v7169_v9, 8  ;;  %v5083_v9 = vld [vmem:[#allocation8 + $0xb8] ss:$0 sm:$0xff] }
0x1f45   :  { %6430 = vmatpush3.bf16.msra.mxu1 %v6429_v22  ;;  %v3845_v22 = vld [vmem:[#allocation7 + $0x930] sm:$0xff]  ;;  %vm8504_vm7 = vmmov %vm8501_vm8 }
0x1f46   :  { %6432 = vmatprep.subr.bf16.mxu1 %v6431_v30  ;;  %v3846_v30 = vld [vmem:[#allocation7 + $0x938] sm:$0xff] }
0x1f47   :  { %v6457_v53 = vpack.c.bf16 %v3846_v30, %v3845_v22  ;;  %v6460_v22 = vpack.c.bf16 %v3966_v23, %v3965_v7  ;;  %v3968_v30 = vld [vmem:[#allocation7 + $0x9d8] sm:$0xff] }
0x1f49   :  { %6434 = vmatpush3.bf16.msra.mxu1 %v6433_v61  ;;  %6461 = vmatpush1.bf16.msra.mxu0 %v6460_v22 }
0x1f4a   :  { %6436 = vmatprep.subr.bf16.mxu1 %v6435_v54  ;;  %6462 = vmatprep.subr.bf16.mxu0 %v8466_v36 }
0x1f4d   :  { %6438 = vmatpush3.bf16.msra.mxu1 %v6437_v33 }
0x1f4e   :  { %6440 = vmatprep.subr.bf16.mxu1 %v6439_v5 }
0x1f51   :  { %6442 = vmatpush3.bf16.msra.mxu1 %v6441_v32 }
0x1f52   :  { %6444 = vmatprep.subr.bf16.mxu1 %v6443_v55 }
0x1f55   :  { %6446 = vmatpush3.bf16.msra.mxu1 %v6445_v12 }
0x1f56   :  { %6448 = vmatprep.subr.bf16.mxu1 %v6447_v63 }
0x1f59   :  { %6450 = vmatpush3.bf16.msra.mxu1 %v6449_v43 }
0x1f5a   :  { %6452 = vmatprep.subr.bf16.mxu1 %v6451_v29 }
0x1f5d   :  { %6454 = vmatpush3.bf16.msra.mxu1 %v6453_v42 }
0x1f5e   :  { %6456 = vmatprep.subr.bf16.mxu1 %v6455_v59  ;;  %v3967_v59 = vld [vmem:[#allocation7 + $0x9d0] sm:$0xff] }
0x1f61   :  { %6458 = vmatpush3.bf16.msra.mxu1 %v6457_v53  ;;  %v6463_v53 = vpack.c.bf16 %v3968_v30, %v3967_v59 }
0x1f62   :  { %6495 = vmatprep.subr.bf16.mxu1 %v8466_v36 }
0x1f63   :  { %6464 = vmatpush1.bf16.msra.mxu0 %v6463_v53 }
0x1f64   :  { %6465 = vmatprep.subr.bf16.mxu0 %v8466_v36 }
0x2017   :  { %v5872_v15 = vpop.f32.mrb[32].mxu1 }
0x2018   :  { %v3786_v61 = vrot.slane %v5872_v15, 1  ;;  %v3792_v54 = vrot.slane %v5872_v15, 7  ;;  %v3798_v0 = vrot.slane %v5872_v15, 6  ;;  %v3776_v18 = vpop.f32.mrb[33].mxu1 }
0x2019   :  { %v3785_v48 = vrot.slane %v3776_v18, 1  ;;  %v3791_v50 = vrot.slane %v3776_v18, 7  ;;  %v3797_v33 = vrot.slane %v3776_v18, 6 }
0x201b   :  { %v3800_v5 = vsel %vm1610_vm9, %v3798_v0, %v3797_v33  ;;  %v3799_v27 = vsel %vm1610_vm9, %v3797_v33, %v3798_v0  ;;  %v3794_v35 = vsel %vm92_vm0, %v3792_v54, %v3791_v50  ;;  %v3787_v40 = vsel %vm128_vm1, %v3785_v48, %v3786_v61  ;;  %v3975_v33 = vld [vmem:[#allocation7 + $0xa10] sm:$0xff] }
0x201c   :  { %v3809_v6 = vsel %vm3803_vm2, %v3800_v5, 0.0  ;;  %v3810_v47 = vsel %vm3804_vm15, %v3799_v27, 0.0  ;;  %v3793_v55 = vsel %vm92_vm0, %v3791_v50, %v3792_v54  ;;  %v3788_v56 = vsel %vm128_vm1, %v3786_v61, %v3785_v48  ;;  %v3971_v61 = vld [vmem:[#allocation7 + $0x9f0] sm:$0xff]  ;;  %v3972_v54 = vld [vmem:[#allocation7 + $0x9f8] sm:$0xff]  ;;  %v3974_v48 = vld [vmem:[#allocation7 + $0xa08] sm:$0xff] }
0x201d   :  { %v6726_v17 = vpack.i.bf16 %v3776_v18, %v3809_v6  ;;  %v6731_v32 = vpack.i.bf16 %v5872_v15, %v3810_v47  ;;  %v3795_v21 = vsel %vm8498_vm5, %v3794_v35, 0.0  ;;  %v3789_v26 = vsel %vm8499_vm13, %v3787_v40, 0.0  ;;  %v3973_v18 = vld [vmem:[#allocation7 + $0xa00] sm:$0xff]  ;;  %v3976_v5 = vld [vmem:[#allocation7 + $0xa18] sm:$0xff]  ;;  %v3978_v40 = vld [vmem:[#allocation7 + $0xa28] sm:$0xff] }
0x201e   :  { %v3796_v29 = vsel %vm8500_vm10, %v3793_v55, 0.0  ;;  %v3790_v2 = vsel %vm8501_vm8, %v3788_v56, 0.0  ;;  %v6466_v15 = vpack.c.bf16 %v3970_v58, %v3969_v51  ;;  %v6469_v0 = vpack.c.bf16 %v3972_v54, %v3971_v61  ;;  %v3977_v35 = vld [vmem:[#allocation7 + $0xa20] sm:$0xff]  ;;  %v3979_v47 = vld [vmem:[#allocation7 + $0xa30] sm:$0xff]  ;;  %v3982_v56 = vld [vmem:[#allocation7 + $0xa48] sm:$0xff] }
0x201f   :  { %6727 = vrot.lane.b32.xlu0 %v6726_v17, %s6880_s22  ;;  %6732 = vrot.lane.b32.xlu1 %v6731_v32, %s6880_s22  ;;  %v6472_v50 = vpack.c.bf16 %v3974_v48, %v3973_v18  ;;  %v6475_v27 = vpack.c.bf16 %v3976_v5, %v3975_v33  ;;  %v6478_v6 = vpack.c.bf16 %v3978_v40, %v3977_v35  ;;  %v3980_v17 = vld [vmem:[#allocation7 + $0xa38] sm:$0xff]  ;;  %v3981_v55 = vld [vmem:[#allocation7 + $0xa40] sm:$0xff]  ;;  %vm8505_vm2 = vmmov %vm8500_vm10  ;;  %vm8513_vm8 = vcmp.lt.s32.totalorder %v7019_v25, 16 }
0x2020   :  { %6467 = vmatpush1.bf16.msra.mxu0 %v6466_v15  ;;  %v6481_v32 = vpack.c.bf16 %v3980_v17, %v3979_v47  ;;  %v4099_v47 = vld [vmem:[#allocation7 + $0xa80] sm:$0xff]  ;;  %v4100_v17 = vld [vmem:[#allocation7 + $0xa88] sm:$0xff]  ;;  %vm8506_vm15 = vmmov %vm8502_vm12 }
0x2021   :  { %6468 = vmatprep.subr.bf16.mxu0 %v8466_v36  ;;  %vm8507_vm13 = vmmov %vm8504_vm7 }
0x2022   :  { %vm8508_vm10 = vmmov %vm8505_vm2 }
0x2024   :  { %6470 = vmatpush1.bf16.msra.mxu0 %v6469_v0 }
0x2025   :  { %6471 = vmatprep.subr.bf16.mxu0 %v8466_v36 }
0x2028   :  { %6473 = vmatpush1.bf16.msra.mxu0 %v6472_v50 }
0x2029   :  { %6474 = vmatprep.subr.bf16.mxu0 %v8466_v36 }
0x202c   :  { %6476 = vmatpush1.bf16.msra.mxu0 %v6475_v27 }
0x202d   :  { %6477 = vmatprep.subr.bf16.mxu0 %v8466_v36 }
0x2030   :  { %6479 = vmatpush1.bf16.msra.mxu0 %v6478_v6 }
0x2031   :  { %6480 = vmatprep.subr.bf16.mxu0 %v8466_v36 }
0x2034   :  { %6482 = vmatpush1.bf16.msra.mxu0 %v6481_v32  ;;  %v4101_v32 = vld [vmem:[#allocation7 + $0xa90] sm:$0xff] }
0x2035   :  { %6483 = vmatprep.subr.bf16.mxu0 %v8466_v36 }
0x2091   :  { %v6728_v24 = vpop.permute.xlu0 %6727  ;;  %v6733_v49 = vpop.permute.xlu1 %6732 }
0x2092   :  { %v6730_v52 = vunpack.i.h.bf16 %v6728_v24  ;;  %v6729_v12 = vunpack.i.l.bf16 %v6728_v24  ;;  %v6734_v63 = vunpack.i.l.bf16 %v6733_v49  ;;  %v6735_v43 = vunpack.i.h.bf16 %v6733_v49  ;;  %v3983_v49 = vld [vmem:[#allocation7 + $0xa50] sm:$0xff] }
0x2093   :  { %v6484_v24 = vpack.c.bf16 %v3982_v56, %v3981_v55  ;;  %v6496_v55 = vpack.c.bf16 %v4100_v17, %v4099_v47  ;;  %v4102_v56 = vld [vmem:[#allocation7 + $0xa98] sm:$0xff] }
0x2094   :  { %v3829_v46 = vsel %vm502_vm14, %v3795_v21, %v6729_v12  ;;  %v3827_v44 = vsel %vm502_vm14, %v3789_v26, %v6730_v52  ;;  %v3830_v28 = vsel %vm502_vm14, %v3796_v29, %v6734_v63  ;;  %v3828_v42 = vsel %vm502_vm14, %v3790_v2, %v6735_v43  ;;  %v3984_v52 = vld [vmem:[#allocation7 + $0xa58] sm:$0xff]  ;;  %v3985_v63 = vld [vmem:[#allocation7 + $0xa60] sm:$0xff]  ;;  %v3986_v21 = vld [vmem:[#allocation7 + $0xa68] sm:$0xff] }
0x2095   :  { %3932 = vmatprep.mubr.f32.mxu1 %v3829_v46  ;;  %6485 = vmatpush1.bf16.msra.mxu0 %v6484_v24  ;;  %v6487_v12 = vpack.c.bf16 %v3984_v52, %v3983_v49  ;;  %v6490_v26 = vpack.c.bf16 %v3986_v21, %v3985_v63  ;;  %v3987_v46 = vld [vmem:[#allocation7 + $0xa70] sm:$0xff]  ;;  %v6499_v24 = vpack.c.bf16 %v4102_v56, %v4101_v32  ;;  %v4103_v49 = vld [vmem:[#allocation7 + $0xaa0] sm:$0xff]  ;;  %v4104_v52 = vld [vmem:[#allocation7 + $0xaa8] sm:$0xff] }
0x2096   :  { %3933 = vmatmul.mubr.f32.vlgmr.msra.gmra.mrb[34].mxu1 %v3827_v44  ;;  %6486 = vmatprep.subr.bf16.mxu0 %v8466_v36  ;;  %v3988_v44 = vld [vmem:[#allocation7 + $0xa78] sm:$0xff]  ;;  %v4105_v63 = vld [vmem:[#allocation7 + $0xab0] sm:$0xff] }
0x2097   :  { %3937 = vmatprep.mubr.f32.mxu1 %v3830_v28  ;;  %v6493_v43 = vpack.c.bf16 %v3988_v44, %v3987_v46  ;;  %v5079_v28 = vld [vmem:[#allocation8 + $0xa8] ss:$0 sm:$0xff]  ;;  %6497 = vmatpush1.bf16.msra.mxu1 %v6496_v55  ;;  %v4106_v21 = vld [vmem:[#allocation7 + $0xab8] sm:$0xff]  ;;  %v4107_v46 = vld [vmem:[#allocation7 + $0xac0] sm:$0xff] }
0x2098   :  { %6498 = vmatprep.subr.bf16.mxu1 %v8466_v36  ;;  %v4108_v44 = vld [vmem:[#allocation7 + $0xac8] sm:$0xff]  ;;  %v4214_v17 = vld [vmem:[#allocation7 + $0xb58] sm:$0xff] }
0x2099   :  { %6488 = vmatpush1.bf16.msra.mxu0 %v6487_v12  ;;  %v6502_v12 = vpack.c.bf16 %v4104_v52, %v4103_v49 }
0x209a   :  { %3938 = vmatmul.mubr.f32.gmra.mrb[36].mxu1 %v3828_v42  ;;  %6489 = vmatprep.subr.bf16.mxu0 %v8466_v36 }
0x209b   :  { %6500 = vmatpush1.bf16.msra.mxu1 %v6499_v24 }
0x209c   :  { %6501 = vmatprep.subr.bf16.mxu1 %v8466_v36 }
0x209d   :  { %6491 = vmatpush1.bf16.msra.mxu0 %v6490_v26  ;;  %v6505_v26 = vpack.c.bf16 %v4106_v21, %v4105_v63 }
0x209e   :  { %6492 = vmatprep.subr.bf16.mxu0 %v8466_v36 }
0x209f   :  { %6503 = vmatpush1.bf16.msra.mxu1 %v6502_v12 }
0x20a0   :  { %6504 = vmatprep.subr.bf16.mxu1 %v8466_v36 }
0x20a1   :  { %6494 = vmatpush1.bf16.msra.mxu0 %v6493_v43  ;;  %v6508_v43 = vpack.c.bf16 %v4108_v44, %v4107_v46 }
0x20a3   :  { %6506 = vmatpush1.bf16.msra.mxu1 %v6505_v26 }
0x20a4   :  { %6507 = vmatprep.subr.bf16.mxu1 %v8466_v36 }
0x20a7   :  { %6509 = vmatpush1.bf16.msra.mxu1 %v6508_v43 }
0x20a8   :  { %6510 = vmatprep.subr.bf16.mxu1 %v8466_v36 }
0x2169   :  { %v5387_v29 = vpop.f32.mrb[34].mxu1 }
0x216a   :  { %v5388_v2 = vpop.f32.mrb[35].mxu1 }
0x216b   :  { %v5389_v42 = vadd.f32 %v5388_v2, %v5387_v29  ;;  %v4109_v29 = vld [vmem:[#allocation7 + $0xad0] sm:$0xff] }
0x216d   :  { %v3935_v7 = vadd.f32 %v5389_v42, %v5079_v28  ;;  %v5390_v23 = vpop.f32.mrb[36].mxu1  ;;  %v4111_v42 = vld [vmem:[#allocation7 + $0xae0] sm:$0xff] }
0x216e   :  { %v5391_v59 = vpop.f32.mrb[37].mxu1 }
0x216f   :  { %v5392_v22 = vadd.f32 %v5391_v59, %v5390_v23  ;;  %3957 = vrot.lane.b32.xlu0 %v3935_v7, %s6880_s22  ;;  %v3943_v53 = vrot.slane %v3935_v7, 7  ;;  %v3949_v51 = vrot.slane %v3935_v7, 1  ;;  %v4112_v7 = vld [vmem:[#allocation7 + $0xae8] sm:$0xff]  ;;  %v4113_v59 = vld [vmem:[#allocation7 + $0xaf0] sm:$0xff] }
0x2170   :  { %v6514_v23 = vpack.c.bf16 %v4112_v7, %v4111_v42 }
0x2171   :  { %v3940_v30 = vadd.f32 %v5392_v22, %v5079_v28  ;;  %v4110_v28 = vld [vmem:[#allocation7 + $0xad8] sm:$0xff] }
0x2172   :  { %v6511_v2 = vpack.c.bf16 %v4110_v28, %v4109_v29  ;;  %v4114_v22 = vld [vmem:[#allocation7 + $0xaf8] sm:$0xff] }
0x2173   :  { %v3944_v58 = vrot.slane %v3940_v30, 7  ;;  %v3950_v15 = vrot.slane %v3940_v30, 1  ;;  %3959 = vrot.lane.b32.xlu1 %v3940_v30, %s6880_s22  ;;  %v6517_v30 = vpack.c.bf16 %v4114_v22, %v4113_v59 }
0x2174   :  { %6512 = vmatpush1.bf16.msra.mxu1 %v6511_v2 }
0x2175   :  { %v3951_v61 = vsel %vm128_vm1, %v3949_v51, %v3950_v15  ;;  %v3946_v54 = vsel %vm92_vm0, %v3944_v58, %v3943_v53  ;;  %v3952_v0 = vsel %vm128_vm1, %v3950_v15, %v3949_v51  ;;  %v3945_v18 = vsel %vm92_vm0, %v3943_v53, %v3944_v58  ;;  %6513 = vmatprep.subr.bf16.mxu1 %v8466_v36  ;;  %v4115_v53 = vld [vmem:[#allocation7 + $0xb00] sm:$0xff]  ;;  %v4116_v51 = vld [vmem:[#allocation7 + $0xb08] sm:$0xff]  ;;  %v4117_v15 = vld [vmem:[#allocation7 + $0xb10] sm:$0xff] }
0x2176   :  { %v3953_v48 = vsel %vm8502_vm12, %v3951_v61, 0.0  ;;  %v3947_v33 = vsel %vm8503_vm6, %v3946_v54, 0.0  ;;  %v3954_v27 = vsel %vm8504_vm7, %v3952_v0, 0.0  ;;  %v3948_v40 = vsel %vm8505_vm2, %v3945_v18, 0.0  ;;  %v4118_v61 = vld [vmem:[#allocation7 + $0xb18] sm:$0xff]  ;;  %v4119_v0 = vld [vmem:[#allocation7 + $0xb20] sm:$0xff]  ;;  %vm8518_vm7 = vmmov %vm8513_vm8 }
0x2177   :  { %5081 = vmatprep.mubr.msk.f32.mxu0 %vm502_vm14, %v3953_v48  ;;  %v6520_v58 = vpack.c.bf16 %v4116_v51, %v4115_v53  ;;  %v6523_v54 = vpack.c.bf16 %v4118_v61, %v4117_v15  ;;  %v4120_v18 = vld [vmem:[#allocation7 + $0xb28] sm:$0xff]  ;;  %vm8515_vm12 = vcmask 261120   ;;  %vm8520_vm2 = vcmp.lt.s32.totalorder %v6995_v1, 6 }
0x2178   :  { %6515 = vmatpush1.bf16.msra.mxu1 %v6514_v23  ;;  %v6526_v48 = vpack.c.bf16 %v4120_v18, %v4119_v0  ;;  %v4216_v15 = vld [vmem:[#allocation7 + $0xb68] sm:$0xff] }
0x2179   :  { %6516 = vmatprep.subr.bf16.mxu1 %v8466_v36 }
0x217c   :  { %6518 = vmatpush1.bf16.msra.mxu1 %v6517_v30 }
0x217d   :  { %6519 = vmatprep.subr.bf16.mxu1 %v8466_v36 }
0x2180   :  { %6521 = vmatpush1.bf16.msra.mxu1 %v6520_v58  ;;  %v4215_v58 = vld [vmem:[#allocation7 + $0xb60] sm:$0xff] }
0x2181   :  { %6522 = vmatprep.subr.bf16.mxu1 %v8466_v36  ;;  %v6539_v61 = vpack.c.bf16 %v4216_v15, %v4215_v58 }
0x2184   :  { %6524 = vmatpush1.bf16.msra.mxu1 %v6523_v54  ;;  %v4218_v54 = vld [vmem:[#allocation7 + $0xb78] sm:$0xff] }
0x2185   :  { %6525 = vmatprep.subr.bf16.mxu1 %v8466_v36  ;;  %v6543_v0 = vpack.c.bf16 %v4218_v54, %v4217_v38  ;;  %v4477_v38 = vld [vmem:[#allocation7 + $0xbc8] sm:$0xff]  ;;  %v4494_v54 = vld [vmem:[#allocation7 + $0xc50] sm:$0xff] }
0x2188   :  { %6527 = vmatpush1.bf16.msra.mxu1 %v6526_v48 }
0x2189   :  { %6528 = vmatprep.subr.bf16.mxu1 %v8466_v36 }
0x21e1   :  { %v3958_v50 = vpop.permute.xlu0 %3957 }
0x21e2   :  { %v3963_v5 = vsel %vm502_vm14, %v3947_v33, %v3958_v50  ;;  %v4121_v50 = vld [vmem:[#allocation7 + $0xb30] sm:$0xff]  ;;  %v4122_v33 = vld [vmem:[#allocation7 + $0xb38] sm:$0xff] }
0x21e3   :  { %4065 = vmatmul.mubr.f32.vlgmr.msra.gmra.mrb[44].mxu0 %v3963_v5  ;;  %v6529_v5 = vpack.c.bf16 %v4122_v33, %v4121_v50 }
0x21e4   :  { %5082 = vmatprep.mubr.msk.f32.mxu0 %vm502_vm14, %v3954_v27  ;;  %v4211_v27 = vld [vmem:[#allocation7 + $0xb40] sm:$0xff] }
0x21e5   :  { %v3960_v35 = vpop.permute.xlu1 %3959  ;;  %6530 = vmatpush1.bf16.msra.mxu1 %v6529_v5 }
0x21e6   :  { %v3964_v6 = vsel %vm502_vm14, %v3948_v40, %v3960_v35  ;;  %6583 = vmatprep.subr.bf16.mxu1 %v8466_v36  ;;  %v4212_v35 = vld [vmem:[#allocation7 + $0xb48] sm:$0xff]  ;;  %v4213_v40 = vld [vmem:[#allocation7 + $0xb50] sm:$0xff] }
0x21e7   :  { %4070 = vmatmul.mubr.f32.gmra.mrb[46].mxu0 %v3964_v6  ;;  %v5080_v6 = vld [vmem:[#allocation8 + $0xb0] ss:$0 sm:$0xff]  ;;  %v6531_v47 = vpack.c.bf16 %v4212_v35, %v4211_v27  ;;  %v6535_v32 = vpack.c.bf16 %v4214_v17, %v4213_v40  ;;  %v5086_v40 = vld [vmem:[#allocation8 + $0xc0] ss:$0 sm:$0xff] }
0x21e9   :  { %6532 = vmatprep.subr.bf16.mxu0 %v6531_v47 }
0x21ea   :  { %6534 = vmatpush3.bf16.msra.mxu0 %v6531_v47 }
0x21eb   :  { %6536 = vmatprep.subr.bf16.mxu0 %v6535_v32 }
0x21ee   :  { %6538 = vmatpush3.bf16.msra.mxu0 %v6535_v32 }
0x21ef   :  { %6540 = vmatprep.subr.bf16.mxu0 %v6539_v61 }
0x21f2   :  { %6542 = vmatpush3.bf16.msra.mxu0 %v6539_v61  ;;  %v4476_v61 = vld [vmem:[#allocation7 + $0xbc0] sm:$0xff] }
0x21f3   :  { %6544 = vmatprep.subr.bf16.mxu0 %v6543_v0 }
0x21f6   :  { %6546 = vmatpush3.bf16.msra.mxu0 %v6543_v0  ;;  %v4495_v0 = vld [vmem:[#allocation7 + $0xc58] sm:$0xff] }
0x22b6   :  { %v4066_v55 = vpop.f32.mrb[44].mxu0 }
0x22b7   :  { %v4067_v56 = vadd.f32 %v5080_v6, %v4066_v55  ;;  %v4068_v24 = vpop.f32.mrb[45].mxu0 }
0x22b9   :  { %v4075_v49 = vmax.f32 %v4067_v56, 0.0 }
0x22ba   :  { %v4071_v52 = vpop.f32.mrb[46].mxu0 }
0x22bb   :  { %v4072_v12 = vadd.f32 %v5080_v6, %v4071_v52  ;;  %4091 = vrot.lane.b32.xlu0 %v4075_v49, %s6880_s22  ;;  %v4073_v63 = vpop.f32.mrb[47].mxu0  ;;  %v4077_v26 = vrot.slane %v4075_v49, 7  ;;  %v4083_v46 = vrot.slane %v4075_v49, 1  ;;  %v4485_v52 = vld [vmem:[#allocation7 + $0xc08] sm:$0xff] }
0x22bc   :  { %v4468_v63 = vld [vmem:[#allocation7 + $0xb80] sm:$0xff] }
0x22bd   :  { %v4076_v21 = vmax.f32 %v4072_v12, 0.0 }
0x22bf   :  { %v4078_v44 = vrot.slane %v4076_v21, 7  ;;  %v4084_v43 = vrot.slane %v4076_v21, 1  ;;  %4093 = vrot.lane.b32.xlu1 %v4076_v21, %s6880_s22 }
0x22c1   :  { %v4085_v29 = vsel %vm128_vm1, %v4083_v46, %v4084_v43  ;;  %v4080_v28 = vsel %vm92_vm0, %v4078_v44, %v4077_v26  ;;  %v4086_v2 = vsel %vm128_vm1, %v4084_v43, %v4083_v46  ;;  %v4079_v42 = vsel %vm92_vm0, %v4077_v26, %v4078_v44  ;;  %v4469_v26 = vld [vmem:[#allocation7 + $0xb88] sm:$0xff]  ;;  %v4486_v46 = vld [vmem:[#allocation7 + $0xc10] sm:$0xff] }
0x22c2   :  { %v4087_v7 = vsel %vm8506_vm15, %v4085_v29, 0.0  ;;  %v4081_v59 = vsel %vm8498_vm5, %v4080_v28, 0.0  ;;  %v4088_v30 = vsel %vm8507_vm13, %v4086_v2, 0.0  ;;  %v4082_v51 = vsel %vm8508_vm10, %v4079_v42, 0.0  ;;  %v4470_v43 = vld [vmem:[#allocation7 + $0xb90] sm:$0xff]  ;;  %v4471_v29 = vld [vmem:[#allocation7 + $0xb98] sm:$0xff]  ;;  %vm8522_vm5 = vmmov %vm8520_vm2 }
0x22c3   :  { %5084 = vmatprep.mubr.msk.f32.mxu1 %vm502_vm14, %v4087_v7  ;;  %v4488_v28 = vld [vmem:[#allocation7 + $0xc20] sm:$0xff]  ;;  %v6557_v2 = vpack.c.bf16 %v4471_v29, %v4470_v43  ;;  %v4490_v7 = vld [vmem:[#allocation7 + $0xc30] sm:$0xff]  ;;  %vm8523_vm13 = vmmov %vm8520_vm2 }
0x22c4   :  { %v4472_v42 = vld [vmem:[#allocation7 + $0xba0] sm:$0xff] }
0x232d   :  { %v4092_v23 = vpop.permute.xlu0 %4091 }
0x232e   :  { %v4097_v22 = vsel %vm502_vm14, %v4081_v59, %v4092_v23  ;;  %v4491_v23 = vld [vmem:[#allocation7 + $0xc38] sm:$0xff] }
0x232f   :  { %4199 = vmatmul.mubr.f32.vlgmr.msra.gmra.mrb[38].mxu1 %v4097_v22  ;;  %v6563_v22 = vpack.c.bf16 %v4491_v23, %v4490_v7 }
0x2330   :  { %5085 = vmatprep.mubr.msk.f32.mxu1 %vm502_vm14, %v4088_v30  ;;  %v4474_v30 = vld [vmem:[#allocation7 + $0xbb0] sm:$0xff] }
0x2331   :  { %v4094_v53 = vpop.permute.xlu1 %4093 }
0x2332   :  { %v4098_v10 = vsel %vm502_vm14, %v4082_v51, %v4094_v53  ;;  %v4475_v53 = vld [vmem:[#allocation7 + $0xbb8] sm:$0xff]  ;;  %v4492_v51 = vld [vmem:[#allocation7 + $0xc40] sm:$0xff] }
0x2333   :  { %4204 = vmatmul.mubr.f32.gmra.mrb[40].mxu1 %v4098_v10  ;;  %v4493_v10 = vld [vmem:[#allocation7 + $0xc48] sm:$0xff]  ;;  %v6565_v58 = vpack.c.bf16 %v4475_v53, %v4474_v30 }
0x2334   :  { %v6567_v15 = vpack.c.bf16 %v4493_v10, %v4492_v51 }
0x2402   :  { %v4200_v18 = vpop.f32.mrb[38].mxu1 }
0x2403   :  { %v4201_v48 = vadd.f32 %v5083_v9, %v4200_v18  ;;  %v4202_v50 = vpop.f32.mrb[39].mxu1  ;;  %v6571_v18 = vpack.c.bf16 %v4495_v0, %v4494_v54 }
0x2404   :  { %v4479_v50 = vld [vmem:[#allocation7 + $0xbd8] sm:$0xff] }
0x2405   :  { %v4209_v33 = vmax.f32 %v4201_v48, 0.0  ;;  %v4478_v48 = vld [vmem:[#allocation7 + $0xbd0] sm:$0xff] }
0x2406   :  { %v4205_v41 = vpop.f32.mrb[40].mxu1 }
0x2407   :  { %v4206_v5 = vadd.f32 %v5083_v9, %v4205_v41  ;;  %v4207_v27 = vpop.f32.mrb[41].mxu1  ;;  %5889 = vmatprep.mubr.msk.f32.mxu0 %vm502_vm14, %v4209_v33  ;;  %v6569_v9 = vpack.c.bf16 %v4477_v38, %v4476_v61  ;;  %v6573_v33 = vpack.c.bf16 %v4479_v50, %v4478_v48  ;;  %v4496_v41 = vld [vmem:[#allocation7 + $0xc60] sm:$0xff] }
0x2409   :  { %v4210_v35 = vmax.f32 %v4206_v5, 0.0  ;;  %v4497_v5 = vld [vmem:[#allocation7 + $0xc68] sm:$0xff] }
0x240a   :  { %v6575_v27 = vpack.c.bf16 %v4497_v5, %v4496_v41 }
0x240b   :  { %5890 = vmatmul.mubr.msk.f32.vlgmr.msra.gmra.mrb[48].mxu0 %vm502_vm14, %v4210_v35  ;;  %v4480_v35 = vld [vmem:[#allocation7 + $0xbe0] sm:$0xff] }
0x240c   :  { %5896 = vmatprep.mubr.msk.f32.mxu0 %vm372_vm11, %v7394_v62  ;;  %v4484_v62 = vld [vmem:[#allocation7 + $0xc00] sm:$0xff] }
0x240d   :  { %v6551_v21 = vpack.c.bf16 %v4485_v52, %v4484_v62 }
0x24de   :  { %v5891_v6 = vpop.f32.mrb[48].mxu0 }
0x24df   :  { %v4302_v47 = vadd.f32 %v5891_v6, %v5086_v40  ;;  %v4296_v17 = vpop.f32.mrb[49].mxu0 }
0x24e0   :  { %v4297_v32 = vadd.f32 %v5086_v40, %v4296_v17  ;;  %v4481_v40 = vld [vmem:[#allocation7 + $0xbe8] sm:$0xff]  ;;  %v4499_v17 = vld [vmem:[#allocation7 + $0xc78] sm:$0xff] }
0x24e1   :  { %v4306_v55 = vadd.f32 %v4302_v47, %v4072_v12  ;;  %v4487_v12 = vld [vmem:[#allocation7 + $0xc18] sm:$0xff]  ;;  %v6577_v6 = vpack.c.bf16 %v4481_v40, %v4480_v35  ;;  %v4498_v47 = vld [vmem:[#allocation7 + $0xc70] sm:$0xff] }
0x24e2   :  { %v4305_v24 = vadd.f32 %v4297_v32, %v4067_v56  ;;  %v6553_v56 = vpack.c.bf16 %v4469_v26, %v4468_v63  ;;  %v6555_v44 = vpack.c.bf16 %v4487_v12, %v4486_v46  ;;  %v6579_v32 = vpack.c.bf16 %v4499_v17, %v4498_v47 }
0x24e4   :  { %v6547_v49 = vpack.c.bf16 %v4306_v55, %v4305_v24  ;;  %v4482_v55 = vld [vmem:[#allocation7 + $0xbf0] sm:$0xff]  ;;  %v4483_v24 = vld [vmem:[#allocation7 + $0xbf8] sm:$0xff] }
0x24e6   :  { %6548 = vmatprep.subr.bf16.mxu0 %v6547_v49 }
0x24e7   :  { %6550 = vmatpush3.bf16.msra.mxu0 %v6547_v49  ;;  %v6581_v49 = vpack.c.bf16 %v4483_v24, %v4482_v55 }
0x24e8   :  { %6552 = vmatprep.subr.bf16.mxu0 %v6551_v21 }
0x24ea   :  { %5897 = vmatmul.mubr.msk.f32.vlgmr.msra.gmra.mrb[50].mxu0 %vm372_vm11, %v7410_v16  ;;  %v4489_v16 = vld [vmem:[#allocation7 + $0xc28] sm:$0xff] }
0x24eb   :  { %5899 = vmatprep.mubr.msk.f32.mxu0 %vm372_vm11, %v7413_v3  ;;  %6554 = vmatpush3.bf16.msra.mxu0 %v6553_v56  ;;  %v6559_v3 = vpack.c.bf16 %v4489_v16, %v4488_v28 }
0x24ec   :  { %6556 = vmatprep.subr.bf16.mxu0 %v6555_v44 }
0x24ee   :  { %5900 = vmatmul.mubr.msk.f32.gmra.mrb[52].mxu0 %vm372_vm11, %v7420_v60  ;;  %v4473_v60 = vld [vmem:[#allocation7 + $0xba8] sm:$0xff]  ;;  %vm8509_vm11 = vcmp.ge.s32.totalorder %v7430_v37, 0 }
0x24ef   :  { %6558 = vmatpush3.bf16.msra.mxu0 %v6557_v2  ;;  %v6561_v59 = vpack.c.bf16 %v4473_v60, %v4472_v42 }
0x24f0   :  { %6560 = vmatprep.subr.bf16.mxu0 %v6559_v3 }
0x24f3   :  { %6562 = vmatpush3.bf16.msra.mxu0 %v6561_v59 }
0x24f4   :  { %6564 = vmatprep.subr.bf16.mxu0 %v6563_v22 }
0x24f7   :  { %6566 = vmatpush3.bf16.msra.mxu0 %v6565_v58 }
0x24f8   :  { %6568 = vmatprep.subr.bf16.mxu0 %v6567_v15 }
0x24fb   :  { %6570 = vmatpush3.bf16.msra.mxu0 %v6569_v9 }
0x24fc   :  { %6572 = vmatprep.subr.bf16.mxu0 %v6571_v18 }
0x24ff   :  { %6574 = vmatpush3.bf16.msra.mxu0 %v6573_v33 }
0x2500   :  { %6576 = vmatprep.subr.bf16.mxu0 %v6575_v27 }
0x2503   :  { %6578 = vmatpush3.bf16.msra.mxu0 %v6577_v6 }
0x2504   :  { %6580 = vmatprep.subr.bf16.mxu0 %v6579_v32 }
0x2507   :  { %6582 = vmatpush3.bf16.msra.mxu0 %v6581_v49 }
0x25bd   :  { %v5898_v62 = vpop.f32.mrb[50].mxu0 }
0x25be   :  { %v4393_v52 = vrot.slane %v5898_v62, 1  ;;  %v4405_v63 = vrot.slane %v5898_v62, 7  ;;  %v4417_v21 = vrot.slane %v5898_v62, 6  ;;  %v4373_v26 = vpop.f32.mrb[51].mxu0 }
0x25bf   :  { %v4392_v46 = vrot.slane %v4373_v26, 1  ;;  %v4404_v12 = vrot.slane %v4373_v26, 7  ;;  %v4416_v56 = vrot.slane %v4373_v26, 6 }
0x25c1   :  { %v5901_v44 = vpop.f32.mrb[52].mxu0  ;;  %v4422_v43 = vsel %vm1610_vm9, %v4416_v56, %v4417_v21  ;;  %v4398_v29 = vsel %vm128_vm1, %v4392_v46, %v4393_v52  ;;  %v4410_v28 = vsel %vm92_vm0, %v4404_v12, %v4405_v63 }
0x25c2   :  { %v4395_v16 = vrot.slane %v5901_v44, 1  ;;  %v4407_v2 = vrot.slane %v5901_v44, 7  ;;  %v4419_v3 = vrot.slane %v5901_v44, 6  ;;  %v4383_v42 = vpop.f32.mrb[53].mxu0  ;;  %v6741_v60 = vpack.i.bf16 %v5898_v62, %v4422_v43  ;;  %v8511_v62 = vld [vmem:[#allocation16_spill] sm:$0xff]  ;;  %v4634_v43 = vld [vmem:[#allocation7 + $0xc80] sm:$0xff] }
0x25c3   :  { %v4394_v7 = vrot.slane %v4383_v42, 1  ;;  %v4406_v23 = vrot.slane %v4383_v42, 7  ;;  %v4418_v59 = vrot.slane %v4383_v42, 6 }
0x25c4   :  { %6742 = vrot.lane.b32.xlu1 %v6741_v60, %s6880_s22  ;;  %v4423_v22 = vsel %vm1610_vm9, %v4419_v3, %v4416_v56  ;;  %v4411_v30 = vsel %vm92_vm0, %v4407_v2, %v4404_v12  ;;  %v4399_v53 = vsel %vm128_vm1, %v4395_v16, %v4392_v46  ;;  %v4639_v60 = vld [vmem:[#allocation7 + $0xca8] sm:$0xff] }
0x25c5   :  { %v4424_v51 = vsel %vm1619_vm4, %v4423_v22, 0.0  ;;  %v4420_v10 = vsel %vm1610_vm9, %v4418_v59, %v4419_v3  ;;  %v4421_v58 = vsel %vm1610_vm9, %v4417_v21, %v4418_v59  ;;  %v4397_v54 = vsel %vm128_vm1, %v4393_v52, %v4394_v7  ;;  %v4641_v59 = vld [vmem:[#allocation7 + $0xcb8] sm:$0xff] }
0x25c6   :  { %v6736_v15 = vpack.i.bf16 %v4373_v26, %v4424_v51  ;;  %v6751_v61 = vpack.i.bf16 %v5901_v44, %v4420_v10  ;;  %v4426_v38 = vsel %vm8509_vm11, %v4421_v58, 0.0  ;;  %v4409_v9 = vsel %vm92_vm0, %v4405_v63, %v4406_v23  ;;  %v4644_v10 = vld [vmem:[#allocation7 + $0xcd0] sm:$0xff]  ;;  %v4645_v58 = vld [vmem:[#allocation7 + $0xcd8] sm:$0xff]  ;;  %vm8525_vm11 = vmmov %vm8520_vm2 }
0x25c7   :  { %v6746_v0 = vpack.i.bf16 %v4383_v42, %v4426_v38  ;;  %v4396_v14 = vsel %vm128_vm1, %v4394_v7, %v4395_v16  ;;  %v4408_v18 = vsel %vm92_vm0, %v4406_v23, %v4407_v2  ;;  %vm8510_vm9 = vcmp.ge.s32.totalorder %v7088_v19, 0  ;;  %v4637_v2 = vld [vmem:[#allocation7 + $0xc98] sm:$0xff]  ;;  %v4638_v42 = vld [vmem:[#allocation7 + $0xca0] sm:$0xff]  ;;  %v4640_v23 = vld [vmem:[#allocation7 + $0xcb0] sm:$0xff] }
0x25c8   :  { %6737 = vrot.lane.b32.xlu0 %v6736_v15, %s6880_s22  ;;  %6752 = vrot.lane.b32.xlu1 %v6751_v61, %s6880_s22  ;;  %v4412_v5 = vsel %vm8510_vm9, %v4411_v30, 0.0  ;;  %v4401_v55 = vsel %vm142_vm3, %v4397_v54, 0.0  ;;  %vm8512_vm4 = vcmp.ge.s32.totalorder %v8511_v62, 0  ;;  %v4403_v56 = vsel %vm8513_vm8, %v4399_v53, 0.0  ;;  %v4642_v30 = vld [vmem:[#allocation7 + $0xcc0] sm:$0xff]  ;;  %v4643_v53 = vld [vmem:[#allocation7 + $0xcc8] sm:$0xff] }
0x25c9   :  { %v4414_v52 = vsel %vm8512_vm4, %v4409_v9, 0.0  ;;  %v6590_v7 = vpack.c.bf16 %v4639_v60, %v4638_v42  ;;  %v6593_v22 = vpack.c.bf16 %v4641_v59, %v4640_v23  ;;  %v6596_v51 = vpack.c.bf16 %v4643_v53, %v4642_v30  ;;  %v4646_v61 = vld [vmem:[#allocation7 + $0xce0] sm:$0xff]  ;;  %v4647_v38 = vld [vmem:[#allocation7 + $0xce8] sm:$0xff]  ;;  %v4649_v9 = vld [vmem:[#allocation7 + $0xcf8] sm:$0xff] }
0x25ca   :  { %v6599_v15 = vpack.c.bf16 %v4645_v58, %v4644_v10  ;;  %v6602_v54 = vpack.c.bf16 %v4647_v38, %v4646_v61  ;;  %v8514_v38 = vld [vmem:[#allocation17_spill] sm:$0xff]  ;;  %vm8517_vm6 = vmmov %vm8512_vm4  ;;  %vm8527_vm4 = vcmp.lt.s32.totalorder %v7045_v39, 16 }
0x25cc   :  { %6747 = vrot.lane.b32.xlu0 %v6746_v0, %s6880_s22  ;;  %v4648_v0 = vld [vmem:[#allocation7 + $0xcf0] sm:$0xff] }
0x2636   :  { %v6743_v37 = vpop.permute.xlu1 %6742 }
0x2637   :  { %v6744_v50 = vunpack.i.l.bf16 %v6743_v37  ;;  %v6745_v40 = vunpack.i.h.bf16 %v6743_v37  ;;  %v4651_v37 = vld [vmem:[#allocation7 + $0xd08] sm:$0xff] }
0x2639   :  { %v4465_v17 = vsel %vm502_vm14, %v4410_v28, %v6744_v50  ;;  %v4461_v49 = vsel %vm502_vm14, %v4401_v55, %v6745_v40  ;;  %v4636_v28 = vld [vmem:[#allocation7 + $0xc90] sm:$0xff] }
0x263a   :  { %v6738_v48 = vpop.permute.xlu0 %6737  ;;  %v6753_v32 = vpop.permute.xlu1 %6752  ;;  %v6587_v3 = vpack.c.bf16 %v4637_v2, %v4636_v28  ;;  %v4652_v50 = vld [vmem:[#allocation7 + $0xd10] sm:$0xff] }
0x263b   :  { %v6740_v33 = vunpack.i.h.bf16 %v6738_v48  ;;  %v6739_v41 = vunpack.i.l.bf16 %v6738_v48  ;;  %v6754_v63 = vunpack.i.l.bf16 %v6753_v32  ;;  %v6755_v26 = vunpack.i.h.bf16 %v6753_v32  ;;  %v4656_v40 = vld [vmem:[#allocation7 + $0xd30] sm:$0xff]  ;;  %v5093_v32 = vld [vmem:[#allocation8 + $0xc8] ss:$0 sm:$0xff] }
0x263d   :  { %v4464_v27 = vsel %vm502_vm14, %v4412_v5, %v6739_v41  ;;  %v4460_v35 = vsel %vm502_vm14, %v4398_v29, %v6740_v33  ;;  %v4467_v12 = vsel %vm502_vm14, %v4408_v18, %v6754_v63  ;;  %v4463_v44 = vsel %vm502_vm14, %v4403_v56, %v6755_v26  ;;  %v4635_v29 = vld [vmem:[#allocation7 + $0xc88] sm:$0xff]  ;;  %v4650_v18 = vld [vmem:[#allocation7 + $0xd00] sm:$0xff]  ;;  %v4653_v33 = vld [vmem:[#allocation7 + $0xd18] sm:$0xff] }
0x263e   :  { %4569 = vmatprep.mubr.f32.mxu0 %v4464_v27  ;;  %v6748_v6 = vpop.permute.xlu0 %6747  ;;  %v6584_v16 = vpack.c.bf16 %v4635_v29, %v4634_v43  ;;  %v6608_v48 = vpack.c.bf16 %v4651_v37, %v4650_v18  ;;  %v6611_v41 = vpack.c.bf16 %v4653_v33, %v4652_v50  ;;  %v4654_v5 = vld [vmem:[#allocation7 + $0xd20] sm:$0xff]  ;;  %v4655_v27 = vld [vmem:[#allocation7 + $0xd28] sm:$0xff] }
0x263f   :  { %v6749_v47 = vunpack.i.l.bf16 %v6748_v6  ;;  %4570 = vmatmul.mubr.f32.vlgmr.msra.gmra.mrb[54].mxu0 %v4460_v35  ;;  %v6750_v24 = vunpack.i.h.bf16 %v6748_v6  ;;  %v6614_v35 = vpack.c.bf16 %v4655_v27, %v4654_v5  ;;  %v4657_v6 = vld [vmem:[#allocation7 + $0xd38] sm:$0xff] }
0x2640   :  { %4574 = vmatprep.mubr.f32.mxu0 %v4465_v17  ;;  %6585 = vmatpush1.bf16.msra.mxu1 %v6584_v16 }
0x2641   :  { %v4466_v21 = vsel %vm502_vm14, %v4414_v52, %v6749_v47  ;;  %v4462_v46 = vsel %vm502_vm14, %v4396_v14, %v6750_v24  ;;  %6586 = vmatprep.subr.bf16.mxu1 %v8466_v36  ;;  %v6605_v14 = vpack.c.bf16 %v4649_v9, %v4648_v0  ;;  %v6617_v47 = vpack.c.bf16 %v4657_v6, %v4656_v40 }
0x2643   :  { %4575 = vmatmul.mubr.f32.gmra.mrb[56].mxu0 %v4461_v49 }
0x2644   :  { %4579 = vmatprep.mubr.f32.mxu0 %v4466_v21  ;;  %6588 = vmatpush1.bf16.msra.mxu1 %v6587_v3 }
0x2645   :  { %6589 = vmatprep.subr.bf16.mxu1 %v8466_v36 }
0x2647   :  { %4580 = vmatmul.mubr.f32.gmra.mrb[58].mxu0 %v4462_v46 }
0x2648   :  { %4584 = vmatprep.mubr.f32.mxu0 %v4467_v12  ;;  %6591 = vmatpush1.bf16.msra.mxu1 %v6590_v7 }
0x2649   :  { %6592 = vmatprep.subr.bf16.mxu1 %v8466_v36 }
0x264b   :  { %4585 = vmatmul.mubr.f32.gmra.mrb[60].mxu0 %v4463_v44 }
0x264c   :  { %6594 = vmatpush1.bf16.msra.mxu1 %v6593_v22 }
0x264d   :  { %6595 = vmatprep.subr.bf16.mxu1 %v8466_v36 }
0x2650   :  { %6597 = vmatpush1.bf16.msra.mxu1 %v6596_v51 }
0x2651   :  { %6598 = vmatprep.subr.bf16.mxu1 %v8466_v36 }
0x2654   :  { %6600 = vmatpush1.bf16.msra.mxu1 %v6599_v15 }
0x2655   :  { %6601 = vmatprep.subr.bf16.mxu1 %v8466_v36 }
0x2658   :  { %6603 = vmatpush1.bf16.msra.mxu1 %v6602_v54  ;;  %v3371_v54 = vsub.f32 %v7972_v45, %v7954_v11 }
0x2659   :  { %6604 = vmatprep.subr.bf16.mxu1 %v8466_v36 }
0x265a   :  { %v3372_v0 = vmul.f32 %v3371_v54, %v3371_v54 }
0x265c   :  { %6606 = vmatpush1.bf16.msra.mxu1 %v6605_v14  ;;  %v3373_v9 = vsel %vm8515_vm12, %v3372_v0, 0.0 }
0x265d   :  { %6607 = vmatprep.subr.bf16.mxu1 %v8466_v36 }
0x2660   :  { %6609 = vmatpush1.bf16.msra.mxu1 %v6608_v48 }
0x2661   :  { %6610 = vmatprep.subr.bf16.mxu1 %v8466_v36 }
0x2664   :  { %6612 = vmatpush1.bf16.msra.mxu1 %v6611_v41 }
0x2665   :  { %6613 = vmatprep.subr.bf16.mxu1 %v8466_v36 }
0x2668   :  { %6615 = vmatpush1.bf16.msra.mxu1 %v6614_v35 }
0x2669   :  { %6616 = vmatprep.subr.bf16.mxu1 %v8466_v36 }
0x266c   :  { %6618 = vmatpush1.bf16.msra.mxu1 %v6617_v47 }
0x2712   :  { %v5441_v17 = vpop.f32.mrb[54].mxu0 }
0x2713   :  { %v5442_v55 = vpop.f32.mrb[55].mxu0 }
0x2714   :  { %v5443_v24 = vadd.f32 %v5442_v55, %v5441_v17 }
0x2716   :  { %v4572_v49 = vadd.f32 %v5443_v24, %v5093_v32  ;;  %v5444_v52 = vpop.f32.mrb[56].mxu0 }
0x2717   :  { %v5445_v63 = vpop.f32.mrb[57].mxu0 }
0x2718   :  { %v5446_v21 = vadd.f32 %v5445_v63, %v5444_v52  ;;  %4618 = vrot.lane.b32.xlu0 %v4572_v49, %s6880_s22  ;;  %v4590_v12 = vrot.slane %v4572_v49, 7  ;;  %v4602_v44 = vrot.slane %v4572_v49, 1 }
0x271a   :  { %v4577_v26 = vadd.f32 %v5446_v21, %v5093_v32  ;;  %v5447_v46 = vpop.f32.mrb[58].mxu0 }
0x271b   :  { %v5448_v56 = vpop.f32.mrb[59].mxu0 }
0x271c   :  { %v4591_v43 = vrot.slane %v4577_v26, 7  ;;  %v4603_v29 = vrot.slane %v4577_v26, 1  ;;  %v5449_v28 = vadd.f32 %v5448_v56, %v5447_v46  ;;  %4620 = vrot.lane.b32.xlu1 %v4577_v26, %s6880_s22 }
0x271e   :  { %v4582_v36 = vadd.f32 %v5449_v28, %v5093_v32  ;;  %v5450_v16 = vpop.f32.mrb[60].mxu0  ;;  %v4608_v2 = vsel %vm128_vm1, %v4602_v44, %v4603_v29  ;;  %v4596_v3 = vsel %vm92_vm0, %v4590_v12, %v4591_v43 }
0x271f   :  { %v5451_v42 = vpop.f32.mrb[61].mxu0  ;;  %5095 = vmatprep.mubr.msk.f32.mxu1 %vm502_vm14, %v4608_v2 }
0x2720   :  { %v4592_v60 = vrot.slane %v4582_v36, 7  ;;  %v4604_v7 = vrot.slane %v4582_v36, 1  ;;  %v5452_v23 = vadd.f32 %v5451_v42, %v5450_v16  ;;  %4622 = vrot.lane.b32.xlu0 %v4582_v36, %s6880_s22 }
0x2722   :  { %v4587_v59 = vadd.f32 %v5452_v23, %v5093_v32  ;;  %v4607_v22 = vsel %vm128_vm1, %v4603_v29, %v4604_v7  ;;  %v4595_v30 = vsel %vm92_vm0, %v4591_v43, %v4592_v60 }
0x2724   :  { %v4593_v53 = vrot.slane %v4587_v59, 7  ;;  %v4605_v51 = vrot.slane %v4587_v59, 1  ;;  %4624 = vrot.lane.b32.xlu1 %v4587_v59, %s6880_s22 }
0x2726   :  { %v4597_v10 = vsel %vm92_vm0, %v4593_v53, %v4590_v12  ;;  %v4606_v58 = vsel %vm128_vm1, %v4604_v7, %v4605_v51  ;;  %v4609_v15 = vsel %vm128_vm1, %v4605_v51, %v4602_v44  ;;  %v4594_v61 = vsel %vm92_vm0, %v4592_v60, %v4593_v53  ;;  %vm8516_vm0 = vmmov %vm8510_vm9 }
0x2727   :  { %v4598_v18 = vsel %vm8516_vm0, %v4597_v10, 0.0  ;;  %v4613_v45 = vsel %vm8518_vm7, %v4609_v15, 0.0  ;;  %vm8526_vm9 = vmmov %vm8520_vm2 }
0x2728   :  { %vm8530_vm0 = vmmov %vm8518_vm7 }
0x2729   :  { %vm8532_vm7 = vmmov %vm8520_vm2 }
0x273f   :  { %1084 = vadd.xlane.f32.xlu0 %v8514_v38  ;;  %v5094_v38 = vld [vmem:[#allocation8 + $0xd0] ss:$0 sm:$0xff] }
0x2743   :  { %2041 = vadd.xlane.f32.xlu0 %v7720_v31  ;;  %v4611_v31 = vsel %vm142_vm3, %v4607_v22, 0.0 }
0x2747   :  { %2084 = vadd.xlane.f32.xlu0 %v7747_v57 }
0x2748   :  { %1982 = vadd.xlane.f32.xlu1 %v7711_v13 }
0x274b   :  { %3374 = vadd.xlane.f32.xlu0 %v3373_v9 }
0x274c   :  { %2147 = vadd.xlane.f32.xlu1 %v7761_v34  ;;  %v4600_v34 = vsel %vm8517_vm6, %v4595_v30, 0.0  ;;  %vm8531_vm6 = vcmp.lt.s32.totalorder %v7005_v4, 15 }
0x278a   :  { %v4619_v14 = vpop.permute.xlu0 %4618 }
0x278b   :  { %v4630_v37 = vsel %vm502_vm14, %v4598_v18, %v4619_v14  ;;  %v6756_v14 = vld [vmem:[#allocation5] sm:$0xff] }
0x278c   :  { %4740 = vmatmul.mubr.f32.vlgmr.msra.gmra.mrb[42].mxu1 %v4630_v37 }
0x278d   :  { %5096 = vmatprep.mubr.msk.f32.mxu1 %vm502_vm14, %v4611_v31 }
0x278e   :  { %v4621_v57 = vpop.permute.xlu1 %4620 }
0x278f   :  { %v4631_v13 = vsel %vm502_vm14, %v4596_v3, %v4621_v57 }
0x2790   :  { %4745 = vmatmul.mubr.f32.gmra.mrb[44].mxu1 %v4631_v13 }
0x2791   :  { %5097 = vmatprep.mubr.msk.f32.mxu1 %vm502_vm14, %v4606_v58 }
0x2792   :  { %v4623_v11 = vpop.permute.xlu0 %4622 }
0x2793   :  { %v4632_v19 = vsel %vm502_vm14, %v4600_v34, %v4623_v11  ;;  %v6757_v11 = vld [vmem:[#allocation5 + $0x8] sm:$0xff] }
0x2794   :  { %4750 = vmatmul.mubr.f32.gmra.mrb[46].mxu1 %v4632_v19 }
0x2795   :  { %5098 = vmatprep.mubr.msk.f32.mxu1 %vm502_vm14, %v4613_v45 }
0x2796   :  { %v4625_v48 = vpop.permute.xlu1 %4624 }
0x2797   :  { %v4633_v50 = vsel %vm502_vm14, %v4594_v61, %v4625_v48  ;;  %vm8519_vm14 = vcmask 293888  }
0x2798   :  { %4755 = vmatmul.mubr.f32.gmra.mrb[48].mxu1 %v4633_v50  ;;  %vm8521_vm15 = vmmov %vm8519_vm14 }
0x2799   :  { %vm8524_vm10 = vmmov %vm8519_vm14 }
0x279a   :  { %vm8528_vm8 = vmmov %vm8524_vm10 }
0x279b   :  { %vm8529_vm12 = vmmov %vm8528_vm8 }
0x27cc   :  { %v1085_v33 = vpop.xlane.xlu0 %1084 }
0x27cd   :  { %v1086_v41 = vrot.slane %v1085_v33, 4 }
0x27cf   :  { %v1087_v5 = vadd.f32 %v1086_v41, %v1085_v33 }
0x27d0   :  { %v2042_v27 = vpop.xlane.xlu0 %2041 }
0x27d1   :  { %v1088_v35 = vrot.slane %v1087_v5, 2  ;;  %v2043_v40 = vrot.slane %v2042_v27, 4 }
0x27d3   :  { %v2044_v62 = vadd.f32 %v2043_v40, %v2042_v27  ;;  %v1089_v6 = vadd.f32 %v1088_v35, %v1087_v5 }
0x27d4   :  { %v2085_v47 = vpop.xlane.xlu0 %2084 }
0x27d5   :  { %v2045_v17 = vrot.slane %v2044_v62, 2  ;;  %v2086_v32 = vrot.slane %v2085_v47, 4  ;;  %v1983_v55 = vpop.xlane.xlu1 %1982  ;;  %v1090_v24 = vrot.slane %v1089_v6, 1 }
0x27d6   :  { %v1984_v49 = vrot.slane %v1983_v55, 4 }
0x27d7   :  { %v2087_v52 = vadd.f32 %v2086_v32, %v2085_v47  ;;  %v1091_v63 = vadd.f32 %v1090_v24, %v1089_v6  ;;  %v2046_v44 = vadd.f32 %v2045_v17, %v2044_v62 }
0x27d8   :  { %v1985_v21 = vadd.f32 %v1984_v49, %v1983_v55  ;;  %v3375_v26 = vpop.xlane.xlu0 %3374  ;;  %v6758_v55 = vld [vmem:[#allocation5 + $0x10] sm:$0xff] }
0x27d9   :  { %v2088_v46 = vrot.slane %v2087_v52, 2  ;;  %v3376_v12 = vrot.slane %v3375_v26, 4  ;;  %v2148_v56 = vpop.xlane.xlu1 %2147  ;;  %6619 = vpush %v1091_v63  ;;  %v2047_v42 = vrot.slane %v2046_v44, 1 }
0x27da   :  { %v1986_v43 = vrot.slane %v1985_v21, 2  ;;  %v2149_v29 = vrot.slane %v2148_v56, 4 }
0x27db   :  { %v3377_v28 = vadd.f32 %v3376_v12, %v3375_v26  ;;  %v2089_v36 = vadd.f32 %v2088_v46, %v2087_v52  ;;  %v2048_v51 = vadd.f32 %v2047_v42, %v2046_v44 }
0x27dc   :  { %v2150_v16 = vadd.f32 %v2149_v29, %v2148_v56  ;;  %v1987_v2 = vadd.f32 %v1986_v43, %v1985_v21 }
0x27dd   :  { %v3378_v3 = vrot.slane %v3377_v28, 2  ;;  %v2090_v60 = vrot.slane %v2089_v36, 1 }
0x27de   :  { %v2151_v7 = vrot.slane %v2150_v16, 2  ;;  %v1988_v23 = vrot.slane %v1987_v2, 1 }
0x27df   :  { %v3379_v59 = vadd.f32 %v3378_v3, %v3377_v28  ;;  %v2091_v30 = vadd.f32 %v2090_v60, %v2089_v36  ;;  %v6759_v60 = vld [vmem:[#allocation5 + $0x18] sm:$0xff] }
0x27e0   :  { %v1989_v22 = vadd.f32 %v1988_v23, %v1987_v2  ;;  %v2152_v53 = vadd.f32 %v2151_v7, %v2150_v16 }
0x27e1   :  { %v3380_v10 = vrot.slane %v3379_v59, 1 }
0x27e2   :  { %6621 = vpush %v1989_v22  ;;  %v2153_v58 = vrot.slane %v2152_v53, 1 }
0x27e3   :  { %6623 = vpush %v2048_v51  ;;  %v3381_v15 = vadd.f32 %v3380_v10, %v3379_v59 }
0x27e4   :  { %6625 = vpush %v2091_v30  ;;  %v2154_v61 = vadd.f32 %v2153_v58, %v2152_v53 }
0x27e6   :  { %6627 = vpush %v2154_v61 }
0x27e7   :  { %6629 = vpush %v3381_v15 }
0x280a   :  { %s6620_s4 = spop %6619 }
0x280b   :  { %s1095_s21 = smul.f32 0.0625, %s6620_s4 }
0x280d   :  { %2168 = sst [smem:[#allocation10 + $0x4]] %s1095_s21 }
0x2813   :  { %s6622_s22 = spop %6621 }
0x2814   :  { %s1993_s14 = smul.f32 0.00086805556, %s6622_s22  ;;  %s6624_s15 = spop %6623 }
0x2815   :  { %s2052_s16 = smul.f32 0.0009259259, %s6624_s15  ;;  %s6626_s17 = spop %6625 }
0x2816   :  { %2160 = sst [smem:[#allocation10]] %s1993_s14  ;;  %s2095_s18 = smul.f32 0.0009920635, %s6626_s17 }
0x2817   :  { %2164 = sst [smem:[#allocation10 + $0x2]] %s2052_s16  ;;  %s6628_s19 = spop %6627 }
0x2818   :  { %2166 = sst [smem:[#allocation10 + $0x3]] %s2095_s18  ;;  %s2158_s20 = smul.f32 0.0009920635, %s6628_s19 }
0x2819   :  { %s6630_s2 = spop %6629 }
0x281a   :  { %2162 = sst [smem:[#allocation10 + $0x1]] %s2158_s20  ;;  %s3385_s1 = smul.f32 0.125, %s6630_s2 }
0x281c   :  { %4953 = sst [smem:[#allocation10 + $0xc]] %s3385_s1 }
0x285f   :  { %v4741_v54 = vpop.f32.mrb[42].mxu1 }
0x2860   :  { %v8230_v0 = vadd.f32 %v5094_v38, %v4741_v54  ;;  %v4743_v9 = vpop.f32.mrb[43].mxu1 }
0x2862   :  { %v8233_v18 = vsub.f32 %v8230_v0, %v6756_v14  ;;  %v4881_v48 = vrot.slane %v8230_v0, 2  ;;  %v4897_v50 = vrot.slane %v8230_v0, 1 }
0x2863   :  { %v4746_v37 = vpop.f32.mrb[44].mxu1 }
0x2864   :  { %v8235_v31 = vadd.f32 %v5094_v38, %v4746_v37  ;;  %v4748_v57 = vpop.f32.mrb[45].mxu1  ;;  %v4764_v13 = vand.u32 2147483647, %v8233_v18  ;;  %v4787_v41 = vrot.slane %v8233_v18, 1  ;;  %v4799_v47 = vrot.slane %v8233_v18, 2 }
0x2866   :  { %v8239_v34 = vsub.f32 %v8235_v31, %v6757_v11  ;;  %v4882_v19 = vrot.slane %v8235_v31, 2  ;;  %v4898_v45 = vrot.slane %v8235_v31, 1  ;;  %v4768_v6 = vsel %vm8519_vm14, %v4764_v13, 0.0  ;;  %vm8533_vm14 = vmmov %vm8520_vm2 }
0x2867   :  { %v4751_v33 = vpop.f32.mrb[46].mxu1 }
0x2868   :  { %v8246_v5 = vadd.f32 %v5094_v38, %v4751_v33  ;;  %v4753_v27 = vpop.f32.mrb[47].mxu1  ;;  %v4765_v35 = vand.u32 2147483647, %v8239_v34  ;;  %v4788_v40 = vrot.slane %v8239_v34, 1  ;;  %v4800_v62 = vrot.slane %v8239_v34, 2 }
0x2869   :  { %v4887_v17 = vsel %vm8520_vm2, %v4881_v48, %v4882_v19  ;;  %v8259_v32 = vsel %vm128_vm1, %v4897_v50, %v4898_v45 }
0x286a   :  { %v4762_v24 = vsub.f32 %v8246_v5, %v6758_v55  ;;  %v4883_v49 = vrot.slane %v8246_v5, 2  ;;  %v4899_v52 = vrot.slane %v8246_v5, 1  ;;  %v4769_v63 = vsel %vm8521_vm15, %v4765_v35, 0.0  ;;  %vm8536_vm15 = vmmov %vm8527_vm4 }
0x286b   :  { %v4756_v21 = vpop.f32.mrb[48].mxu1  ;;  %v4770_v26 = vadd.f32 %v4769_v63, %v4768_v6  ;;  %v4793_v46 = vsel %vm128_vm1, %v4787_v41, %v4788_v40  ;;  %v4805_v12 = vsel %vm8522_vm5, %v4799_v47, %v4800_v62  ;;  %v8270_v56 = vadd.f32 %v4887_v17, %v8230_v0  ;;  %v8534_v17 = vld [vmem:[#allocation15_spill] sm:$0xff] }
0x286c   :  { %v4886_v44 = vsel %vm8523_vm13, %v4882_v19, %v4883_v49  ;;  %v8280_v43 = vsel %vm128_vm1, %v4898_v45, %v4899_v52  ;;  %v8282_v29 = vadd.f32 %v5094_v38, %v4756_v21  ;;  %v4758_v28 = vpop.f32.mrb[49].mxu1  ;;  %v4766_v36 = vand.u32 2147483647, %v4762_v24  ;;  %vm8538_vm13 = vmmov %vm8528_vm8 }
0x286d   :  { %v4789_v16 = vrot.slane %v4762_v24, 1  ;;  %v4811_v2 = vsub.f32 %v4793_v46, %v8233_v18  ;;  %v4801_v3 = vrot.slane %v4762_v24, 2  ;;  %v4842_v42 = vadd.f32 %v4805_v12, %v8233_v18 }
0x286e   :  { %v4763_v7 = vsub.f32 %v8282_v29, %v6759_v60  ;;  %v4884_v23 = vrot.slane %v8282_v29, 2  ;;  %v4900_v59 = vrot.slane %v8282_v29, 1  ;;  %v4771_v22 = vsel %vm8524_vm10, %v4766_v36, 0.0  ;;  %vm8539_vm10 = vmmov %vm8528_vm8 }
0x286f   :  { %v4772_v30 = vadd.f32 %v4771_v22, %v4770_v26  ;;  %v4792_v53 = vsel %vm128_vm1, %v4788_v40, %v4789_v16  ;;  %v4819_v51 = vand.u32 2147483647, %v4811_v2  ;;  %v4804_v10 = vsel %vm8525_vm11, %v4800_v62, %v4801_v3  ;;  %vm8540_vm11 = vmmov %vm8532_vm7 }
0x2870   :  { %v4888_v58 = vsel %vm8526_vm9, %v4884_v23, %v4881_v48  ;;  %v4767_v15 = vand.u32 2147483647, %v4763_v7  ;;  %v4790_v61 = vrot.slane %v4763_v7, 1  ;;  %v4796_v38 = vsel %vm142_vm3, %v4792_v53, 0.0  ;;  %vm8541_vm9 = vmmov %vm8528_vm8 }
0x2871   :  { %v4892_v54 = vsel %vm8527_vm4, %v4888_v58, 0.0  ;;  %v4812_v9 = vsub.f32 %v4796_v38, %v8239_v34  ;;  %v4823_v14 = vsel %vm8528_vm8, %v4819_v51, 0.0  ;;  %v4802_v18 = vrot.slane %v4763_v7, 2 }
0x2872   :  { %v8303_v37 = vadd.f32 %v4892_v54, %v8282_v29  ;;  %v4773_v57 = vsel %vm8529_vm12, %v4767_v15, 0.0  ;;  %v4791_v13 = vsel %vm128_vm1, %v4789_v16, %v4790_v61  ;;  %v4794_v11 = vsel %vm128_vm1, %v4790_v61, %v4787_v41 }
0x2873   :  { %v4774_v19 = vadd.f32 %v4773_v57, %v4772_v30  ;;  %v4798_v45 = vsel %vm8530_vm0, %v4794_v11, 0.0  ;;  %v4813_v48 = vsub.f32 %v4791_v13, %v4762_v24  ;;  %v4816_v33 = vsel %vm8531_vm6, %v4812_v9, 0.0  ;;  %vm8545_vm0 = vmmov %vm8541_vm9 }
0x2874   :  { %v4814_v27 = vsub.f32 %v4798_v45, %v4763_v7  ;;  %v4820_v35 = vand.u32 2147483647, %v4816_v33  ;;  %v4803_v40 = vsel %vm8532_vm7, %v4801_v3, %v4802_v18  ;;  %v4806_v62 = vsel %vm8533_vm14, %v4802_v18, %v4799_v47  ;;  %vm8547_vm7 = vmmov %vm8545_vm0 }
0x2875   :  { %4775 = vadd.xlane.f32.xlu1 %v4774_v19  ;;  %v4821_v6 = vand.u32 2147483647, %v4813_v48  ;;  %vm8535_vm2 = vcmp.lt.s32.totalorder %v8534_v17, 16  ;;  %v4810_v55 = vsel %vm8536_vm15, %v4806_v62, 0.0  ;;  %v4844_v63 = vadd.f32 %v4803_v40, %v4762_v24  ;;  %vm8548_vm14 = vmmov %vm8545_vm0 }
0x2876   :  { %v4808_v41 = vsel %vm8535_vm2, %v4804_v10, 0.0  ;;  %vm8537_vm5 = vcmp.lt.s32.totalorder %v7010_v8, 15  ;;  %v4824_v26 = vsel %vm8538_vm13, %v4820_v35, 0.0  ;;  %v4845_v29 = vadd.f32 %v4810_v55, %v4763_v7  ;;  %vm8542_vm4 = vmmov %vm8535_vm2 }
0x2877   :  { %v4818_v21 = vsel %vm8537_vm5, %v4814_v27, 0.0  ;;  %v4843_v12 = vadd.f32 %v4808_v41, %v8239_v34  ;;  %v4825_v36 = vadd.f32 %v4824_v26, %v4823_v14  ;;  %v4826_v47 = vsel %vm8539_vm10, %v4821_v6, 0.0  ;;  %vm8552_vm15 = vmmov %vm8545_vm0 }
0x2878   :  { %v4822_v28 = vand.u32 2147483647, %v4818_v21  ;;  %v4846_v16 = vmul.f32 2.0, %v4793_v46  ;;  %v4847_v2 = vmul.f32 2.0, %v4796_v38  ;;  %v4848_v3 = vmul.f32 2.0, %v4791_v13  ;;  %vm8553_vm5 = vmmov %vm8545_vm0 }
0x2879   :  { %v4849_v60 = vmul.f32 2.0, %v4798_v45  ;;  %v4885_v39 = vsel %vm8540_vm11, %v4883_v49, %v4884_v23  ;;  %v4827_v24 = vadd.f32 %v4826_v47, %v4825_v36  ;;  %v4890_v34 = vsel %vm8542_vm4, %v4886_v44, 0.0  ;;  %vm8554_vm13 = vmmov %vm8545_vm0 }
0x287a   :  { %v4828_v22 = vsel %vm8541_vm9, %v4822_v28, 0.0  ;;  %v4850_v30 = vsub.f32 %v4842_v42, %v4846_v16  ;;  %v4851_v7 = vsub.f32 %v4843_v12, %v4847_v2  ;;  %v4852_v53 = vsub.f32 %v4844_v63, %v4848_v3  ;;  %vm8555_vm10 = vmmov %vm8545_vm0 }
0x287b   :  { %v4853_v51 = vsub.f32 %v4845_v29, %v4849_v60  ;;  %v4894_v46 = vadd.f32 %v4890_v34, %v8235_v31  ;;  %v4829_v10 = vadd.f32 %v4828_v22, %v4827_v24  ;;  %v4895_v15 = vadd.f32 %v4885_v39, %v8246_v5 }
0x287c   :  { %v4858_v58 = vand.u32 2147483647, %v4850_v30  ;;  %v4901_v49 = vsel %vm128_vm1, %v4899_v52, %v4900_v59  ;;  %vm8543_vm8 = vcmp.lt.s32.totalorder %v7005_v4, 14  ;;  %vm8544_vm12 = vcmp.lt.s32.totalorder %v7010_v8, 14 }
0x287d   :  { %v4855_v42 = vsel %vm8543_vm8, %v4851_v7, 0.0  ;;  %v4857_v44 = vsel %vm8544_vm12, %v4853_v51, 0.0  ;;  %v4860_v23 = vand.u32 2147483647, %v4852_v53  ;;  %v4904_v31 = vsel %vm128_vm1, %v4900_v59, %v4897_v50  ;;  %4830 = vadd.xlane.f32.xlu0 %v4829_v10  ;;  %vm8549_vm1 = vmmov %vm8545_vm0 }
0x287e   :  { %v4859_v61 = vand.u32 2147483647, %v4855_v42  ;;  %v4861_v38 = vand.u32 2147483647, %v4857_v44  ;;  %v4906_v5 = vsel %vm142_vm3, %v8280_v43, 0.0  ;;  %v4862_v52 = vsel %vm8545_vm0, %v4858_v58, 0.0  ;;  %vm8550_vm3 = vmmov %vm8543_vm8 }
0x287f   :  { %vm8546_vm6 = vcmp.lt.s32.totalorder %v7019_v25, 16  ;;  %v4909_v9 = vmul.f32 2.0, %v8259_v32  ;;  %v4910_v14 = vmul.f32 2.0, %v4906_v5  ;;  %v4865_v1 = vsel %vm8548_vm14, %v4860_v23, 0.0  ;;  %vm8551_vm2 = vmmov %vm8544_vm12 }
0x2880   :  { %v4908_v54 = vsel %vm8546_vm6, %v4904_v31, 0.0  ;;  %v4863_v0 = vsel %vm8547_vm7, %v4859_v61, 0.0  ;;  %v4911_v50 = vmul.f32 2.0, %v4901_v49  ;;  %v4867_v20 = vsel %vm8549_vm1, %v4861_v38, 0.0 }
0x2881   :  { %v4912_v59 = vmul.f32 2.0, %v4908_v54  ;;  %v4864_v18 = vadd.f32 %v4863_v0, %v4862_v52  ;;  %v4913_v57 = vsub.f32 %v8270_v56, %v4909_v9  ;;  %v4914_v13 = vsub.f32 %v4894_v46, %v4910_v14 }
0x2882   :  { %v4915_v43 = vsub.f32 %v4895_v15, %v4911_v50 }
0x2883   :  { %v4916_v11 = vsub.f32 %v8303_v37, %v4912_v59  ;;  %v4866_v25 = vadd.f32 %v4865_v1, %v4864_v18  ;;  %v4918_v32 = vsel %vm8550_vm3, %v4914_v13, 0.0  ;;  %v4921_v19 = vmul.f32 %v4913_v57, %v4913_v57 }
0x2884   :  { %v4922_v48 = vmul.f32 %v4918_v32, %v4918_v32  ;;  %v4923_v33 = vmul.f32 %v4915_v43, %v4915_v43 }
0x2885   :  { %v4920_v45 = vsel %vm8551_vm2, %v4916_v11, 0.0  ;;  %v4868_v27 = vadd.f32 %v4867_v20, %v4866_v25  ;;  %v4925_v56 = vsel %vm8552_vm15, %v4921_v19, 0.0 }
0x2886   :  { %v4924_v35 = vmul.f32 %v4920_v45, %v4920_v45  ;;  %v4926_v40 = vsel %vm8553_vm5, %v4922_v48, 0.0  ;;  %v4928_v62 = vsel %vm8554_vm13, %v4923_v33, 0.0 }
0x2887   :  { %4869 = vadd.xlane.f32.xlu1 %v4868_v27  ;;  %v4927_v37 = vadd.f32 %v4926_v40, %v4925_v56 }
0x2888   :  { %v4930_v6 = vsel %vm8555_vm10, %v4924_v35, 0.0 }
0x2889   :  { %v4929_v4 = vadd.f32 %v4928_v62, %v4927_v37 }
0x288b   :  { %v4931_v17 = vadd.f32 %v4930_v6, %v4929_v4 }
0x288d   :  { %4932 = vadd.xlane.f32.xlu0 %v4931_v17 }
0x2902   :  { %v4776_v8 = vpop.xlane.xlu1 %4775 }
0x2903   :  { %v4777_v41 = vrot.slane %v4776_v8, 4 }
0x2905   :  { %v4778_v55 = vadd.f32 %v4777_v41, %v4776_v8 }
0x2907   :  { %v4779_v63 = vrot.slane %v4778_v55, 2 }
0x2909   :  { %v4780_v21 = vadd.f32 %v4779_v63, %v4778_v55 }
0x290a   :  { %v4831_v26 = vpop.xlane.xlu0 %4830 }
0x290b   :  { %v4832_v12 = vrot.slane %v4831_v26, 4  ;;  %v4781_v29 = vrot.slane %v4780_v21, 1 }
0x290d   :  { %v4833_v28 = vadd.f32 %v4832_v12, %v4831_v26  ;;  %v4782_v36 = vadd.f32 %v4781_v29, %v4780_v21 }
0x290f   :  { %v4834_v47 = vrot.slane %v4833_v28, 2  ;;  %6631 = vpush %v4782_v36 }
0x2911   :  { %v4835_v16 = vadd.f32 %v4834_v47, %v4833_v28 }
0x2913   :  { %v4836_v3 = vrot.slane %v4835_v16, 1 }
0x2914   :  { %v4870_v2 = vpop.xlane.xlu1 %4869 }
0x2915   :  { %v4871_v60 = vrot.slane %v4870_v2, 4  ;;  %v4837_v39 = vadd.f32 %v4836_v3, %v4835_v16 }
0x2917   :  { %v4872_v24 = vadd.f32 %v4871_v60, %v4870_v2  ;;  %6633 = vpush %v4837_v39 }
0x2919   :  { %v4873_v22 = vrot.slane %v4872_v24, 2 }
0x291a   :  { %v4933_v30 = vpop.xlane.xlu0 %4932 }
0x291b   :  { %v4874_v34 = vadd.f32 %v4873_v22, %v4872_v24  ;;  %v4934_v7 = vrot.slane %v4933_v30, 4 }
0x291d   :  { %v4935_v53 = vadd.f32 %v4934_v7, %v4933_v30  ;;  %v4875_v51 = vrot.slane %v4874_v34, 1 }
0x291f   :  { %v4936_v46 = vrot.slane %v4935_v53, 2  ;;  %v4876_v10 = vadd.f32 %v4875_v51, %v4874_v34 }
0x2921   :  { %v4937_v58 = vadd.f32 %v4936_v46, %v4935_v53  ;;  %6635 = vpush %v4876_v10 }
0x2923   :  { %v4938_v15 = vrot.slane %v4937_v58, 1 }
0x2925   :  { %v4939_v49 = vadd.f32 %v4938_v15, %v4937_v58 }
0x2927   :  { %6637 = vpush %v4939_v49 }
0x2940   :  { %s6632_s5 = spop %6631 }
0x2941   :  { %s4786_s9 = smul.f32 0.00086805556, %s6632_s5 }
0x2943   :  { %4945 = sst [smem:[#allocation10 + $0x8]] %s4786_s9 }
0x2948   :  { %s6634_s10 = spop %6633 }
0x2949   :  { %s4841_s23 = smul.f32 0.0009259259, %s6634_s10 }
0x294b   :  { %4949 = sst [smem:[#allocation10 + $0xa]] %s4841_s23 }
0x2952   :  { %s6636_s25 = spop %6635 }
0x2953   :  { %s4880_s26 = smul.f32 0.0009920635, %s6636_s25 }
0x2955   :  { %4951 = sst [smem:[#allocation10 + $0xb]] %s4880_s26 }
0x2958   :  { %s6638_s30 = spop %6637 }
0x2959   :  { %s4943_s7 = smul.f32 0.0009920635, %s6638_s30 }
0x295b   :  { %4947 = sst [smem:[#allocation10 + $0x9]] %s4943_s7 }
0x295c   :  { %6859 = shalt.err (!%p6856_p8)
}
0x295d   :  { %s6884_s11 = smov [#allocation10]  }
0x295e   :  { %4971 = dma.smem_to_vmem %s6884_s11, 16, %s4969_s29, [#allocation4]  }
0x295f   :  { %6866 = dma.done.wait [#allocation4], 16  }
0x2960   :  { %6867 = vsyncadd [#allocation4], 4294967280 }
0x2961   :  { %4977 = sfence }
0x2962   :  { %4978 = vsyncpa [#allocation3], 1 }
0x2963   :  { %4979 = vsyncpa [#allocation6], 1 }
0x2964   :  { %4980 = vsyncpa [#allocation9], 1 }
0x2965   :  { %4981 = vsyncpa [#allocation4], 1 }

</bundles_post_ra>
